<compile_context>
chip_gen: v7x
topology: tpu7x:2x2x1
jax: 0.10.0
libtpu: 0.0.40
codegen_flags: <defaults>
</compile_context>

<pallas_src>
import functools

import jax
import jax.numpy as jnp
from jax.experimental import pallas as pl
from jax.experimental.pallas import tpu as pltpu


_TM = 512            # M-tile for the GEMM grid when M is large
_EPS = 1e-5          # BatchNorm eps (PyTorch default)


# ----------------------------------------------------------------------------
# Fused Pallas kernel:  out = act( (A @ W) * scale + shift )
#   a_ref  : (tm, K)  bf16 activations (im2col patches)
#   w_ref  : (K,  N)  bf16 GEMM-form conv weights
#   ss_ref : (2,  N)  f32 packed (scale, shift)   [BN + bias folded]
# ----------------------------------------------------------------------------
def _gemm_bn_act_kernel(a_ref, w_ref, ss_ref, o_ref, *, act):
    acc = jnp.dot(a_ref[...], w_ref[...], preferred_element_type=jnp.float32)
    y = acc * ss_ref[0:1, :] + ss_ref[1:2, :]          # f32 epilogue
    if act == "relu":
        y = jnp.maximum(y, 0.0)
    elif act == "sigmoid":
        # numerically stable sigmoid on the EUP: sigmoid(y) = 0.5*(tanh(y/2)+1)
        y = 0.5 * (jnp.tanh(0.5 * y) + 1.0)
    o_ref[...] = y.astype(o_ref.dtype)


def fused_gemm(A, Wm, ss, act, out_dtype):
    """act((A @ Wm) * ss[0] + ss[1]) with one Pallas TPU kernel."""
    M, K = A.shape
    K2, N = Wm.shape
    assert K == K2, (A.shape, Wm.shape)
    A = A.astype(jnp.bfloat16)                         # bf16 MXU inputs

    if M <= _TM:                                       # single block, no pad
        tm, Mp, grid_m = M, M, 1
    else:                                              # tile M, pad rows only
        tm = _TM
        grid_m = pl.cdiv(M, _TM)
        Mp = grid_m * _TM
        if Mp != M:
            A = jnp.pad(A, ((0, Mp - M), (0, 0)))

    out = pl.pallas_call(
        functools.partial(_gemm_bn_act_kernel, act=act),
        out_shape=jax.ShapeDtypeStruct((Mp, N), out_dtype),
        grid=(grid_m,),
        in_specs=[
            pl.BlockSpec((tm, K), lambda i: (i, 0)),
            pl.BlockSpec((K, N), lambda i: (0, 0)),    # weights stay resident
            pl.BlockSpec((2, N), lambda i: (0, 0)),    # packed scale/shift
        ],
        out_specs=pl.BlockSpec((tm, N), lambda i: (i, 0)),
        compiler_params=pltpu.CompilerParams(
            dimension_semantics=("parallel",),
            vmem_limit_bytes=32 * 1024 * 1024,
        ),
    )(A, Wm, ss)
    return out[:M] if Mp != M else out


# ----------------------------------------------------------------------------
# Conv / ConvTranspose wrappers (im2col glue in XLA, GEMM+epilogue in Pallas)
# ----------------------------------------------------------------------------
def _im2col(x, kh, kw, stride, pad_h, pad_w):
    """x: (N,H,W,C) NHWC -> (N*Ho*Wo, kh*kw*C) patch matrix, tap-major (i,j,c)."""
    if pad_h or pad_w:
        x = jnp.pad(x, ((0, 0), (pad_h, pad_h), (pad_w, pad_w), (0, 0)))
    n, hp, wp, c = x.shape
    ho = (hp - kh) // stride + 1
    wo = (wp - kw) // stride + 1
    if ho == 1 and wo == 1 and hp == kh and wp == kw:
        return x.reshape(n, kh * kw * c), 1, 1          # whole-image conv
    cols = []
    for i in range(kh):
        for j in range(kw):
            cols.append(x[:, i:i + stride * (ho - 1) + 1:stride,
                             j:j + stride * (wo - 1) + 1:stride, :])
    a = jnp.concatenate(cols, axis=-1)
    return a.reshape(n * ho * wo, kh * kw * c), ho, wo


def conv(x, layer, *, kh, kw, stride=1, pad=0, act="none",
         out_dtype=jnp.bfloat16):
    """Conv2d with folded BN / bias / activation.  x: NHWC."""
    wm, ss = layer
    pad_h, pad_w = pad if isinstance(pad, tuple) else (pad, pad)
    a, ho, wo = _im2col(x, kh, kw, stride, pad_h, pad_w)
    out = fused_gemm(a, wm, ss, act, out_dtype)
    return out.reshape(x.shape[0], ho, wo, -1)


def deconv(x, layer, *, kh, kw, stride=1, pad=0, act="none",
           out_dtype=jnp.bfloat16):
    """ConvTranspose2d (general spatial input) with folded BN / bias / act."""
    n, h, w_, c = x.shape
    if stride > 1:                                      # input dilation
        xd = jnp.zeros((n, (h - 1) * stride + 1, (w_ - 1) * stride + 1, c),
                       x.dtype)
        xd = xd.at[:, ::stride, ::stride, :].set(x)
    else:
        xd = x
    # equivalent forward conv (weights already flipped/swapped at prep time)
    return conv(xd, layer, kh=kh, kw=kw, stride=1,
                pad=(kh - 1 - pad, kw - 1 - pad), act=act, out_dtype=out_dtype)


def stamp(x2d, layer, *, kh, kw, act="none", out_dtype=jnp.bfloat16):
    """ConvTranspose2d on a 1x1 spatial input == a single dense GEMM."""
    wm, ss = layer
    out = fused_gemm(x2d, wm, ss, act, out_dtype)       # (N, kh*kw*Cout)
    return out.reshape(x2d.shape[0], kh, kw, -1)


# ----------------------------------------------------------------------------
# One-time weight preparation (GEMM form + folded BN/bias), outside the forward
# ----------------------------------------------------------------------------
def _bn_fold(gamma, beta, mean, var, bias=None, eps=_EPS):
    scale = gamma / jnp.sqrt(var + eps)
    shift = beta - mean * scale
    if bias is not None:
        shift = shift + scale * bias
    return scale, shift


def _pack_ss(scale, shift, n):
    if scale is None:
        scale = jnp.ones((n,), jnp.float32)
    if shift is None:
        shift = jnp.zeros((n,), jnp.float32)
    return jnp.stack([scale, shift]).astype(jnp.float32)


def _prep_conv(w_pt, scale=None, shift=None):
    # w_pt: (C_out, C_in, kh, kw)  (PyTorch Conv2d layout)
    c_out, c_in, kh, kw = w_pt.shape
    wm = jnp.transpose(w_pt, (2, 3, 1, 0)).reshape(kh * kw * c_in, c_out)
    return wm.astype(jnp.bfloat16), _pack_ss(scale, shift, c_out)


def _prep_deconv(w_pt, scale=None, shift=None):
    # w_pt: (C_in, C_out, kh, kw)  (PyTorch ConvTranspose2d layout)
    w_eff = jnp.transpose(jnp.flip(w_pt, axis=(2, 3)), (1, 0, 2, 3))
    return _prep_conv(w_eff, scale, shift)


def _prep_stamp(w_pt, scale=None, shift=None):
    # ConvTranspose2d on a 1x1 input: out[n,i,j,co] = sum_ci x[n,ci]*w[ci,co,i,j]
    c_in, c_out, kh, kw = w_pt.shape
    wm = jnp.transpose(w_pt, (0, 2, 3, 1)).reshape(c_in, kh * kw * c_out)
    if scale is None:
        scale = jnp.ones((c_out,), jnp.float32)
    if shift is None:
        shift = jnp.zeros((c_out,), jnp.float32)
    return (wm.astype(jnp.bfloat16),
            _pack_ss(jnp.tile(scale, kh * kw), jnp.tile(shift, kh * kw),
                     kh * kw * c_out))


def _w(key, shape, std=0.05):
    return jax.random.normal(key, shape, jnp.float32) * std


def _bn(c):
    # (gamma, beta, running_mean, running_var) — PyTorch defaults
    return (jnp.ones((c,), jnp.float32), jnp.zeros((c,), jnp.float32),
            jnp.zeros((c,), jnp.float32), jnp.ones((c,), jnp.float32))


def init_raw_params(key, nc, ngf, ncondf, nhd):
    keys = iter(jax.random.split(key, 32))
    enc = dict(
        in_cond_w=_w(next(keys), (10, 2 * ncondf, 6, 6)),
        in_cond_b=_w(next(keys), (2 * ncondf,)),
        cond_bn1=_bn(2 * ncondf),
        out_cond_w=_w(next(keys), (2 * ncondf, ncondf, 4, 4)),
        out_cond_b=_w(next(keys), (ncondf,)),
        in_conv_w=_w(next(keys), (4 * ngf, nc, 3, 3)),
        in_bn=_bn(4 * ngf + ncondf),
        mid_conv1_w=_w(next(keys), (2 * ngf, 4 * ngf + ncondf, 3, 3)),
        mid_bn1=_bn(2 * ngf),
        mid_conv2_w=_w(next(keys), (ngf, 2 * ngf, 3, 3)),
        mid_bn2=_bn(ngf),
        out_conv_w=_w(next(keys), (nhd, ngf, 4, 4)),
        out_conv_b=_w(next(keys), (nhd,)),
    )
    dec = dict(
        in_cond_w=_w(next(keys), (10, 2 * ncondf, 6, 6)),
        in_cond_b=_w(next(keys), (2 * ncondf,)),
        cond_bn1=_bn(2 * ncondf),
        out_cond_w=_w(next(keys), (ncondf, 2 * ncondf, 3, 3)),
        out_cond_b=_w(next(keys), (ncondf,)),
        in_conv1_w=_w(next(keys), (nhd, 2 * ngf, 6, 6)),
        in_bn1=_bn(2 * ngf),
        in_conv2_w=_w(next(keys), (4 * ngf, 2 * ngf, 3, 3)),
        in_bn2=_bn(4 * ngf + ncondf),
        mid_conv1_w=_w(next(keys), (4 * ngf + ncondf, 2 * ngf, 5, 5)),
        mid_bn1=_bn(2 * ngf),
        mid_conv2_w=_w(next(keys), (2 * ngf, ngf, 3, 3)),
        mid_bn2=_bn(ngf),
        out_conv_w=_w(next(keys), (nc, ngf, 4, 4)),
        out_conv_b=_w(next(keys), (nc,)),
    )
    return {"enc": enc, "dec": dec}


def prepare_params(raw, nc, ngf, ncondf, nhd):
    """One-time conversion of PyTorch-shaped weights to folded GEMM form."""
    del nc, ncondf, nhd
    e, d = raw["enc"], raw["dec"]
    ngf4 = 4 * ngf

    enc = {}
    sc, sh = _bn_fold(*e["cond_bn1"], bias=e["in_cond_b"])
    enc["in_cond"] = _prep_stamp(e["in_cond_w"], sc, sh)
    g, b, m, v = e["in_bn"]                    # applied to cat(x, cond): split
    sc, sh = _bn_fold(g[ngf4:], b[ngf4:], m[ngf4:], v[ngf4:],
                      bias=e["out_cond_b"])
    enc["out_cond"] = _prep_deconv(e["out_cond_w"], sc, sh)
    sc, sh = _bn_fold(g[:ngf4], b[:ngf4], m[:ngf4], v[:ngf4])
    enc["in_conv"] = _prep_conv(e["in_conv_w"], sc, sh)
    enc["mid_conv1"] = _prep_conv(e["mid_conv1_w"], *_bn_fold(*e["mid_bn1"]))
    enc["mid_conv2"] = _prep_conv(e["mid_conv2_w"], *_bn_fold(*e["mid_bn2"]))
    enc["out_conv"] = _prep_conv(e["out_conv_w"], None, e["out_conv_b"])

    dec = {}
    sc, sh = _bn_fold(*d["cond_bn1"], bias=d["in_cond_b"])
    dec["in_cond"] = _prep_stamp(d["in_cond_w"], sc, sh)
    g, b, m, v = d["in_bn2"]                   # applied to cat(x, cond): split
    sc, sh = _bn_fold(g[ngf4:], b[ngf4:], m[ngf4:], v[ngf4:],
                      bias=d["out_cond_b"])
    dec["out_cond"] = _prep_conv(d["out_cond_w"], sc, sh)
    dec["in_conv1"] = _prep_stamp(d["in_conv1_w"], *_bn_fold(*d["in_bn1"]))
    sc, sh = _bn_fold(g[:ngf4], b[:ngf4], m[:ngf4], v[:ngf4])
    dec["in_conv2"] = _prep_conv(d["in_conv2_w"], sc, sh)
    dec["mid_conv1"] = _prep_deconv(d["mid_conv1_w"], *_bn_fold(*d["mid_bn1"]))
    dec["mid_conv2"] = _prep_deconv(d["mid_conv2_w"], *_bn_fold(*d["mid_bn2"]))
    dec["out_conv"] = _prep_conv(d["out_conv_w"], None, d["out_conv_b"])

    return {"enc": enc, "dec": dec}


# ----------------------------------------------------------------------------
# Encoder / Decoder / AutoEncoder forward (NCHW external, NHWC internal)
# ----------------------------------------------------------------------------
def encoder_forward(p, x_nchw, cond):
    pe = p["enc"]
    x = jnp.transpose(x_nchw, (0, 2, 3, 1)).astype(jnp.bfloat16)   # NHWC
    # cond branch: relu(cond_bn1(in_cond(cond)))  ->  out_cond (+ in_bn tail)
    c = stamp(cond.astype(jnp.bfloat16), pe["in_cond"], kh=6, kw=6, act="relu")
    c = deconv(c, pe["out_cond"], kh=4, kw=4, stride=2, pad=0, act="relu")
    # image branch: in_conv (+ in_bn head, relu)
    x = conv(x, pe["in_conv"], kh=3, kw=3, stride=2, pad=1, act="relu")
    h = jnp.concatenate([x, c], axis=-1)           # torch.cat((x, cond), dim=1)
    h = conv(h, pe["mid_conv1"], kh=3, kw=3, stride=2, pad=1, act="relu")
    h = conv(h, pe["mid_conv2"], kh=3, kw=3, stride=2, pad=1, act="relu")
    h = conv(h, pe["out_conv"], kh=4, kw=4, stride=1, pad=0, act="none")
    return h                                        # (N, 1, 1, nhd) NHWC


def decoder_forward(p, h_nhwc, cond):
    pd = p["dec"]
    n = h_nhwc.shape[0]
    c = stamp(cond.astype(jnp.bfloat16), pd["in_cond"], kh=6, kw=6, act="relu")
    c = conv(c, pd["out_cond"], kh=3, kw=3, stride=1, pad=1, act="relu")
    x = stamp(h_nhwc.reshape(n, -1).astype(jnp.bfloat16), pd["in_conv1"],
              kh=6, kw=6, act="relu")
    x = conv(x, pd["in_conv2"], kh=3, kw=3, stride=1, pad=1, act="relu")
    h = jnp.concatenate([x, c], axis=-1)
    h = deconv(h, pd["mid_conv1"], kh=5, kw=5, stride=2, pad=0, act="relu")
    h = deconv(h, pd["mid_conv2"], kh=3, kw=3, stride=2, pad=1, act="relu")
    out = conv(h, pd["out_conv"], kh=4, kw=4, stride=1, pad=1,
               act="sigmoid", out_dtype=jnp.float32)
    return jnp.transpose(out, (0, 3, 1, 2))         # back to NCHW


def autoencoder_forward(p, x, enc_cond, dec_cond):
    h = encoder_forward(p, x, enc_cond)
    return decoder_forward(p, h, dec_cond)


# ----------------------------------------------------------------------------
if __name__ == "__main__":
    # Spatial size 28 so the encoder image branch (28 -> 14) matches the
    # conditional branch output (14x14) at the channel concat, as in PyTorch.
    nc, ngf, ncondf, nhd = 3, 4, 12, 16
    batch = 2

    raw = init_raw_params(jax.random.PRNGKey(0), nc, ngf, ncondf, nhd)
    params = prepare_params(raw, nc, ngf, ncondf, nhd)   # one-time weight prep

    kx, ke, kd = jax.random.split(jax.random.PRNGKey(0), 3)
    x = jax.random.normal(kx, (batch, nc, 28, 28), jnp.float32)
    enc_cond = jax.random.normal(ke, (batch, 10), jnp.float32)
    dec_cond = jax.random.normal(kd, (batch, 10), jnp.float32)

    out = jax.jit(autoencoder_forward)(params, x, enc_cond, dec_cond)
    jax.block_until_ready(out)

    assert out.shape == (batch, nc, 28, 28), out.shape
    assert bool(jnp.all(jnp.isfinite(out)))
    assert bool(jnp.all((out >= 0.0) & (out <= 1.0)))    # sigmoid output range
    print("KERNEL_OK")
</pallas_src>

<mosaic_0001>
module attributes {stable_mosaic.version = 11 : i64} {
  func.func @_gemm_bn_act_kernel(%arg0: i32, %arg1: memref<2x10xbf16, #tpu.memory_space<vmem>>, %arg2: memref<10x864xbf16, #tpu.memory_space<vmem>>, %arg3: memref<2x864xf32, #tpu.memory_space<vmem>>, %arg4: memref<2x864xbf16, #tpu.memory_space<vmem>>) attributes {dimension_semantics = [#tpu.dimension_semantics<parallel>], iteration_bounds = array<i64: 1>, scalar_prefetch = 0 : i64, scratch_operands = 0 : i64, tpu.core_type = #tpu.core_type<tc>, window_params = [{transform_indices = @transform_0, window_bounds = array<i64: 2, 10>}, {pipeline_mode = #tpu.pipeline_mode<synchronous>, transform_indices = @transform_1, window_bounds = array<i64: 10, 864>}, {pipeline_mode = #tpu.pipeline_mode<synchronous>, transform_indices = @transform_2, window_bounds = array<i64: 2, 864>}, {transform_indices = @transform_3, window_bounds = array<i64: 2, 864>}]} {
    %c0 = arith.constant 0 : index
    %c0_0 = arith.constant 0 : index
    %0 = vector.load %arg1[%c0, %c0_0] : memref<2x10xbf16, #tpu.memory_space<vmem>>, vector<2x10xbf16>
    %c0_1 = arith.constant 0 : index
    %c0_2 = arith.constant 0 : index
    %1 = vector.load %arg2[%c0_1, %c0_2] : memref<10x864xbf16, #tpu.memory_space<vmem>>, vector<10x864xbf16>
    %cst = arith.constant dense<0.000000e+00> : vector<2x864xf32>
    %2 = tpu.matmul %0, %1, %cst {dimension_numbers = #tpu.dot_dimension_numbers<[1], [0], [0], [1], [0, 0, 1, 1], [], []>} : vector<2x10xbf16>, vector<10x864xbf16>, vector<2x864xf32> -> vector<2x864xf32>
    %c0_3 = arith.constant 0 : index
    %c0_4 = arith.constant 0 : index
    %3 = vector.load %arg3[%c0_3, %c0_4] : memref<2x864xf32, #tpu.memory_space<vmem>>, vector<1x864xf32>
    %4 = vector.broadcast %3 : vector<1x864xf32> to vector<2x864xf32>
    %5 = arith.mulf %2, %4 : vector<2x864xf32>
    %c1 = arith.constant 1 : index
    %c0_5 = arith.constant 0 : index
    %6 = vector.load %arg3[%c1, %c0_5] : memref<2x864xf32, #tpu.memory_space<vmem>>, vector<1x864xf32>
    %7 = vector.broadcast %6 : vector<1x864xf32> to vector<2x864xf32>
    %8 = arith.addf %5, %7 : vector<2x864xf32>
    %cst_6 = arith.constant 0.000000e+00 : f32
    %9 = vector.broadcast %cst_6 : f32 to vector<2x864xf32>
    %10 = arith.maximumf %8, %9 : vector<2x864xf32>
    %11 = arith.truncf %10 : vector<2x864xf32> to vector<2x864xbf16>
    %c0_7 = arith.constant 0 : index
    %c0_8 = arith.constant 0 : index
    %12 = vector.load %arg4[%c0_7, %c0_8] : memref<2x864xbf16, #tpu.memory_space<vmem>>, vector<2x864xbf16>
    tpu.vector_store %arg4[%c0_7, %c0_8], %11 {strides = array<i32>} : memref<2x864xbf16, #tpu.memory_space<vmem>>, vector<2x864xbf16>,
    return
  }
  func.func @transform_0(%arg0: i32) -> (i32, i32) {
    %c0_i32 = arith.constant 0 : i32
    %c0_i32_0 = arith.constant 0 : i32
    return %arg0, %c0_i32 : i32, i32
  }
  func.func @transform_1(%arg0: i32) -> (i32, i32) {
    %c0_i32 = arith.constant 0 : i32
    %c0_i32_0 = arith.constant 0 : i32
    %c0_i32_1 = arith.constant 0 : i32
    return %c0_i32, %c0_i32_0 : i32, i32
  }
  func.func @transform_2(%arg0: i32) -> (i32, i32) {
    %c0_i32 = arith.constant 0 : i32
    %c0_i32_0 = arith.constant 0 : i32
    %c0_i32_1 = arith.constant 0 : i32
    return %c0_i32, %c0_i32_0 : i32, i32
  }
  func.func @transform_3(%arg0: i32) -> (i32, i32) {
    %c0_i32 = arith.constant 0 : i32
    %c0_i32_0 = arith.constant 0 : i32
    return %arg0, %c0_i32 : i32, i32
  }
}

module attributes {stable_mosaic.version = 11 : i64} {
  func.func @_gemm_bn_act_kernel(%arg0: i32, %arg1: memref<392x384xbf16, #tpu.memory_space<vmem>>, %arg2: memref<384x12xbf16, #tpu.memory_space<vmem>>, %arg3: memref<2x12xf32, #tpu.memory_space<vmem>>, %arg4: memref<392x12xbf16, #tpu.memory_space<vmem>>) attributes {dimension_semantics = [#tpu.dimension_semantics<parallel>], iteration_bounds = array<i64: 1>, scalar_prefetch = 0 : i64, scratch_operands = 0 : i64, tpu.core_type = #tpu.core_type<tc>, window_params = [{transform_indices = @transform_0, window_bounds = array<i64: 392, 384>}, {pipeline_mode = #tpu.pipeline_mode<synchronous>, transform_indices = @transform_1, window_bounds = array<i64: 384, 12>}, {pipeline_mode = #tpu.pipeline_mode<synchronous>, transform_indices = @transform_2, window_bounds = array<i64: 2, 12>}, {transform_indices = @transform_3, window_bounds = array<i64: 392, 12>}]} {
    %c0 = arith.constant 0 : index
    %c0_0 = arith.constant 0 : index
    %0 = vector.load %arg1[%c0, %c0_0] : memref<392x384xbf16, #tpu.memory_space<vmem>>, vector<392x384xbf16>
    %c0_1 = arith.constant 0 : index
    %c0_2 = arith.constant 0 : index
    %1 = vector.load %arg2[%c0_1, %c0_2] : memref<384x12xbf16, #tpu.memory_space<vmem>>, vector<384x12xbf16>
    %cst = arith.constant dense<0.000000e+00> : vector<392x12xf32>
    %2 = tpu.matmul %0, %1, %cst {dimension_numbers = #tpu.dot_dimension_numbers<[1], [0], [0], [1], [0, 0, 1, 1], [], []>} : vector<392x384xbf16>, vector<384x12xbf16>, vector<392x12xf32> -> vector<392x12xf32>
    %c0_3 = arith.constant 0 : index
    %c0_4 = arith.constant 0 : index
    %3 = vector.load %arg3[%c0_3, %c0_4] : memref<2x12xf32, #tpu.memory_space<vmem>>, vector<1x12xf32>
    %4 = vector.broadcast %3 : vector<1x12xf32> to vector<392x12xf32>
    %5 = arith.mulf %2, %4 : vector<392x12xf32>
    %c1 = arith.constant 1 : index
    %c0_5 = arith.constant 0 : index
    %6 = vector.load %arg3[%c1, %c0_5] : memref<2x12xf32, #tpu.memory_space<vmem>>, vector<1x12xf32>
    %7 = vector.broadcast %6 : vector<1x12xf32> to vector<392x12xf32>
    %8 = arith.addf %5, %7 : vector<392x12xf32>
    %cst_6 = arith.constant 0.000000e+00 : f32
    %9 = vector.broadcast %cst_6 : f32 to vector<392x12xf32>
    %10 = arith.maximumf %8, %9 : vector<392x12xf32>
    %11 = arith.truncf %10 : vector<392x12xf32> to vector<392x12xbf16>
    %c0_7 = arith.constant 0 : index
    %c0_8 = arith.constant 0 : index
    %12 = vector.load %arg4[%c0_7, %c0_8] : memref<392x12xbf16, #tpu.memory_space<vmem>>, vector<392x12xbf16>
    tpu.vector_store %arg4[%c0_7, %c0_8], %11 {strides = array<i32>} : memref<392x12xbf16, #tpu.memory_space<vmem>>, vector<392x12xbf16>,
    return
  }
  func.func @transform_0(%arg0: i32) -> (i32, i32) {
    %c0_i32 = arith.constant 0 : i32
    %c0_i32_0 = arith.constant 0 : i32
    return %arg0, %c0_i32 : i32, i32
  }
  func.func @transform_1(%arg0: i32) -> (i32, i32) {
    %c0_i32 = arith.constant 0 : i32
    %c0_i32_0 = arith.constant 0 : i32
    %c0_i32_1 = arith.constant 0 : i32
    return %c0_i32, %c0_i32_0 : i32, i32
  }
  func.func @transform_2(%arg0: i32) -> (i32, i32) {
    %c0_i32 = arith.constant 0 : i32
    %c0_i32_0 = arith.constant 0 : i32
    %c0_i32_1 = arith.constant 0 : i32
    return %c0_i32, %c0_i32_0 : i32, i32
  }
  func.func @transform_3(%arg0: i32) -> (i32, i32) {
    %c0_i32 = arith.constant 0 : i32
    %c0_i32_0 = arith.constant 0 : i32
    return %arg0, %c0_i32 : i32, i32
  }
}

module attributes {stable_mosaic.version = 11 : i64} {
  func.func @_gemm_bn_act_kernel(%arg0: i32, %arg1: memref<392x27xbf16, #tpu.memory_space<vmem>>, %arg2: memref<27x16xbf16, #tpu.memory_space<vmem>>, %arg3: memref<2x16xf32, #tpu.memory_space<vmem>>, %arg4: memref<392x16xbf16, #tpu.memory_space<vmem>>) attributes {dimension_semantics = [#tpu.dimension_semantics<parallel>], iteration_bounds = array<i64: 1>, scalar_prefetch = 0 : i64, scratch_operands = 0 : i64, tpu.core_type = #tpu.core_type<tc>, window_params = [{transform_indices = @transform_0, window_bounds = array<i64: 392, 27>}, {pipeline_mode = #tpu.pipeline_mode<synchronous>, transform_indices = @transform_1, window_bounds = array<i64: 27, 16>}, {pipeline_mode = #tpu.pipeline_mode<synchronous>, transform_indices = @transform_2, window_bounds = array<i64: 2, 16>}, {transform_indices = @transform_3, window_bounds = array<i64: 392, 16>}]} {
    %c0 = arith.constant 0 : index
    %c0_0 = arith.constant 0 : index
    %0 = vector.load %arg1[%c0, %c0_0] : memref<392x27xbf16, #tpu.memory_space<vmem>>, vector<392x27xbf16>
    %c0_1 = arith.constant 0 : index
    %c0_2 = arith.constant 0 : index
    %1 = vector.load %arg2[%c0_1, %c0_2] : memref<27x16xbf16, #tpu.memory_space<vmem>>, vector<27x16xbf16>
    %cst = arith.constant dense<0.000000e+00> : vector<392x16xf32>
    %2 = tpu.matmul %0, %1, %cst {dimension_numbers = #tpu.dot_dimension_numbers<[1], [0], [0], [1], [0, 0, 1, 1], [], []>} : vector<392x27xbf16>, vector<27x16xbf16>, vector<392x16xf32> -> vector<392x16xf32>
    %c0_3 = arith.constant 0 : index
    %c0_4 = arith.constant 0 : index
    %3 = vector.load %arg3[%c0_3, %c0_4] : memref<2x16xf32, #tpu.memory_space<vmem>>, vector<1x16xf32>
    %4 = vector.broadcast %3 : vector<1x16xf32> to vector<392x16xf32>
    %5 = arith.mulf %2, %4 : vector<392x16xf32>
    %c1 = arith.constant 1 : index
    %c0_5 = arith.constant 0 : index
    %6 = vector.load %arg3[%c1, %c0_5] : memref<2x16xf32, #tpu.memory_space<vmem>>, vector<1x16xf32>
    %7 = vector.broadcast %6 : vector<1x16xf32> to vector<392x16xf32>
    %8 = arith.addf %5, %7 : vector<392x16xf32>
    %cst_6 = arith.constant 0.000000e+00 : f32
    %9 = vector.broadcast %cst_6 : f32 to vector<392x16xf32>
    %10 = arith.maximumf %8, %9 : vector<392x16xf32>
    %11 = arith.truncf %10 : vector<392x16xf32> to vector<392x16xbf16>
    %c0_7 = arith.constant 0 : index
    %c0_8 = arith.constant 0 : index
    %12 = vector.load %arg4[%c0_7, %c0_8] : memref<392x16xbf16, #tpu.memory_space<vmem>>, vector<392x16xbf16>
    tpu.vector_store %arg4[%c0_7, %c0_8], %11 {strides = array<i32>} : memref<392x16xbf16, #tpu.memory_space<vmem>>, vector<392x16xbf16>,
    return
  }
  func.func @transform_0(%arg0: i32) -> (i32, i32) {
    %c0_i32 = arith.constant 0 : i32
    %c0_i32_0 = arith.constant 0 : i32
    return %arg0, %c0_i32 : i32, i32
  }
  func.func @transform_1(%arg0: i32) -> (i32, i32) {
    %c0_i32 = arith.constant 0 : i32
    %c0_i32_0 = arith.constant 0 : i32
    %c0_i32_1 = arith.constant 0 : i32
    return %c0_i32, %c0_i32_0 : i32, i32
  }
  func.func @transform_2(%arg0: i32) -> (i32, i32) {
    %c0_i32 = arith.constant 0 : i32
    %c0_i32_0 = arith.constant 0 : i32
    %c0_i32_1 = arith.constant 0 : i32
    return %c0_i32, %c0_i32_0 : i32, i32
  }
  func.func @transform_3(%arg0: i32) -> (i32, i32) {
    %c0_i32 = arith.constant 0 : i32
    %c0_i32_0 = arith.constant 0 : i32
    return %arg0, %c0_i32 : i32, i32
  }
}

module attributes {stable_mosaic.version = 11 : i64} {
  func.func @_gemm_bn_act_kernel(%arg0: i32, %arg1: memref<98x252xbf16, #tpu.memory_space<vmem>>, %arg2: memref<252x8xbf16, #tpu.memory_space<vmem>>, %arg3: memref<2x8xf32, #tpu.memory_space<vmem>>, %arg4: memref<98x8xbf16, #tpu.memory_space<vmem>>) attributes {dimension_semantics = [#tpu.dimension_semantics<parallel>], iteration_bounds = array<i64: 1>, scalar_prefetch = 0 : i64, scratch_operands = 0 : i64, tpu.core_type = #tpu.core_type<tc>, window_params = [{transform_indices = @transform_0, window_bounds = array<i64: 98, 252>}, {pipeline_mode = #tpu.pipeline_mode<synchronous>, transform_indices = @transform_1, window_bounds = array<i64: 252, 8>}, {pipeline_mode = #tpu.pipeline_mode<synchronous>, transform_indices = @transform_2, window_bounds = array<i64: 2, 8>}, {transform_indices = @transform_3, window_bounds = array<i64: 98, 8>}]} {
    %c0 = arith.constant 0 : index
    %c0_0 = arith.constant 0 : index
    %0 = vector.load %arg1[%c0, %c0_0] : memref<98x252xbf16, #tpu.memory_space<vmem>>, vector<98x252xbf16>
    %c0_1 = arith.constant 0 : index
    %c0_2 = arith.constant 0 : index
    %1 = vector.load %arg2[%c0_1, %c0_2] : memref<252x8xbf16, #tpu.memory_space<vmem>>, vector<252x8xbf16>
    %cst = arith.constant dense<0.000000e+00> : vector<98x8xf32>
    %2 = tpu.matmul %0, %1, %cst {dimension_numbers = #tpu.dot_dimension_numbers<[1], [0], [0], [1], [0, 0, 1, 1], [], []>} : vector<98x252xbf16>, vector<252x8xbf16>, vector<98x8xf32> -> vector<98x8xf32>
    %c0_3 = arith.constant 0 : index
    %c0_4 = arith.constant 0 : index
    %3 = vector.load %arg3[%c0_3, %c0_4] : memref<2x8xf32, #tpu.memory_space<vmem>>, vector<1x8xf32>
    %4 = vector.broadcast %3 : vector<1x8xf32> to vector<98x8xf32>
    %5 = arith.mulf %2, %4 : vector<98x8xf32>
    %c1 = arith.constant 1 : index
    %c0_5 = arith.constant 0 : index
    %6 = vector.load %arg3[%c1, %c0_5] : memref<2x8xf32, #tpu.memory_space<vmem>>, vector<1x8xf32>
    %7 = vector.broadcast %6 : vector<1x8xf32> to vector<98x8xf32>
    %8 = arith.addf %5, %7 : vector<98x8xf32>
    %cst_6 = arith.constant 0.000000e+00 : f32
    %9 = vector.broadcast %cst_6 : f32 to vector<98x8xf32>
    %10 = arith.maximumf %8, %9 : vector<98x8xf32>
    %11 = arith.truncf %10 : vector<98x8xf32> to vector<98x8xbf16>
    %c0_7 = arith.constant 0 : index
    %c0_8 = arith.constant 0 : index
    %12 = vector.load %arg4[%c0_7, %c0_8] : memref<98x8xbf16, #tpu.memory_space<vmem>>, vector<98x8xbf16>
    tpu.vector_store %arg4[%c0_7, %c0_8], %11 {strides = array<i32>} : memref<98x8xbf16, #tpu.memory_space<vmem>>, vector<98x8xbf16>,
    return
  }
  func.func @transform_0(%arg0: i32) -> (i32, i32) {
    %c0_i32 = arith.constant 0 : i32
    %c0_i32_0 = arith.constant 0 : i32
    return %arg0, %c0_i32 : i32, i32
  }
  func.func @transform_1(%arg0: i32) -> (i32, i32) {
    %c0_i32 = arith.constant 0 : i32
    %c0_i32_0 = arith.constant 0 : i32
    %c0_i32_1 = arith.constant 0 : i32
    return %c0_i32, %c0_i32_0 : i32, i32
  }
  func.func @transform_2(%arg0: i32) -> (i32, i32) {
    %c0_i32 = arith.constant 0 : i32
    %c0_i32_0 = arith.constant 0 : i32
    %c0_i32_1 = arith.constant 0 : i32
    return %c0_i32, %c0_i32_0 : i32, i32
  }
  func.func @transform_3(%arg0: i32) -> (i32, i32) {
    %c0_i32 = arith.constant 0 : i32
    %c0_i32_0 = arith.constant 0 : i32
    return %arg0, %c0_i32 : i32, i32
  }
}

module attributes {stable_mosaic.version = 11 : i64} {
  func.func @_gemm_bn_act_kernel(%arg0: i32, %arg1: memref<32x72xbf16, #tpu.memory_space<vmem>>, %arg2: memref<72x4xbf16, #tpu.memory_space<vmem>>, %arg3: memref<2x4xf32, #tpu.memory_space<vmem>>, %arg4: memref<32x4xbf16, #tpu.memory_space<vmem>>) attributes {dimension_semantics = [#tpu.dimension_semantics<parallel>], iteration_bounds = array<i64: 1>, scalar_prefetch = 0 : i64, scratch_operands = 0 : i64, tpu.core_type = #tpu.core_type<tc>, window_params = [{transform_indices = @transform_0, window_bounds = array<i64: 32, 72>}, {pipeline_mode = #tpu.pipeline_mode<synchronous>, transform_indices = @transform_1, window_bounds = array<i64: 72, 4>}, {pipeline_mode = #tpu.pipeline_mode<synchronous>, transform_indices = @transform_2, window_bounds = array<i64: 2, 4>}, {transform_indices = @transform_3, window_bounds = array<i64: 32, 4>}]} {
    %c0 = arith.constant 0 : index
    %c0_0 = arith.constant 0 : index
    %0 = vector.load %arg1[%c0, %c0_0] : memref<32x72xbf16, #tpu.memory_space<vmem>>, vector<32x72xbf16>
    %c0_1 = arith.constant 0 : index
    %c0_2 = arith.constant 0 : index
    %1 = vector.load %arg2[%c0_1, %c0_2] : memref<72x4xbf16, #tpu.memory_space<vmem>>, vector<72x4xbf16>
    %cst = arith.constant dense<0.000000e+00> : vector<32x4xf32>
    %2 = tpu.matmul %0, %1, %cst {dimension_numbers = #tpu.dot_dimension_numbers<[1], [0], [0], [1], [0, 0, 1, 1], [], []>} : vector<32x72xbf16>, vector<72x4xbf16>, vector<32x4xf32> -> vector<32x4xf32>
    %c0_3 = arith.constant 0 : index
    %c0_4 = arith.constant 0 : index
    %3 = vector.load %arg3[%c0_3, %c0_4] : memref<2x4xf32, #tpu.memory_space<vmem>>, vector<1x4xf32>
    %4 = vector.broadcast %3 : vector<1x4xf32> to vector<32x4xf32>
    %5 = arith.mulf %2, %4 : vector<32x4xf32>
    %c1 = arith.constant 1 : index
    %c0_5 = arith.constant 0 : index
    %6 = vector.load %arg3[%c1, %c0_5] : memref<2x4xf32, #tpu.memory_space<vmem>>, vector<1x4xf32>
    %7 = vector.broadcast %6 : vector<1x4xf32> to vector<32x4xf32>
    %8 = arith.addf %5, %7 : vector<32x4xf32>
    %cst_6 = arith.constant 0.000000e+00 : f32
    %9 = vector.broadcast %cst_6 : f32 to vector<32x4xf32>
    %10 = arith.maximumf %8, %9 : vector<32x4xf32>
    %11 = arith.truncf %10 : vector<32x4xf32> to vector<32x4xbf16>
    %c0_7 = arith.constant 0 : index
    %c0_8 = arith.constant 0 : index
    %12 = vector.load %arg4[%c0_7, %c0_8] : memref<32x4xbf16, #tpu.memory_space<vmem>>, vector<32x4xbf16>
    tpu.vector_store %arg4[%c0_7, %c0_8], %11 {strides = array<i32>} : memref<32x4xbf16, #tpu.memory_space<vmem>>, vector<32x4xbf16>,
    return
  }
  func.func @transform_0(%arg0: i32) -> (i32, i32) {
    %c0_i32 = arith.constant 0 : i32
    %c0_i32_0 = arith.constant 0 : i32
    return %arg0, %c0_i32 : i32, i32
  }
  func.func @transform_1(%arg0: i32) -> (i32, i32) {
    %c0_i32 = arith.constant 0 : i32
    %c0_i32_0 = arith.constant 0 : i32
    %c0_i32_1 = arith.constant 0 : i32
    return %c0_i32, %c0_i32_0 : i32, i32
  }
  func.func @transform_2(%arg0: i32) -> (i32, i32) {
    %c0_i32 = arith.constant 0 : i32
    %c0_i32_0 = arith.constant 0 : i32
    %c0_i32_1 = arith.constant 0 : i32
    return %c0_i32, %c0_i32_0 : i32, i32
  }
  func.func @transform_3(%arg0: i32) -> (i32, i32) {
    %c0_i32 = arith.constant 0 : i32
    %c0_i32_0 = arith.constant 0 : i32
    return %arg0, %c0_i32 : i32, i32
  }
}

module attributes {stable_mosaic.version = 11 : i64} {
  func.func @_gemm_bn_act_kernel(%arg0: i32, %arg1: memref<2x16xbf16, #tpu.memory_space<vmem>>, %arg2: memref<16x288xbf16, #tpu.memory_space<vmem>>, %arg3: memref<2x288xf32, #tpu.memory_space<vmem>>, %arg4: memref<2x288xbf16, #tpu.memory_space<vmem>>) attributes {dimension_semantics = [#tpu.dimension_semantics<parallel>], iteration_bounds = array<i64: 1>, scalar_prefetch = 0 : i64, scratch_operands = 0 : i64, tpu.core_type = #tpu.core_type<tc>, window_params = [{transform_indices = @transform_0, window_bounds = array<i64: 2, 16>}, {pipeline_mode = #tpu.pipeline_mode<synchronous>, transform_indices = @transform_1, window_bounds = array<i64: 16, 288>}, {pipeline_mode = #tpu.pipeline_mode<synchronous>, transform_indices = @transform_2, window_bounds = array<i64: 2, 288>}, {transform_indices = @transform_3, window_bounds = array<i64: 2, 288>}]} {
    %c0 = arith.constant 0 : index
    %c0_0 = arith.constant 0 : index
    %0 = vector.load %arg1[%c0, %c0_0] : memref<2x16xbf16, #tpu.memory_space<vmem>>, vector<2x16xbf16>
    %c0_1 = arith.constant 0 : index
    %c0_2 = arith.constant 0 : index
    %1 = vector.load %arg2[%c0_1, %c0_2] : memref<16x288xbf16, #tpu.memory_space<vmem>>, vector<16x288xbf16>
    %cst = arith.constant dense<0.000000e+00> : vector<2x288xf32>
    %2 = tpu.matmul %0, %1, %cst {dimension_numbers = #tpu.dot_dimension_numbers<[1], [0], [0], [1], [0, 0, 1, 1], [], []>} : vector<2x16xbf16>, vector<16x288xbf16>, vector<2x288xf32> -> vector<2x288xf32>
    %c0_3 = arith.constant 0 : index
    %c0_4 = arith.constant 0 : index
    %3 = vector.load %arg3[%c0_3, %c0_4] : memref<2x288xf32, #tpu.memory_space<vmem>>, vector<1x288xf32>
    %4 = vector.broadcast %3 : vector<1x288xf32> to vector<2x288xf32>
    %5 = arith.mulf %2, %4 : vector<2x288xf32>
    %c1 = arith.constant 1 : index
    %c0_5 = arith.constant 0 : index
    %6 = vector.load %arg3[%c1, %c0_5] : memref<2x288xf32, #tpu.memory_space<vmem>>, vector<1x288xf32>
    %7 = vector.broadcast %6 : vector<1x288xf32> to vector<2x288xf32>
    %8 = arith.addf %5, %7 : vector<2x288xf32>
    %cst_6 = arith.constant 0.000000e+00 : f32
    %9 = vector.broadcast %cst_6 : f32 to vector<2x288xf32>
    %10 = arith.maximumf %8, %9 : vector<2x288xf32>
    %11 = arith.truncf %10 : vector<2x288xf32> to vector<2x288xbf16>
    %c0_7 = arith.constant 0 : index
    %c0_8 = arith.constant 0 : index
    %12 = vector.load %arg4[%c0_7, %c0_8] : memref<2x288xbf16, #tpu.memory_space<vmem>>, vector<2x288xbf16>
    tpu.vector_store %arg4[%c0_7, %c0_8], %11 {strides = array<i32>} : memref<2x288xbf16, #tpu.memory_space<vmem>>, vector<2x288xbf16>,
    return
  }
  func.func @transform_0(%arg0: i32) -> (i32, i32) {
    %c0_i32 = arith.constant 0 : i32
    %c0_i32_0 = arith.constant 0 : i32
    return %arg0, %c0_i32 : i32, i32
  }
  func.func @transform_1(%arg0: i32) -> (i32, i32) {
    %c0_i32 = arith.constant 0 : i32
    %c0_i32_0 = arith.constant 0 : i32
    %c0_i32_1 = arith.constant 0 : i32
    return %c0_i32, %c0_i32_0 : i32, i32
  }
  func.func @transform_2(%arg0: i32) -> (i32, i32) {
    %c0_i32 = arith.constant 0 : i32
    %c0_i32_0 = arith.constant 0 : i32
    %c0_i32_1 = arith.constant 0 : i32
    return %c0_i32, %c0_i32_0 : i32, i32
  }
  func.func @transform_3(%arg0: i32) -> (i32, i32) {
    %c0_i32 = arith.constant 0 : i32
    %c0_i32_0 = arith.constant 0 : i32
    return %arg0, %c0_i32 : i32, i32
  }
}

module attributes {stable_mosaic.version = 11 : i64} {
  func.func @_gemm_bn_act_kernel(%arg0: i32, %arg1: memref<2x64xbf16, #tpu.memory_space<vmem>>, %arg2: memref<64x16xbf16, #tpu.memory_space<vmem>>, %arg3: memref<2x16xf32, #tpu.memory_space<vmem>>, %arg4: memref<2x16xbf16, #tpu.memory_space<vmem>>) attributes {dimension_semantics = [#tpu.dimension_semantics<parallel>], iteration_bounds = array<i64: 1>, scalar_prefetch = 0 : i64, scratch_operands = 0 : i64, tpu.core_type = #tpu.core_type<tc>, window_params = [{transform_indices = @transform_0, window_bounds = array<i64: 2, 64>}, {pipeline_mode = #tpu.pipeline_mode<synchronous>, transform_indices = @transform_1, window_bounds = array<i64: 64, 16>}, {pipeline_mode = #tpu.pipeline_mode<synchronous>, transform_indices = @transform_2, window_bounds = array<i64: 2, 16>}, {transform_indices = @transform_3, window_bounds = array<i64: 2, 16>}]} {
    %c0 = arith.constant 0 : index
    %c0_0 = arith.constant 0 : index
    %0 = vector.load %arg1[%c0, %c0_0] : memref<2x64xbf16, #tpu.memory_space<vmem>>, vector<2x64xbf16>
    %c0_1 = arith.constant 0 : index
    %c0_2 = arith.constant 0 : index
    %1 = vector.load %arg2[%c0_1, %c0_2] : memref<64x16xbf16, #tpu.memory_space<vmem>>, vector<64x16xbf16>
    %cst = arith.constant dense<0.000000e+00> : vector<2x16xf32>
    %2 = tpu.matmul %0, %1, %cst {dimension_numbers = #tpu.dot_dimension_numbers<[1], [0], [0], [1], [0, 0, 1, 1], [], []>} : vector<2x64xbf16>, vector<64x16xbf16>, vector<2x16xf32> -> vector<2x16xf32>
    %c0_3 = arith.constant 0 : index
    %c0_4 = arith.constant 0 : index
    %3 = vector.load %arg3[%c0_3, %c0_4] : memref<2x16xf32, #tpu.memory_space<vmem>>, vector<1x16xf32>
    %4 = vector.broadcast %3 : vector<1x16xf32> to vector<2x16xf32>
    %5 = arith.mulf %2, %4 : vector<2x16xf32>
    %c1 = arith.constant 1 : index
    %c0_5 = arith.constant 0 : index
    %6 = vector.load %arg3[%c1, %c0_5] : memref<2x16xf32, #tpu.memory_space<vmem>>, vector<1x16xf32>
    %7 = vector.broadcast %6 : vector<1x16xf32> to vector<2x16xf32>
    %8 = arith.addf %5, %7 : vector<2x16xf32>
    %9 = arith.truncf %8 : vector<2x16xf32> to vector<2x16xbf16>
    %c0_6 = arith.constant 0 : index
    %c0_7 = arith.constant 0 : index
    %10 = vector.load %arg4[%c0_6, %c0_7] : memref<2x16xbf16, #tpu.memory_space<vmem>>, vector<2x16xbf16>
    tpu.vector_store %arg4[%c0_6, %c0_7], %9 {strides = array<i32>} : memref<2x16xbf16, #tpu.memory_space<vmem>>, vector<2x16xbf16>,
    return
  }
  func.func @transform_0(%arg0: i32) -> (i32, i32) {
    %c0_i32 = arith.constant 0 : i32
    %c0_i32_0 = arith.constant 0 : i32
    return %arg0, %c0_i32 : i32, i32
  }
  func.func @transform_1(%arg0: i32) -> (i32, i32) {
    %c0_i32 = arith.constant 0 : i32
    %c0_i32_0 = arith.constant 0 : i32
    %c0_i32_1 = arith.constant 0 : i32
    return %c0_i32, %c0_i32_0 : i32, i32
  }
  func.func @transform_2(%arg0: i32) -> (i32, i32) {
    %c0_i32 = arith.constant 0 : i32
    %c0_i32_0 = arith.constant 0 : i32
    %c0_i32_1 = arith.constant 0 : i32
    return %c0_i32, %c0_i32_0 : i32, i32
  }
  func.func @transform_3(%arg0: i32) -> (i32, i32) {
    %c0_i32 = arith.constant 0 : i32
    %c0_i32_0 = arith.constant 0 : i32
    return %arg0, %c0_i32 : i32, i32
  }
}

module attributes {stable_mosaic.version = 11 : i64} {
  func.func @_gemm_bn_act_kernel(%arg0: i32, %arg1: memref<72x72xbf16, #tpu.memory_space<vmem>>, %arg2: memref<72x16xbf16, #tpu.memory_space<vmem>>, %arg3: memref<2x16xf32, #tpu.memory_space<vmem>>, %arg4: memref<72x16xbf16, #tpu.memory_space<vmem>>) attributes {dimension_semantics = [#tpu.dimension_semantics<parallel>], iteration_bounds = array<i64: 1>, scalar_prefetch = 0 : i64, scratch_operands = 0 : i64, tpu.core_type = #tpu.core_type<tc>, window_params = [{transform_indices = @transform_0, window_bounds = array<i64: 72, 72>}, {pipeline_mode = #tpu.pipeline_mode<synchronous>, transform_indices = @transform_1, window_bounds = array<i64: 72, 16>}, {pipeline_mode = #tpu.pipeline_mode<synchronous>, transform_indices = @transform_2, window_bounds = array<i64: 2, 16>}, {transform_indices = @transform_3, window_bounds = array<i64: 72, 16>}]} {
    %c0 = arith.constant 0 : index
    %c0_0 = arith.constant 0 : index
    %0 = vector.load %arg1[%c0, %c0_0] : memref<72x72xbf16, #tpu.memory_space<vmem>>, vector<72x72xbf16>
    %c0_1 = arith.constant 0 : index
    %c0_2 = arith.constant 0 : index
    %1 = vector.load %arg2[%c0_1, %c0_2] : memref<72x16xbf16, #tpu.memory_space<vmem>>, vector<72x16xbf16>
    %cst = arith.constant dense<0.000000e+00> : vector<72x16xf32>
    %2 = tpu.matmul %0, %1, %cst {dimension_numbers = #tpu.dot_dimension_numbers<[1], [0], [0], [1], [0, 0, 1, 1], [], []>} : vector<72x72xbf16>, vector<72x16xbf16>, vector<72x16xf32> -> vector<72x16xf32>
    %c0_3 = arith.constant 0 : index
    %c0_4 = arith.constant 0 : index
    %3 = vector.load %arg3[%c0_3, %c0_4] : memref<2x16xf32, #tpu.memory_space<vmem>>, vector<1x16xf32>
    %4 = vector.broadcast %3 : vector<1x16xf32> to vector<72x16xf32>
    %5 = arith.mulf %2, %4 : vector<72x16xf32>
    %c1 = arith.constant 1 : index
    %c0_5 = arith.constant 0 : index
    %6 = vector.load %arg3[%c1, %c0_5] : memref<2x16xf32, #tpu.memory_space<vmem>>, vector<1x16xf32>
    %7 = vector.broadcast %6 : vector<1x16xf32> to vector<72x16xf32>
    %8 = arith.addf %5, %7 : vector<72x16xf32>
    %cst_6 = arith.constant 0.000000e+00 : f32
    %9 = vector.broadcast %cst_6 : f32 to vector<72x16xf32>
    %10 = arith.maximumf %8, %9 : vector<72x16xf32>
    %11 = arith.truncf %10 : vector<72x16xf32> to vector<72x16xbf16>
    %c0_7 = arith.constant 0 : index
    %c0_8 = arith.constant 0 : index
    %12 = vector.load %arg4[%c0_7, %c0_8] : memref<72x16xbf16, #tpu.memory_space<vmem>>, vector<72x16xbf16>
    tpu.vector_store %arg4[%c0_7, %c0_8], %11 {strides = array<i32>} : memref<72x16xbf16, #tpu.memory_space<vmem>>, vector<72x16xbf16>,
    return
  }
  func.func @transform_0(%arg0: i32) -> (i32, i32) {
    %c0_i32 = arith.constant 0 : i32
    %c0_i32_0 = arith.constant 0 : i32
    return %arg0, %c0_i32 : i32, i32
  }
  func.func @transform_1(%arg0: i32) -> (i32, i32) {
    %c0_i32 = arith.constant 0 : i32
    %c0_i32_0 = arith.constant 0 : i32
    %c0_i32_1 = arith.constant 0 : i32
    return %c0_i32, %c0_i32_0 : i32, i32
  }
  func.func @transform_2(%arg0: i32) -> (i32, i32) {
    %c0_i32 = arith.constant 0 : i32
    %c0_i32_0 = arith.constant 0 : i32
    %c0_i32_1 = arith.constant 0 : i32
    return %c0_i32, %c0_i32_0 : i32, i32
  }
  func.func @transform_3(%arg0: i32) -> (i32, i32) {
    %c0_i32 = arith.constant 0 : i32
    %c0_i32_0 = arith.constant 0 : i32
    return %arg0, %c0_i32 : i32, i32
  }
}

module attributes {stable_mosaic.version = 11 : i64} {
  func.func @_gemm_bn_act_kernel(%arg0: i32, %arg1: memref<72x216xbf16, #tpu.memory_space<vmem>>, %arg2: memref<216x12xbf16, #tpu.memory_space<vmem>>, %arg3: memref<2x12xf32, #tpu.memory_space<vmem>>, %arg4: memref<72x12xbf16, #tpu.memory_space<vmem>>) attributes {dimension_semantics = [#tpu.dimension_semantics<parallel>], iteration_bounds = array<i64: 1>, scalar_prefetch = 0 : i64, scratch_operands = 0 : i64, tpu.core_type = #tpu.core_type<tc>, window_params = [{transform_indices = @transform_0, window_bounds = array<i64: 72, 216>}, {pipeline_mode = #tpu.pipeline_mode<synchronous>, transform_indices = @transform_1, window_bounds = array<i64: 216, 12>}, {pipeline_mode = #tpu.pipeline_mode<synchronous>, transform_indices = @transform_2, window_bounds = array<i64: 2, 12>}, {transform_indices = @transform_3, window_bounds = array<i64: 72, 12>}]} {
    %c0 = arith.constant 0 : index
    %c0_0 = arith.constant 0 : index
    %0 = vector.load %arg1[%c0, %c0_0] : memref<72x216xbf16, #tpu.memory_space<vmem>>, vector<72x216xbf16>
    %c0_1 = arith.constant 0 : index
    %c0_2 = arith.constant 0 : index
    %1 = vector.load %arg2[%c0_1, %c0_2] : memref<216x12xbf16, #tpu.memory_space<vmem>>, vector<216x12xbf16>
    %cst = arith.constant dense<0.000000e+00> : vector<72x12xf32>
    %2 = tpu.matmul %0, %1, %cst {dimension_numbers = #tpu.dot_dimension_numbers<[1], [0], [0], [1], [0, 0, 1, 1], [], []>} : vector<72x216xbf16>, vector<216x12xbf16>, vector<72x12xf32> -> vector<72x12xf32>
    %c0_3 = arith.constant 0 : index
    %c0_4 = arith.constant 0 : index
    %3 = vector.load %arg3[%c0_3, %c0_4] : memref<2x12xf32, #tpu.memory_space<vmem>>, vector<1x12xf32>
    %4 = vector.broadcast %3 : vector<1x12xf32> to vector<72x12xf32>
    %5 = arith.mulf %2, %4 : vector<72x12xf32>
    %c1 = arith.constant 1 : index
    %c0_5 = arith.constant 0 : index
    %6 = vector.load %arg3[%c1, %c0_5] : memref<2x12xf32, #tpu.memory_space<vmem>>, vector<1x12xf32>
    %7 = vector.broadcast %6 : vector<1x12xf32> to vector<72x12xf32>
    %8 = arith.addf %5, %7 : vector<72x12xf32>
    %cst_6 = arith.constant 0.000000e+00 : f32
    %9 = vector.broadcast %cst_6 : f32 to vector<72x12xf32>
    %10 = arith.maximumf %8, %9 : vector<72x12xf32>
    %11 = arith.truncf %10 : vector<72x12xf32> to vector<72x12xbf16>
    %c0_7 = arith.constant 0 : index
    %c0_8 = arith.constant 0 : index
    %12 = vector.load %arg4[%c0_7, %c0_8] : memref<72x12xbf16, #tpu.memory_space<vmem>>, vector<72x12xbf16>
    tpu.vector_store %arg4[%c0_7, %c0_8], %11 {strides = array<i32>} : memref<72x12xbf16, #tpu.memory_space<vmem>>, vector<72x12xbf16>,
    return
  }
  func.func @transform_0(%arg0: i32) -> (i32, i32) {
    %c0_i32 = arith.constant 0 : i32
    %c0_i32_0 = arith.constant 0 : i32
    return %arg0, %c0_i32 : i32, i32
  }
  func.func @transform_1(%arg0: i32) -> (i32, i32) {
    %c0_i32 = arith.constant 0 : i32
    %c0_i32_0 = arith.constant 0 : i32
    %c0_i32_1 = arith.constant 0 : i32
    return %c0_i32, %c0_i32_0 : i32, i32
  }
  func.func @transform_2(%arg0: i32) -> (i32, i32) {
    %c0_i32 = arith.constant 0 : i32
    %c0_i32_0 = arith.constant 0 : i32
    %c0_i32_1 = arith.constant 0 : i32
    return %c0_i32, %c0_i32_0 : i32, i32
  }
  func.func @transform_3(%arg0: i32) -> (i32, i32) {
    %c0_i32 = arith.constant 0 : i32
    %c0_i32_0 = arith.constant 0 : i32
    return %arg0, %c0_i32 : i32, i32
  }
}

module attributes {stable_mosaic.version = 11 : i64} {
  func.func @_gemm_bn_act_kernel(%arg0: i32, %arg1: memref<450x700xbf16, #tpu.memory_space<vmem>>, %arg2: memref<700x8xbf16, #tpu.memory_space<vmem>>, %arg3: memref<2x8xf32, #tpu.memory_space<vmem>>, %arg4: memref<450x8xbf16, #tpu.memory_space<vmem>>) attributes {dimension_semantics = [#tpu.dimension_semantics<parallel>], iteration_bounds = array<i64: 1>, scalar_prefetch = 0 : i64, scratch_operands = 0 : i64, tpu.core_type = #tpu.core_type<tc>, window_params = [{transform_indices = @transform_0, window_bounds = array<i64: 450, 700>}, {pipeline_mode = #tpu.pipeline_mode<synchronous>, transform_indices = @transform_1, window_bounds = array<i64: 700, 8>}, {pipeline_mode = #tpu.pipeline_mode<synchronous>, transform_indices = @transform_2, window_bounds = array<i64: 2, 8>}, {transform_indices = @transform_3, window_bounds = array<i64: 450, 8>}]} {
    %c0 = arith.constant 0 : index
    %c0_0 = arith.constant 0 : index
    %0 = vector.load %arg1[%c0, %c0_0] : memref<450x700xbf16, #tpu.memory_space<vmem>>, vector<450x700xbf16>
    %c0_1 = arith.constant 0 : index
    %c0_2 = arith.constant 0 : index
    %1 = vector.load %arg2[%c0_1, %c0_2] : memref<700x8xbf16, #tpu.memory_space<vmem>>, vector<700x8xbf16>
    %cst = arith.constant dense<0.000000e+00> : vector<450x8xf32>
    %2 = tpu.matmul %0, %1, %cst {dimension_numbers = #tpu.dot_dimension_numbers<[1], [0], [0], [1], [0, 0, 1, 1], [], []>} : vector<450x700xbf16>, vector<700x8xbf16>, vector<450x8xf32> -> vector<450x8xf32>
    %c0_3 = arith.constant 0 : index
    %c0_4 = arith.constant 0 : index
    %3 = vector.load %arg3[%c0_3, %c0_4] : memref<2x8xf32, #tpu.memory_space<vmem>>, vector<1x8xf32>
    %4 = vector.broadcast %3 : vector<1x8xf32> to vector<450x8xf32>
    %5 = arith.mulf %2, %4 : vector<450x8xf32>
    %c1 = arith.constant 1 : index
    %c0_5 = arith.constant 0 : index
    %6 = vector.load %arg3[%c1, %c0_5] : memref<2x8xf32, #tpu.memory_space<vmem>>, vector<1x8xf32>
    %7 = vector.broadcast %6 : vector<1x8xf32> to vector<450x8xf32>
    %8 = arith.addf %5, %7 : vector<450x8xf32>
    %cst_6 = arith.constant 0.000000e+00 : f32
    %9 = vector.broadcast %cst_6 : f32 to vector<450x8xf32>
    %10 = arith.maximumf %8, %9 : vector<450x8xf32>
    %11 = arith.truncf %10 : vector<450x8xf32> to vector<450x8xbf16>
    %c0_7 = arith.constant 0 : index
    %c0_8 = arith.constant 0 : index
    %12 = vector.load %arg4[%c0_7, %c0_8] : memref<450x8xbf16, #tpu.memory_space<vmem>>, vector<450x8xbf16>
    tpu.vector_store %arg4[%c0_7, %c0_8], %11 {strides = array<i32>} : memref<450x8xbf16, #tpu.memory_space<vmem>>, vector<450x8xbf16>,
    return
  }
  func.func @transform_0(%arg0: i32) -> (i32, i32) {
    %c0_i32 = arith.constant 0 : i32
    %c0_i32_0 = arith.constant 0 : i32
    return %arg0, %c0_i32 : i32, i32
  }
  func.func @transform_1(%arg0: i32) -> (i32, i32) {
    %c0_i32 = arith.constant 0 : i32
    %c0_i32_0 = arith.constant 0 : i32
    %c0_i32_1 = arith.constant 0 : i32
    return %c0_i32, %c0_i32_0 : i32, i32
  }
  func.func @transform_2(%arg0: i32) -> (i32, i32) {
    %c0_i32 = arith.constant 0 : i32
    %c0_i32_0 = arith.constant 0 : i32
    %c0_i32_1 = arith.constant 0 : i32
    return %c0_i32, %c0_i32_0 : i32, i32
  }
  func.func @transform_3(%arg0: i32) -> (i32, i32) {
    %c0_i32 = arith.constant 0 : i32
    %c0_i32_0 = arith.constant 0 : i32
    return %arg0, %c0_i32 : i32, i32
  }
}

module attributes {stable_mosaic.version = 11 : i64} {
  func.func @_gemm_bn_act_kernel(%arg0: i32, %arg1: memref<512x72xbf16, #tpu.memory_space<vmem>>, %arg2: memref<72x4xbf16, #tpu.memory_space<vmem>>, %arg3: memref<2x4xf32, #tpu.memory_space<vmem>>, %arg4: memref<512x4xbf16, #tpu.memory_space<vmem>>) attributes {dimension_semantics = [#tpu.dimension_semantics<parallel>], iteration_bounds = array<i64: 4>, scalar_prefetch = 0 : i64, scratch_operands = 0 : i64, tpu.core_type = #tpu.core_type<tc>, window_params = [{transform_indices = @transform_0, window_bounds = array<i64: 512, 72>}, {pipeline_mode = #tpu.pipeline_mode<synchronous>, transform_indices = @transform_1, window_bounds = array<i64: 72, 4>}, {pipeline_mode = #tpu.pipeline_mode<synchronous>, transform_indices = @transform_2, window_bounds = array<i64: 2, 4>}, {transform_indices = @transform_3, window_bounds = array<i64: 512, 4>}]} {
    %c0 = arith.constant 0 : index
    %c0_0 = arith.constant 0 : index
    %0 = vector.load %arg1[%c0, %c0_0] : memref<512x72xbf16, #tpu.memory_space<vmem>>, vector<512x72xbf16>
    %c0_1 = arith.constant 0 : index
    %c0_2 = arith.constant 0 : index
    %1 = vector.load %arg2[%c0_1, %c0_2] : memref<72x4xbf16, #tpu.memory_space<vmem>>, vector<72x4xbf16>
    %cst = arith.constant dense<0.000000e+00> : vector<512x4xf32>
    %2 = tpu.matmul %0, %1, %cst {dimension_numbers = #tpu.dot_dimension_numbers<[1], [0], [0], [1], [0, 0, 1, 1], [], []>} : vector<512x72xbf16>, vector<72x4xbf16>, vector<512x4xf32> -> vector<512x4xf32>
    %c0_3 = arith.constant 0 : index
    %c0_4 = arith.constant 0 : index
    %3 = vector.load %arg3[%c0_3, %c0_4] : memref<2x4xf32, #tpu.memory_space<vmem>>, vector<1x4xf32>
    %4 = vector.broadcast %3 : vector<1x4xf32> to vector<512x4xf32>
    %5 = arith.mulf %2, %4 : vector<512x4xf32>
    %c1 = arith.constant 1 : index
    %c0_5 = arith.constant 0 : index
    %6 = vector.load %arg3[%c1, %c0_5] : memref<2x4xf32, #tpu.memory_space<vmem>>, vector<1x4xf32>
    %7 = vector.broadcast %6 : vector<1x4xf32> to vector<512x4xf32>
    %8 = arith.addf %5, %7 : vector<512x4xf32>
    %cst_6 = arith.constant 0.000000e+00 : f32
    %9 = vector.broadcast %cst_6 : f32 to vector<512x4xf32>
    %10 = arith.maximumf %8, %9 : vector<512x4xf32>
    %11 = arith.truncf %10 : vector<512x4xf32> to vector<512x4xbf16>
    %c0_7 = arith.constant 0 : index
    %c0_8 = arith.constant 0 : index
    %12 = vector.load %arg4[%c0_7, %c0_8] : memref<512x4xbf16, #tpu.memory_space<vmem>>, vector<512x4xbf16>
    tpu.vector_store %arg4[%c0_7, %c0_8], %11 {strides = array<i32>} : memref<512x4xbf16, #tpu.memory_space<vmem>>, vector<512x4xbf16>,
    return
  }
  func.func @transform_0(%arg0: i32) -> (i32, i32) {
    %c0_i32 = arith.constant 0 : i32
    %c0_i32_0 = arith.constant 0 : i32
    return %arg0, %c0_i32 : i32, i32
  }
  func.func @transform_1(%arg0: i32) -> (i32, i32) {
    %c0_i32 = arith.constant 0 : i32
    %c0_i32_0 = arith.constant 0 : i32
    %c0_i32_1 = arith.constant 0 : i32
    return %c0_i32, %c0_i32_0 : i32, i32
  }
  func.func @transform_2(%arg0: i32) -> (i32, i32) {
    %c0_i32 = arith.constant 0 : i32
    %c0_i32_0 = arith.constant 0 : i32
    %c0_i32_1 = arith.constant 0 : i32
    return %c0_i32, %c0_i32_0 : i32, i32
  }
  func.func @transform_3(%arg0: i32) -> (i32, i32) {
    %c0_i32 = arith.constant 0 : i32
    %c0_i32_0 = arith.constant 0 : i32
    return %arg0, %c0_i32 : i32, i32
  }
}

module attributes {stable_mosaic.version = 11 : i64} {
  func.func @_gemm_bn_act_kernel(%arg0: i32, %arg1: memref<512x64xbf16, #tpu.memory_space<vmem>>, %arg2: memref<64x3xbf16, #tpu.memory_space<vmem>>, %arg3: memref<2x3xf32, #tpu.memory_space<vmem>>, %arg4: memref<512x3xf32, #tpu.memory_space<vmem>>) attributes {dimension_semantics = [#tpu.dimension_semantics<parallel>], iteration_bounds = array<i64: 4>, scalar_prefetch = 0 : i64, scratch_operands = 0 : i64, tpu.core_type = #tpu.core_type<tc>, window_params = [{transform_indices = @transform_0, window_bounds = array<i64: 512, 64>}, {pipeline_mode = #tpu.pipeline_mode<synchronous>, transform_indices = @transform_1, window_bounds = array<i64: 64, 3>}, {pipeline_mode = #tpu.pipeline_mode<synchronous>, transform_indices = @transform_2, window_bounds = array<i64: 2, 3>}, {transform_indices = @transform_3, window_bounds = array<i64: 512, 3>}]} {
    %c0 = arith.constant 0 : index
    %c0_0 = arith.constant 0 : index
    %0 = vector.load %arg1[%c0, %c0_0] : memref<512x64xbf16, #tpu.memory_space<vmem>>, vector<512x64xbf16>
    %c0_1 = arith.constant 0 : index
    %c0_2 = arith.constant 0 : index
    %1 = vector.load %arg2[%c0_1, %c0_2] : memref<64x3xbf16, #tpu.memory_space<vmem>>, vector<64x3xbf16>
    %cst = arith.constant dense<0.000000e+00> : vector<512x3xf32>
    %2 = tpu.matmul %0, %1, %cst {dimension_numbers = #tpu.dot_dimension_numbers<[1], [0], [0], [1], [0, 0, 1, 1], [], []>} : vector<512x64xbf16>, vector<64x3xbf16>, vector<512x3xf32> -> vector<512x3xf32>
    %c0_3 = arith.constant 0 : index
    %c0_4 = arith.constant 0 : index
    %3 = vector.load %arg3[%c0_3, %c0_4] : memref<2x3xf32, #tpu.memory_space<vmem>>, vector<1x3xf32>
    %4 = vector.broadcast %3 : vector<1x3xf32> to vector<512x3xf32>
    %5 = arith.mulf %2, %4 : vector<512x3xf32>
    %c1 = arith.constant 1 : index
    %c0_5 = arith.constant 0 : index
    %6 = vector.load %arg3[%c1, %c0_5] : memref<2x3xf32, #tpu.memory_space<vmem>>, vector<1x3xf32>
    %7 = vector.broadcast %6 : vector<1x3xf32> to vector<512x3xf32>
    %8 = arith.addf %5, %7 : vector<512x3xf32>
    %cst_6 = arith.constant 5.000000e-01 : f32
    %9 = vector.broadcast %cst_6 : f32 to vector<512x3xf32>
    %10 = arith.mulf %9, %8 : vector<512x3xf32>
    %11 = math.tanh %10 : vector<512x3xf32>
    %cst_7 = arith.constant 1.000000e+00 : f32
    %12 = vector.broadcast %cst_7 : f32 to vector<512x3xf32>
    %13 = arith.addf %11, %12 : vector<512x3xf32>
    %cst_8 = arith.constant 5.000000e-01 : f32
    %14 = vector.broadcast %cst_8 : f32 to vector<512x3xf32>
    %15 = arith.mulf %14, %13 : vector<512x3xf32>
    %c0_9 = arith.constant 0 : index
    %c0_10 = arith.constant 0 : index
    %16 = vector.load %arg4[%c0_9, %c0_10] : memref<512x3xf32, #tpu.memory_space<vmem>>, vector<512x3xf32>
    tpu.vector_store %arg4[%c0_9, %c0_10], %15 {strides = array<i32>} : memref<512x3xf32, #tpu.memory_space<vmem>>, vector<512x3xf32>,
    return
  }
  func.func @transform_0(%arg0: i32) -> (i32, i32) {
    %c0_i32 = arith.constant 0 : i32
    %c0_i32_0 = arith.constant 0 : i32
    return %arg0, %c0_i32 : i32, i32
  }
  func.func @transform_1(%arg0: i32) -> (i32, i32) {
    %c0_i32 = arith.constant 0 : i32
    %c0_i32_0 = arith.constant 0 : i32
    %c0_i32_1 = arith.constant 0 : i32
    return %c0_i32, %c0_i32_0 : i32, i32
  }
  func.func @transform_2(%arg0: i32) -> (i32, i32) {
    %c0_i32 = arith.constant 0 : i32
    %c0_i32_0 = arith.constant 0 : i32
    %c0_i32_1 = arith.constant 0 : i32
    return %c0_i32, %c0_i32_0 : i32, i32
  }
  func.func @transform_3(%arg0: i32) -> (i32, i32) {
    %c0_i32 = arith.constant 0 : i32
    %c0_i32_0 = arith.constant 0 : i32
    return %arg0, %c0_i32 : i32, i32
  }
}

</mosaic_0001>

<bundles_post_ra>
// kernel: autoencoder_forward.13
= control target key start
LH: loop header
LB: loop body
LE: loop exit
PB: predicated region body
PF: predicated region fallthrough
CT: control target
= control target key end

     0   :  { %vm57_vm0 = vcmask 1044480   ;;  %v459_v1 = vmov 0   ;;  %vm53_vm1 = vcmask 80896   ;;  %v460_v10 = vmov 0.0   ;;  %s527_s1 = inlined_call_operand.vmem [shape: bf16[10,864], index: 1, kind: input, shape index: {}]   ;;  %s528_s0 = inlined_call_operand.vmem [shape: bf16[2,10], index: 0, kind: input, shape index: {}]   ;;  %s529_s2 = inlined_call_operand.vmem [shape: f32[2,864], index: 2, kind: input, shape index: {}]   ;;  %s530_s3 = inlined_call_operand.vmem [shape: bf16[2,864], index: 3, kind: output, shape index: {}]  }
   0x1   :  { %v449_v0 = vld [vmem:[%s527_s1 + $0x4] ss:$28 sps:$4 sm:$0x1f]   ;;  %111 = vmatprep.mubr.bf16.mxu0 %v459_v1  ;;  %152 = vmatprep.mubr.bf16.mxu1 %v459_v1  ;;  %v451_v2 = vld [vmem:[%s527_s1 + $0xc] ss:$28 sps:$4 sm:$0x1f]   ;;  %v244_v14 = vlaneseq }
   0x2   :  { %426 = vmatprep.subr.msk.bf16.mxu0 %vm57_vm0, %v449_v0  ;;  %v453_v3 = vld [vmem:[%s527_s1] ss:$28 sps:$4 sm:$0x1f]   ;;  %v454_v4 = vld [vmem:[%s527_s1 + $0x8] ss:$28 sps:$4 sm:$0x1f]   ;;  %428 = vmatprep.subr.msk.bf16.mxu1 %vm57_vm0, %v451_v2 }
   0x3   :  { %v15_v5 = vld [vmem:[%s528_s0] sm:$0x1]  ;;  %v59_v6 = vsel %vm57_vm0, %v453_v3, 0  ;;  %v65_v7 = vsel %vm57_vm0, %v454_v4, 0  ;;  %vm461_vm2 = vmmov 0   ;;  %v245_v15 = vshrl.u32 %v244_v14, 7 }
   0x4   :  { %v455_v8 = vld [vmem:[%s527_s1 + $0x14] ss:$28 sps:$4 sm:$0x1f]   ;;  %80 = vmatpush1.bf16.msra.mxu0 %v59_v6  ;;  %121 = vmatpush1.bf16.msra.mxu1 %v65_v7  ;;  %v242_v18 = vld [vmem:[%s529_s2] ss:$2 sm:$0x7f] }
   0x5   :  { %v457_v9 = vld [vmem:[%s527_s1 + $0x10] ss:$28 sps:$4 sm:$0x1f]   ;;  %430 = vmatprep.subr.msk.bf16.mxu0 %vm57_vm0, %v455_v8  ;;  %439 = vmatprep.subr.bf16.mxu1 %v460_v10  ;;  %v458_v11 = vld [vmem:[%s527_s1 + $0x18] ss:$28 sps:$4 sm:$0x1f]  }
   0x6   :  { %v71_v12 = vsel %vm57_vm0, %v457_v9, 0  ;;  %v77_v13 = vsel %vm57_vm0, %v458_v11, 0  ;;  %v246_v16 = vsub.s32 0, %v245_v15  ;;  %v254_v17 = vsub.s32 2, %v245_v15 }
   0x7   :  { %427 = vmatmul.mubr.msk.bf16.vlgmr.msra.gmra.mrb[0].mxu0 %vm53_vm1, %v15_v5  ;;  %429 = vmatmul.mubr.msk.bf16.vlgmr.msra.gmra.mrb[0].mxu1 %vm53_vm1, %v15_v5  ;;  %v250_v19 = vsub.s32 1, %v245_v15  ;;  %v258_v20 = vsub.s32 3, %v245_v15  ;;  %v433_v21 = vld [vmem:[%s529_s2 + $0x1] ss:$2 sm:$0x7f]  ;;  %v262_v34 = vsub.s32 4, %v245_v15 }
   0x8   :  { %162 = vmatpush1.bf16.msra.mxu0 %v71_v12  ;;  %440 = vmatpush3.bf16.msra.mxu1 %v77_v13  ;;  %v247_v22 = vrot.slane %v242_v18, %v246_v16  ;;  %v255_v23 = vrot.slane %v242_v18, %v254_v17  ;;  %v462_v25 = vmov 1966171168   ;;  %v292_v28 = vrot.slane %v433_v21, %v246_v16 }
   0x9   :  { %193 = vmatprep.mubr.bf16.mxu0 %v459_v1  ;;  %441 = vmatprep.mubr.msk.bf16.mxu1 %vm461_vm2, %v460_v10  ;;  %v251_v24 = vrot.slane %v242_v18, %v250_v19  ;;  %v356_v26 = vunpack.c.l.s4 %v462_v25  ;;  %v259_v27 = vrot.slane %v242_v18, %v258_v20  ;;  %v300_v29 = vrot.slane %v433_v21, %v254_v17 }
   0xa   :  { %v296_v32 = vrot.slane %v433_v21, %v250_v19  ;;  %v304_v33 = vrot.slane %v433_v21, %v258_v20  ;;  %v270_v35 = vsub.s32 6, %v245_v15  ;;  %v266_v45 = vsub.s32 5, %v245_v15 }
   0xb   :  { %v357_v41 = vunpack.c.0.s8 %v356_v26  ;;  %v263_v52 = vrot.slane %v242_v18, %v262_v34  ;;  %vm401_vm3 = vcmask 1040384   ;;  %vm402_vm4 = vcmask 1041409  }
   0xc   :  { %v271_v53 = vrot.slane %v242_v18, %v270_v35  ;;  %v267_v59 = vrot.slane %v242_v18, %v266_v45  ;;  %v308_v60 = vrot.slane %v433_v21, %v262_v34  ;;  %v316_v61 = vrot.slane %v433_v21, %v270_v35  ;;  %vm403_vm5 = vmor %vm402_vm4, %vm401_vm3 }
   0xd   :  { %v360_v57 = vsub.s32 %v357_v41, %v245_v15  ;;  %v312_v2 = vrot.slane %v433_v21, %v266_v45  ;;  %vm404_vm6 = vcmask 1042434   ;;  %vm406_vm8 = vcmask 1043459  }
   0xe   :  { %vm405_vm7 = vmor %vm404_vm6, %vm403_vm5  ;;  %vm408_vm10 = vcmask 1044484   ;;  %vm410_vm12 = vcmask 1045509   ;;  %vm412_vm14 = vcmask 784390  }
   0xf   :  { %431 = vmatmul.mubr.msk.bf16.vlgmr.msra.gmra.mrb[4].mxu0 %vm53_vm1, %v15_v5  ;;  %442 = vmatmul.mubr.msk.bf16.vlgmr.msra.gmra.mrb[4].mxu1 %vm53_vm1, %v15_v5  ;;  %vm407_vm9 = vmor %vm406_vm8, %vm405_vm7 }
  0x10   :  { %vm409_vm11 = vmor %vm408_vm10, %vm407_vm9 }
  0x11   :  { %vm411_vm13 = vmor %vm410_vm12, %vm409_vm11 }
  0x12   :  { %vm413_vm15 = vmor %vm412_vm14, %vm411_vm13 }
  0xda   :  { %v113_v30 = vpop.f32.mrb[0].mxu0  ;;  %v154_v31 = vpop.f32.mrb[0].mxu1 }
  0xdb   :  { %v279_v36 = vmul.f32 %v247_v22, %v113_v30  ;;  %v281_v37 = vmul.f32 %v255_v23, %v154_v31  ;;  %v115_v38 = vpop.f32.mrb[1].mxu0  ;;  %v156_v39 = vpop.f32.mrb[1].mxu1 }
  0xdc   :  { %v280_v40 = vmul.f32 %v251_v24, %v115_v38  ;;  %v282_v42 = vmul.f32 %v259_v27, %v156_v39  ;;  %v117_v43 = vpop.f32.mrb[2].mxu0  ;;  %v158_v44 = vpop.f32.mrb[2].mxu1 }
  0xdd   :  { %v324_v46 = vadd.f32 %v292_v28, %v279_v36  ;;  %v326_v47 = vadd.f32 %v300_v29, %v281_v37  ;;  %v118_v48 = vpop.f32.mrb[3].mxu0  ;;  %v159_v49 = vpop.f32.mrb[3].mxu1 }
  0xde   :  { %v325_v50 = vadd.f32 %v296_v32, %v280_v40  ;;  %v327_v51 = vadd.f32 %v304_v33, %v282_v42 }
  0xdf   :  { %v331_v54 = vmax.f32 %v324_v46, 0.0  ;;  %v333_v55 = vmax.f32 %v326_v47, 0.0 }
  0xe0   :  { %v332_v56 = vmax.f32 %v325_v50, 0.0  ;;  %v334_v58 = vmax.f32 %v327_v51, 0.0 }
  0xe2   :  { %v434_v62 = vpack.c.bf16 %v332_v56, %v331_v54  ;;  %v435_v63 = vpack.c.bf16 %v334_v58, %v333_v55  ;;  %v195_v0 = vpop.f32.mrb[4].mxu0  ;;  %v236_v1 = vpop.f32.mrb[4].mxu1 }
  0xe3   :  { %v283_v3 = vmul.f32 %v263_v52, %v195_v0  ;;  %v285_v4 = vmul.f32 %v271_v53, %v236_v1  ;;  %v197_v5 = vpop.f32.mrb[5].mxu0  ;;  %v443_v6 = vpop.f32.mrb[5].mxu1 }
  0xe4   :  { %v361_v7 = vrot.slane %v434_v62, %v360_v57  ;;  %v368_v8 = vrot.slane %v435_v63, %v360_v57  ;;  %v284_v9 = vmul.f32 %v267_v59, %v197_v5  ;;  %v199_v10 = vpop.f32.mrb[6].mxu0  ;;  %v239_v11 = vpop.f32.mrb[6].mxu1 }
  0xe5   :  { %v328_v12 = vadd.f32 %v308_v60, %v283_v3  ;;  %v330_v13 = vadd.f32 %v316_v61, %v285_v4  ;;  %v200_v14 = vpop.f32.mrb[7].mxu0  ;;  %v444_v15 = vpop.f32.mrb[7].mxu1 }
  0xe6   :  { %v383_v16 = vcombine.low %v361_v7, %v368_v8  ;;  %v329_v17 = vadd.f32 %v312_v2, %v284_v9 }
  0xe7   :  { %v335_v18 = vmax.f32 %v328_v12, 0.0  ;;  %v337_v19 = vmax.f32 %v330_v13, 0.0 }
  0xe8   :  { %v336_v20 = vmax.f32 %v329_v17, 0.0  ;;  %v391_v26 = vrot.slane %v383_v16, %v360_v57 }
  0xe9   :  { %v344_v21 = vpack.c.bf16 %v337_v19, %v337_v19 }
  0xea   :  { %v436_v22 = vpack.c.bf16 %v336_v20, %v335_v18 }
  0xeb   :  { %v382_v23 = vrot.slane %v344_v21, %v360_v57 }
  0xec   :  { %v375_v24 = vrot.slane %v436_v22, %v360_v57 }
  0xee   :  { %v384_v25 = vcombine.low %v375_v24, %v382_v23 }
  0xf0   :  { %v398_v27 = vrot.slane %v384_v25, %v360_v57 }
  0xf2   :  { %v399_v28 = vcombine.low %v391_v26, %v398_v27 }
  0xf4   :  { %414 = vst.msk [vmem:[%s530_s3] sm:$0x7f] %vm413_vm15, %v399_v28 }

// kernel: autoencoder_forward.14
= control target key start
LH: loop header
LB: loop body
LE: loop exit
PB: predicated region body
PF: predicated region fallthrough
CT: control target
= control target key end

     0   :  { %v2095_v0 = vmov 0   ;;  %v2096_v2 = vmov 0.0   ;;  %vm2097_vm0 = vmmov 0   ;;  %vm1518_vm1 = vcmask 93184   ;;  %s2901_s1 = inlined_call_operand.vmem [shape: bf16[384,12], index: 1, kind: input, shape index: {}]   ;;  %s2902_s0 = inlined_call_operand.vmem [shape: bf16[392,384], index: 0, kind: input, shape index: {}]   ;;  %s2903_s2 = inlined_call_operand.vmem [shape: f32[2,12], index: 2, kind: input, shape index: {}]   ;;  %s2904_s3 = inlined_call_operand.vmem [shape: bf16[392,12], index: 3, kind: output, shape index: {}]  }
   0x1   :  { %700 = vmatprep.subr.bf16.mxu1 %v2095_v0  ;;  %v1972_v1 = vld [vmem:[%s2901_s1] sm:$0xff]   ;;  %1804 = vmatprep.subr.bf16.mxu0 %v2096_v2  ;;  %v1973_v3 = vld [vmem:[%s2901_s1 + $0x8] sm:$0xff]   ;;  %v1974_v4 = vld [vmem:[%s2901_s1 + $0x10] sm:$0xff]  }
   0x2   :  { %1820 = vmatprep.mubr.msk.bf16.mxu0 %vm2097_vm0, %v2096_v2  ;;  %701 = vmatpush1.bf16.msra.mxu1 %v1972_v1  ;;  %v1980_v5 = vld [vmem:[%s2901_s1 + $0x80] sm:$0xff]   ;;  %v1975_v6 = vld [vmem:[%s2901_s1 + $0x18] sm:$0xff]   ;;  %v1982_v7 = vld [vmem:[%s2901_s1 + $0x88] sm:$0xff]  }
   0x3   :  { %702 = vmatprep.subr.bf16.mxu1 %v2095_v0  ;;  %1805 = vmatpush3.bf16.msra.mxu0 %v1980_v5  ;;  %v1976_v8 = vld [vmem:[%s2901_s1 + $0x20] sm:$0xff]   ;;  %v1984_v9 = vld [vmem:[%s2901_s1 + $0x90] sm:$0xff]   ;;  %v1977_v10 = vld [vmem:[%s2901_s1 + $0x28] sm:$0xff]  }
   0x4   :  { %1806 = vmatprep.subr.bf16.mxu0 %v2096_v2  ;;  %v1986_v11 = vld [vmem:[%s2901_s1 + $0x98] sm:$0xff]   ;;  %v1978_v12 = vld [vmem:[%s2901_s1 + $0x30] sm:$0xff]   ;;  %v1988_v13 = vld [vmem:[%s2901_s1 + $0xa0] sm:$0xff]  }
   0x5   :  { %v1979_v14 = vld [vmem:[%s2901_s1 + $0x38] sm:$0xff]   ;;  %v1990_v15 = vld [vmem:[%s2901_s1 + $0xa8] sm:$0xff]   ;;  %v1999_v16 = vld [vmem:[%s2902_s0 + $0x4] ss:$12 sps:$4 sm:$0xff]  }
   0x6   :  { %703 = vmatpush1.bf16.msra.mxu1 %v1973_v3  ;;  %732 = vmatprep.mubr.bf16.mxu1 %v1999_v16  ;;  %v1981_v17 = vld [vmem:[%s2901_s1 + $0x40] sm:$0xff]   ;;  %v1992_v18 = vld [vmem:[%s2901_s1 + $0xb0] sm:$0xff]   ;;  %v1983_v19 = vld [vmem:[%s2901_s1 + $0x48] sm:$0xff]  }
   0x7   :  { %704 = vmatprep.subr.bf16.mxu1 %v2095_v0  ;;  %1807 = vmatpush3.bf16.msra.mxu0 %v1982_v7  ;;  %v1994_v20 = vld [vmem:[%s2901_s1 + $0xb8] sm:$0xff]   ;;  %v1996_v21 = vld [vmem:[%s2902_s0 + $0x8] ss:$12 sps:$4 sm:$0xff]   ;;  %v2000_v24 = vld [vmem:[%s2902_s0 + $0x20] ss:$12 sps:$4 sm:$0xff]  }
   0x8   :  { %1808 = vmatprep.subr.bf16.mxu0 %v2096_v2  ;;  %v1985_v22 = vld [vmem:[%s2901_s1 + $0x50] sm:$0xff]   ;;  %v1987_v23 = vld [vmem:[%s2901_s1 + $0x58] sm:$0xff]   ;;  %v1989_v25 = vld [vmem:[%s2901_s1 + $0x60] sm:$0xff]  }
   0x9   :  { %v1991_v26 = vld [vmem:[%s2901_s1 + $0x68] sm:$0xff]   ;;  %v2004_v27 = vld [vmem:[%s2902_s0 + $0x38] ss:$12 sps:$4 sm:$0xff]   ;;  %v1993_v28 = vld [vmem:[%s2901_s1 + $0x70] sm:$0xff]  }
   0xa   :  { %705 = vmatpush1.bf16.msra.mxu1 %v1974_v4  ;;  %v1995_v29 = vld [vmem:[%s2901_s1 + $0x78] sm:$0xff]   ;;  %v1997_v30 = vld [vmem:[%s2902_s0] ss:$12 sps:$4 sm:$0xff]   ;;  %v2012_v34 = vld [vmem:[%s2902_s0 + $0x68] ss:$12 sps:$4 sm:$0xff]  }
   0xb   :  { %706 = vmatprep.subr.bf16.mxu1 %v2095_v0  ;;  %1809 = vmatpush3.bf16.msra.mxu0 %v1984_v9  ;;  %v2008_v31 = vld [vmem:[%s2902_s0 + $0x50] ss:$12 sps:$4 sm:$0xff]   ;;  %v2003_v33 = vld [vmem:[%s2902_s0 + $0x18] ss:$12 sps:$4 sm:$0xff]   ;;  %v2005_v35 = vld [vmem:[%s2902_s0 + $0x34] ss:$12 sps:$4 sm:$0xff]  }
   0xc   :  { %1810 = vmatprep.subr.bf16.mxu0 %v2096_v2  ;;  %v2001_v32 = vld [vmem:[%s2902_s0 + $0x1c] ss:$12 sps:$4 sm:$0xff]   ;;  %v2016_v37 = vld [vmem:[%s2902_s0 + $0x80] ss:$12 sps:$4 sm:$0xff]   ;;  %v2020_v40 = vld [vmem:[%s2902_s0 + $0x98] ss:$12 sps:$4 sm:$0xff]  }
   0xd   :  { %v2007_v36 = vld [vmem:[%s2902_s0 + $0x30] ss:$12 sps:$4 sm:$0xff]   ;;  %v2009_v38 = vld [vmem:[%s2902_s0 + $0x4c] ss:$12 sps:$4 sm:$0xff]   ;;  %v2011_v39 = vld [vmem:[%s2902_s0 + $0x48] ss:$12 sps:$4 sm:$0xff]  }
   0xe   :  { %707 = vmatpush1.bf16.msra.mxu1 %v1975_v6  ;;  %v2013_v41 = vld [vmem:[%s2902_s0 + $0x64] ss:$12 sps:$4 sm:$0xff]   ;;  %v2015_v42 = vld [vmem:[%s2902_s0 + $0x60] ss:$12 sps:$4 sm:$0xff]   ;;  %v2017_v44 = vld [vmem:[%s2902_s0 + $0x7c] ss:$12 sps:$4 sm:$0xff]  }
   0xf   :  { %708 = vmatprep.subr.bf16.mxu1 %v2095_v0  ;;  %1811 = vmatpush3.bf16.msra.mxu0 %v1986_v11  ;;  %v2024_v43 = vld [vmem:[%s2902_s0 + $0xb0] ss:$12 sps:$4 sm:$0xff]   ;;  %v2019_v45 = vld [vmem:[%s2902_s0 + $0x78] ss:$12 sps:$4 sm:$0xff]   ;;  %v2028_v46 = vld [vmem:[%s2902_s0 + $0xc8] ss:$12 sps:$4 sm:$0xff]  }
  0x10   :  { %1812 = vmatprep.subr.bf16.mxu0 %v2096_v2  ;;  %v2021_v47 = vld [vmem:[%s2902_s0 + $0x94] ss:$12 sps:$4 sm:$0xff]   ;;  %v2023_v48 = vld [vmem:[%s2902_s0 + $0x90] ss:$12 sps:$4 sm:$0xff]   ;;  %v2025_v50 = vld [vmem:[%s2902_s0 + $0xac] ss:$12 sps:$4 sm:$0xff]  }
  0x11   :  { %v2032_v49 = vld [vmem:[%s2902_s0 + $0xe0] ss:$12 sps:$4 sm:$0xff]   ;;  %v2027_v51 = vld [vmem:[%s2902_s0 + $0xa8] ss:$12 sps:$4 sm:$0xff]   ;;  %v2036_v52 = vld [vmem:[%s2902_s0 + $0xf8] ss:$12 sps:$4 sm:$0xff]  }
  0x12   :  { %709 = vmatpush1.bf16.msra.mxu1 %v1976_v8  ;;  %v2029_v53 = vld [vmem:[%s2902_s0 + $0xc4] ss:$12 sps:$4 sm:$0xff]   ;;  %v2031_v54 = vld [vmem:[%s2902_s0 + $0xc0] ss:$12 sps:$4 sm:$0xff]   ;;  %v2033_v56 = vld [vmem:[%s2902_s0 + $0xdc] ss:$12 sps:$4 sm:$0xff]  }
  0x13   :  { %710 = vmatprep.subr.bf16.mxu1 %v2095_v0  ;;  %1813 = vmatpush3.bf16.msra.mxu0 %v1988_v13  ;;  %v2040_v55 = vld [vmem:[%s2902_s0 + $0x110] ss:$12 sps:$4 sm:$0xff]   ;;  %v2035_v57 = vld [vmem:[%s2902_s0 + $0xd8] ss:$12 sps:$4 sm:$0xff]   ;;  %v2044_v58 = vld [vmem:[%s2902_s0 + $0x128] ss:$12 sps:$4 sm:$0xff]  }
  0x14   :  { %1814 = vmatprep.subr.bf16.mxu0 %v2096_v2  ;;  %v2037_v59 = vld [vmem:[%s2902_s0 + $0xf4] ss:$12 sps:$4 sm:$0xff]   ;;  %v2039_v60 = vld [vmem:[%s2902_s0 + $0xf0] ss:$12 sps:$4 sm:$0xff]   ;;  %v2041_v62 = vld [vmem:[%s2902_s0 + $0x10c] ss:$12 sps:$4 sm:$0xff]  }
  0x15   :  { %v2048_v61 = vld [vmem:[%s2902_s0 + $0x140] ss:$12 sps:$4 sm:$0xff]   ;;  %v2043_v63 = vld [vmem:[%s2902_s0 + $0x108] ss:$12 sps:$4 sm:$0xff]   ;;  %v2045_v1 = vld [vmem:[%s2902_s0 + $0x124] ss:$12 sps:$4 sm:$0xff]  }
  0x16   :  { %711 = vmatpush1.bf16.msra.mxu1 %v1977_v10  ;;  %v2047_v3 = vld [vmem:[%s2902_s0 + $0x120] ss:$12 sps:$4 sm:$0xff]   ;;  %v2056_v4 = vld [vmem:[%s2902_s0 + $0x170] ss:$12 sps:$4 sm:$0xff]   ;;  %v2051_v6 = vld [vmem:[%s2902_s0 + $0x138] ss:$12 sps:$4 sm:$0xff]  }
  0x17   :  { %712 = vmatprep.subr.bf16.mxu1 %v2095_v0  ;;  %1815 = vmatpush3.bf16.msra.mxu0 %v1990_v15  ;;  %v2049_v5 = vld [vmem:[%s2902_s0 + $0x13c] ss:$12 sps:$4 sm:$0xff]   ;;  %v2053_v8 = vld [vmem:[%s2902_s0 + $0x154] ss:$12 sps:$4 sm:$0xff]   ;;  %v2057_v11 = vld [vmem:[%s2902_s0 + $0x16c] ss:$12 sps:$4 sm:$0xff]  }
  0x18   :  { %1816 = vmatprep.subr.bf16.mxu0 %v2096_v2  ;;  %v2060_v7 = vld [vmem:[%s2902_s0 + $0x188] ss:$12 sps:$4 sm:$0xff]   ;;  %v2055_v9 = vld [vmem:[%s2902_s0 + $0x150] ss:$12 sps:$4 sm:$0xff]   ;;  %v2064_v10 = vld [vmem:[%s2902_s0 + $0x1a0] ss:$12 sps:$4 sm:$0xff]  }
  0x19   :  { %v2068_v13 = vld [vmem:[%s2902_s0 + $0x1b8] ss:$12 sps:$4 sm:$0xff]   ;;  %v2063_v15 = vld [vmem:[%s2902_s0 + $0x180] ss:$12 sps:$4 sm:$0xff]   ;;  %v2072_v16 = vld [vmem:[%s2902_s0 + $0x1d0] ss:$12 sps:$4 sm:$0xff]  }
  0x1a   :  { %713 = vmatpush1.bf16.msra.mxu1 %v1978_v12  ;;  %v2059_v12 = vld [vmem:[%s2902_s0 + $0x168] ss:$12 sps:$4 sm:$0xff]  }
  0x1b   :  { %714 = vmatprep.subr.bf16.mxu1 %v2095_v0  ;;  %1817 = vmatpush3.bf16.msra.mxu0 %v1992_v18  ;;  %v2067_v18 = vld [vmem:[%s2902_s0 + $0x198] ss:$12 sps:$4 sm:$0xff]  }
  0x1c   :  { %1818 = vmatprep.subr.bf16.mxu0 %v2096_v2 }
  0x1e   :  { %715 = vmatpush1.bf16.msra.mxu1 %v1979_v14  ;;  %v2061_v14 = vld [vmem:[%s2902_s0 + $0x184] ss:$12 sps:$4 sm:$0xff]  }
  0x1f   :  { %716 = vmatprep.subr.bf16.mxu1 %v2095_v0  ;;  %1819 = vmatpush3.bf16.msra.mxu0 %v1994_v20  ;;  %v2069_v20 = vld [vmem:[%s2902_s0 + $0x1b4] ss:$12 sps:$4 sm:$0xff]  }
  0x22   :  { %717 = vmatpush1.bf16.msra.mxu1 %v1981_v17  ;;  %1821 = vmatmul.mubr.bf16.vlgmr.msra.gmra.mrb[0].mxu0 %v1996_v21  ;;  %v2065_v17 = vld [vmem:[%s2902_s0 + $0x19c] ss:$12 sps:$4 sm:$0xff]  }
  0x23   :  { %718 = vmatprep.subr.bf16.mxu1 %v2095_v0  ;;  %1824 = vmatprep.mubr.msk.bf16.mxu0 %vm2097_vm0, %v2096_v2  ;;  %v2071_v21 = vld [vmem:[%s2902_s0 + $0x1b0] ss:$12 sps:$4 sm:$0xff]  }
  0x26   :  { %719 = vmatpush1.bf16.msra.mxu1 %v1983_v19  ;;  %v2076_v19 = vld [vmem:[%s2902_s0 + $0x1e8] ss:$12 sps:$4 sm:$0xff]  }
  0x27   :  { %720 = vmatprep.subr.bf16.mxu1 %v2095_v0 }
  0x2a   :  { %721 = vmatpush1.bf16.msra.mxu1 %v1985_v22  ;;  %1825 = vmatmul.mubr.bf16.gmra.mrb[4].mxu0 %v2000_v24  ;;  %v2080_v22 = vld [vmem:[%s2902_s0 + $0x200] ss:$12 sps:$4 sm:$0xff]   ;;  %v2075_v24 = vld [vmem:[%s2902_s0 + $0x1c8] ss:$12 sps:$4 sm:$0xff]  }
  0x2b   :  { %722 = vmatprep.subr.bf16.mxu1 %v2095_v0  ;;  %1828 = vmatprep.mubr.msk.bf16.mxu0 %vm2097_vm0, %v2096_v2 }
  0x2e   :  { %723 = vmatpush1.bf16.msra.mxu1 %v1987_v23  ;;  %v2073_v23 = vld [vmem:[%s2902_s0 + $0x1cc] ss:$12 sps:$4 sm:$0xff]  }
  0x2f   :  { %724 = vmatprep.subr.bf16.mxu1 %v2095_v0 }
  0x32   :  { %725 = vmatpush1.bf16.msra.mxu1 %v1989_v25  ;;  %1829 = vmatmul.mubr.bf16.gmra.mrb[8].mxu0 %v2004_v27  ;;  %v2084_v25 = vld [vmem:[%s2902_s0 + $0x218] ss:$12 sps:$4 sm:$0xff]   ;;  %v2079_v27 = vld [vmem:[%s2902_s0 + $0x1e0] ss:$12 sps:$4 sm:$0xff]  }
  0x33   :  { %726 = vmatprep.subr.bf16.mxu1 %v2095_v0  ;;  %1832 = vmatprep.mubr.msk.bf16.mxu0 %vm2097_vm0, %v2096_v2 }
  0x36   :  { %727 = vmatpush1.bf16.msra.mxu1 %v1991_v26  ;;  %v2077_v26 = vld [vmem:[%s2902_s0 + $0x1e4] ss:$12 sps:$4 sm:$0xff]  }
  0x37   :  { %728 = vmatprep.subr.bf16.mxu1 %v2095_v0 }
  0x3a   :  { %729 = vmatpush1.bf16.msra.mxu1 %v1993_v28  ;;  %1833 = vmatmul.mubr.bf16.gmra.mrb[12].mxu0 %v2008_v31  ;;  %v2088_v28 = vld [vmem:[%s2902_s0 + $0x230] ss:$12 sps:$4 sm:$0xff]   ;;  %v2092_v31 = vld [vmem:[%s2902_s0 + $0x248] ss:$0 sps:$4 sm:$0xff]  }
  0x3b   :  { %730 = vmatprep.subr.bf16.mxu1 %v2095_v0  ;;  %1836 = vmatprep.mubr.msk.bf16.mxu0 %vm2097_vm0, %v2096_v2  ;;  %v2052_v0 = vld [vmem:[%s2902_s0 + $0x158] ss:$12 sps:$4 sm:$0xff]  }
  0x3e   :  { %731 = vmatpush1.bf16.msra.mxu1 %v1995_v29  ;;  %v2081_v29 = vld [vmem:[%s2902_s0 + $0x1fc] ss:$12 sps:$4 sm:$0xff]  }
  0x41   :  { %733 = vmatmul.mubr.bf16.vlgmr.msra.gmra.mrb[0].mxu1 %v1997_v30  ;;  %v2083_v30 = vld [vmem:[%s2902_s0 + $0x1f8] ss:$12 sps:$4 sm:$0xff]  }
  0x42   :  { %740 = vmatprep.mubr.bf16.mxu1 %v2001_v32  ;;  %1837 = vmatmul.mubr.bf16.gmra.mrb[16].mxu0 %v2012_v34  ;;  %v2085_v32 = vld [vmem:[%s2902_s0 + $0x214] ss:$12 sps:$4 sm:$0xff]  }
  0x43   :  { %1840 = vmatprep.mubr.msk.bf16.mxu0 %vm2097_vm0, %v2096_v2  ;;  %v111_v34 = vld [vmem:[%s2902_s0 + $0x240] sm:$0xff] }
  0x49   :  { %741 = vmatmul.mubr.bf16.gmra.mrb[4].mxu1 %v2003_v33  ;;  %v2087_v33 = vld [vmem:[%s2902_s0 + $0x210] ss:$12 sps:$4 sm:$0xff]  }
  0x4a   :  { %748 = vmatprep.mubr.bf16.mxu1 %v2005_v35  ;;  %1841 = vmatmul.mubr.bf16.gmra.mrb[20].mxu0 %v2016_v37  ;;  %v2091_v35 = vld [vmem:[%s2902_s0 + $0x228] ss:$12 sps:$4 sm:$0xff]  }
  0x4b   :  { %1844 = vmatprep.mubr.msk.bf16.mxu0 %vm2097_vm0, %v2096_v2 }
  0x51   :  { %749 = vmatmul.mubr.bf16.gmra.mrb[8].mxu1 %v2007_v36  ;;  %v1645_v36 = vcombine.high %v111_v34, %v111_v34 }
  0x52   :  { %756 = vmatprep.mubr.bf16.mxu1 %v2009_v38  ;;  %1845 = vmatmul.mubr.bf16.gmra.mrb[24].mxu0 %v2020_v40  ;;  %v1644_v38 = vcombine.low %v111_v34, %v111_v34 }
  0x53   :  { %1848 = vmatprep.mubr.msk.bf16.mxu0 %vm2097_vm0, %v2096_v2 }
  0x59   :  { %757 = vmatmul.mubr.bf16.gmra.mrb[12].mxu1 %v2011_v39 }
  0x5a   :  { %764 = vmatprep.mubr.bf16.mxu1 %v2013_v41  ;;  %1849 = vmatmul.mubr.bf16.gmra.mrb[28].mxu0 %v2024_v43 }
  0x5b   :  { %1852 = vmatprep.mubr.msk.bf16.mxu0 %vm2097_vm0, %v2096_v2 }
  0x61   :  { %765 = vmatmul.mubr.bf16.gmra.mrb[16].mxu1 %v2015_v42 }
  0x62   :  { %772 = vmatprep.mubr.bf16.mxu1 %v2017_v44  ;;  %1853 = vmatmul.mubr.bf16.gmra.mrb[32].mxu0 %v2028_v46 }
  0x63   :  { %1856 = vmatprep.mubr.msk.bf16.mxu0 %vm2097_vm0, %v2096_v2 }
  0x69   :  { %773 = vmatmul.mubr.bf16.gmra.mrb[20].mxu1 %v2019_v45 }
  0x6a   :  { %780 = vmatprep.mubr.bf16.mxu1 %v2021_v47  ;;  %1857 = vmatmul.mubr.bf16.gmra.mrb[36].mxu0 %v2032_v49 }
  0x6b   :  { %1860 = vmatprep.mubr.msk.bf16.mxu0 %vm2097_vm0, %v2096_v2 }
  0x71   :  { %781 = vmatmul.mubr.bf16.gmra.mrb[24].mxu1 %v2023_v48 }
  0x72   :  { %788 = vmatprep.mubr.bf16.mxu1 %v2025_v50  ;;  %1861 = vmatmul.mubr.bf16.gmra.mrb[40].mxu0 %v2036_v52 }
  0x73   :  { %1864 = vmatprep.mubr.msk.bf16.mxu0 %vm2097_vm0, %v2096_v2 }
  0x79   :  { %789 = vmatmul.mubr.bf16.gmra.mrb[28].mxu1 %v2027_v51  ;;  %v2489_v51 = vld [vmem:[%s2903_s2] ss:$0 sm:$0xff] }
  0x7a   :  { %796 = vmatprep.mubr.bf16.mxu1 %v2029_v53  ;;  %1865 = vmatmul.mubr.bf16.gmra.mrb[44].mxu0 %v2040_v55 }
  0x7b   :  { %1868 = vmatprep.mubr.msk.bf16.mxu0 %vm2097_vm0, %v2096_v2 }
  0x81   :  { %797 = vmatmul.mubr.bf16.gmra.mrb[32].mxu1 %v2031_v54 }
  0x82   :  { %804 = vmatprep.mubr.bf16.mxu1 %v2033_v56  ;;  %1869 = vmatmul.mubr.bf16.gmra.mrb[48].mxu0 %v2044_v58  ;;  %v2494_v56 = vld [vmem:[%s2903_s2 + $0x1] ss:$0 sm:$0xff] }
  0x83   :  { %1872 = vmatprep.mubr.msk.bf16.mxu0 %vm2097_vm0, %v2096_v2 }
  0x89   :  { %805 = vmatmul.mubr.bf16.gmra.mrb[36].mxu1 %v2035_v57 }
  0x8a   :  { %812 = vmatprep.mubr.bf16.mxu1 %v2037_v59  ;;  %1873 = vmatmul.mubr.bf16.gmra.mrb[52].mxu0 %v2048_v61 }
  0x8b   :  { %1876 = vmatprep.mubr.msk.bf16.mxu0 %vm2097_vm0, %v2096_v2 }
  0x91   :  { %813 = vmatmul.mubr.bf16.gmra.mrb[40].mxu1 %v2039_v60 }
  0x92   :  { %820 = vmatprep.mubr.bf16.mxu1 %v2041_v62  ;;  %1877 = vmatmul.mubr.bf16.gmra.mrb[56].mxu0 %v2052_v0 }
  0x93   :  { %1880 = vmatprep.mubr.msk.bf16.mxu0 %vm2097_vm0, %v2096_v2 }
  0x99   :  { %821 = vmatmul.mubr.bf16.gmra.mrb[44].mxu1 %v2043_v63 }
  0x9a   :  { %828 = vmatprep.mubr.bf16.mxu1 %v2045_v1  ;;  %1881 = vmatmul.mubr.bf16.gmra.mrb[60].mxu0 %v2056_v4 }
  0x9b   :  { %1884 = vmatprep.mubr.msk.bf16.mxu0 %vm2097_vm0, %v2096_v2 }
  0xa1   :  { %829 = vmatmul.mubr.bf16.gmra.mrb[48].mxu1 %v2047_v3 }
  0xa2   :  { %836 = vmatprep.mubr.bf16.mxu1 %v2049_v5  ;;  %1885 = vmatmul.mubr.bf16.gmra.mrb[64].mxu0 %v2060_v7 }
  0xa3   :  { %1888 = vmatprep.mubr.msk.bf16.mxu0 %vm2097_vm0, %v2096_v2 }
  0xa9   :  { %837 = vmatmul.mubr.bf16.gmra.mrb[52].mxu1 %v2051_v6 }
  0xaa   :  { %844 = vmatprep.mubr.bf16.mxu1 %v2053_v8  ;;  %1889 = vmatmul.mubr.bf16.gmra.mrb[68].mxu0 %v2064_v10 }
  0xab   :  { %1892 = vmatprep.mubr.msk.bf16.mxu0 %vm2097_vm0, %v2096_v2 }
  0xb1   :  { %845 = vmatmul.mubr.bf16.gmra.mrb[56].mxu1 %v2055_v9 }
  0xb2   :  { %852 = vmatprep.mubr.bf16.mxu1 %v2057_v11  ;;  %1893 = vmatmul.mubr.bf16.gmra.mrb[72].mxu0 %v2068_v13 }
  0xb3   :  { %1896 = vmatprep.mubr.msk.bf16.mxu0 %vm2097_vm0, %v2096_v2 }
  0xb9   :  { %853 = vmatmul.mubr.bf16.gmra.mrb[60].mxu1 %v2059_v12 }
  0xba   :  { %860 = vmatprep.mubr.bf16.mxu1 %v2061_v14  ;;  %1897 = vmatmul.mubr.bf16.gmra.mrb[76].mxu0 %v2072_v16 }
  0xbb   :  { %1900 = vmatprep.mubr.msk.bf16.mxu0 %vm2097_vm0, %v2096_v2 }
  0xc1   :  { %861 = vmatmul.mubr.bf16.gmra.mrb[64].mxu1 %v2063_v15 }
  0xc2   :  { %868 = vmatprep.mubr.bf16.mxu1 %v2065_v17  ;;  %1901 = vmatmul.mubr.bf16.gmra.mrb[80].mxu0 %v2076_v19 }
  0xc3   :  { %1904 = vmatprep.mubr.msk.bf16.mxu0 %vm2097_vm0, %v2096_v2 }
  0xc9   :  { %869 = vmatmul.mubr.bf16.gmra.mrb[68].mxu1 %v2067_v18 }
  0xca   :  { %876 = vmatprep.mubr.bf16.mxu1 %v2069_v20  ;;  %1905 = vmatmul.mubr.bf16.gmra.mrb[84].mxu0 %v2080_v22 }
  0xcb   :  { %1908 = vmatprep.mubr.msk.bf16.mxu0 %vm2097_vm0, %v2096_v2 }
  0xd1   :  { %877 = vmatmul.mubr.bf16.gmra.mrb[72].mxu1 %v2071_v21 }
  0xd2   :  { %884 = vmatprep.mubr.bf16.mxu1 %v2073_v23  ;;  %1909 = vmatmul.mubr.bf16.gmra.mrb[88].mxu0 %v2084_v25 }
  0xd3   :  { %1912 = vmatprep.mubr.msk.bf16.mxu0 %vm2097_vm0, %v2096_v2 }
  0xd9   :  { %885 = vmatmul.mubr.bf16.gmra.mrb[76].mxu1 %v2075_v24 }
  0xda   :  { %892 = vmatprep.mubr.bf16.mxu1 %v2077_v26  ;;  %1913 = vmatmul.mubr.bf16.gmra.mrb[92].mxu0 %v2088_v28 }
  0xdb   :  { %1916 = vmatprep.mubr.msk.bf16.mxu0 %vm2097_vm0, %v2096_v2  ;;  %v2089_v2 = vld [vmem:[%s2902_s0 + $0x22c] ss:$12 sps:$4 sm:$0xff]  }
  0xe1   :  { %893 = vmatmul.mubr.bf16.gmra.mrb[80].mxu1 %v2079_v27 }
  0xe2   :  { %900 = vmatprep.mubr.bf16.mxu1 %v2081_v29  ;;  %1917 = vmatmul.mubr.bf16.gmra.mrb[96].mxu0 %v2092_v31 }
  0xe9   :  { %901 = vmatmul.mubr.bf16.gmra.mrb[84].mxu1 %v2083_v30 }
  0xea   :  { %908 = vmatprep.mubr.bf16.mxu1 %v2085_v32 }
  0xf1   :  { %909 = vmatmul.mubr.bf16.gmra.mrb[88].mxu1 %v2087_v33 }
  0xf2   :  { %916 = vmatprep.mubr.bf16.mxu1 %v2089_v2 }
  0xf5   :  { %v966_v37 = vpop.f32.mrb[0].mxu0 }
  0xf6   :  { %v1822_v39 = vpop.f32.mrb[1].mxu0 }
  0xf7   :  { %v969_v40 = vpop.f32.mrb[2].mxu0 }
  0xf8   :  { %v1823_v41 = vpop.f32.mrb[3].mxu0 }
  0xf9   :  { %917 = vmatmul.mubr.bf16.gmra.mrb[92].mxu1 %v2091_v35 }
  0xfa   :  { %924 = vmatprep.mubr.bf16.mxu1 %v1645_v36 }
  0xfd   :  { %v974_v42 = vpop.f32.mrb[4].mxu0 }
  0xfe   :  { %v1826_v43 = vpop.f32.mrb[5].mxu0 }
  0xff   :  { %v977_v44 = vpop.f32.mrb[6].mxu0 }
 0x100   :  { %v1827_v45 = vpop.f32.mrb[7].mxu0 }
 0x101   :  { %925 = vmatmul.mubr.bf16.gmra.mrb[96].mxu1 %v1644_v38 }
 0x105   :  { %v982_v46 = vpop.f32.mrb[8].mxu0 }
 0x106   :  { %v1830_v47 = vpop.f32.mrb[9].mxu0 }
 0x107   :  { %v985_v48 = vpop.f32.mrb[10].mxu0 }
 0x108   :  { %v1831_v49 = vpop.f32.mrb[11].mxu0 }
 0x10d   :  { %v990_v52 = vpop.f32.mrb[12].mxu0 }
 0x10e   :  { %v1834_v55 = vpop.f32.mrb[13].mxu0 }
 0x10f   :  { %v2496_v58 = vpop.f32.mrb[14].mxu0 }
 0x110   :  { %v1835_v62 = vpop.f32.mrb[15].mxu0 }
 0x114   :  { %v734_v50 = vpop.f32.mrb[0].mxu1 }
 0x115   :  { %v967_v53 = vadd.f32 %v966_v37, %v734_v50  ;;  %v736_v54 = vpop.f32.mrb[1].mxu1  ;;  %v2502_v5 = vpop.f32.mrb[16].mxu0 }
 0x116   :  { %v737_v57 = vpop.f32.mrb[2].mxu1  ;;  %v1838_v10 = vpop.f32.mrb[17].mxu0 }
 0x117   :  { %v1169_v59 = vmul.f32 %v2489_v51, %v967_v53  ;;  %v970_v60 = vadd.f32 %v969_v40, %v737_v57  ;;  %v739_v61 = vpop.f32.mrb[3].mxu1  ;;  %v2504_v12 = vpop.f32.mrb[18].mxu0 }
 0x118   :  { %v1839_v17 = vpop.f32.mrb[19].mxu0 }
 0x119   :  { %v1223_v63 = vadd.f32 %v2494_v56, %v1169_v59  ;;  %v1170_v0 = vmul.f32 %v2489_v51, %v970_v60 }
 0x11b   :  { %v1272_v1 = vmax.f32 %v1223_v63, 0.0  ;;  %v1224_v3 = vadd.f32 %v2494_v56, %v1170_v0 }
 0x11c   :  { %v742_v4 = vpop.f32.mrb[4].mxu1 }
 0x11d   :  { %v1722_v6 = vpack.c.bf16 %v1272_v1, %v1272_v1  ;;  %v1273_v7 = vmax.f32 %v1224_v3, 0.0  ;;  %v975_v8 = vadd.f32 %v974_v42, %v742_v4  ;;  %v744_v9 = vpop.f32.mrb[5].mxu1  ;;  %v2518_v23 = vpop.f32.mrb[20].mxu0 }
 0x11e   :  { %v745_v11 = vpop.f32.mrb[6].mxu1  ;;  %v1842_v28 = vpop.f32.mrb[21].mxu0 }
 0x11f   :  { %1519 = vst.msk [vmem:[%s2904_s3] sm:$0xf] %vm1518_vm1, %v1722_v6  ;;  %v1723_v13 = vpack.c.bf16 %v1273_v7, %v1273_v7  ;;  %v1171_v14 = vmul.f32 %v2489_v51, %v975_v8  ;;  %v978_v15 = vadd.f32 %v977_v44, %v745_v11  ;;  %v747_v16 = vpop.f32.mrb[7].mxu1  ;;  %v2520_v30 = vpop.f32.mrb[22].mxu0 }
 0x120   :  { %v1843_v34 = vpop.f32.mrb[23].mxu0 }
 0x121   :  { %1520 = vst.msk [vmem:[%s2904_s3 + $0x4] sm:$0xf] %vm1518_vm1, %v1723_v13  ;;  %v1225_v18 = vadd.f32 %v2494_v56, %v1171_v14  ;;  %v1172_v19 = vmul.f32 %v2489_v51, %v978_v15 }
 0x123   :  { %v1274_v20 = vmax.f32 %v1225_v18, 0.0  ;;  %v1226_v21 = vadd.f32 %v2494_v56, %v1172_v19 }
 0x124   :  { %v750_v22 = vpop.f32.mrb[8].mxu1 }
 0x125   :  { %v1724_v24 = vpack.c.bf16 %v1274_v20, %v1274_v20  ;;  %v1275_v25 = vmax.f32 %v1226_v21, 0.0  ;;  %v983_v26 = vadd.f32 %v982_v46, %v750_v22  ;;  %v752_v27 = vpop.f32.mrb[9].mxu1  ;;  %v2534_v40 = vpop.f32.mrb[24].mxu0 }
 0x126   :  { %v753_v29 = vpop.f32.mrb[10].mxu1  ;;  %v1846_v45 = vpop.f32.mrb[25].mxu0 }
 0x127   :  { %1521 = vst.msk [vmem:[%s2904_s3 + $0x8] sm:$0xf] %vm1518_vm1, %v1724_v24  ;;  %v1725_v31 = vpack.c.bf16 %v1275_v25, %v1275_v25  ;;  %v1173_v32 = vmul.f32 %v2489_v51, %v983_v26  ;;  %v986_v33 = vadd.f32 %v985_v48, %v753_v29  ;;  %v755_v2 = vpop.f32.mrb[11].mxu1  ;;  %v2536_v47 = vpop.f32.mrb[26].mxu0 }
 0x128   :  { %v1847_v54 = vpop.f32.mrb[27].mxu0 }
 0x129   :  { %1522 = vst.msk [vmem:[%s2904_s3 + $0xc] sm:$0xf] %vm1518_vm1, %v1725_v31  ;;  %v1227_v35 = vadd.f32 %v2494_v56, %v1173_v32  ;;  %v1174_v36 = vmul.f32 %v2489_v51, %v986_v33 }
 0x12b   :  { %v1276_v37 = vmax.f32 %v1227_v35, 0.0  ;;  %v1228_v38 = vadd.f32 %v2494_v56, %v1174_v36 }
 0x12c   :  { %v758_v39 = vpop.f32.mrb[12].mxu1 }
 0x12d   :  { %v1726_v41 = vpack.c.bf16 %v1276_v37, %v1276_v37  ;;  %v1277_v42 = vmax.f32 %v1228_v38, 0.0  ;;  %v991_v43 = vadd.f32 %v990_v52, %v758_v39  ;;  %v760_v44 = vpop.f32.mrb[13].mxu1  ;;  %v2551_v61 = vpop.f32.mrb[28].mxu0 }
 0x12e   :  { %v761_v46 = vpop.f32.mrb[14].mxu1  ;;  %v1850_v1 = vpop.f32.mrb[29].mxu0 }
 0x12f   :  { %1523 = vst.msk [vmem:[%s2904_s3 + $0x10] sm:$0xf] %vm1518_vm1, %v1726_v41  ;;  %v1727_v48 = vpack.c.bf16 %v1277_v42, %v1277_v42  ;;  %v1175_v49 = vmul.f32 %v2489_v51, %v991_v43  ;;  %v994_v50 = vadd.f32 %v2496_v58, %v761_v46  ;;  %v763_v53 = vpop.f32.mrb[15].mxu1  ;;  %v2554_v4 = vpop.f32.mrb[30].mxu0 }
 0x130   :  { %v1851_v10 = vpop.f32.mrb[31].mxu0 }
 0x131   :  { %1524 = vst.msk [vmem:[%s2904_s3 + $0x14] sm:$0xf] %vm1518_vm1, %v1727_v48  ;;  %v1229_v52 = vadd.f32 %v2494_v56, %v1175_v49  ;;  %v1176_v55 = vmul.f32 %v2489_v51, %v994_v50 }
 0x133   :  { %v1278_v57 = vmax.f32 %v1229_v52, 0.0  ;;  %v1230_v59 = vadd.f32 %v2494_v56, %v1176_v55 }
 0x134   :  { %v766_v60 = vpop.f32.mrb[16].mxu1 }
 0x135   :  { %v1728_v62 = vpack.c.bf16 %v1278_v57, %v1278_v57  ;;  %v1279_v63 = vmax.f32 %v1230_v59, 0.0  ;;  %v999_v58 = vadd.f32 %v2502_v5, %v766_v60  ;;  %v768_v0 = vpop.f32.mrb[17].mxu1  ;;  %v2569_v16 = vpop.f32.mrb[32].mxu0 }
 0x136   :  { %v769_v3 = vpop.f32.mrb[18].mxu1  ;;  %v1854_v20 = vpop.f32.mrb[33].mxu0 }
 0x137   :  { %1525 = vst.msk [vmem:[%s2904_s3 + $0x18] sm:$0xf] %vm1518_vm1, %v1728_v62  ;;  %v1729_v6 = vpack.c.bf16 %v1279_v63, %v1279_v63  ;;  %v1177_v7 = vmul.f32 %v2489_v51, %v999_v58  ;;  %v1002_v8 = vadd.f32 %v2504_v12, %v769_v3  ;;  %v771_v9 = vpop.f32.mrb[19].mxu1  ;;  %v2572_v22 = vpop.f32.mrb[34].mxu0 }
 0x138   :  { %v1855_v28 = vpop.f32.mrb[35].mxu0 }
 0x139   :  { %1526 = vst.msk [vmem:[%s2904_s3 + $0x1c] sm:$0xf] %vm1518_vm1, %v1729_v6  ;;  %v1231_v5 = vadd.f32 %v2494_v56, %v1177_v7  ;;  %v1178_v11 = vmul.f32 %v2489_v51, %v1002_v8 }
 0x13b   :  { %v1280_v13 = vmax.f32 %v1231_v5, 0.0  ;;  %v1232_v14 = vadd.f32 %v2494_v56, %v1178_v11 }
 0x13c   :  { %v774_v15 = vpop.f32.mrb[20].mxu1 }
 0x13d   :  { %v1730_v17 = vpack.c.bf16 %v1280_v13, %v1280_v13  ;;  %v1281_v18 = vmax.f32 %v1232_v14, 0.0  ;;  %v1007_v12 = vadd.f32 %v2518_v23, %v774_v15  ;;  %v776_v19 = vpop.f32.mrb[21].mxu1  ;;  %v2587_v2 = vpop.f32.mrb[36].mxu0 }
 0x13e   :  { %v777_v21 = vpop.f32.mrb[22].mxu1  ;;  %v1858_v37 = vpop.f32.mrb[37].mxu0 }
 0x13f   :  { %1527 = vst.msk [vmem:[%s2904_s3 + $0x20] sm:$0xf] %vm1518_vm1, %v1730_v17  ;;  %v1731_v24 = vpack.c.bf16 %v1281_v18, %v1281_v18  ;;  %v1179_v25 = vmul.f32 %v2489_v51, %v1007_v12  ;;  %v1010_v26 = vadd.f32 %v2520_v30, %v777_v21  ;;  %v779_v27 = vpop.f32.mrb[23].mxu1  ;;  %v2590_v39 = vpop.f32.mrb[38].mxu0 }
 0x140   :  { %v1859_v45 = vpop.f32.mrb[39].mxu0 }
 0x141   :  { %1528 = vst.msk [vmem:[%s2904_s3 + $0x24] sm:$0xf] %vm1518_vm1, %v1731_v24  ;;  %v1233_v23 = vadd.f32 %v2494_v56, %v1179_v25  ;;  %v1180_v29 = vmul.f32 %v2489_v51, %v1010_v26 }
 0x143   :  { %v1282_v31 = vmax.f32 %v1233_v23, 0.0  ;;  %v1234_v32 = vadd.f32 %v2494_v56, %v1180_v29 }
 0x144   :  { %v782_v33 = vpop.f32.mrb[24].mxu1 }
 0x145   :  { %v1732_v34 = vpack.c.bf16 %v1282_v31, %v1282_v31  ;;  %v1283_v35 = vmax.f32 %v1234_v32, 0.0  ;;  %v1015_v30 = vadd.f32 %v2534_v40, %v782_v33  ;;  %v784_v36 = vpop.f32.mrb[25].mxu1  ;;  %v2605_v53 = vpop.f32.mrb[40].mxu0 }
 0x146   :  { %v785_v38 = vpop.f32.mrb[26].mxu1  ;;  %v1862_v57 = vpop.f32.mrb[41].mxu0 }
 0x147   :  { %1529 = vst.msk [vmem:[%s2904_s3 + $0x28] sm:$0xf] %vm1518_vm1, %v1732_v34  ;;  %v1733_v41 = vpack.c.bf16 %v1283_v35, %v1283_v35  ;;  %v1181_v42 = vmul.f32 %v2489_v51, %v1015_v30  ;;  %v1018_v43 = vadd.f32 %v2536_v47, %v785_v38  ;;  %v787_v44 = vpop.f32.mrb[27].mxu1  ;;  %v2608_v60 = vpop.f32.mrb[42].mxu0 }
 0x148   :  { %v1863_v1 = vpop.f32.mrb[43].mxu0 }
 0x149   :  { %1530 = vst.msk [vmem:[%s2904_s3 + $0x2c] sm:$0xf] %vm1518_vm1, %v1733_v41  ;;  %v1235_v40 = vadd.f32 %v2494_v56, %v1181_v42  ;;  %v1182_v46 = vmul.f32 %v2489_v51, %v1018_v43 }
 0x14b   :  { %v1284_v48 = vmax.f32 %v1235_v40, 0.0  ;;  %v1236_v49 = vadd.f32 %v2494_v56, %v1182_v46 }
 0x14c   :  { %v790_v50 = vpop.f32.mrb[28].mxu1 }
 0x14d   :  { %v1734_v54 = vpack.c.bf16 %v1284_v48, %v1284_v48  ;;  %v1285_v52 = vmax.f32 %v1236_v49, 0.0  ;;  %v1023_v47 = vadd.f32 %v2551_v61, %v790_v50  ;;  %v792_v55 = vpop.f32.mrb[29].mxu1  ;;  %v2623_v9 = vpop.f32.mrb[44].mxu0 }
 0x14e   :  { %v793_v59 = vpop.f32.mrb[30].mxu1  ;;  %v1866_v13 = vpop.f32.mrb[45].mxu0 }
 0x14f   :  { %1531 = vst.msk [vmem:[%s2904_s3 + $0x30] sm:$0xf] %vm1518_vm1, %v1734_v54  ;;  %v1735_v62 = vpack.c.bf16 %v1285_v52, %v1285_v52  ;;  %v1183_v63 = vmul.f32 %v2489_v51, %v1023_v47  ;;  %v1026_v58 = vadd.f32 %v2554_v4, %v793_v59  ;;  %v795_v0 = vpop.f32.mrb[31].mxu1  ;;  %v2626_v15 = vpop.f32.mrb[46].mxu0 }
 0x150   :  { %v1867_v20 = vpop.f32.mrb[47].mxu0 }
 0x151   :  { %1532 = vst.msk [vmem:[%s2904_s3 + $0x34] sm:$0xf] %vm1518_vm1, %v1735_v62  ;;  %v1237_v61 = vadd.f32 %v2494_v56, %v1183_v63  ;;  %v1184_v3 = vmul.f32 %v2489_v51, %v1026_v58 }
 0x153   :  { %v1286_v6 = vmax.f32 %v1237_v61, 0.0  ;;  %v1238_v7 = vadd.f32 %v2494_v56, %v1184_v3 }
 0x154   :  { %v798_v8 = vpop.f32.mrb[32].mxu1 }
 0x155   :  { %v1736_v10 = vpack.c.bf16 %v1286_v6, %v1286_v6  ;;  %v1287_v5 = vmax.f32 %v1238_v7, 0.0  ;;  %v1031_v4 = vadd.f32 %v2569_v16, %v798_v8  ;;  %v800_v11 = vpop.f32.mrb[33].mxu1  ;;  %v2641_v27 = vpop.f32.mrb[48].mxu0 }
 0x156   :  { %v801_v14 = vpop.f32.mrb[34].mxu1  ;;  %v1870_v31 = vpop.f32.mrb[49].mxu0 }
 0x157   :  { %1533 = vst.msk [vmem:[%s2904_s3 + $0x38] sm:$0xf] %vm1518_vm1, %v1736_v10  ;;  %v1737_v17 = vpack.c.bf16 %v1287_v5, %v1287_v5  ;;  %v1185_v18 = vmul.f32 %v2489_v51, %v1031_v4  ;;  %v1034_v12 = vadd.f32 %v2572_v22, %v801_v14  ;;  %v803_v19 = vpop.f32.mrb[35].mxu1  ;;  %v2644_v33 = vpop.f32.mrb[50].mxu0 }
 0x158   :  { %v1871_v37 = vpop.f32.mrb[51].mxu0 }
 0x159   :  { %1534 = vst.msk [vmem:[%s2904_s3 + $0x3c] sm:$0xf] %vm1518_vm1, %v1737_v17  ;;  %v1239_v16 = vadd.f32 %v2494_v56, %v1185_v18  ;;  %v1186_v21 = vmul.f32 %v2489_v51, %v1034_v12 }
 0x15b   :  { %v1288_v24 = vmax.f32 %v1239_v16, 0.0  ;;  %v1240_v25 = vadd.f32 %v2494_v56, %v1186_v21 }
 0x15c   :  { %v806_v26 = vpop.f32.mrb[36].mxu1 }
 0x15d   :  { %v1738_v28 = vpack.c.bf16 %v1288_v24, %v1288_v24  ;;  %v1289_v23 = vmax.f32 %v1240_v25, 0.0  ;;  %v1039_v22 = vadd.f32 %v2587_v2, %v806_v26  ;;  %v808_v29 = vpop.f32.mrb[37].mxu1  ;;  %v2659_v44 = vpop.f32.mrb[52].mxu0 }
 0x15e   :  { %v809_v32 = vpop.f32.mrb[38].mxu1  ;;  %v1874_v48 = vpop.f32.mrb[53].mxu0 }
 0x15f   :  { %1535 = vst.msk [vmem:[%s2904_s3 + $0x40] sm:$0xf] %vm1518_vm1, %v1738_v28  ;;  %v1739_v34 = vpack.c.bf16 %v1289_v23, %v1289_v23  ;;  %v1187_v35 = vmul.f32 %v2489_v51, %v1039_v22  ;;  %v1042_v30 = vadd.f32 %v2590_v39, %v809_v32  ;;  %v811_v36 = vpop.f32.mrb[39].mxu1  ;;  %v2662_v50 = vpop.f32.mrb[54].mxu0 }
 0x160   :  { %v1875_v57 = vpop.f32.mrb[55].mxu0 }
 0x161   :  { %1536 = vst.msk [vmem:[%s2904_s3 + $0x44] sm:$0xf] %vm1518_vm1, %v1739_v34  ;;  %v1241_v2 = vadd.f32 %v2494_v56, %v1187_v35  ;;  %v1188_v38 = vmul.f32 %v2489_v51, %v1042_v30 }
 0x163   :  { %v1290_v41 = vmax.f32 %v1241_v2, 0.0  ;;  %v1242_v42 = vadd.f32 %v2494_v56, %v1188_v38 }
 0x164   :  { %v814_v43 = vpop.f32.mrb[40].mxu1 }
 0x165   :  { %v1740_v45 = vpack.c.bf16 %v1290_v41, %v1290_v41  ;;  %v1291_v40 = vmax.f32 %v1242_v42, 0.0  ;;  %v1047_v39 = vadd.f32 %v2605_v53, %v814_v43  ;;  %v816_v46 = vpop.f32.mrb[41].mxu1  ;;  %v2677_v0 = vpop.f32.mrb[56].mxu0 }
 0x166   :  { %v817_v49 = vpop.f32.mrb[42].mxu1  ;;  %v1878_v6 = vpop.f32.mrb[57].mxu0 }
 0x167   :  { %1537 = vst.msk [vmem:[%s2904_s3 + $0x48] sm:$0xf] %vm1518_vm1, %v1740_v45  ;;  %v1741_v54 = vpack.c.bf16 %v1291_v40, %v1291_v40  ;;  %v1189_v52 = vmul.f32 %v2489_v51, %v1047_v39  ;;  %v1050_v47 = vadd.f32 %v2608_v60, %v817_v49  ;;  %v819_v55 = vpop.f32.mrb[43].mxu1  ;;  %v2680_v8 = vpop.f32.mrb[58].mxu0 }
 0x168   :  { %v1879_v13 = vpop.f32.mrb[59].mxu0 }
 0x169   :  { %1538 = vst.msk [vmem:[%s2904_s3 + $0x4c] sm:$0xf] %vm1518_vm1, %v1741_v54  ;;  %v1243_v53 = vadd.f32 %v2494_v56, %v1189_v52  ;;  %v1190_v59 = vmul.f32 %v2489_v51, %v1050_v47 }
 0x16b   :  { %v1292_v62 = vmax.f32 %v1243_v53, 0.0  ;;  %v1244_v63 = vadd.f32 %v2494_v56, %v1190_v59 }
 0x16c   :  { %v822_v58 = vpop.f32.mrb[44].mxu1 }
 0x16d   :  { %v1742_v1 = vpack.c.bf16 %v1292_v62, %v1292_v62  ;;  %v1293_v61 = vmax.f32 %v1244_v63, 0.0  ;;  %v1055_v60 = vadd.f32 %v2623_v9, %v822_v58  ;;  %v824_v3 = vpop.f32.mrb[45].mxu1  ;;  %v2695_v19 = vpop.f32.mrb[60].mxu0 }
 0x16e   :  { %v825_v7 = vpop.f32.mrb[46].mxu1  ;;  %v1882_v24 = vpop.f32.mrb[61].mxu0 }
 0x16f   :  { %1539 = vst.msk [vmem:[%s2904_s3 + $0x50] sm:$0xf] %vm1518_vm1, %v1742_v1  ;;  %v1743_v10 = vpack.c.bf16 %v1293_v61, %v1293_v61  ;;  %v1191_v5 = vmul.f32 %v2489_v51, %v1055_v60  ;;  %v1058_v4 = vadd.f32 %v2626_v15, %v825_v7  ;;  %v827_v11 = vpop.f32.mrb[47].mxu1  ;;  %v2698_v26 = vpop.f32.mrb[62].mxu0 }
 0x170   :  { %v1883_v31 = vpop.f32.mrb[63].mxu0 }
 0x171   :  { %1540 = vst.msk [vmem:[%s2904_s3 + $0x54] sm:$0xf] %vm1518_vm1, %v1743_v10  ;;  %v1245_v9 = vadd.f32 %v2494_v56, %v1191_v5  ;;  %v1192_v14 = vmul.f32 %v2489_v51, %v1058_v4 }
 0x173   :  { %v1294_v17 = vmax.f32 %v1245_v9, 0.0  ;;  %v1246_v18 = vadd.f32 %v2494_v56, %v1192_v14 }
 0x174   :  { %v830_v12 = vpop.f32.mrb[48].mxu1 }
 0x175   :  { %v1744_v20 = vpack.c.bf16 %v1294_v17, %v1294_v17  ;;  %v1295_v16 = vmax.f32 %v1246_v18, 0.0  ;;  %v1063_v15 = vadd.f32 %v2641_v27, %v830_v12  ;;  %v832_v21 = vpop.f32.mrb[49].mxu1  ;;  %v2713_v36 = vpop.f32.mrb[64].mxu0 }
 0x176   :  { %v833_v25 = vpop.f32.mrb[50].mxu1  ;;  %v1886_v41 = vpop.f32.mrb[65].mxu0 }
 0x177   :  { %1541 = vst.msk [vmem:[%s2904_s3 + $0x58] sm:$0xf] %vm1518_vm1, %v1744_v20  ;;  %v1745_v28 = vpack.c.bf16 %v1295_v16, %v1295_v16  ;;  %v1193_v23 = vmul.f32 %v2489_v51, %v1063_v15  ;;  %v1066_v22 = vadd.f32 %v2644_v33, %v833_v25  ;;  %v835_v29 = vpop.f32.mrb[51].mxu1  ;;  %v2716_v43 = vpop.f32.mrb[66].mxu0 }
 0x178   :  { %v1887_v48 = vpop.f32.mrb[67].mxu0 }
 0x179   :  { %1542 = vst.msk [vmem:[%s2904_s3 + $0x5c] sm:$0xf] %vm1518_vm1, %v1745_v28  ;;  %v1247_v27 = vadd.f32 %v2494_v56, %v1193_v23  ;;  %v1194_v32 = vmul.f32 %v2489_v51, %v1066_v22 }
 0x17b   :  { %v1296_v34 = vmax.f32 %v1247_v27, 0.0  ;;  %v1248_v35 = vadd.f32 %v2494_v56, %v1194_v32 }
 0x17c   :  { %v838_v30 = vpop.f32.mrb[52].mxu1 }
 0x17d   :  { %v1746_v37 = vpack.c.bf16 %v1296_v34, %v1296_v34  ;;  %v1297_v2 = vmax.f32 %v1248_v35, 0.0  ;;  %v1071_v33 = vadd.f32 %v2659_v44, %v838_v30  ;;  %v840_v38 = vpop.f32.mrb[53].mxu1  ;;  %v2731_v55 = vpop.f32.mrb[68].mxu0 }
 0x17e   :  { %v841_v42 = vpop.f32.mrb[54].mxu1  ;;  %v1890_v62 = vpop.f32.mrb[69].mxu0 }
 0x17f   :  { %1543 = vst.msk [vmem:[%s2904_s3 + $0x60] sm:$0xf] %vm1518_vm1, %v1746_v37  ;;  %v1747_v45 = vpack.c.bf16 %v1297_v2, %v1297_v2  ;;  %v1195_v40 = vmul.f32 %v2489_v51, %v1071_v33  ;;  %v1074_v39 = vadd.f32 %v2662_v50, %v841_v42  ;;  %v843_v46 = vpop.f32.mrb[55].mxu1  ;;  %v2734_v58 = vpop.f32.mrb[70].mxu0 }
 0x180   :  { %v1891_v6 = vpop.f32.mrb[71].mxu0 }
 0x181   :  { %1544 = vst.msk [vmem:[%s2904_s3 + $0x64] sm:$0xf] %vm1518_vm1, %v1747_v45  ;;  %v1249_v44 = vadd.f32 %v2494_v56, %v1195_v40  ;;  %v1196_v49 = vmul.f32 %v2489_v51, %v1074_v39 }
 0x183   :  { %v1298_v54 = vmax.f32 %v1249_v44, 0.0  ;;  %v1250_v52 = vadd.f32 %v2494_v56, %v1196_v49 }
 0x184   :  { %v846_v47 = vpop.f32.mrb[56].mxu1 }
 0x185   :  { %v1748_v57 = vpack.c.bf16 %v1298_v54, %v1298_v54  ;;  %v1299_v53 = vmax.f32 %v1250_v52, 0.0  ;;  %v1079_v50 = vadd.f32 %v2677_v0, %v846_v47  ;;  %v848_v59 = vpop.f32.mrb[57].mxu1  ;;  %v2749_v11 = vpop.f32.mrb[72].mxu0 }
 0x186   :  { %v849_v63 = vpop.f32.mrb[58].mxu1  ;;  %v1894_v17 = vpop.f32.mrb[73].mxu0 }
 0x187   :  { %1545 = vst.msk [vmem:[%s2904_s3 + $0x68] sm:$0xf] %vm1518_vm1, %v1748_v57  ;;  %v1749_v1 = vpack.c.bf16 %v1299_v53, %v1299_v53  ;;  %v1197_v61 = vmul.f32 %v2489_v51, %v1079_v50  ;;  %v1082_v60 = vadd.f32 %v2680_v8, %v849_v63  ;;  %v851_v3 = vpop.f32.mrb[59].mxu1  ;;  %v2752_v12 = vpop.f32.mrb[74].mxu0 }
 0x188   :  { %v1895_v24 = vpop.f32.mrb[75].mxu0 }
 0x189   :  { %1546 = vst.msk [vmem:[%s2904_s3 + $0x6c] sm:$0xf] %vm1518_vm1, %v1749_v1  ;;  %v1251_v0 = vadd.f32 %v2494_v56, %v1197_v61  ;;  %v1198_v7 = vmul.f32 %v2489_v51, %v1082_v60 }
 0x18b   :  { %v1300_v10 = vmax.f32 %v1251_v0, 0.0  ;;  %v1252_v5 = vadd.f32 %v2494_v56, %v1198_v7 }
 0x18c   :  { %v854_v4 = vpop.f32.mrb[60].mxu1 }
 0x18d   :  { %v1750_v13 = vpack.c.bf16 %v1300_v10, %v1300_v10  ;;  %v1301_v9 = vmax.f32 %v1252_v5, 0.0  ;;  %v1087_v8 = vadd.f32 %v2695_v19, %v854_v4  ;;  %v856_v14 = vpop.f32.mrb[61].mxu1  ;;  %v2767_v29 = vpop.f32.mrb[76].mxu0 }
 0x18e   :  { %v857_v18 = vpop.f32.mrb[62].mxu1  ;;  %v1898_v34 = vpop.f32.mrb[77].mxu0 }
 0x18f   :  { %1547 = vst.msk [vmem:[%s2904_s3 + $0x70] sm:$0xf] %vm1518_vm1, %v1750_v13  ;;  %v1751_v20 = vpack.c.bf16 %v1301_v9, %v1301_v9  ;;  %v1199_v16 = vmul.f32 %v2489_v51, %v1087_v8  ;;  %v1090_v15 = vadd.f32 %v2698_v26, %v857_v18  ;;  %v859_v21 = vpop.f32.mrb[63].mxu1  ;;  %v2770_v30 = vpop.f32.mrb[78].mxu0 }
 0x190   :  { %v1899_v41 = vpop.f32.mrb[79].mxu0 }
 0x191   :  { %1548 = vst.msk [vmem:[%s2904_s3 + $0x74] sm:$0xf] %vm1518_vm1, %v1751_v20  ;;  %v1253_v19 = vadd.f32 %v2494_v56, %v1199_v16  ;;  %v1200_v25 = vmul.f32 %v2489_v51, %v1090_v15 }
 0x193   :  { %v1302_v28 = vmax.f32 %v1253_v19, 0.0  ;;  %v1254_v23 = vadd.f32 %v2494_v56, %v1200_v25 }
 0x194   :  { %v862_v22 = vpop.f32.mrb[64].mxu1 }
 0x195   :  { %v1752_v31 = vpack.c.bf16 %v1302_v28, %v1302_v28  ;;  %v1303_v27 = vmax.f32 %v1254_v23, 0.0  ;;  %v1095_v26 = vadd.f32 %v2713_v36, %v862_v22  ;;  %v864_v32 = vpop.f32.mrb[65].mxu1  ;;  %v2785_v46 = vpop.f32.mrb[80].mxu0 }
 0x196   :  { %v865_v35 = vpop.f32.mrb[66].mxu1  ;;  %v1902_v54 = vpop.f32.mrb[81].mxu0 }
 0x197   :  { %1549 = vst.msk [vmem:[%s2904_s3 + $0x78] sm:$0xf] %vm1518_vm1, %v1752_v31  ;;  %v1753_v37 = vpack.c.bf16 %v1303_v27, %v1303_v27  ;;  %v1201_v2 = vmul.f32 %v2489_v51, %v1095_v26  ;;  %v1098_v33 = vadd.f32 %v2716_v43, %v865_v35  ;;  %v867_v38 = vpop.f32.mrb[67].mxu1  ;;  %v2788_v47 = vpop.f32.mrb[82].mxu0 }
 0x198   :  { %v1903_v62 = vpop.f32.mrb[83].mxu0 }
 0x199   :  { %1550 = vst.msk [vmem:[%s2904_s3 + $0x7c] sm:$0xf] %vm1518_vm1, %v1753_v37  ;;  %v1255_v36 = vadd.f32 %v2494_v56, %v1201_v2  ;;  %v1202_v42 = vmul.f32 %v2489_v51, %v1098_v33 }
 0x19b   :  { %v1304_v45 = vmax.f32 %v1255_v36, 0.0  ;;  %v1256_v40 = vadd.f32 %v2494_v56, %v1202_v42 }
 0x19c   :  { %v870_v39 = vpop.f32.mrb[68].mxu1 }
 0x19d   :  { %v1754_v48 = vpack.c.bf16 %v1304_v45, %v1304_v45  ;;  %v1305_v44 = vmax.f32 %v1256_v40, 0.0  ;;  %v1103_v43 = vadd.f32 %v2731_v55, %v870_v39  ;;  %v872_v49 = vpop.f32.mrb[69].mxu1  ;;  %v2803_v3 = vpop.f32.mrb[84].mxu0 }
 0x19e   :  { %v873_v52 = vpop.f32.mrb[70].mxu1  ;;  %v1906_v10 = vpop.f32.mrb[85].mxu0 }
 0x19f   :  { %1551 = vst.msk [vmem:[%s2904_s3 + $0x80] sm:$0xf] %vm1518_vm1, %v1754_v48  ;;  %v1755_v57 = vpack.c.bf16 %v1305_v44, %v1305_v44  ;;  %v1203_v53 = vmul.f32 %v2489_v51, %v1103_v43  ;;  %v1106_v50 = vadd.f32 %v2734_v58, %v873_v52  ;;  %v875_v59 = vpop.f32.mrb[71].mxu1  ;;  %v2806_v4 = vpop.f32.mrb[86].mxu0 }
 0x1a0   :  { %v1907_v17 = vpop.f32.mrb[87].mxu0 }
 0x1a1   :  { %1552 = vst.msk [vmem:[%s2904_s3 + $0x84] sm:$0xf] %vm1518_vm1, %v1755_v57  ;;  %v1257_v55 = vadd.f32 %v2494_v56, %v1203_v53  ;;  %v1204_v63 = vmul.f32 %v2489_v51, %v1106_v50 }
 0x1a3   :  { %v1306_v1 = vmax.f32 %v1257_v55, 0.0  ;;  %v1258_v61 = vadd.f32 %v2494_v56, %v1204_v63 }
 0x1a4   :  { %v878_v60 = vpop.f32.mrb[72].mxu1 }
 0x1a5   :  { %v1756_v6 = vpack.c.bf16 %v1306_v1, %v1306_v1  ;;  %v1307_v0 = vmax.f32 %v1258_v61, 0.0  ;;  %v1111_v58 = vadd.f32 %v2749_v11, %v878_v60  ;;  %v880_v7 = vpop.f32.mrb[73].mxu1  ;;  %v1142_v21 = vpop.f32.mrb[88].mxu0 }
 0x1a6   :  { %v881_v5 = vpop.f32.mrb[74].mxu1  ;;  %v1910_v28 = vpop.f32.mrb[89].mxu0 }
 0x1a7   :  { %1553 = vst.msk [vmem:[%s2904_s3 + $0x88] sm:$0xf] %vm1518_vm1, %v1756_v6  ;;  %v1757_v13 = vpack.c.bf16 %v1307_v0, %v1307_v0  ;;  %v1205_v9 = vmul.f32 %v2489_v51, %v1111_v58  ;;  %v1114_v8 = vadd.f32 %v2752_v12, %v881_v5  ;;  %v883_v14 = vpop.f32.mrb[75].mxu1  ;;  %v1145_v22 = vpop.f32.mrb[90].mxu0 }
 0x1a8   :  { %v1911_v34 = vpop.f32.mrb[91].mxu0 }
 0x1a9   :  { %1554 = vst.msk [vmem:[%s2904_s3 + $0x8c] sm:$0xf] %vm1518_vm1, %v1757_v13  ;;  %v1259_v11 = vadd.f32 %v2494_v56, %v1205_v9  ;;  %v1206_v18 = vmul.f32 %v2489_v51, %v1114_v8 }
 0x1ab   :  { %v1308_v20 = vmax.f32 %v1259_v11, 0.0  ;;  %v1260_v16 = vadd.f32 %v2494_v56, %v1206_v18 }
 0x1ac   :  { %v886_v15 = vpop.f32.mrb[76].mxu1 }
 0x1ad   :  { %v1758_v24 = vpack.c.bf16 %v1308_v20, %v1308_v20  ;;  %v1309_v19 = vmax.f32 %v1260_v16, 0.0  ;;  %v1119_v12 = vadd.f32 %v2767_v29, %v886_v15  ;;  %v888_v25 = vpop.f32.mrb[77].mxu1  ;;  %v1150_v38 = vpop.f32.mrb[92].mxu0 }
 0x1ae   :  { %v889_v23 = vpop.f32.mrb[78].mxu1  ;;  %v1914_v45 = vpop.f32.mrb[93].mxu0 }
 0x1af   :  { %1555 = vst.msk [vmem:[%s2904_s3 + $0x90] sm:$0xf] %vm1518_vm1, %v1758_v24  ;;  %v1759_v31 = vpack.c.bf16 %v1309_v19, %v1309_v19  ;;  %v1207_v27 = vmul.f32 %v2489_v51, %v1119_v12  ;;  %v1122_v26 = vadd.f32 %v2770_v30, %v889_v23  ;;  %v891_v32 = vpop.f32.mrb[79].mxu1  ;;  %v1153_v39 = vpop.f32.mrb[94].mxu0 }
 0x1b0   :  { %v1915_v54 = vpop.f32.mrb[95].mxu0 }
 0x1b1   :  { %1556 = vst.msk [vmem:[%s2904_s3 + $0x94] sm:$0xf] %vm1518_vm1, %v1759_v31  ;;  %v1261_v29 = vadd.f32 %v2494_v56, %v1207_v27  ;;  %v1208_v35 = vmul.f32 %v2489_v51, %v1122_v26 }
 0x1b3   :  { %v1310_v37 = vmax.f32 %v1261_v29, 0.0  ;;  %v1262_v2 = vadd.f32 %v2494_v56, %v1208_v35 }
 0x1b4   :  { %v894_v33 = vpop.f32.mrb[80].mxu1 }
 0x1b5   :  { %v1760_v41 = vpack.c.bf16 %v1310_v37, %v1310_v37  ;;  %v1311_v36 = vmax.f32 %v1262_v2, 0.0  ;;  %v1127_v30 = vadd.f32 %v2785_v46, %v894_v33  ;;  %v896_v42 = vpop.f32.mrb[81].mxu1  ;;  %v1158_v59 = vpop.f32.mrb[96].mxu0 }
 0x1b6   :  { %v897_v40 = vpop.f32.mrb[82].mxu1  ;;  %v1918_v1 = vpop.f32.mrb[97].mxu0 }
 0x1b7   :  { %1557 = vst.msk [vmem:[%s2904_s3 + $0x98] sm:$0xf] %vm1518_vm1, %v1760_v41  ;;  %v1761_v48 = vpack.c.bf16 %v1311_v36, %v1311_v36  ;;  %v1209_v44 = vmul.f32 %v2489_v51, %v1127_v30  ;;  %v1130_v43 = vadd.f32 %v2788_v47, %v897_v40  ;;  %v899_v49 = vpop.f32.mrb[83].mxu1  ;;  %v1161_v60 = vpop.f32.mrb[98].mxu0 }
 0x1b8   :  { %v1919_v10 = vpop.f32.mrb[99].mxu0 }
 0x1b9   :  { %1558 = vst.msk [vmem:[%s2904_s3 + $0x9c] sm:$0xf] %vm1518_vm1, %v1761_v48  ;;  %v1263_v46 = vadd.f32 %v2494_v56, %v1209_v44  ;;  %v1210_v52 = vmul.f32 %v2489_v51, %v1130_v43 }
 0x1bb   :  { %v1312_v57 = vmax.f32 %v1263_v46, 0.0  ;;  %v1264_v53 = vadd.f32 %v2494_v56, %v1210_v52 }
 0x1bc   :  { %v902_v50 = vpop.f32.mrb[84].mxu1 }
 0x1bd   :  { %v1762_v62 = vpack.c.bf16 %v1312_v57, %v1312_v57  ;;  %v1313_v55 = vmax.f32 %v1264_v53, 0.0  ;;  %v1135_v47 = vadd.f32 %v2803_v3, %v902_v50  ;;  %v904_v63 = vpop.f32.mrb[85].mxu1 }
 0x1be   :  { %v905_v61 = vpop.f32.mrb[86].mxu1 }
 0x1bf   :  { %1559 = vst.msk [vmem:[%s2904_s3 + $0xa0] sm:$0xf] %vm1518_vm1, %v1762_v62  ;;  %v1763_v6 = vpack.c.bf16 %v1313_v55, %v1313_v55  ;;  %v1211_v0 = vmul.f32 %v2489_v51, %v1135_v47  ;;  %v1138_v58 = vadd.f32 %v2806_v4, %v905_v61  ;;  %v907_v7 = vpop.f32.mrb[87].mxu1 }
 0x1c1   :  { %1560 = vst.msk [vmem:[%s2904_s3 + $0xa4] sm:$0xf] %vm1518_vm1, %v1763_v6  ;;  %v1265_v3 = vadd.f32 %v2494_v56, %v1211_v0  ;;  %v1212_v5 = vmul.f32 %v2489_v51, %v1138_v58 }
 0x1c3   :  { %v1314_v13 = vmax.f32 %v1265_v3, 0.0  ;;  %v1266_v9 = vadd.f32 %v2494_v56, %v1212_v5 }
 0x1c4   :  { %v910_v8 = vpop.f32.mrb[88].mxu1 }
 0x1c5   :  { %v1764_v14 = vpack.c.bf16 %v1314_v13, %v1314_v13  ;;  %v1315_v17 = vmax.f32 %v1266_v9, 0.0  ;;  %v1143_v11 = vadd.f32 %v1142_v21, %v910_v8  ;;  %v912_v18 = vpop.f32.mrb[89].mxu1 }
 0x1c6   :  { %v913_v4 = vpop.f32.mrb[90].mxu1 }
 0x1c7   :  { %1561 = vst.msk [vmem:[%s2904_s3 + $0xa8] sm:$0xf] %vm1518_vm1, %v1764_v14  ;;  %v1765_v20 = vpack.c.bf16 %v1315_v17, %v1315_v17  ;;  %v1213_v16 = vmul.f32 %v2489_v51, %v1143_v11  ;;  %v1146_v15 = vadd.f32 %v1145_v22, %v913_v4  ;;  %v915_v24 = vpop.f32.mrb[91].mxu1 }
 0x1c9   :  { %1562 = vst.msk [vmem:[%s2904_s3 + $0xac] sm:$0xf] %vm1518_vm1, %v1765_v20  ;;  %v1267_v19 = vadd.f32 %v2494_v56, %v1213_v16  ;;  %v1214_v21 = vmul.f32 %v2489_v51, %v1146_v15 }
 0x1cb   :  { %v1316_v12 = vmax.f32 %v1267_v19, 0.0  ;;  %v1268_v25 = vadd.f32 %v2494_v56, %v1214_v21 }
 0x1cc   :  { %v918_v28 = vpop.f32.mrb[92].mxu1 }
 0x1cd   :  { %v1766_v23 = vpack.c.bf16 %v1316_v12, %v1316_v12  ;;  %v1317_v31 = vmax.f32 %v1268_v25, 0.0  ;;  %v1151_v27 = vadd.f32 %v1150_v38, %v918_v28  ;;  %v920_v26 = vpop.f32.mrb[93].mxu1 }
 0x1ce   :  { %v921_v32 = vpop.f32.mrb[94].mxu1 }
 0x1cf   :  { %1563 = vst.msk [vmem:[%s2904_s3 + $0xb0] sm:$0xf] %vm1518_vm1, %v1766_v23  ;;  %v1767_v22 = vpack.c.bf16 %v1317_v31, %v1317_v31  ;;  %v1215_v34 = vmul.f32 %v2489_v51, %v1151_v27  ;;  %v1154_v29 = vadd.f32 %v1153_v39, %v921_v32  ;;  %v923_v35 = vpop.f32.mrb[95].mxu1 }
 0x1d1   :  { %1564 = vst.msk [vmem:[%s2904_s3 + $0xb4] sm:$0xf] %vm1518_vm1, %v1767_v22  ;;  %v1269_v37 = vadd.f32 %v2494_v56, %v1215_v34  ;;  %v1216_v2 = vmul.f32 %v2489_v51, %v1154_v29 }
 0x1d3   :  { %v1318_v33 = vmax.f32 %v1269_v37, 0.0  ;;  %v1270_v38 = vadd.f32 %v2494_v56, %v1216_v2 }
 0x1d4   :  { %v926_v41 = vpop.f32.mrb[96].mxu1 }
 0x1d5   :  { %v1768_v36 = vpack.c.bf16 %v1318_v33, %v1318_v33  ;;  %v1319_v30 = vmax.f32 %v1270_v38, 0.0  ;;  %v1159_v42 = vadd.f32 %v1158_v59, %v926_v41  ;;  %v928_v45 = vpop.f32.mrb[97].mxu1 }
 0x1d6   :  { %v929_v40 = vpop.f32.mrb[98].mxu1 }
 0x1d7   :  { %1565 = vst.msk [vmem:[%s2904_s3 + $0xb8] sm:$0xf] %vm1518_vm1, %v1768_v36  ;;  %v1769_v39 = vpack.c.bf16 %v1319_v30, %v1319_v30  ;;  %v1217_v48 = vmul.f32 %v2489_v51, %v1159_v42  ;;  %v930_v44 = vpop.f32.mrb[99].mxu1 }
 0x1d9   :  { %1566 = vst.msk [vmem:[%s2904_s3 + $0xbc] sm:$0xf] %vm1518_vm1, %v1769_v39  ;;  %v1271_v43 = vadd.f32 %v2494_v56, %v1217_v48 }
 0x1db   :  { %v1320_v49 = vmax.f32 %v1271_v43, 0.0 }
 0x1dd   :  { %v1770_v54 = vpack.c.bf16 %v1320_v49, %v1320_v49 }
 0x1df   :  { %1567 = vst.msk [vmem:[%s2904_s3 + $0xc0] sm:$0xf] %vm1518_vm1, %v1770_v54 }

// kernel: autoencoder_forward.15
= control target key start
LH: loop header
LB: loop body
LE: loop exit
PB: predicated region body
PF: predicated region fallthrough
CT: control target
= control target key end

     0   :  { %vm278_vm0 = vcmask 1044480   ;;  %vm279_vm1 = vcmask 1045504   ;;  %v1242_v0 = vmov 0.0   ;;  %v1243_v2 = vmov 65535   ;;  %s1729_s1 = inlined_call_operand.vmem [shape: bf16[27,16], index: 1, kind: input, shape index: {}]   ;;  %s1730_s0 = inlined_call_operand.vmem [shape: bf16[392,27], index: 0, kind: input, shape index: {}]   ;;  %s1731_s2 = inlined_call_operand.vmem [shape: f32[2,16], index: 2, kind: input, shape index: {}]   ;;  %s1732_s3 = inlined_call_operand.vmem [shape: bf16[392,16], index: 3, kind: output, shape index: {}]  }
   0x1   :  { %1104 = vmatprep.subr.bf16.mxu0 %v1242_v0  ;;  %v1215_v1 = vld [vmem:[%s1729_s1] sm:$0xff]   ;;  %v280_v3 = vsel %vm278_vm0, 4294967295, %v1243_v2  ;;  %1208 = vmatprep.subr.bf16.mxu1 %v1242_v0  ;;  %v1216_v4 = vld [vmem:[%s1729_s1 + $0x8] sm:$0x3f]   ;;  %vm1244_vm2 = vmmov 0   ;;  %vm202_vm3 = vcmask 220160  }
   0x2   :  { %1105 = vmatpush3.bf16.msra.mxu0 %v1215_v1  ;;  %v281_v5 = vsel %vm279_vm1, %v280_v3, 0  ;;  %1210 = vmatpush3.bf16.msra.mxu1 %v1215_v1  ;;  %v1217_v7 = vld [vmem:[%s1730_s0] sm:$0xff]   ;;  %v1218_v8 = vld [vmem:[%s1730_s0 + $0x68] sm:$0xff]   ;;  %v1220_v10 = vld [vmem:[%s1730_s0 + $0x70] sm:$0xff]   ;;  %vm871_vm4 = vcmask 125952  }
   0x3   :  { %1106 = vmatprep.subr.bf16.mxu0 %v1242_v0  ;;  %v283_v6 = vand.u32 %v1216_v4, %v281_v5  ;;  %1108 = vmatprep.mubr.msk.bf16.mxu0 %vm1244_vm2, %v1242_v0  ;;  %v1219_v9 = vld [vmem:[%s1730_s0 + $0x8] sm:$0xff]   ;;  %v1221_v11 = vld [vmem:[%s1730_s0 + $0x10] sm:$0xff]   ;;  %v1222_v12 = vld [vmem:[%s1730_s0 + $0x78] sm:$0xff]  }
   0x4   :  { %1209 = vmatprep.subr.bf16.mxu1 %v1242_v0  ;;  %1160 = vmatprep.mubr.msk.bf16.mxu1 %vm1244_vm2, %v1242_v0  ;;  %v1223_v13 = vld [vmem:[%s1730_s0 + $0x18] sm:$0xff]   ;;  %v1224_v14 = vld [vmem:[%s1730_s0 + $0x80] sm:$0xff]   ;;  %v1226_v16 = vld [vmem:[%s1730_s0 + $0x88] sm:$0xff]  }
   0x5   :  { %v1225_v15 = vld [vmem:[%s1730_s0 + $0x20] sm:$0xff]   ;;  %v1227_v17 = vld [vmem:[%s1730_s0 + $0x28] sm:$0xff]   ;;  %v1228_v18 = vld [vmem:[%s1730_s0 + $0x90] sm:$0xff]  }
   0x6   :  { %1107 = vmatpush3.bf16.msra.mxu0 %v283_v6  ;;  %1211 = vmatpush3.bf16.msra.mxu1 %v283_v6  ;;  %v1229_v19 = vld [vmem:[%s1730_s0 + $0x30] sm:$0xff]   ;;  %v1230_v20 = vld [vmem:[%s1730_s0 + $0x98] sm:$0xff]   ;;  %v1232_v22 = vld [vmem:[%s1730_s0 + $0xa0] sm:$0xff]  }
   0x7   :  { %v1231_v21 = vld [vmem:[%s1730_s0 + $0x38] sm:$0xff]   ;;  %v1233_v23 = vld [vmem:[%s1730_s0 + $0x40] sm:$0xff]   ;;  %v1234_v24 = vld [vmem:[%s1730_s0 + $0xa8] sm:$0xff]  }
   0x8   :  { %v1235_v25 = vld [vmem:[%s1730_s0 + $0x48] sm:$0xff]   ;;  %v1236_v26 = vld [vmem:[%s1730_s0 + $0xb0] sm:$0xff]   ;;  %v1238_v28 = vld [vmem:[%s1730_s0 + $0xb8] sm:$0xff]  }
   0x9   :  { %1109 = vmatmul.mubr.msk.bf16.vlgmr.msra.gmra.mrb[0].mxu0 %vm202_vm3, %v1217_v7  ;;  %1161 = vmatmul.mubr.msk.bf16.vlgmr.msra.gmra.mrb[0].mxu1 %vm202_vm3, %v1218_v8  ;;  %v1237_v27 = vld [vmem:[%s1730_s0 + $0x50] sm:$0xff]   ;;  %v1239_v29 = vld [vmem:[%s1730_s0 + $0x58] sm:$0xff]   ;;  %v1240_v30 = vld [vmem:[%s1730_s0 + $0xc0] ss:$0 sps:$4 sm:$0xff]  }
   0xa   :  { %1112 = vmatprep.mubr.msk.bf16.mxu0 %vm1244_vm2, %v1242_v0  ;;  %1164 = vmatprep.mubr.msk.bf16.mxu1 %vm1244_vm2, %v1242_v0  ;;  %v1241_v31 = vld [vmem:[%s1730_s0 + $0x60] sm:$0xff]  }
   0xb   :  { %v1428_v32 = vld [vmem:[%s1731_s2] ss:$0 sm:$0xff]  ;;  %v1433_v34 = vld [vmem:[%s1731_s2 + $0x1] ss:$0 sm:$0xff] }
  0x11   :  { %1113 = vmatmul.mubr.msk.bf16.gmra.mrb[4].mxu0 %vm202_vm3, %v1219_v9  ;;  %1165 = vmatmul.mubr.msk.bf16.gmra.mrb[4].mxu1 %vm202_vm3, %v1220_v10 }
  0x12   :  { %1116 = vmatprep.mubr.msk.bf16.mxu0 %vm1244_vm2, %v1242_v0  ;;  %1168 = vmatprep.mubr.msk.bf16.mxu1 %vm1244_vm2, %v1242_v0 }
  0x19   :  { %1117 = vmatmul.mubr.msk.bf16.gmra.mrb[8].mxu0 %vm202_vm3, %v1221_v11  ;;  %1169 = vmatmul.mubr.msk.bf16.gmra.mrb[8].mxu1 %vm202_vm3, %v1222_v12 }
  0x1a   :  { %1120 = vmatprep.mubr.msk.bf16.mxu0 %vm1244_vm2, %v1242_v0  ;;  %1172 = vmatprep.mubr.msk.bf16.mxu1 %vm1244_vm2, %v1242_v0 }
  0x21   :  { %1121 = vmatmul.mubr.msk.bf16.gmra.mrb[12].mxu0 %vm202_vm3, %v1223_v13  ;;  %1173 = vmatmul.mubr.msk.bf16.gmra.mrb[12].mxu1 %vm202_vm3, %v1224_v14 }
  0x22   :  { %1124 = vmatprep.mubr.msk.bf16.mxu0 %vm1244_vm2, %v1242_v0  ;;  %1176 = vmatprep.mubr.msk.bf16.mxu1 %vm1244_vm2, %v1242_v0 }
  0x29   :  { %1125 = vmatmul.mubr.msk.bf16.gmra.mrb[16].mxu0 %vm202_vm3, %v1225_v15  ;;  %1177 = vmatmul.mubr.msk.bf16.gmra.mrb[16].mxu1 %vm202_vm3, %v1226_v16 }
  0x2a   :  { %1128 = vmatprep.mubr.msk.bf16.mxu0 %vm1244_vm2, %v1242_v0  ;;  %1180 = vmatprep.mubr.msk.bf16.mxu1 %vm1244_vm2, %v1242_v0 }
  0x31   :  { %1129 = vmatmul.mubr.msk.bf16.gmra.mrb[20].mxu0 %vm202_vm3, %v1227_v17  ;;  %1181 = vmatmul.mubr.msk.bf16.gmra.mrb[20].mxu1 %vm202_vm3, %v1228_v18 }
  0x32   :  { %1132 = vmatprep.mubr.msk.bf16.mxu0 %vm1244_vm2, %v1242_v0  ;;  %1184 = vmatprep.mubr.msk.bf16.mxu1 %vm1244_vm2, %v1242_v0 }
  0x39   :  { %1133 = vmatmul.mubr.msk.bf16.gmra.mrb[24].mxu0 %vm202_vm3, %v1229_v19  ;;  %1185 = vmatmul.mubr.msk.bf16.gmra.mrb[24].mxu1 %vm202_vm3, %v1230_v20 }
  0x3a   :  { %1136 = vmatprep.mubr.msk.bf16.mxu0 %vm1244_vm2, %v1242_v0  ;;  %1188 = vmatprep.mubr.msk.bf16.mxu1 %vm1244_vm2, %v1242_v0 }
  0x41   :  { %1137 = vmatmul.mubr.msk.bf16.gmra.mrb[28].mxu0 %vm202_vm3, %v1231_v21  ;;  %1189 = vmatmul.mubr.msk.bf16.gmra.mrb[28].mxu1 %vm202_vm3, %v1232_v22 }
  0x42   :  { %1140 = vmatprep.mubr.msk.bf16.mxu0 %vm1244_vm2, %v1242_v0  ;;  %1192 = vmatprep.mubr.msk.bf16.mxu1 %vm1244_vm2, %v1242_v0 }
  0x49   :  { %1141 = vmatmul.mubr.msk.bf16.gmra.mrb[32].mxu0 %vm202_vm3, %v1233_v23  ;;  %1193 = vmatmul.mubr.msk.bf16.gmra.mrb[32].mxu1 %vm202_vm3, %v1234_v24 }
  0x4a   :  { %1144 = vmatprep.mubr.msk.bf16.mxu0 %vm1244_vm2, %v1242_v0  ;;  %1196 = vmatprep.mubr.msk.bf16.mxu1 %vm1244_vm2, %v1242_v0 }
  0x51   :  { %1145 = vmatmul.mubr.msk.bf16.gmra.mrb[36].mxu0 %vm202_vm3, %v1235_v25  ;;  %1197 = vmatmul.mubr.msk.bf16.gmra.mrb[36].mxu1 %vm202_vm3, %v1236_v26 }
  0x52   :  { %1148 = vmatprep.mubr.msk.bf16.mxu0 %vm1244_vm2, %v1242_v0  ;;  %1200 = vmatprep.mubr.msk.bf16.mxu1 %vm1244_vm2, %v1242_v0 }
  0x59   :  { %1149 = vmatmul.mubr.msk.bf16.gmra.mrb[40].mxu0 %vm202_vm3, %v1237_v27  ;;  %1201 = vmatmul.mubr.msk.bf16.gmra.mrb[40].mxu1 %vm202_vm3, %v1238_v28 }
  0x5a   :  { %1152 = vmatprep.mubr.msk.bf16.mxu0 %vm1244_vm2, %v1242_v0  ;;  %1204 = vmatprep.mubr.msk.bf16.mxu1 %vm1244_vm2, %v1242_v0 }
  0x61   :  { %1153 = vmatmul.mubr.msk.bf16.gmra.mrb[44].mxu0 %vm202_vm3, %v1239_v29  ;;  %1205 = vmatmul.mubr.msk.bf16.gmra.mrb[44].mxu1 %vm202_vm3, %v1240_v30 }
  0x62   :  { %1156 = vmatprep.mubr.msk.bf16.mxu0 %vm1244_vm2, %v1242_v0 }
  0x69   :  { %1157 = vmatmul.mubr.msk.bf16.gmra.mrb[48].mxu0 %vm202_vm3, %v1241_v31 }
  0xdc   :  { %v319_v33 = vpop.f32.mrb[0].mxu0  ;;  %v423_v35 = vpop.f32.mrb[0].mxu1 }
  0xdd   :  { %v522_v36 = vmul.f32 %v1428_v32, %v319_v33  ;;  %v1110_v37 = vpop.f32.mrb[1].mxu0  ;;  %v548_v38 = vmul.f32 %v1428_v32, %v423_v35  ;;  %v1162_v39 = vpop.f32.mrb[1].mxu1 }
  0xde   :  { %v322_v40 = vpop.f32.mrb[2].mxu0  ;;  %v426_v41 = vpop.f32.mrb[2].mxu1 }
  0xdf   :  { %v576_v42 = vadd.f32 %v1433_v34, %v522_v36  ;;  %v523_v43 = vmul.f32 %v1428_v32, %v322_v40  ;;  %v1111_v44 = vpop.f32.mrb[3].mxu0  ;;  %v602_v45 = vadd.f32 %v1433_v34, %v548_v38  ;;  %v549_v46 = vmul.f32 %v1428_v32, %v426_v41  ;;  %v1163_v47 = vpop.f32.mrb[3].mxu1 }
  0xe1   :  { %v625_v48 = vmax.f32 %v576_v42, 0.0  ;;  %v577_v49 = vadd.f32 %v1433_v34, %v523_v43  ;;  %v651_v50 = vmax.f32 %v602_v45, 0.0  ;;  %v603_v51 = vadd.f32 %v1433_v34, %v549_v46 }
  0xe3   :  { %v1028_v52 = vpack.c.bf16 %v625_v48, %v625_v48  ;;  %v626_v53 = vmax.f32 %v577_v49, 0.0  ;;  %v1054_v54 = vpack.c.bf16 %v651_v50, %v651_v50  ;;  %v652_v55 = vmax.f32 %v603_v51, 0.0 }
  0xe4   :  { %v327_v56 = vpop.f32.mrb[4].mxu0  ;;  %v431_v57 = vpop.f32.mrb[4].mxu1 }
  0xe5   :  { %872 = vst.msk [vmem:[%s1732_s3] sm:$0xf] %vm871_vm4, %v1028_v52  ;;  %v1029_v58 = vpack.c.bf16 %v626_v53, %v626_v53  ;;  %898 = vst.msk [vmem:[%s1732_s3 + $0x68] sm:$0xf] %vm871_vm4, %v1054_v54  ;;  %v524_v59 = vmul.f32 %v1428_v32, %v327_v56  ;;  %v1114_v60 = vpop.f32.mrb[5].mxu0  ;;  %v1055_v61 = vpack.c.bf16 %v652_v55, %v652_v55  ;;  %v1166_v63 = vpop.f32.mrb[5].mxu1 }
  0xe6   :  { %v550_v62 = vmul.f32 %v1428_v32, %v431_v57  ;;  %v330_v0 = vpop.f32.mrb[6].mxu0  ;;  %v434_v1 = vpop.f32.mrb[6].mxu1 }
  0xe7   :  { %873 = vst.msk [vmem:[%s1732_s3 + $0x4] sm:$0xf] %vm871_vm4, %v1029_v58  ;;  %v578_v2 = vadd.f32 %v1433_v34, %v524_v59  ;;  %899 = vst.msk [vmem:[%s1732_s3 + $0x6c] sm:$0xf] %vm871_vm4, %v1055_v61  ;;  %v525_v3 = vmul.f32 %v1428_v32, %v330_v0  ;;  %v1115_v4 = vpop.f32.mrb[7].mxu0  ;;  %v551_v6 = vmul.f32 %v1428_v32, %v434_v1  ;;  %v1167_v7 = vpop.f32.mrb[7].mxu1 }
  0xe8   :  { %v604_v5 = vadd.f32 %v1433_v34, %v550_v62 }
  0xe9   :  { %v627_v8 = vmax.f32 %v578_v2, 0.0  ;;  %v579_v9 = vadd.f32 %v1433_v34, %v525_v3  ;;  %v605_v11 = vadd.f32 %v1433_v34, %v551_v6 }
  0xea   :  { %v653_v10 = vmax.f32 %v604_v5, 0.0 }
  0xeb   :  { %v1030_v12 = vpack.c.bf16 %v627_v8, %v627_v8  ;;  %v628_v13 = vmax.f32 %v579_v9, 0.0  ;;  %v654_v15 = vmax.f32 %v605_v11, 0.0 }
  0xec   :  { %v1056_v14 = vpack.c.bf16 %v653_v10, %v653_v10  ;;  %v335_v16 = vpop.f32.mrb[8].mxu0  ;;  %v439_v17 = vpop.f32.mrb[8].mxu1 }
  0xed   :  { %874 = vst.msk [vmem:[%s1732_s3 + $0x8] sm:$0xf] %vm871_vm4, %v1030_v12  ;;  %v1031_v18 = vpack.c.bf16 %v628_v13, %v628_v13  ;;  %v526_v19 = vmul.f32 %v1428_v32, %v335_v16  ;;  %v1118_v20 = vpop.f32.mrb[9].mxu0  ;;  %v1057_v21 = vpack.c.bf16 %v654_v15, %v654_v15  ;;  %v552_v22 = vmul.f32 %v1428_v32, %v439_v17  ;;  %v1170_v23 = vpop.f32.mrb[9].mxu1 }
  0xee   :  { %900 = vst.msk [vmem:[%s1732_s3 + $0x70] sm:$0xf] %vm871_vm4, %v1056_v14  ;;  %v338_v24 = vpop.f32.mrb[10].mxu0  ;;  %v442_v25 = vpop.f32.mrb[10].mxu1 }
  0xef   :  { %875 = vst.msk [vmem:[%s1732_s3 + $0xc] sm:$0xf] %vm871_vm4, %v1031_v18  ;;  %v580_v26 = vadd.f32 %v1433_v34, %v526_v19  ;;  %901 = vst.msk [vmem:[%s1732_s3 + $0x74] sm:$0xf] %vm871_vm4, %v1057_v21  ;;  %v527_v27 = vmul.f32 %v1428_v32, %v338_v24  ;;  %v1119_v28 = vpop.f32.mrb[11].mxu0  ;;  %v606_v29 = vadd.f32 %v1433_v34, %v552_v22  ;;  %v1171_v31 = vpop.f32.mrb[11].mxu1 }
  0xf0   :  { %v553_v30 = vmul.f32 %v1428_v32, %v442_v25 }
  0xf1   :  { %v629_v33 = vmax.f32 %v580_v26, 0.0  ;;  %v581_v35 = vadd.f32 %v1433_v34, %v527_v27  ;;  %v655_v36 = vmax.f32 %v606_v29, 0.0 }
  0xf2   :  { %v607_v37 = vadd.f32 %v1433_v34, %v553_v30 }
  0xf3   :  { %v1032_v38 = vpack.c.bf16 %v629_v33, %v629_v33  ;;  %v630_v39 = vmax.f32 %v581_v35, 0.0  ;;  %v1058_v40 = vpack.c.bf16 %v655_v36, %v655_v36 }
  0xf4   :  { %v656_v41 = vmax.f32 %v607_v37, 0.0  ;;  %v343_v42 = vpop.f32.mrb[12].mxu0  ;;  %v447_v43 = vpop.f32.mrb[12].mxu1 }
  0xf5   :  { %876 = vst.msk [vmem:[%s1732_s3 + $0x10] sm:$0xf] %vm871_vm4, %v1032_v38  ;;  %v1033_v44 = vpack.c.bf16 %v630_v39, %v630_v39  ;;  %902 = vst.msk [vmem:[%s1732_s3 + $0x78] sm:$0xf] %vm871_vm4, %v1058_v40  ;;  %v528_v45 = vmul.f32 %v1428_v32, %v343_v42  ;;  %v1122_v46 = vpop.f32.mrb[13].mxu0  ;;  %v554_v48 = vmul.f32 %v1428_v32, %v447_v43  ;;  %v1174_v49 = vpop.f32.mrb[13].mxu1 }
  0xf6   :  { %v1059_v47 = vpack.c.bf16 %v656_v41, %v656_v41  ;;  %v346_v50 = vpop.f32.mrb[14].mxu0  ;;  %v450_v51 = vpop.f32.mrb[14].mxu1 }
  0xf7   :  { %877 = vst.msk [vmem:[%s1732_s3 + $0x14] sm:$0xf] %vm871_vm4, %v1033_v44  ;;  %v582_v52 = vadd.f32 %v1433_v34, %v528_v45  ;;  %v529_v53 = vmul.f32 %v1428_v32, %v346_v50  ;;  %v1123_v54 = vpop.f32.mrb[15].mxu0  ;;  %v608_v55 = vadd.f32 %v1433_v34, %v554_v48  ;;  %v555_v56 = vmul.f32 %v1428_v32, %v450_v51  ;;  %v1175_v57 = vpop.f32.mrb[15].mxu1 }
  0xf8   :  { %903 = vst.msk [vmem:[%s1732_s3 + $0x7c] sm:$0xf] %vm871_vm4, %v1059_v47 }
  0xf9   :  { %v631_v58 = vmax.f32 %v582_v52, 0.0  ;;  %v583_v59 = vadd.f32 %v1433_v34, %v529_v53  ;;  %v657_v60 = vmax.f32 %v608_v55, 0.0  ;;  %v609_v61 = vadd.f32 %v1433_v34, %v555_v56 }
  0xfb   :  { %v1034_v62 = vpack.c.bf16 %v631_v58, %v631_v58  ;;  %v632_v63 = vmax.f32 %v583_v59, 0.0  ;;  %v1060_v0 = vpack.c.bf16 %v657_v60, %v657_v60  ;;  %v658_v1 = vmax.f32 %v609_v61, 0.0 }
  0xfc   :  { %v351_v2 = vpop.f32.mrb[16].mxu0  ;;  %v455_v3 = vpop.f32.mrb[16].mxu1 }
  0xfd   :  { %878 = vst.msk [vmem:[%s1732_s3 + $0x18] sm:$0xf] %vm871_vm4, %v1034_v62  ;;  %v1035_v4 = vpack.c.bf16 %v632_v63, %v632_v63  ;;  %904 = vst.msk [vmem:[%s1732_s3 + $0x80] sm:$0xf] %vm871_vm4, %v1060_v0  ;;  %v530_v5 = vmul.f32 %v1428_v32, %v351_v2  ;;  %v1126_v6 = vpop.f32.mrb[17].mxu0  ;;  %v1061_v7 = vpack.c.bf16 %v658_v1, %v658_v1  ;;  %v1178_v9 = vpop.f32.mrb[17].mxu1 }
  0xfe   :  { %v556_v8 = vmul.f32 %v1428_v32, %v455_v3  ;;  %v354_v10 = vpop.f32.mrb[18].mxu0  ;;  %v458_v11 = vpop.f32.mrb[18].mxu1 }
  0xff   :  { %879 = vst.msk [vmem:[%s1732_s3 + $0x1c] sm:$0xf] %vm871_vm4, %v1035_v4  ;;  %v584_v12 = vadd.f32 %v1433_v34, %v530_v5  ;;  %905 = vst.msk [vmem:[%s1732_s3 + $0x84] sm:$0xf] %vm871_vm4, %v1061_v7  ;;  %v531_v13 = vmul.f32 %v1428_v32, %v354_v10  ;;  %v1127_v14 = vpop.f32.mrb[19].mxu0  ;;  %v557_v16 = vmul.f32 %v1428_v32, %v458_v11  ;;  %v1179_v17 = vpop.f32.mrb[19].mxu1 }
 0x100   :  { %v610_v15 = vadd.f32 %v1433_v34, %v556_v8 }
 0x101   :  { %v633_v18 = vmax.f32 %v584_v12, 0.0  ;;  %v585_v19 = vadd.f32 %v1433_v34, %v531_v13  ;;  %v611_v21 = vadd.f32 %v1433_v34, %v557_v16 }
 0x102   :  { %v659_v20 = vmax.f32 %v610_v15, 0.0 }
 0x103   :  { %v1036_v22 = vpack.c.bf16 %v633_v18, %v633_v18  ;;  %v634_v23 = vmax.f32 %v585_v19, 0.0  ;;  %v660_v25 = vmax.f32 %v611_v21, 0.0 }
 0x104   :  { %v1062_v24 = vpack.c.bf16 %v659_v20, %v659_v20  ;;  %v359_v26 = vpop.f32.mrb[20].mxu0  ;;  %v463_v27 = vpop.f32.mrb[20].mxu1 }
 0x105   :  { %880 = vst.msk [vmem:[%s1732_s3 + $0x20] sm:$0xf] %vm871_vm4, %v1036_v22  ;;  %v1037_v28 = vpack.c.bf16 %v634_v23, %v634_v23  ;;  %v532_v29 = vmul.f32 %v1428_v32, %v359_v26  ;;  %v1130_v30 = vpop.f32.mrb[21].mxu0  ;;  %v1063_v31 = vpack.c.bf16 %v660_v25, %v660_v25  ;;  %v558_v33 = vmul.f32 %v1428_v32, %v463_v27  ;;  %v1182_v35 = vpop.f32.mrb[21].mxu1 }
 0x106   :  { %906 = vst.msk [vmem:[%s1732_s3 + $0x88] sm:$0xf] %vm871_vm4, %v1062_v24  ;;  %v362_v36 = vpop.f32.mrb[22].mxu0  ;;  %v466_v37 = vpop.f32.mrb[22].mxu1 }
 0x107   :  { %881 = vst.msk [vmem:[%s1732_s3 + $0x24] sm:$0xf] %vm871_vm4, %v1037_v28  ;;  %v586_v38 = vadd.f32 %v1433_v34, %v532_v29  ;;  %907 = vst.msk [vmem:[%s1732_s3 + $0x8c] sm:$0xf] %vm871_vm4, %v1063_v31  ;;  %v533_v39 = vmul.f32 %v1428_v32, %v362_v36  ;;  %v1131_v40 = vpop.f32.mrb[23].mxu0  ;;  %v612_v41 = vadd.f32 %v1433_v34, %v558_v33  ;;  %v1183_v43 = vpop.f32.mrb[23].mxu1 }
 0x108   :  { %v559_v42 = vmul.f32 %v1428_v32, %v466_v37 }
 0x109   :  { %v635_v44 = vmax.f32 %v586_v38, 0.0  ;;  %v587_v45 = vadd.f32 %v1433_v34, %v533_v39  ;;  %v661_v46 = vmax.f32 %v612_v41, 0.0 }
 0x10a   :  { %v613_v47 = vadd.f32 %v1433_v34, %v559_v42 }
 0x10b   :  { %v1038_v48 = vpack.c.bf16 %v635_v44, %v635_v44  ;;  %v636_v49 = vmax.f32 %v587_v45, 0.0  ;;  %v1064_v50 = vpack.c.bf16 %v661_v46, %v661_v46 }
 0x10c   :  { %v662_v51 = vmax.f32 %v613_v47, 0.0  ;;  %v367_v52 = vpop.f32.mrb[24].mxu0  ;;  %v471_v53 = vpop.f32.mrb[24].mxu1 }
 0x10d   :  { %882 = vst.msk [vmem:[%s1732_s3 + $0x28] sm:$0xf] %vm871_vm4, %v1038_v48  ;;  %v1039_v54 = vpack.c.bf16 %v636_v49, %v636_v49  ;;  %908 = vst.msk [vmem:[%s1732_s3 + $0x90] sm:$0xf] %vm871_vm4, %v1064_v50  ;;  %v534_v55 = vmul.f32 %v1428_v32, %v367_v52  ;;  %v1134_v56 = vpop.f32.mrb[25].mxu0  ;;  %v560_v58 = vmul.f32 %v1428_v32, %v471_v53  ;;  %v1186_v59 = vpop.f32.mrb[25].mxu1 }
 0x10e   :  { %v1065_v57 = vpack.c.bf16 %v662_v51, %v662_v51  ;;  %v370_v60 = vpop.f32.mrb[26].mxu0  ;;  %v474_v61 = vpop.f32.mrb[26].mxu1 }
 0x10f   :  { %883 = vst.msk [vmem:[%s1732_s3 + $0x2c] sm:$0xf] %vm871_vm4, %v1039_v54  ;;  %v588_v62 = vadd.f32 %v1433_v34, %v534_v55  ;;  %v535_v63 = vmul.f32 %v1428_v32, %v370_v60  ;;  %v1135_v0 = vpop.f32.mrb[27].mxu0  ;;  %v614_v1 = vadd.f32 %v1433_v34, %v560_v58  ;;  %v561_v2 = vmul.f32 %v1428_v32, %v474_v61  ;;  %v1187_v3 = vpop.f32.mrb[27].mxu1 }
 0x110   :  { %909 = vst.msk [vmem:[%s1732_s3 + $0x94] sm:$0xf] %vm871_vm4, %v1065_v57 }
 0x111   :  { %v637_v4 = vmax.f32 %v588_v62, 0.0  ;;  %v589_v5 = vadd.f32 %v1433_v34, %v535_v63  ;;  %v663_v6 = vmax.f32 %v614_v1, 0.0  ;;  %v615_v7 = vadd.f32 %v1433_v34, %v561_v2 }
 0x113   :  { %v1040_v8 = vpack.c.bf16 %v637_v4, %v637_v4  ;;  %v638_v9 = vmax.f32 %v589_v5, 0.0  ;;  %v1066_v10 = vpack.c.bf16 %v663_v6, %v663_v6  ;;  %v664_v11 = vmax.f32 %v615_v7, 0.0 }
 0x114   :  { %v375_v12 = vpop.f32.mrb[28].mxu0  ;;  %v479_v13 = vpop.f32.mrb[28].mxu1 }
 0x115   :  { %884 = vst.msk [vmem:[%s1732_s3 + $0x30] sm:$0xf] %vm871_vm4, %v1040_v8  ;;  %v1041_v14 = vpack.c.bf16 %v638_v9, %v638_v9  ;;  %910 = vst.msk [vmem:[%s1732_s3 + $0x98] sm:$0xf] %vm871_vm4, %v1066_v10  ;;  %v536_v15 = vmul.f32 %v1428_v32, %v375_v12  ;;  %v1138_v16 = vpop.f32.mrb[29].mxu0  ;;  %v1067_v17 = vpack.c.bf16 %v664_v11, %v664_v11  ;;  %v1190_v19 = vpop.f32.mrb[29].mxu1 }
 0x116   :  { %v562_v18 = vmul.f32 %v1428_v32, %v479_v13  ;;  %v378_v20 = vpop.f32.mrb[30].mxu0  ;;  %v482_v21 = vpop.f32.mrb[30].mxu1 }
 0x117   :  { %885 = vst.msk [vmem:[%s1732_s3 + $0x34] sm:$0xf] %vm871_vm4, %v1041_v14  ;;  %v590_v22 = vadd.f32 %v1433_v34, %v536_v15  ;;  %911 = vst.msk [vmem:[%s1732_s3 + $0x9c] sm:$0xf] %vm871_vm4, %v1067_v17  ;;  %v537_v23 = vmul.f32 %v1428_v32, %v378_v20  ;;  %v1139_v24 = vpop.f32.mrb[31].mxu0  ;;  %v563_v26 = vmul.f32 %v1428_v32, %v482_v21  ;;  %v1191_v27 = vpop.f32.mrb[31].mxu1 }
 0x118   :  { %v616_v25 = vadd.f32 %v1433_v34, %v562_v18 }
 0x119   :  { %v639_v28 = vmax.f32 %v590_v22, 0.0  ;;  %v591_v29 = vadd.f32 %v1433_v34, %v537_v23  ;;  %v617_v31 = vadd.f32 %v1433_v34, %v563_v26 }
 0x11a   :  { %v665_v30 = vmax.f32 %v616_v25, 0.0 }
 0x11b   :  { %v1042_v33 = vpack.c.bf16 %v639_v28, %v639_v28  ;;  %v640_v35 = vmax.f32 %v591_v29, 0.0  ;;  %v666_v37 = vmax.f32 %v617_v31, 0.0 }
 0x11c   :  { %v1068_v36 = vpack.c.bf16 %v665_v30, %v665_v30  ;;  %v383_v38 = vpop.f32.mrb[32].mxu0  ;;  %v487_v39 = vpop.f32.mrb[32].mxu1 }
 0x11d   :  { %886 = vst.msk [vmem:[%s1732_s3 + $0x38] sm:$0xf] %vm871_vm4, %v1042_v33  ;;  %v1043_v40 = vpack.c.bf16 %v640_v35, %v640_v35  ;;  %v538_v41 = vmul.f32 %v1428_v32, %v383_v38  ;;  %v1142_v42 = vpop.f32.mrb[33].mxu0  ;;  %v1069_v43 = vpack.c.bf16 %v666_v37, %v666_v37  ;;  %v564_v44 = vmul.f32 %v1428_v32, %v487_v39  ;;  %v1194_v45 = vpop.f32.mrb[33].mxu1 }
 0x11e   :  { %912 = vst.msk [vmem:[%s1732_s3 + $0xa0] sm:$0xf] %vm871_vm4, %v1068_v36  ;;  %v386_v46 = vpop.f32.mrb[34].mxu0  ;;  %v490_v47 = vpop.f32.mrb[34].mxu1 }
 0x11f   :  { %887 = vst.msk [vmem:[%s1732_s3 + $0x3c] sm:$0xf] %vm871_vm4, %v1043_v40  ;;  %v592_v48 = vadd.f32 %v1433_v34, %v538_v41  ;;  %913 = vst.msk [vmem:[%s1732_s3 + $0xa4] sm:$0xf] %vm871_vm4, %v1069_v43  ;;  %v539_v49 = vmul.f32 %v1428_v32, %v386_v46  ;;  %v1143_v50 = vpop.f32.mrb[35].mxu0  ;;  %v618_v51 = vadd.f32 %v1433_v34, %v564_v44  ;;  %v1195_v53 = vpop.f32.mrb[35].mxu1 }
 0x120   :  { %v565_v52 = vmul.f32 %v1428_v32, %v490_v47 }
 0x121   :  { %v641_v54 = vmax.f32 %v592_v48, 0.0  ;;  %v593_v55 = vadd.f32 %v1433_v34, %v539_v49  ;;  %v667_v56 = vmax.f32 %v618_v51, 0.0 }
 0x122   :  { %v619_v57 = vadd.f32 %v1433_v34, %v565_v52 }
 0x123   :  { %v1044_v58 = vpack.c.bf16 %v641_v54, %v641_v54  ;;  %v642_v59 = vmax.f32 %v593_v55, 0.0  ;;  %v1070_v60 = vpack.c.bf16 %v667_v56, %v667_v56 }
 0x124   :  { %v668_v61 = vmax.f32 %v619_v57, 0.0  ;;  %v391_v62 = vpop.f32.mrb[36].mxu0  ;;  %v495_v63 = vpop.f32.mrb[36].mxu1 }
 0x125   :  { %888 = vst.msk [vmem:[%s1732_s3 + $0x40] sm:$0xf] %vm871_vm4, %v1044_v58  ;;  %v1045_v0 = vpack.c.bf16 %v642_v59, %v642_v59  ;;  %914 = vst.msk [vmem:[%s1732_s3 + $0xa8] sm:$0xf] %vm871_vm4, %v1070_v60  ;;  %v540_v1 = vmul.f32 %v1428_v32, %v391_v62  ;;  %v1146_v2 = vpop.f32.mrb[37].mxu0  ;;  %v566_v4 = vmul.f32 %v1428_v32, %v495_v63  ;;  %v1198_v5 = vpop.f32.mrb[37].mxu1 }
 0x126   :  { %v1071_v3 = vpack.c.bf16 %v668_v61, %v668_v61  ;;  %v394_v6 = vpop.f32.mrb[38].mxu0  ;;  %v498_v7 = vpop.f32.mrb[38].mxu1 }
 0x127   :  { %889 = vst.msk [vmem:[%s1732_s3 + $0x44] sm:$0xf] %vm871_vm4, %v1045_v0  ;;  %v594_v8 = vadd.f32 %v1433_v34, %v540_v1  ;;  %v541_v9 = vmul.f32 %v1428_v32, %v394_v6  ;;  %v1147_v10 = vpop.f32.mrb[39].mxu0  ;;  %v620_v11 = vadd.f32 %v1433_v34, %v566_v4  ;;  %v567_v12 = vmul.f32 %v1428_v32, %v498_v7  ;;  %v1199_v13 = vpop.f32.mrb[39].mxu1 }
 0x128   :  { %915 = vst.msk [vmem:[%s1732_s3 + $0xac] sm:$0xf] %vm871_vm4, %v1071_v3 }
 0x129   :  { %v643_v14 = vmax.f32 %v594_v8, 0.0  ;;  %v595_v15 = vadd.f32 %v1433_v34, %v541_v9  ;;  %v669_v16 = vmax.f32 %v620_v11, 0.0  ;;  %v621_v17 = vadd.f32 %v1433_v34, %v567_v12 }
 0x12b   :  { %v1046_v18 = vpack.c.bf16 %v643_v14, %v643_v14  ;;  %v644_v19 = vmax.f32 %v595_v15, 0.0  ;;  %v1072_v20 = vpack.c.bf16 %v669_v16, %v669_v16  ;;  %v670_v21 = vmax.f32 %v621_v17, 0.0 }
 0x12c   :  { %v399_v22 = vpop.f32.mrb[40].mxu0  ;;  %v503_v23 = vpop.f32.mrb[40].mxu1 }
 0x12d   :  { %890 = vst.msk [vmem:[%s1732_s3 + $0x48] sm:$0xf] %vm871_vm4, %v1046_v18  ;;  %v1047_v24 = vpack.c.bf16 %v644_v19, %v644_v19  ;;  %916 = vst.msk [vmem:[%s1732_s3 + $0xb0] sm:$0xf] %vm871_vm4, %v1072_v20  ;;  %v542_v25 = vmul.f32 %v1428_v32, %v399_v22  ;;  %v1150_v26 = vpop.f32.mrb[41].mxu0  ;;  %v1073_v27 = vpack.c.bf16 %v670_v21, %v670_v21  ;;  %v1202_v29 = vpop.f32.mrb[41].mxu1 }
 0x12e   :  { %v568_v28 = vmul.f32 %v1428_v32, %v503_v23  ;;  %v402_v30 = vpop.f32.mrb[42].mxu0  ;;  %v506_v31 = vpop.f32.mrb[42].mxu1 }
 0x12f   :  { %891 = vst.msk [vmem:[%s1732_s3 + $0x4c] sm:$0xf] %vm871_vm4, %v1047_v24  ;;  %v596_v33 = vadd.f32 %v1433_v34, %v542_v25  ;;  %917 = vst.msk [vmem:[%s1732_s3 + $0xb4] sm:$0xf] %vm871_vm4, %v1073_v27  ;;  %v543_v35 = vmul.f32 %v1428_v32, %v402_v30  ;;  %v1151_v36 = vpop.f32.mrb[43].mxu0  ;;  %v569_v38 = vmul.f32 %v1428_v32, %v506_v31  ;;  %v1203_v39 = vpop.f32.mrb[43].mxu1 }
 0x130   :  { %v622_v37 = vadd.f32 %v1433_v34, %v568_v28 }
 0x131   :  { %v645_v40 = vmax.f32 %v596_v33, 0.0  ;;  %v597_v41 = vadd.f32 %v1433_v34, %v543_v35  ;;  %v623_v43 = vadd.f32 %v1433_v34, %v569_v38 }
 0x132   :  { %v671_v42 = vmax.f32 %v622_v37, 0.0 }
 0x133   :  { %v1048_v44 = vpack.c.bf16 %v645_v40, %v645_v40  ;;  %v646_v45 = vmax.f32 %v597_v41, 0.0  ;;  %v672_v47 = vmax.f32 %v623_v43, 0.0 }
 0x134   :  { %v1074_v46 = vpack.c.bf16 %v671_v42, %v671_v42  ;;  %v407_v48 = vpop.f32.mrb[44].mxu0  ;;  %v511_v49 = vpop.f32.mrb[44].mxu1 }
 0x135   :  { %892 = vst.msk [vmem:[%s1732_s3 + $0x50] sm:$0xf] %vm871_vm4, %v1048_v44  ;;  %v1049_v50 = vpack.c.bf16 %v646_v45, %v646_v45  ;;  %v544_v51 = vmul.f32 %v1428_v32, %v407_v48  ;;  %v1154_v52 = vpop.f32.mrb[45].mxu0  ;;  %v1075_v53 = vpack.c.bf16 %v672_v47, %v672_v47  ;;  %v570_v54 = vmul.f32 %v1428_v32, %v511_v49  ;;  %v1206_v55 = vpop.f32.mrb[45].mxu1 }
 0x136   :  { %918 = vst.msk [vmem:[%s1732_s3 + $0xb8] sm:$0xf] %vm871_vm4, %v1074_v46  ;;  %v410_v56 = vpop.f32.mrb[46].mxu0  ;;  %v514_v57 = vpop.f32.mrb[46].mxu1 }
 0x137   :  { %893 = vst.msk [vmem:[%s1732_s3 + $0x54] sm:$0xf] %vm871_vm4, %v1049_v50  ;;  %v598_v58 = vadd.f32 %v1433_v34, %v544_v51  ;;  %919 = vst.msk [vmem:[%s1732_s3 + $0xbc] sm:$0xf] %vm871_vm4, %v1075_v53  ;;  %v545_v59 = vmul.f32 %v1428_v32, %v410_v56  ;;  %v1155_v60 = vpop.f32.mrb[47].mxu0  ;;  %v624_v61 = vadd.f32 %v1433_v34, %v570_v54  ;;  %v1207_v62 = vpop.f32.mrb[47].mxu1 }
 0x139   :  { %v647_v63 = vmax.f32 %v598_v58, 0.0  ;;  %v599_v0 = vadd.f32 %v1433_v34, %v545_v59  ;;  %v673_v1 = vmax.f32 %v624_v61, 0.0 }
 0x13b   :  { %v1050_v2 = vpack.c.bf16 %v647_v63, %v647_v63  ;;  %v648_v3 = vmax.f32 %v599_v0, 0.0  ;;  %v1076_v4 = vpack.c.bf16 %v673_v1, %v673_v1 }
 0x13c   :  { %v415_v5 = vpop.f32.mrb[48].mxu0 }
 0x13d   :  { %894 = vst.msk [vmem:[%s1732_s3 + $0x58] sm:$0xf] %vm871_vm4, %v1050_v2  ;;  %v1051_v6 = vpack.c.bf16 %v648_v3, %v648_v3  ;;  %920 = vst.msk [vmem:[%s1732_s3 + $0xc0] sm:$0xf] %vm871_vm4, %v1076_v4  ;;  %v546_v7 = vmul.f32 %v1428_v32, %v415_v5  ;;  %v1158_v8 = vpop.f32.mrb[49].mxu0 }
 0x13e   :  { %v418_v9 = vpop.f32.mrb[50].mxu0 }
 0x13f   :  { %895 = vst.msk [vmem:[%s1732_s3 + $0x5c] sm:$0xf] %vm871_vm4, %v1051_v6  ;;  %v600_v10 = vadd.f32 %v1433_v34, %v546_v7  ;;  %v547_v11 = vmul.f32 %v1428_v32, %v418_v9  ;;  %v1159_v12 = vpop.f32.mrb[51].mxu0 }
 0x141   :  { %v649_v13 = vmax.f32 %v600_v10, 0.0  ;;  %v601_v14 = vadd.f32 %v1433_v34, %v547_v11 }
 0x143   :  { %v1052_v15 = vpack.c.bf16 %v649_v13, %v649_v13  ;;  %v650_v16 = vmax.f32 %v601_v14, 0.0 }
 0x145   :  { %896 = vst.msk [vmem:[%s1732_s3 + $0x60] sm:$0xf] %vm871_vm4, %v1052_v15  ;;  %v1053_v17 = vpack.c.bf16 %v650_v16, %v650_v16 }
 0x147   :  { %897 = vst.msk [vmem:[%s1732_s3 + $0x64] sm:$0xf] %vm871_vm4, %v1053_v17 }

// kernel: autoencoder_forward.16
= control target key start
LH: loop header
LB: loop body
LE: loop exit
PB: predicated region body
PF: predicated region fallthrough
CT: control target
= control target key end

     0   :  { %vm215_vm0 = vcmask 1014784   ;;  %vm237_vm1 = vcmask 1045504   ;;  %vm431_vm2 = vcmask 60416   ;;  %vm444_vm3 = vcmask 57344   ;;  %s828_s1 = inlined_call_operand.vmem [shape: bf16[252,8], index: 1, kind: input, shape index: {}]   ;;  %s829_s0 = inlined_call_operand.vmem [shape: bf16[98,252], index: 0, kind: input, shape index: {}]   ;;  %s830_s2 = inlined_call_operand.vmem [shape: f32[2,8], index: 2, kind: input, shape index: {}]   ;;  %s831_s3 = inlined_call_operand.vmem [shape: bf16[98,8], index: 3, kind: output, shape index: {}]  }
   0x1   :  { %v591_v0 = vld [vmem:[%s828_s1 + $0x40] sm:$0xff]   ;;  %v593_v2 = vld [vmem:[%s828_s1 + $0x48] sm:$0xff]   ;;  %v595_v4 = vld [vmem:[%s828_s1 + $0x50] sm:$0xff]  }
   0x2   :  { %v592_v1 = vld [vmem:[%s828_s1] sm:$0xff]   ;;  %515 = vmatprep.subr.bf16.mxu0 %v591_v0  ;;  %573 = vmatprep.subr.bf16.mxu1 %v591_v0  ;;  %v594_v3 = vld [vmem:[%s828_s1 + $0x8] sm:$0xff]   ;;  %v596_v5 = vld [vmem:[%s828_s1 + $0x10] sm:$0xff]  }
   0x3   :  { %516 = vmatpush3.bf16.msra.mxu0 %v592_v1  ;;  %581 = vmatpush3.bf16.msra.mxu1 %v592_v1  ;;  %v597_v6 = vld [vmem:[%s828_s1 + $0x58] sm:$0xff]   ;;  %v599_v8 = vld [vmem:[%s828_s1 + $0x60] sm:$0xff]   ;;  %v601_v10 = vld [vmem:[%s828_s1 + $0x68] sm:$0xff]  }
   0x4   :  { %517 = vmatprep.subr.bf16.mxu0 %v593_v2  ;;  %574 = vmatprep.subr.bf16.mxu1 %v593_v2  ;;  %v598_v7 = vld [vmem:[%s828_s1 + $0x18] sm:$0xff]   ;;  %v600_v9 = vld [vmem:[%s828_s1 + $0x20] sm:$0xff]   ;;  %v602_v13 = vld [vmem:[%s828_s1 + $0x28] sm:$0xff]  }
   0x5   :  { %v609_v11 = vld [vmem:[%s829_s0 + $0x4] ss:$8 sps:$4 sm:$0xff]   ;;  %v603_v14 = vld [vmem:[%s828_s1 + $0x70] sm:$0xff]   ;;  %v605_v16 = vld [vmem:[%s828_s1 + $0x78] sm:$0x3f]  }
   0x6   :  { %v612_v12 = vld [vmem:[%s829_s0 + $0x44] ss:$8 sps:$4 sm:$0xff]   ;;  %480 = vmatprep.mubr.msk.bf16.mxu0 %vm215_vm0, %v609_v11  ;;  %v604_v15 = vld [vmem:[%s828_s1 + $0x30] sm:$0xff]   ;;  %v606_v17 = vld [vmem:[%s828_s1 + $0x38] sm:$0xff]  }
   0x7   :  { %518 = vmatpush3.bf16.msra.mxu0 %v594_v3  ;;  %582 = vmatpush3.bf16.msra.mxu1 %v594_v3  ;;  %v607_v18 = vld [vmem:[%s829_s0] ss:$8 sps:$4 sm:$0xff]   ;;  %v613_v20 = vld [vmem:[%s829_s0 + $0x14] ss:$8 sps:$4 sm:$0xff]   ;;  %v615_v23 = vld [vmem:[%s829_s0 + $0x10] ss:$8 sps:$4 sm:$0xff]  }
   0x8   :  { %519 = vmatprep.subr.bf16.mxu0 %v595_v4  ;;  %575 = vmatprep.subr.bf16.mxu1 %v595_v4  ;;  %v610_v19 = vld [vmem:[%s829_s0 + $0x40] ss:$8 sps:$4 sm:$0xff]   ;;  %v616_v21 = vld [vmem:[%s829_s0 + $0x54] ss:$8 sps:$4 sm:$0xff]   ;;  %v620_v24 = vld [vmem:[%s829_s0 + $0x50] ss:$8 sps:$4 sm:$0xff]  }
   0x9   :  { %484 = vmatprep.mubr.msk.bf16.mxu1 %vm215_vm0, %v612_v12  ;;  %v27_v22 = vld [vmem:[%s829_s0 + $0x60] sm:$0x11]  ;;  %v623_v29 = vld [vmem:[%s829_s0 + $0x34] ss:$8 sps:$4 sm:$0xff]   ;;  %v626_v30 = vld [vmem:[%s829_s0 + $0x30] ss:$8 sps:$4 sm:$0xff]  }
   0xa   :  { %v618_v25 = vld [vmem:[%s829_s0 + $0x24] ss:$8 sps:$4 sm:$0xff]   ;;  %v463_v26 = vcombine.high %v27_v22, %v27_v22  ;;  %v621_v27 = vld [vmem:[%s829_s0 + $0x20] ss:$8 sps:$4 sm:$0xff]   ;;  %v462_v28 = vcombine.low %v27_v22, %v27_v22 }
   0xb   :  { %520 = vmatpush3.bf16.msra.mxu0 %v596_v5  ;;  %583 = vmatpush3.bf16.msra.mxu1 %v596_v5  ;;  %v744_v34 = vld [vmem:[%s830_s2] ss:$0 sm:$0xff]  ;;  %v749_v40 = vld [vmem:[%s830_s2 + $0x1] ss:$0 sm:$0xff] }
   0xc   :  { %521 = vmatprep.subr.bf16.mxu0 %v597_v6  ;;  %576 = vmatprep.subr.bf16.mxu1 %v597_v6 }
   0xf   :  { %522 = vmatpush3.bf16.msra.mxu0 %v598_v7  ;;  %584 = vmatpush3.bf16.msra.mxu1 %v598_v7 }
  0x10   :  { %523 = vmatprep.subr.bf16.mxu0 %v599_v8  ;;  %577 = vmatprep.subr.bf16.mxu1 %v599_v8 }
  0x13   :  { %524 = vmatpush3.bf16.msra.mxu0 %v600_v9  ;;  %585 = vmatpush3.bf16.msra.mxu1 %v600_v9 }
  0x14   :  { %525 = vmatprep.subr.bf16.mxu0 %v601_v10  ;;  %578 = vmatprep.subr.bf16.mxu1 %v601_v10 }
  0x17   :  { %526 = vmatpush3.bf16.msra.mxu0 %v602_v13  ;;  %586 = vmatpush3.bf16.msra.mxu1 %v602_v13 }
  0x18   :  { %527 = vmatprep.subr.bf16.mxu0 %v603_v14  ;;  %579 = vmatprep.subr.bf16.mxu1 %v603_v14 }
  0x1b   :  { %528 = vmatpush3.bf16.msra.mxu0 %v604_v15  ;;  %587 = vmatpush3.bf16.msra.mxu1 %v604_v15 }
  0x1c   :  { %589 = vmatprep.subr.msk.bf16.mxu0 %vm237_vm1, %v605_v16  ;;  %590 = vmatprep.subr.msk.bf16.mxu1 %vm237_vm1, %v605_v16 }
  0x1f   :  { %530 = vmatpush3.bf16.msra.mxu0 %v606_v17  ;;  %588 = vmatpush3.bf16.msra.mxu1 %v606_v17 }
  0x22   :  { %274 = vmatmul.mubr.bf16.vlgmr.msra.gmra.mrb[0].mxu0 %v607_v18  ;;  %306 = vmatmul.mubr.bf16.vlgmr.msra.gmra.mrb[0].mxu1 %v610_v19 }
  0x23   :  { %481 = vmatprep.mubr.msk.bf16.mxu0 %vm215_vm0, %v613_v20  ;;  %485 = vmatprep.mubr.msk.bf16.mxu1 %vm215_vm0, %v616_v21 }
  0x2a   :  { %282 = vmatmul.mubr.bf16.gmra.mrb[4].mxu0 %v615_v23  ;;  %314 = vmatmul.mubr.bf16.gmra.mrb[4].mxu1 %v620_v24 }
  0x2b   :  { %482 = vmatprep.mubr.msk.bf16.mxu0 %vm215_vm0, %v618_v25  ;;  %486 = vmatprep.mubr.msk.bf16.mxu1 %vm215_vm0, %v463_v26 }
  0x32   :  { %290 = vmatmul.mubr.bf16.gmra.mrb[8].mxu0 %v621_v27  ;;  %322 = vmatmul.mubr.bf16.gmra.mrb[8].mxu1 %v462_v28 }
  0x33   :  { %483 = vmatprep.mubr.msk.bf16.mxu0 %vm215_vm0, %v623_v29 }
  0x3a   :  { %298 = vmatmul.mubr.bf16.gmra.mrb[12].mxu0 %v626_v30 }
  0xf5   :  { %v531_v31 = vpop.f32.mrb[0].mxu0  ;;  %v555_v32 = vpop.f32.mrb[0].mxu1 }
  0xf6   :  { %v532_v33 = vpop.f32.mrb[1].mxu0  ;;  %v556_v35 = vpop.f32.mrb[1].mxu1 }
  0xf7   :  { %v533_v36 = vadd.f32 %v532_v33, %v531_v31  ;;  %v534_v37 = vpop.f32.mrb[2].mxu0  ;;  %v557_v38 = vadd.f32 %v556_v35, %v555_v32  ;;  %v558_v39 = vpop.f32.mrb[2].mxu1 }
  0xf8   :  { %v535_v41 = vpop.f32.mrb[3].mxu0  ;;  %v559_v42 = vpop.f32.mrb[3].mxu1 }
  0xf9   :  { %v334_v43 = vmul.f32 %v533_v36, %v744_v34  ;;  %v536_v44 = vadd.f32 %v535_v41, %v534_v37  ;;  %v342_v45 = vmul.f32 %v557_v38, %v744_v34  ;;  %v560_v46 = vadd.f32 %v559_v42, %v558_v39 }
  0xfb   :  { %v352_v47 = vadd.f32 %v749_v40, %v334_v43  ;;  %v335_v48 = vmul.f32 %v536_v44, %v744_v34  ;;  %v360_v49 = vadd.f32 %v749_v40, %v342_v45  ;;  %v343_v50 = vmul.f32 %v560_v46, %v744_v34 }
  0xfd   :  { %v365_v51 = vmax.f32 %v352_v47, 0.0  ;;  %v353_v52 = vadd.f32 %v749_v40, %v335_v48  ;;  %v537_v53 = vpop.f32.mrb[4].mxu0  ;;  %v373_v54 = vmax.f32 %v360_v49, 0.0  ;;  %v361_v55 = vadd.f32 %v749_v40, %v343_v50  ;;  %v561_v56 = vpop.f32.mrb[4].mxu1 }
  0xfe   :  { %v538_v57 = vpop.f32.mrb[5].mxu0  ;;  %v562_v58 = vpop.f32.mrb[5].mxu1 }
  0xff   :  { %v502_v59 = vpack.c.bf16 %v365_v51, %v365_v51  ;;  %v366_v60 = vmax.f32 %v353_v52, 0.0  ;;  %v510_v61 = vpack.c.bf16 %v373_v54, %v373_v54  ;;  %v539_v62 = vadd.f32 %v538_v57, %v537_v53  ;;  %v540_v63 = vpop.f32.mrb[6].mxu0  ;;  %v564_v0 = vpop.f32.mrb[6].mxu1 }
 0x100   :  { %v374_v1 = vmax.f32 %v361_v55, 0.0  ;;  %v541_v2 = vpop.f32.mrb[7].mxu0  ;;  %v563_v3 = vadd.f32 %v562_v58, %v561_v56  ;;  %v565_v4 = vpop.f32.mrb[7].mxu1 }
 0x101   :  { %432 = vst.msk [vmem:[%s831_s3] sm:$0xf] %vm431_vm2, %v502_v59  ;;  %v503_v5 = vpack.c.bf16 %v366_v60, %v366_v60  ;;  %440 = vst.msk [vmem:[%s831_s3 + $0x20] sm:$0xf] %vm431_vm2, %v510_v61  ;;  %v336_v6 = vmul.f32 %v539_v62, %v744_v34  ;;  %v542_v7 = vadd.f32 %v541_v2, %v540_v63 }
 0x102   :  { %v566_v8 = vadd.f32 %v565_v4, %v564_v0  ;;  %v511_v9 = vpack.c.bf16 %v374_v1, %v374_v1  ;;  %v344_v10 = vmul.f32 %v563_v3, %v744_v34 }
 0x103   :  { %433 = vst.msk [vmem:[%s831_s3 + $0x4] sm:$0xf] %vm431_vm2, %v503_v5  ;;  %v354_v11 = vadd.f32 %v749_v40, %v336_v6  ;;  %v337_v12 = vmul.f32 %v542_v7, %v744_v34 }
 0x104   :  { %v345_v13 = vmul.f32 %v566_v8, %v744_v34  ;;  %441 = vst.msk [vmem:[%s831_s3 + $0x24] sm:$0xf] %vm431_vm2, %v511_v9  ;;  %v362_v14 = vadd.f32 %v749_v40, %v344_v10 }
 0x105   :  { %v367_v15 = vmax.f32 %v354_v11, 0.0  ;;  %v355_v16 = vadd.f32 %v749_v40, %v337_v12  ;;  %v543_v17 = vpop.f32.mrb[8].mxu0  ;;  %v567_v19 = vpop.f32.mrb[8].mxu1 }
 0x106   :  { %v363_v18 = vadd.f32 %v749_v40, %v345_v13  ;;  %v375_v20 = vmax.f32 %v362_v14, 0.0  ;;  %v544_v21 = vpop.f32.mrb[9].mxu0  ;;  %v568_v22 = vpop.f32.mrb[9].mxu1 }
 0x107   :  { %v504_v23 = vpack.c.bf16 %v367_v15, %v367_v15  ;;  %v368_v24 = vmax.f32 %v355_v16, 0.0  ;;  %v545_v25 = vadd.f32 %v544_v21, %v543_v17  ;;  %v546_v26 = vpop.f32.mrb[10].mxu0  ;;  %v570_v28 = vpop.f32.mrb[10].mxu1  ;;  %v569_v31 = vadd.f32 %v568_v22, %v567_v19 }
 0x108   :  { %v376_v27 = vmax.f32 %v363_v18, 0.0  ;;  %v512_v29 = vpack.c.bf16 %v375_v20, %v375_v20  ;;  %v547_v30 = vpop.f32.mrb[11].mxu0  ;;  %v571_v32 = vpop.f32.mrb[11].mxu1 }
 0x109   :  { %434 = vst.msk [vmem:[%s831_s3 + $0x8] sm:$0xf] %vm431_vm2, %v504_v23  ;;  %v505_v33 = vpack.c.bf16 %v368_v24, %v368_v24  ;;  %v338_v35 = vmul.f32 %v545_v25, %v744_v34  ;;  %v548_v37 = vadd.f32 %v547_v30, %v546_v26  ;;  %v346_v38 = vmul.f32 %v569_v31, %v744_v34 }
 0x10a   :  { %v513_v36 = vpack.c.bf16 %v376_v27, %v376_v27  ;;  %442 = vst.msk [vmem:[%s831_s3 + $0x28] sm:$0xf] %vm431_vm2, %v512_v29 }
 0x10b   :  { %435 = vst.msk [vmem:[%s831_s3 + $0xc] sm:$0xf] %vm431_vm2, %v505_v33  ;;  %v356_v39 = vadd.f32 %v749_v40, %v338_v35  ;;  %v339_v41 = vmul.f32 %v548_v37, %v744_v34  ;;  %v364_v42 = vadd.f32 %v749_v40, %v346_v38 }
 0x10c   :  { %443 = vst.msk [vmem:[%s831_s3 + $0x2c] sm:$0xf] %vm431_vm2, %v513_v36 }
 0x10d   :  { %v369_v43 = vmax.f32 %v356_v39, 0.0  ;;  %v357_v44 = vadd.f32 %v749_v40, %v339_v41  ;;  %v549_v45 = vpop.f32.mrb[12].mxu0  ;;  %v377_v46 = vmax.f32 %v364_v42, 0.0 }
 0x10e   :  { %v550_v47 = vpop.f32.mrb[13].mxu0 }
 0x10f   :  { %v506_v48 = vpack.c.bf16 %v369_v43, %v369_v43  ;;  %v370_v49 = vmax.f32 %v357_v44, 0.0  ;;  %v551_v50 = vadd.f32 %v550_v47, %v549_v45  ;;  %v552_v51 = vpop.f32.mrb[14].mxu0  ;;  %v514_v52 = vpack.c.bf16 %v377_v46, %v377_v46 }
 0x110   :  { %v553_v53 = vpop.f32.mrb[15].mxu0 }
 0x111   :  { %436 = vst.msk [vmem:[%s831_s3 + $0x10] sm:$0xf] %vm431_vm2, %v506_v48  ;;  %v507_v54 = vpack.c.bf16 %v370_v49, %v370_v49  ;;  %v340_v55 = vmul.f32 %v551_v50, %v744_v34  ;;  %v554_v56 = vadd.f32 %v553_v53, %v552_v51 }
 0x112   :  { %445 = vst.msk [vmem:[%s831_s3 + $0x30] sm:$0x1] %vm444_vm3, %v514_v52 }
 0x113   :  { %437 = vst.msk [vmem:[%s831_s3 + $0x14] sm:$0xf] %vm431_vm2, %v507_v54  ;;  %v358_v57 = vadd.f32 %v749_v40, %v340_v55  ;;  %v341_v58 = vmul.f32 %v554_v56, %v744_v34 }
 0x115   :  { %v371_v59 = vmax.f32 %v358_v57, 0.0  ;;  %v359_v60 = vadd.f32 %v749_v40, %v341_v58 }
 0x117   :  { %v508_v61 = vpack.c.bf16 %v371_v59, %v371_v59  ;;  %v372_v62 = vmax.f32 %v359_v60, 0.0 }
 0x119   :  { %438 = vst.msk [vmem:[%s831_s3 + $0x18] sm:$0xf] %vm431_vm2, %v508_v61  ;;  %v509_v63 = vpack.c.bf16 %v372_v62, %v372_v62 }
 0x11b   :  { %439 = vst.msk [vmem:[%s831_s3 + $0x1c] sm:$0xf] %vm431_vm2, %v509_v63 }

// kernel: autoencoder_forward.17
= control target key start
LH: loop header
LB: loop body
LE: loop exit
PB: predicated region body
PF: predicated region fallthrough
CT: control target
= control target key end

     0   :  { %vm65_vm0 = vcmask 588800   ;;  %vm72_vm1 = vcmask 1043456   ;;  %vm163_vm2 = vcmask 27648   ;;  %s279_s1 = inlined_call_operand.vmem [shape: bf16[72,4], index: 1, kind: input, shape index: {}]   ;;  %s280_s0 = inlined_call_operand.vmem [shape: bf16[32,72], index: 0, kind: input, shape index: {}]   ;;  %s281_s2 = inlined_call_operand.vmem [shape: f32[2,4], index: 2, kind: input, shape index: {}]   ;;  %s282_s3 = inlined_call_operand.vmem [shape: bf16[32,4], index: 3, kind: output, shape index: {}]  }
   0x1   :  { %v213_v0 = vld [vmem:[%s279_s1] sm:$0xff]   ;;  %v214_v1 = vld [vmem:[%s279_s1 + $0x8] sm:$0xff]   ;;  %v215_v2 = vld [vmem:[%s279_s1 + $0x10] sm:$0xff]  }
   0x2   :  { %198 = vmatprep.subr.bf16.mxu0 %v213_v0  ;;  %v218_v3 = vld [vmem:[%s280_s0] sm:$0xff]   ;;  %v216_v4 = vld [vmem:[%s279_s1 + $0x18] sm:$0xff]   ;;  %v219_v7 = vld [vmem:[%s280_s0 + $0x8] sm:$0xff]  }
   0x3   :  { %199 = vmatpush3.bf16.msra.mxu0 %v213_v0  ;;  %208 = vmatprep.mubr.msk.bf16.mxu0 %vm65_vm0, %v218_v3  ;;  %v217_v5 = vld [vmem:[%s279_s1 + $0x20] ss:$0 sps:$4 sm:$0xff]   ;;  %v182_v10 = vld [vmem:[%s281_s2 + $0x1] ss:$0 sm:$0xff] }
   0x4   :  { %200 = vmatprep.subr.bf16.mxu0 %v214_v1  ;;  %v74_v6 = vsel %vm72_vm1, %v217_v5, 0  ;;  %v181_v8 = vld [vmem:[%s281_s2] ss:$0 sm:$0xff] }
   0x7   :  { %201 = vmatpush3.bf16.msra.mxu0 %v214_v1 }
   0x8   :  { %202 = vmatprep.subr.bf16.mxu0 %v215_v2 }
   0xb   :  { %203 = vmatpush3.bf16.msra.mxu0 %v215_v2 }
   0xc   :  { %204 = vmatprep.subr.bf16.mxu0 %v216_v4 }
   0xf   :  { %205 = vmatpush3.bf16.msra.mxu0 %v216_v4 }
  0x10   :  { %212 = vmatprep.subr.msk.bf16.mxu0 %vm72_vm1, %v217_v5 }
  0x13   :  { %207 = vmatpush3.bf16.msra.mxu0 %v74_v6 }
  0x16   :  { %209 = vmatmul.mubr.msk.bf16.vlgmr.msra.gmra.mrb[0].mxu0 %vm65_vm0, %v219_v7 }
  0xe9   :  { %v210_v9 = vpop.f32.mrb[0].mxu0 }
  0xea   :  { %v132_v11 = vmul.f32 %v210_v9, %v181_v8  ;;  %v110_v12 = vpop.f32.mrb[1].mxu0 }
  0xeb   :  { %v130_v13 = vmul.f32 %v181_v8, %v110_v12  ;;  %v211_v14 = vpop.f32.mrb[2].mxu0 }
  0xec   :  { %v141_v15 = vadd.f32 %v182_v10, %v132_v11  ;;  %v133_v16 = vmul.f32 %v211_v14, %v181_v8  ;;  %v113_v17 = vpop.f32.mrb[3].mxu0 }
  0xed   :  { %v139_v18 = vadd.f32 %v182_v10, %v130_v13  ;;  %v131_v19 = vmul.f32 %v181_v8, %v113_v17 }
  0xee   :  { %v145_v20 = vmax.f32 %v141_v15, 0.0  ;;  %v142_v21 = vadd.f32 %v182_v10, %v133_v16 }
  0xef   :  { %v143_v22 = vmax.f32 %v139_v18, 0.0  ;;  %v140_v23 = vadd.f32 %v182_v10, %v131_v19 }
  0xf0   :  { %v189_v24 = vpack.c.bf16 %v145_v20, %v145_v20  ;;  %v146_v25 = vmax.f32 %v142_v21, 0.0 }
  0xf1   :  { %v187_v26 = vpack.c.bf16 %v143_v22, %v143_v22  ;;  %v144_v27 = vmax.f32 %v140_v23, 0.0 }
  0xf2   :  { %166 = vst.msk [vmem:[%s282_s3 + $0x8] sm:$0xf] %vm163_vm2, %v189_v24  ;;  %v190_v28 = vpack.c.bf16 %v146_v25, %v146_v25 }
  0xf3   :  { %164 = vst.msk [vmem:[%s282_s3] sm:$0xf] %vm163_vm2, %v187_v26  ;;  %v188_v29 = vpack.c.bf16 %v144_v27, %v144_v27 }
  0xf4   :  { %167 = vst.msk [vmem:[%s282_s3 + $0xc] sm:$0xf] %vm163_vm2, %v190_v28 }
  0xf5   :  { %165 = vst.msk [vmem:[%s282_s3 + $0x4] sm:$0xf] %vm163_vm2, %v188_v29 }

// kernel: autoencoder_forward.21
= control target key start
LH: loop header
LB: loop body
LE: loop exit
PB: predicated region body
PF: predicated region fallthrough
CT: control target
= control target key end

     0   :  { %v228_v0 = vmov 0.0   ;;  %vm229_vm0 = vmmov 0   ;;  %v230_v3 = vmov 0   ;;  %vm36_vm1 = vcmask 130048   ;;  %s273_s1 = inlined_call_operand.vmem [shape: bf16[16,288], index: 1, kind: input, shape index: {}]   ;;  %s274_s0 = inlined_call_operand.vmem [shape: bf16[2,16], index: 0, kind: input, shape index: {}]   ;;  %s275_s2 = inlined_call_operand.vmem [shape: f32[2,288], index: 2, kind: input, shape index: {}]   ;;  %s276_s3 = inlined_call_operand.vmem [shape: bf16[2,288], index: 3, kind: output, shape index: {}]  }
   0x1   :  { %214 = vmatprep.subr.bf16.mxu1 %v228_v0  ;;  %v224_v1 = vld [vmem:[%s273_s1 + $0x4] ss:$12 sps:$4 sm:$0xff]   ;;  %216 = vmatprep.mubr.msk.bf16.mxu1 %vm229_vm0, %v228_v0  ;;  %v226_v2 = vld [vmem:[%s273_s1 + $0x8] ss:$12 sps:$4 sm:$0xff]   ;;  %v227_v4 = vld [vmem:[%s273_s1] ss:$12 sps:$4 sm:$0xff]   ;;  %v123_v6 = vlaneseq }
   0x2   :  { %72 = vmatprep.mubr.bf16.mxu0 %v230_v3  ;;  %40 = vmatprep.subr.bf16.mxu0 %v224_v1  ;;  %v15_v5 = vld [vmem:[%s274_s0] sm:$0x1]  ;;  %v210_v12 = vld [vmem:[%s275_s2 + $0x1] ss:$2 sm:$0x7]  ;;  %vm195_vm2 = vcmask 1040384  }
   0x3   :  { %215 = vmatpush3.bf16.msra.mxu1 %v226_v2  ;;  %41 = vmatpush1.bf16.msra.mxu0 %v227_v4  ;;  %v124_v7 = vshrl.u32 %v123_v6, 7  ;;  %v121_v9 = vld [vmem:[%s275_s2] ss:$2 sm:$0x7]  ;;  %v231_v14 = vmov 1966171168  }
   0x4   :  { %v173_v15 = vunpack.c.l.s4 %v231_v14  ;;  %vm196_vm3 = vcmask 1041409   ;;  %vm198_vm5 = vcmask 256002  }
   0x5   :  { %v133_v8 = vsub.s32 2, %v124_v7  ;;  %v125_v10 = vsub.s32 0, %v124_v7  ;;  %v129_v11 = vsub.s32 1, %v124_v7  ;;  %vm197_vm4 = vmor %vm196_vm3, %vm195_vm2 }
   0x6   :  { %217 = vmatmul.mubr.msk.bf16.vlgmr.msra.gmra.mrb[0].mxu1 %vm36_vm1, %v15_v5  ;;  %208 = vmatmul.mubr.msk.bf16.vlgmr.msra.gmra.mrb[0].mxu0 %vm36_vm1, %v15_v5  ;;  %v174_v22 = vunpack.c.0.s8 %v173_v15  ;;  %vm199_vm6 = vmor %vm198_vm5, %vm197_vm4 }
   0x7   :  { %v134_v13 = vrot.slane %v121_v9, %v133_v8  ;;  %v126_v16 = vrot.slane %v121_v9, %v125_v10  ;;  %v155_v17 = vrot.slane %v210_v12, %v133_v8  ;;  %v130_v18 = vrot.slane %v121_v9, %v129_v11 }
   0x8   :  { %v147_v20 = vrot.slane %v210_v12, %v125_v10  ;;  %v151_v25 = vrot.slane %v210_v12, %v129_v11  ;;  %v177_v36 = vsub.s32 %v174_v22, %v124_v7 }
  0xd9   :  { %v115_v19 = vpop.f32.mrb[0].mxu1  ;;  %v74_v23 = vpop.f32.mrb[0].mxu0 }
  0xda   :  { %v140_v21 = vmul.f32 %v134_v13, %v115_v19  ;;  %v218_v24 = vpop.f32.mrb[1].mxu1  ;;  %v138_v26 = vmul.f32 %v126_v16, %v74_v23  ;;  %v76_v27 = vpop.f32.mrb[1].mxu0 }
  0xdb   :  { %v118_v28 = vpop.f32.mrb[2].mxu1  ;;  %v139_v30 = vmul.f32 %v130_v18, %v76_v27  ;;  %v78_v31 = vpop.f32.mrb[2].mxu0 }
  0xdc   :  { %v161_v29 = vadd.f32 %v155_v17, %v140_v21  ;;  %v219_v32 = vpop.f32.mrb[3].mxu1  ;;  %v159_v33 = vadd.f32 %v147_v20, %v138_v26  ;;  %v79_v34 = vpop.f32.mrb[3].mxu0 }
  0xdd   :  { %v160_v37 = vadd.f32 %v151_v25, %v139_v30 }
  0xde   :  { %v164_v35 = vmax.f32 %v161_v29, 0.0  ;;  %v162_v38 = vmax.f32 %v159_v33, 0.0 }
  0xdf   :  { %v163_v40 = vmax.f32 %v160_v37, 0.0 }
  0xe0   :  { %v167_v39 = vpack.c.bf16 %v164_v35, %v164_v35 }
  0xe1   :  { %v211_v42 = vpack.c.bf16 %v163_v40, %v162_v38 }
  0xe2   :  { %v185_v41 = vrot.slane %v167_v39, %v177_v36 }
  0xe3   :  { %v178_v43 = vrot.slane %v211_v42, %v177_v36 }
  0xe5   :  { %v186_v44 = vcombine.low %v178_v43, %v185_v41 }
  0xe7   :  { %v193_v45 = vrot.slane %v186_v44, %v177_v36 }
  0xe9   :  { %200 = vst.msk [vmem:[%s276_s3] sm:$0x7] %vm199_vm6, %v193_v45 }

// kernel: autoencoder_forward.18
= control target key start
LH: loop header
LB: loop body
LE: loop exit
PB: predicated region body
PF: predicated region fallthrough
CT: control target
= control target key end

     0   :  { %v141_v0 = vmov 0.0   ;;  %vm142_vm0 = vmmov 0   ;;  %vm48_vm1 = vcmask 523264   ;;  %vm105_vm2 = vcmask 122880   ;;  %s187_s1 = inlined_call_operand.vmem [shape: bf16[64,16], index: 1, kind: input, shape index: {}]   ;;  %s188_s0 = inlined_call_operand.vmem [shape: bf16[2,64], index: 0, kind: input, shape index: {}]   ;;  %s189_s2 = inlined_call_operand.vmem [shape: f32[2,16], index: 2, kind: input, shape index: {}]   ;;  %s190_s3 = inlined_call_operand.vmem [shape: bf16[2,16], index: 3, kind: output, shape index: {}]  }
   0x1   :  { %123 = vmatprep.subr.bf16.mxu0 %v141_v0  ;;  %v137_v1 = vld [vmem:[%s187_s1] sm:$0xff]   ;;  %131 = vmatprep.mubr.msk.bf16.mxu0 %vm142_vm0, %v141_v0  ;;  %v138_v2 = vld [vmem:[%s187_s1 + $0x8] sm:$0xff]   ;;  %v139_v3 = vld [vmem:[%s187_s1 + $0x10] sm:$0xff]  }
   0x2   :  { %124 = vmatpush3.bf16.msra.mxu0 %v137_v1  ;;  %v140_v4 = vld [vmem:[%s187_s1 + $0x18] sm:$0xff]   ;;  %v15_v5 = vld [vmem:[%s188_s0] sm:$0x1]  ;;  %v117_v8 = vld [vmem:[%s189_s2 + $0x1] ss:$0 sm:$0xff] }
   0x3   :  { %125 = vmatprep.subr.bf16.mxu0 %v141_v0  ;;  %v116_v6 = vld [vmem:[%s189_s2] ss:$0 sm:$0xff] }
   0x6   :  { %126 = vmatpush3.bf16.msra.mxu0 %v138_v2 }
   0x7   :  { %127 = vmatprep.subr.bf16.mxu0 %v141_v0 }
   0xa   :  { %128 = vmatpush3.bf16.msra.mxu0 %v139_v3 }
   0xb   :  { %129 = vmatprep.subr.bf16.mxu0 %v141_v0 }
   0xe   :  { %130 = vmatpush3.bf16.msra.mxu0 %v140_v4 }
  0x11   :  { %132 = vmatmul.mubr.msk.bf16.vlgmr.msra.gmra.mrb[0].mxu0 %vm48_vm1, %v15_v5 }
  0xe4   :  { %v86_v7 = vpop.f32.mrb[0].mxu0 }
  0xe5   :  { %v97_v9 = vmul.f32 %v116_v6, %v86_v7  ;;  %v133_v10 = vpop.f32.mrb[1].mxu0 }
  0xe6   :  { %v89_v11 = vpop.f32.mrb[2].mxu0 }
  0xe7   :  { %v103_v12 = vadd.f32 %v117_v8, %v97_v9  ;;  %v134_v13 = vpop.f32.mrb[3].mxu0 }
  0xe9   :  { %v104_v14 = vpack.c.bf16 %v103_v12, %v103_v12 }
  0xeb   :  { %106 = vst.msk [vmem:[%s190_s3] sm:$0x1] %vm105_vm2, %v104_v14 }

// kernel: autoencoder_forward.22
= control target key start
LH: loop header
LB: loop body
LE: loop exit
PB: predicated region body
PF: predicated region fallthrough
CT: control target
= control target key end

     0   :  { %v360_v0 = vmov 0.0   ;;  %vm361_vm0 = vmmov 0   ;;  %vm99_vm1 = vcmask 1043456   ;;  %vm83_vm2 = vcmask 588800   ;;  %s459_s1 = inlined_call_operand.vmem [shape: bf16[72,16], index: 1, kind: input, shape index: {}]   ;;  %s460_s0 = inlined_call_operand.vmem [shape: bf16[72,72], index: 0, kind: input, shape index: {}]   ;;  %s461_s2 = inlined_call_operand.vmem [shape: f32[2,16], index: 2, kind: input, shape index: {}]   ;;  %s462_s3 = inlined_call_operand.vmem [shape: bf16[72,16], index: 3, kind: output, shape index: {}]  }
   0x1   :  { %308 = vmatprep.subr.bf16.mxu0 %v360_v0  ;;  %v350_v1 = vld [vmem:[%s459_s1] sm:$0xff]   ;;  %338 = vmatprep.subr.bf16.mxu1 %v360_v0  ;;  %v351_v2 = vld [vmem:[%s459_s1 + $0x8] sm:$0xff]   ;;  %v352_v3 = vld [vmem:[%s459_s1 + $0x10] sm:$0xff]   ;;  %vm249_vm3 = vcmask 125952  }
   0x2   :  { %318 = vmatprep.mubr.msk.bf16.mxu0 %vm361_vm0, %v360_v0  ;;  %330 = vmatprep.mubr.msk.bf16.mxu1 %vm361_vm0, %v360_v0  ;;  %v353_v4 = vld [vmem:[%s459_s1 + $0x18] sm:$0xff]   ;;  %v354_v5 = vld [vmem:[%s459_s1 + $0x20] ss:$0 sps:$4 sm:$0xff]   ;;  %v357_v9 = vld [vmem:[%s460_s0 + $0x8] sm:$0xff]  }
   0x3   :  { %309 = vmatpush3.bf16.msra.mxu0 %v350_v1  ;;  %343 = vmatpush3.bf16.msra.mxu1 %v350_v1  ;;  %v101_v6 = vsel %vm99_vm1, %v354_v5, 0  ;;  %v355_v7 = vld [vmem:[%s460_s0] sm:$0xff]   ;;  %v356_v8 = vld [vmem:[%s460_s0 + $0x18] sm:$0xff]   ;;  %v359_v11 = vld [vmem:[%s460_s0 + $0x10] sm:$0xff]  }
   0x4   :  { %310 = vmatprep.subr.bf16.mxu0 %v360_v0  ;;  %339 = vmatprep.subr.bf16.mxu1 %v360_v0  ;;  %v358_v10 = vld [vmem:[%s460_s0 + $0x20] ss:$0 sps:$4 sm:$0xff]   ;;  %v279_v14 = vld [vmem:[%s461_s2 + $0x1] ss:$0 sm:$0xff] }
   0x5   :  { %v278_v12 = vld [vmem:[%s461_s2] ss:$0 sm:$0xff] }
   0x7   :  { %311 = vmatpush3.bf16.msra.mxu0 %v351_v2  ;;  %344 = vmatpush3.bf16.msra.mxu1 %v351_v2 }
   0x8   :  { %312 = vmatprep.subr.bf16.mxu0 %v360_v0  ;;  %340 = vmatprep.subr.bf16.mxu1 %v360_v0 }
   0xb   :  { %313 = vmatpush3.bf16.msra.mxu0 %v352_v3  ;;  %345 = vmatpush3.bf16.msra.mxu1 %v352_v3 }
   0xc   :  { %314 = vmatprep.subr.bf16.mxu0 %v360_v0  ;;  %341 = vmatprep.subr.bf16.mxu1 %v360_v0 }
   0xf   :  { %315 = vmatpush3.bf16.msra.mxu0 %v353_v4  ;;  %346 = vmatpush3.bf16.msra.mxu1 %v353_v4 }
  0x10   :  { %316 = vmatprep.subr.bf16.mxu0 %v360_v0  ;;  %342 = vmatprep.subr.bf16.mxu1 %v360_v0 }
  0x13   :  { %317 = vmatpush3.bf16.msra.mxu0 %v101_v6  ;;  %347 = vmatpush3.bf16.msra.mxu1 %v101_v6 }
  0x16   :  { %319 = vmatmul.mubr.msk.bf16.vlgmr.msra.gmra.mrb[0].mxu0 %vm83_vm2, %v355_v7  ;;  %331 = vmatmul.mubr.msk.bf16.vlgmr.msra.gmra.mrb[0].mxu1 %vm83_vm2, %v356_v8 }
  0x17   :  { %322 = vmatprep.mubr.msk.bf16.mxu0 %vm361_vm0, %v360_v0  ;;  %334 = vmatprep.mubr.msk.bf16.mxu1 %vm361_vm0, %v360_v0 }
  0x1e   :  { %323 = vmatmul.mubr.msk.bf16.gmra.mrb[4].mxu0 %vm83_vm2, %v357_v9  ;;  %335 = vmatmul.mubr.msk.bf16.gmra.mrb[4].mxu1 %vm83_vm2, %v358_v10 }
  0x1f   :  { %326 = vmatprep.mubr.msk.bf16.mxu0 %vm361_vm0, %v360_v0 }
  0x26   :  { %327 = vmatmul.mubr.msk.bf16.gmra.mrb[8].mxu0 %vm83_vm2, %v359_v11 }
  0xe9   :  { %v137_v13 = vpop.f32.mrb[0].mxu0  ;;  %v161_v15 = vpop.f32.mrb[0].mxu1 }
  0xea   :  { %v180_v16 = vmul.f32 %v278_v12, %v137_v13  ;;  %v320_v17 = vpop.f32.mrb[1].mxu0  ;;  %v186_v18 = vmul.f32 %v278_v12, %v161_v15  ;;  %v332_v19 = vpop.f32.mrb[1].mxu1 }
  0xeb   :  { %v140_v20 = vpop.f32.mrb[2].mxu0  ;;  %v164_v21 = vpop.f32.mrb[2].mxu1 }
  0xec   :  { %v194_v22 = vadd.f32 %v279_v14, %v180_v16  ;;  %v181_v23 = vmul.f32 %v278_v12, %v140_v20  ;;  %v321_v24 = vpop.f32.mrb[3].mxu0  ;;  %v200_v25 = vadd.f32 %v279_v14, %v186_v18  ;;  %v187_v26 = vmul.f32 %v278_v12, %v164_v21  ;;  %v333_v27 = vpop.f32.mrb[3].mxu1 }
  0xee   :  { %v203_v28 = vmax.f32 %v194_v22, 0.0  ;;  %v195_v29 = vadd.f32 %v279_v14, %v181_v23  ;;  %v209_v30 = vmax.f32 %v200_v25, 0.0  ;;  %v201_v31 = vadd.f32 %v279_v14, %v187_v26 }
  0xf0   :  { %v289_v32 = vpack.c.bf16 %v203_v28, %v203_v28  ;;  %v204_v33 = vmax.f32 %v195_v29, 0.0  ;;  %v295_v34 = vpack.c.bf16 %v209_v30, %v209_v30  ;;  %v210_v35 = vmax.f32 %v201_v31, 0.0 }
  0xf1   :  { %v145_v36 = vpop.f32.mrb[4].mxu0  ;;  %v169_v37 = vpop.f32.mrb[4].mxu1 }
  0xf2   :  { %250 = vst.msk [vmem:[%s462_s3] sm:$0xf] %vm249_vm3, %v289_v32  ;;  %v290_v38 = vpack.c.bf16 %v204_v33, %v204_v33  ;;  %256 = vst.msk [vmem:[%s462_s3 + $0x18] sm:$0xf] %vm249_vm3, %v295_v34  ;;  %v182_v39 = vmul.f32 %v278_v12, %v145_v36  ;;  %v324_v40 = vpop.f32.mrb[5].mxu0  ;;  %v296_v41 = vpack.c.bf16 %v210_v35, %v210_v35  ;;  %v336_v43 = vpop.f32.mrb[5].mxu1 }
  0xf3   :  { %v188_v42 = vmul.f32 %v278_v12, %v169_v37  ;;  %v148_v44 = vpop.f32.mrb[6].mxu0  ;;  %v172_v45 = vpop.f32.mrb[6].mxu1 }
  0xf4   :  { %251 = vst.msk [vmem:[%s462_s3 + $0x4] sm:$0xf] %vm249_vm3, %v290_v38  ;;  %v196_v46 = vadd.f32 %v279_v14, %v182_v39  ;;  %257 = vst.msk [vmem:[%s462_s3 + $0x1c] sm:$0xf] %vm249_vm3, %v296_v41  ;;  %v183_v47 = vmul.f32 %v278_v12, %v148_v44  ;;  %v325_v48 = vpop.f32.mrb[7].mxu0  ;;  %v337_v50 = vpop.f32.mrb[7].mxu1 }
  0xf5   :  { %v202_v49 = vadd.f32 %v279_v14, %v188_v42 }
  0xf6   :  { %v205_v51 = vmax.f32 %v196_v46, 0.0  ;;  %v197_v52 = vadd.f32 %v279_v14, %v183_v47 }
  0xf7   :  { %v211_v53 = vmax.f32 %v202_v49, 0.0 }
  0xf8   :  { %v291_v54 = vpack.c.bf16 %v205_v51, %v205_v51  ;;  %v206_v55 = vmax.f32 %v197_v52, 0.0 }
  0xf9   :  { %v297_v56 = vpack.c.bf16 %v211_v53, %v211_v53  ;;  %v153_v57 = vpop.f32.mrb[8].mxu0 }
  0xfa   :  { %252 = vst.msk [vmem:[%s462_s3 + $0x8] sm:$0xf] %vm249_vm3, %v291_v54  ;;  %v292_v58 = vpack.c.bf16 %v206_v55, %v206_v55  ;;  %v184_v59 = vmul.f32 %v278_v12, %v153_v57  ;;  %v328_v60 = vpop.f32.mrb[9].mxu0 }
  0xfb   :  { %258 = vst.msk [vmem:[%s462_s3 + $0x20] sm:$0xf] %vm249_vm3, %v297_v56  ;;  %v156_v61 = vpop.f32.mrb[10].mxu0 }
  0xfc   :  { %253 = vst.msk [vmem:[%s462_s3 + $0xc] sm:$0xf] %vm249_vm3, %v292_v58  ;;  %v198_v62 = vadd.f32 %v279_v14, %v184_v59  ;;  %v185_v63 = vmul.f32 %v278_v12, %v156_v61  ;;  %v329_v0 = vpop.f32.mrb[11].mxu0 }
  0xfe   :  { %v207_v1 = vmax.f32 %v198_v62, 0.0  ;;  %v199_v2 = vadd.f32 %v279_v14, %v185_v63 }
 0x100   :  { %v293_v3 = vpack.c.bf16 %v207_v1, %v207_v1  ;;  %v208_v4 = vmax.f32 %v199_v2, 0.0 }
 0x102   :  { %254 = vst.msk [vmem:[%s462_s3 + $0x10] sm:$0xf] %vm249_vm3, %v293_v3  ;;  %v294_v5 = vpack.c.bf16 %v208_v4, %v208_v4 }
 0x104   :  { %255 = vst.msk [vmem:[%s462_s3 + $0x14] sm:$0xf] %vm249_vm3, %v294_v5 }

// kernel: autoencoder_forward.20
= control target key start
LH: loop header
LB: loop body
LE: loop exit
PB: predicated region body
PF: predicated region fallthrough
CT: control target
= control target key end

     0   :  { %v460_v0 = vmov 0   ;;  %vm174_vm0 = vcmask 719872   ;;  %vm190_vm1 = vcmask 1043456   ;;  %vm340_vm2 = vcmask 93184   ;;  %s625_s1 = inlined_call_operand.vmem [shape: bf16[216,12], index: 1, kind: input, shape index: {}]   ;;  %s626_s0 = inlined_call_operand.vmem [shape: bf16[72,216], index: 0, kind: input, shape index: {}]   ;;  %s627_s2 = inlined_call_operand.vmem [shape: f32[2,12], index: 2, kind: input, shape index: {}]   ;;  %s628_s3 = inlined_call_operand.vmem [shape: bf16[72,12], index: 3, kind: output, shape index: {}]  }
   0x1   :  { %194 = vmatprep.subr.bf16.mxu0 %v460_v0  ;;  %v432_v1 = vld [vmem:[%s625_s1] sm:$0xff]   ;;  %403 = vmatprep.subr.bf16.mxu1 %v460_v0  ;;  %v433_v2 = vld [vmem:[%s625_s1 + $0x8] sm:$0xff]   ;;  %v434_v3 = vld [vmem:[%s625_s1 + $0x10] sm:$0xff]  }
   0x2   :  { %195 = vmatpush1.bf16.msra.mxu0 %v432_v1  ;;  %417 = vmatpush1.bf16.msra.mxu1 %v432_v1  ;;  %v435_v4 = vld [vmem:[%s625_s1 + $0x18] sm:$0xff]   ;;  %v436_v5 = vld [vmem:[%s625_s1 + $0x20] sm:$0xff]   ;;  %v437_v8 = vld [vmem:[%s625_s1 + $0x28] sm:$0xff]  }
   0x3   :  { %196 = vmatprep.subr.bf16.mxu0 %v460_v0  ;;  %404 = vmatprep.subr.bf16.mxu1 %v460_v0  ;;  %v448_v6 = vld [vmem:[%s626_s0 + $0x4] ss:$8 sps:$4 sm:$0xff]   ;;  %v451_v7 = vld [vmem:[%s626_s0 + $0x34] ss:$8 sps:$4 sm:$0xff]   ;;  %v445_v16 = vld [vmem:[%s625_s1 + $0x68] ss:$0 sps:$4 sm:$0xff]  }
   0x4   :  { %378 = vmatprep.mubr.msk.bf16.mxu0 %vm174_vm0, %v448_v6  ;;  %381 = vmatprep.mubr.msk.bf16.mxu1 %vm174_vm0, %v451_v7  ;;  %v438_v9 = vld [vmem:[%s625_s1 + $0x30] sm:$0xff]   ;;  %v439_v10 = vld [vmem:[%s625_s1 + $0x38] sm:$0xff]   ;;  %v440_v11 = vld [vmem:[%s625_s1 + $0x40] sm:$0xff]   ;;  %v192_v17 = vsel %vm190_vm1, %v445_v16, 0 }
   0x5   :  { %v441_v12 = vld [vmem:[%s625_s1 + $0x48] sm:$0xff]   ;;  %v442_v13 = vld [vmem:[%s625_s1 + $0x50] sm:$0xff]   ;;  %v443_v14 = vld [vmem:[%s625_s1 + $0x58] sm:$0xff]  }
   0x6   :  { %197 = vmatpush1.bf16.msra.mxu0 %v433_v2  ;;  %418 = vmatpush1.bf16.msra.mxu1 %v433_v2  ;;  %v444_v15 = vld [vmem:[%s625_s1 + $0x60] sm:$0xff]   ;;  %v449_v20 = vld [vmem:[%s626_s0 + $0x30] ss:$8 sps:$4 sm:$0xff]   ;;  %v452_v21 = vld [vmem:[%s626_s0 + $0x14] ss:$8 sps:$4 sm:$0xff]  }
   0x7   :  { %198 = vmatprep.subr.bf16.mxu0 %v460_v0  ;;  %405 = vmatprep.subr.bf16.mxu1 %v460_v0  ;;  %v23_v18 = vld [vmem:[%s626_s0 + $0x40] sm:$0xff]  ;;  %v454_v23 = vld [vmem:[%s626_s0 + $0x10] ss:$8 sps:$4 sm:$0xff]  }
   0x8   :  { %v446_v19 = vld [vmem:[%s626_s0] ss:$8 sps:$4 sm:$0xff]   ;;  %v363_v22 = vcombine.high %v23_v18, %v23_v18  ;;  %v362_v24 = vcombine.low %v23_v18, %v23_v18  ;;  %v456_v25 = vld [vmem:[%s626_s0 + $0x24] ss:$8 sps:$4 sm:$0xff]  }
   0x9   :  { %v459_v26 = vld [vmem:[%s626_s0 + $0x20] ss:$8 sps:$4 sm:$0xff]  }
   0xa   :  { %199 = vmatpush1.bf16.msra.mxu0 %v434_v3  ;;  %419 = vmatpush1.bf16.msra.mxu1 %v434_v3  ;;  %v383_v27 = vld [vmem:[%s627_s2] ss:$0 sm:$0xff]  ;;  %v384_v29 = vld [vmem:[%s627_s2 + $0x1] ss:$0 sm:$0xff] }
   0xb   :  { %200 = vmatprep.subr.bf16.mxu0 %v460_v0  ;;  %406 = vmatprep.subr.bf16.mxu1 %v460_v0 }
   0xe   :  { %201 = vmatpush1.bf16.msra.mxu0 %v435_v4  ;;  %420 = vmatpush1.bf16.msra.mxu1 %v435_v4 }
   0xf   :  { %202 = vmatprep.subr.bf16.mxu0 %v460_v0  ;;  %407 = vmatprep.subr.bf16.mxu1 %v460_v0 }
  0x12   :  { %203 = vmatpush1.bf16.msra.mxu0 %v436_v5  ;;  %421 = vmatpush1.bf16.msra.mxu1 %v436_v5 }
  0x13   :  { %204 = vmatprep.subr.bf16.mxu0 %v460_v0  ;;  %408 = vmatprep.subr.bf16.mxu1 %v460_v0 }
  0x16   :  { %205 = vmatpush1.bf16.msra.mxu0 %v437_v8  ;;  %422 = vmatpush1.bf16.msra.mxu1 %v437_v8 }
  0x17   :  { %206 = vmatprep.subr.bf16.mxu0 %v460_v0  ;;  %409 = vmatprep.subr.bf16.mxu1 %v460_v0 }
  0x1a   :  { %207 = vmatpush1.bf16.msra.mxu0 %v438_v9  ;;  %423 = vmatpush1.bf16.msra.mxu1 %v438_v9 }
  0x1b   :  { %208 = vmatprep.subr.bf16.mxu0 %v460_v0  ;;  %410 = vmatprep.subr.bf16.mxu1 %v460_v0 }
  0x1e   :  { %209 = vmatpush1.bf16.msra.mxu0 %v439_v10  ;;  %424 = vmatpush1.bf16.msra.mxu1 %v439_v10 }
  0x1f   :  { %210 = vmatprep.subr.bf16.mxu0 %v460_v0  ;;  %411 = vmatprep.subr.bf16.mxu1 %v460_v0 }
  0x22   :  { %211 = vmatpush1.bf16.msra.mxu0 %v440_v11  ;;  %425 = vmatpush1.bf16.msra.mxu1 %v440_v11 }
  0x23   :  { %212 = vmatprep.subr.bf16.mxu0 %v460_v0  ;;  %412 = vmatprep.subr.bf16.mxu1 %v460_v0 }
  0x26   :  { %213 = vmatpush1.bf16.msra.mxu0 %v441_v12  ;;  %426 = vmatpush1.bf16.msra.mxu1 %v441_v12 }
  0x27   :  { %214 = vmatprep.subr.bf16.mxu0 %v460_v0  ;;  %413 = vmatprep.subr.bf16.mxu1 %v460_v0 }
  0x2a   :  { %215 = vmatpush1.bf16.msra.mxu0 %v442_v13  ;;  %427 = vmatpush1.bf16.msra.mxu1 %v442_v13 }
  0x2b   :  { %216 = vmatprep.subr.bf16.mxu0 %v460_v0  ;;  %414 = vmatprep.subr.bf16.mxu1 %v460_v0 }
  0x2e   :  { %217 = vmatpush1.bf16.msra.mxu0 %v443_v14  ;;  %428 = vmatpush1.bf16.msra.mxu1 %v443_v14 }
  0x2f   :  { %218 = vmatprep.subr.bf16.mxu0 %v460_v0  ;;  %415 = vmatprep.subr.bf16.mxu1 %v460_v0 }
  0x32   :  { %219 = vmatpush1.bf16.msra.mxu0 %v444_v15  ;;  %429 = vmatpush1.bf16.msra.mxu1 %v444_v15 }
  0x33   :  { %220 = vmatprep.subr.bf16.mxu0 %v460_v0  ;;  %416 = vmatprep.subr.bf16.mxu1 %v460_v0 }
  0x36   :  { %221 = vmatpush1.bf16.msra.mxu0 %v192_v17  ;;  %430 = vmatpush1.bf16.msra.mxu1 %v192_v17 }
  0x39   :  { %227 = vmatmul.mubr.bf16.vlgmr.msra.gmra.mrb[0].mxu0 %v446_v19  ;;  %251 = vmatmul.mubr.bf16.vlgmr.msra.gmra.mrb[0].mxu1 %v449_v20 }
  0x3a   :  { %379 = vmatprep.mubr.msk.bf16.mxu0 %vm174_vm0, %v452_v21  ;;  %382 = vmatprep.mubr.msk.bf16.mxu1 %vm174_vm0, %v363_v22 }
  0x41   :  { %235 = vmatmul.mubr.bf16.gmra.mrb[4].mxu0 %v454_v23  ;;  %259 = vmatmul.mubr.bf16.gmra.mrb[4].mxu1 %v362_v24 }
  0x42   :  { %380 = vmatprep.mubr.msk.bf16.mxu0 %vm174_vm0, %v456_v25 }
  0x49   :  { %243 = vmatmul.mubr.bf16.gmra.mrb[8].mxu0 %v459_v26 }
 0x10c   :  { %v228_v28 = vpop.f32.mrb[0].mxu0  ;;  %v252_v30 = vpop.f32.mrb[0].mxu1 }
 0x10d   :  { %v271_v31 = vmul.f32 %v383_v27, %v228_v28  ;;  %v230_v32 = vpop.f32.mrb[1].mxu0  ;;  %v277_v33 = vmul.f32 %v383_v27, %v252_v30  ;;  %v254_v34 = vpop.f32.mrb[1].mxu1 }
 0x10e   :  { %v231_v35 = vpop.f32.mrb[2].mxu0  ;;  %v255_v36 = vpop.f32.mrb[2].mxu1 }
 0x10f   :  { %v285_v37 = vadd.f32 %v384_v29, %v271_v31  ;;  %v272_v38 = vmul.f32 %v383_v27, %v231_v35  ;;  %v233_v39 = vpop.f32.mrb[3].mxu0  ;;  %v291_v40 = vadd.f32 %v384_v29, %v277_v33  ;;  %v278_v41 = vmul.f32 %v383_v27, %v255_v36  ;;  %v257_v42 = vpop.f32.mrb[3].mxu1 }
 0x111   :  { %v294_v43 = vmax.f32 %v285_v37, 0.0  ;;  %v286_v44 = vadd.f32 %v384_v29, %v272_v38  ;;  %v300_v45 = vmax.f32 %v291_v40, 0.0  ;;  %v292_v46 = vadd.f32 %v384_v29, %v278_v41 }
 0x113   :  { %v394_v47 = vpack.c.bf16 %v294_v43, %v294_v43  ;;  %v295_v48 = vmax.f32 %v286_v44, 0.0  ;;  %v400_v49 = vpack.c.bf16 %v300_v45, %v300_v45  ;;  %v301_v50 = vmax.f32 %v292_v46, 0.0 }
 0x114   :  { %v236_v51 = vpop.f32.mrb[4].mxu0  ;;  %v260_v52 = vpop.f32.mrb[4].mxu1 }
 0x115   :  { %341 = vst.msk [vmem:[%s628_s3] sm:$0xf] %vm340_vm2, %v394_v47  ;;  %v395_v53 = vpack.c.bf16 %v295_v48, %v295_v48  ;;  %347 = vst.msk [vmem:[%s628_s3 + $0x18] sm:$0xf] %vm340_vm2, %v400_v49  ;;  %v273_v54 = vmul.f32 %v383_v27, %v236_v51  ;;  %v238_v55 = vpop.f32.mrb[5].mxu0  ;;  %v401_v56 = vpack.c.bf16 %v301_v50, %v301_v50  ;;  %v262_v58 = vpop.f32.mrb[5].mxu1 }
 0x116   :  { %v279_v57 = vmul.f32 %v383_v27, %v260_v52  ;;  %v239_v59 = vpop.f32.mrb[6].mxu0  ;;  %v263_v60 = vpop.f32.mrb[6].mxu1 }
 0x117   :  { %342 = vst.msk [vmem:[%s628_s3 + $0x4] sm:$0xf] %vm340_vm2, %v395_v53  ;;  %v287_v61 = vadd.f32 %v384_v29, %v273_v54  ;;  %348 = vst.msk [vmem:[%s628_s3 + $0x1c] sm:$0xf] %vm340_vm2, %v401_v56  ;;  %v274_v62 = vmul.f32 %v383_v27, %v239_v59  ;;  %v241_v63 = vpop.f32.mrb[7].mxu0  ;;  %v264_v1 = vpop.f32.mrb[7].mxu1 }
 0x118   :  { %v293_v0 = vadd.f32 %v384_v29, %v279_v57 }
 0x119   :  { %v296_v2 = vmax.f32 %v287_v61, 0.0  ;;  %v288_v3 = vadd.f32 %v384_v29, %v274_v62 }
 0x11a   :  { %v302_v4 = vmax.f32 %v293_v0, 0.0 }
 0x11b   :  { %v396_v5 = vpack.c.bf16 %v296_v2, %v296_v2  ;;  %v297_v6 = vmax.f32 %v288_v3, 0.0 }
 0x11c   :  { %v402_v7 = vpack.c.bf16 %v302_v4, %v302_v4  ;;  %v244_v8 = vpop.f32.mrb[8].mxu0 }
 0x11d   :  { %343 = vst.msk [vmem:[%s628_s3 + $0x8] sm:$0xf] %vm340_vm2, %v396_v5  ;;  %v397_v9 = vpack.c.bf16 %v297_v6, %v297_v6  ;;  %v275_v10 = vmul.f32 %v383_v27, %v244_v8  ;;  %v246_v11 = vpop.f32.mrb[9].mxu0 }
 0x11e   :  { %349 = vst.msk [vmem:[%s628_s3 + $0x20] sm:$0xf] %vm340_vm2, %v402_v7  ;;  %v247_v12 = vpop.f32.mrb[10].mxu0 }
 0x11f   :  { %344 = vst.msk [vmem:[%s628_s3 + $0xc] sm:$0xf] %vm340_vm2, %v397_v9  ;;  %v289_v13 = vadd.f32 %v384_v29, %v275_v10  ;;  %v276_v14 = vmul.f32 %v383_v27, %v247_v12  ;;  %v249_v15 = vpop.f32.mrb[11].mxu0 }
 0x121   :  { %v298_v16 = vmax.f32 %v289_v13, 0.0  ;;  %v290_v17 = vadd.f32 %v384_v29, %v276_v14 }
 0x123   :  { %v398_v18 = vpack.c.bf16 %v298_v16, %v298_v16  ;;  %v299_v19 = vmax.f32 %v290_v17, 0.0 }
 0x125   :  { %345 = vst.msk [vmem:[%s628_s3 + $0x10] sm:$0xf] %vm340_vm2, %v398_v18  ;;  %v399_v20 = vpack.c.bf16 %v299_v19, %v299_v19 }
 0x127   :  { %346 = vst.msk [vmem:[%s628_s3 + $0x14] sm:$0xf] %vm340_vm2, %v399_v20 }

// kernel: autoencoder_forward.23
= control target key start
LH: loop header
LB: loop body
LE: loop exit
PB: predicated region body
PF: predicated region fallthrough
CT: control target
= control target key end

     0   :  { %v3599_v0 = vmov 0   ;;  %vm1457_vm0 = vcmask 1045504   ;;  %vm1369_vm1 = vcmask 490496   ;;  %vm2663_vm2 = vcmask 60416   ;;  %s4863_s1 = inlined_call_operand.vmem [shape: bf16[700,8], index: 1, kind: input, shape index: {}]   ;;  %s4864_s0 = inlined_call_operand.vmem [shape: bf16[450,700], index: 0, kind: input, shape index: {}]   ;;  %s4865_s2 = inlined_call_operand.vmem [shape: f32[2,8], index: 2, kind: input, shape index: {}]   ;;  %s4866_s3 = inlined_call_operand.vmem [shape: bf16[450,8], index: 3, kind: output, shape index: {}]  }
   0x1   :  { %1461 = vmatprep.subr.bf16.mxu1 %v3599_v0  ;;  %1725 = vmatprep.subr.bf16.mxu0 %v3599_v0  ;;  %v3295_v1 = vld [vmem:[%s4863_s1] sm:$0xff]   ;;  %v3297_v3 = vld [vmem:[%s4863_s1 + $0x8] sm:$0xff]   ;;  %v3299_v5 = vld [vmem:[%s4863_s1 + $0x10] sm:$0xff]   ;;  %vm2720_vm3 = vcmask 57344  }
   0x2   :  { %v3628_v2 = vld [vmem:[%s4863_s1 + $0x80] sm:$0xff]   ;;  %1462 = vmatpush1.bf16.msra.mxu1 %v3295_v1  ;;  %v3638_v4 = vld [vmem:[%s4863_s1 + $0x88] sm:$0xff]   ;;  %v3649_v6 = vld [vmem:[%s4863_s1 + $0x90] sm:$0xff]  }
   0x3   :  { %1726 = vmatpush1.bf16.msra.mxu0 %v3628_v2  ;;  %1463 = vmatprep.subr.bf16.mxu1 %v3599_v0  ;;  %v3301_v7 = vld [vmem:[%s4863_s1 + $0x18] sm:$0xff]   ;;  %v3303_v9 = vld [vmem:[%s4863_s1 + $0x20] sm:$0xff]   ;;  %v3305_v11 = vld [vmem:[%s4863_s1 + $0x28] sm:$0xff]  }
   0x4   :  { %1727 = vmatprep.subr.bf16.mxu0 %v3599_v0  ;;  %v3660_v8 = vld [vmem:[%s4863_s1 + $0x98] sm:$0xff]   ;;  %v3671_v10 = vld [vmem:[%s4863_s1 + $0xa0] sm:$0xff]   ;;  %v3682_v12 = vld [vmem:[%s4863_s1 + $0xa8] sm:$0xff]  }
   0x5   :  { %v3307_v13 = vld [vmem:[%s4863_s1 + $0x30] sm:$0xff]   ;;  %v3309_v15 = vld [vmem:[%s4863_s1 + $0x38] sm:$0xff]   ;;  %v3311_v17 = vld [vmem:[%s4863_s1 + $0x40] sm:$0xff]  }
   0x6   :  { %1464 = vmatpush1.bf16.msra.mxu1 %v3297_v3  ;;  %v3693_v14 = vld [vmem:[%s4863_s1 + $0xb0] sm:$0xff]   ;;  %v3704_v16 = vld [vmem:[%s4863_s1 + $0xb8] sm:$0xff]   ;;  %v3715_v18 = vld [vmem:[%s4863_s1 + $0xc0] sm:$0xff]  }
   0x7   :  { %1728 = vmatpush1.bf16.msra.mxu0 %v3638_v4  ;;  %1465 = vmatprep.subr.bf16.mxu1 %v3599_v0  ;;  %v3329_v19 = vld [vmem:[%s4864_s0 + $0x4] ss:$24 sps:$4 sm:$0xff]   ;;  %v3313_v20 = vld [vmem:[%s4863_s1 + $0x48] sm:$0xff]   ;;  %v3315_v23 = vld [vmem:[%s4863_s1 + $0x50] sm:$0xff]  }
   0x8   :  { %1729 = vmatprep.subr.bf16.mxu0 %v3599_v0  ;;  %v3332_v21 = vld [vmem:[%s4864_s0 + $0xc] ss:$24 sps:$4 sm:$0xff]   ;;  %1493 = vmatprep.mubr.bf16.mxu1 %v3329_v19  ;;  %v3743_v24 = vld [vmem:[%s4863_s1 + $0xd0] sm:$0xff]   ;;  %v3317_v25 = vld [vmem:[%s4863_s1 + $0x58] sm:$0xff]  }
   0x9   :  { %v3732_v22 = vld [vmem:[%s4863_s1 + $0xc8] sm:$0xff]   ;;  %1757 = vmatprep.mubr.bf16.mxu0 %v3332_v21  ;;  %v3754_v26 = vld [vmem:[%s4863_s1 + $0xd8] sm:$0xff]   ;;  %v3319_v27 = vld [vmem:[%s4863_s1 + $0x60] sm:$0xff]  }
   0xa   :  { %1466 = vmatpush1.bf16.msra.mxu1 %v3299_v5  ;;  %v3765_v28 = vld [vmem:[%s4863_s1 + $0xe0] sm:$0xff]   ;;  %v3321_v29 = vld [vmem:[%s4863_s1 + $0x68] sm:$0xff]   ;;  %v3323_v31 = vld [vmem:[%s4863_s1 + $0x70] sm:$0xff]  }
   0xb   :  { %1730 = vmatpush1.bf16.msra.mxu0 %v3649_v6  ;;  %1467 = vmatprep.subr.bf16.mxu1 %v3599_v0  ;;  %v3776_v30 = vld [vmem:[%s4863_s1 + $0xe8] sm:$0xff]   ;;  %v3787_v32 = vld [vmem:[%s4863_s1 + $0xf0] sm:$0xff]   ;;  %v3325_v33 = vld [vmem:[%s4863_s1 + $0x78] sm:$0xff]  }
   0xc   :  { %1731 = vmatprep.subr.bf16.mxu0 %v3599_v0  ;;  %v3798_v34 = vld [vmem:[%s4863_s1 + $0xf8] sm:$0xff]   ;;  %v3330_v36 = vld [vmem:[%s4864_s0 + $0x8] ss:$24 sps:$4 sm:$0xff]   ;;  %v3334_v38 = vld [vmem:[%s4864_s0 + $0x34] ss:$24 sps:$4 sm:$0xff]  }
   0xd   :  { %v3327_v35 = vld [vmem:[%s4864_s0] ss:$24 sps:$4 sm:$0xff]   ;;  %v3336_v39 = vld [vmem:[%s4864_s0 + $0x3c] ss:$24 sps:$4 sm:$0xff]   ;;  %v3340_v40 = vld [vmem:[%s4863_s1 + $0x108] sm:$0xff]  }
   0xe   :  { %1468 = vmatpush1.bf16.msra.mxu1 %v3301_v7  ;;  %v3333_v37 = vld [vmem:[%s4863_s1 + $0x100] sm:$0xff]   ;;  %v3338_v41 = vld [vmem:[%s4864_s0 + $0x30] ss:$24 sps:$4 sm:$0xff]   ;;  %v3358_v46 = vld [vmem:[%s4863_s1 + $0x118] sm:$0xff]  }
   0xf   :  { %1732 = vmatpush1.bf16.msra.mxu0 %v3660_v8  ;;  %1469 = vmatprep.subr.bf16.mxu1 %v3599_v0  ;;  %v3339_v42 = vld [vmem:[%s4864_s0 + $0x38] ss:$24 sps:$4 sm:$0xff]   ;;  %v3341_v43 = vld [vmem:[%s4864_s0 + $0x64] ss:$24 sps:$4 sm:$0xff]   ;;  %v3346_v48 = vld [vmem:[%s4864_s0 + $0x68] ss:$24 sps:$4 sm:$0xff]  }
  0x10   :  { %1733 = vmatprep.subr.bf16.mxu0 %v3599_v0  ;;  %v3343_v44 = vld [vmem:[%s4864_s0 + $0x6c] ss:$24 sps:$4 sm:$0xff]   ;;  %v3347_v45 = vld [vmem:[%s4863_s1 + $0x110] sm:$0xff]   ;;  %v3345_v47 = vld [vmem:[%s4864_s0 + $0x60] ss:$24 sps:$4 sm:$0xff]  }
  0x11   :  { %v3348_v49 = vld [vmem:[%s4864_s0 + $0x94] ss:$24 sps:$4 sm:$0xff]   ;;  %v3367_v51 = vld [vmem:[%s4863_s1 + $0x120] sm:$0xff]   ;;  %v3352_v53 = vld [vmem:[%s4864_s0 + $0x90] ss:$24 sps:$4 sm:$0xff]  }
  0x12   :  { %1470 = vmatpush1.bf16.msra.mxu1 %v3303_v9  ;;  %v3350_v50 = vld [vmem:[%s4864_s0 + $0x9c] ss:$24 sps:$4 sm:$0xff]   ;;  %v3374_v52 = vld [vmem:[%s4863_s1 + $0x128] sm:$0xff]   ;;  %v3353_v54 = vld [vmem:[%s4864_s0 + $0x98] ss:$24 sps:$4 sm:$0xff]  }
  0x13   :  { %1734 = vmatpush1.bf16.msra.mxu0 %v3671_v10  ;;  %1471 = vmatprep.subr.bf16.mxu1 %v3599_v0  ;;  %v3354_v55 = vld [vmem:[%s4864_s0 + $0xc4] ss:$24 sps:$4 sm:$0xff]   ;;  %v3381_v57 = vld [vmem:[%s4863_s1 + $0x130] sm:$0xff]   ;;  %v3359_v59 = vld [vmem:[%s4864_s0 + $0xc0] ss:$24 sps:$4 sm:$0xff]  }
  0x14   :  { %1735 = vmatprep.subr.bf16.mxu0 %v3599_v0  ;;  %v3356_v56 = vld [vmem:[%s4864_s0 + $0xcc] ss:$24 sps:$4 sm:$0xff]   ;;  %v3392_v58 = vld [vmem:[%s4863_s1 + $0x138] sm:$0xff]   ;;  %v3360_v60 = vld [vmem:[%s4864_s0 + $0xc8] ss:$24 sps:$4 sm:$0xff]  }
  0x15   :  { %v3361_v61 = vld [vmem:[%s4864_s0 + $0xf4] ss:$24 sps:$4 sm:$0xff]   ;;  %v3401_v63 = vld [vmem:[%s4863_s1 + $0x140] sm:$0xff]   ;;  %v3365_v1 = vld [vmem:[%s4864_s0 + $0xf0] ss:$24 sps:$4 sm:$0xff]  }
  0x16   :  { %1472 = vmatpush1.bf16.msra.mxu1 %v3305_v11  ;;  %v3363_v62 = vld [vmem:[%s4864_s0 + $0xfc] ss:$24 sps:$4 sm:$0xff]   ;;  %v3366_v3 = vld [vmem:[%s4864_s0 + $0xf8] ss:$24 sps:$4 sm:$0xff]   ;;  %v3370_v5 = vld [vmem:[%s4864_s0 + $0x12c] ss:$24 sps:$4 sm:$0xff]  }
  0x17   :  { %1736 = vmatpush1.bf16.msra.mxu0 %v3682_v12  ;;  %1473 = vmatprep.subr.bf16.mxu1 %v3599_v0  ;;  %v3426_v7 = vld [vmem:[%s4863_s1 + $0x158] sm:$0x3f]   ;;  %v3373_v9 = vld [vmem:[%s4864_s0 + $0x128] ss:$24 sps:$4 sm:$0xff]   ;;  %v3388_v19 = vld [vmem:[%s4864_s0 + $0x1b4] ss:$24 sps:$4 sm:$0xff]  }
  0x18   :  { %1737 = vmatprep.subr.bf16.mxu0 %v3599_v0  ;;  %v1459_v11 = vsel %vm1457_vm0, %v3426_v7, 0  ;;  %v3393_v21 = vld [vmem:[%s4864_s0 + $0x1b0] ss:$24 sps:$4 sm:$0xff]   ;;  %v3471_v7 = vld [vmem:[%s4864_s0 + $0x424] ss:$24 sps:$4 sm:$0xff]  }
  0x1a   :  { %1474 = vmatpush1.bf16.msra.mxu1 %v3307_v13  ;;  %v3379_v13 = vld [vmem:[%s4864_s0 + $0x150] ss:$24 sps:$4 sm:$0xff]  }
  0x1b   :  { %1738 = vmatpush1.bf16.msra.mxu0 %v3693_v14  ;;  %1475 = vmatprep.subr.bf16.mxu1 %v3599_v0 }
  0x1c   :  { %1739 = vmatprep.subr.bf16.mxu0 %v3599_v0 }
  0x1e   :  { %1476 = vmatpush1.bf16.msra.mxu1 %v3309_v15  ;;  %v3382_v15 = vld [vmem:[%s4864_s0 + $0x184] ss:$24 sps:$4 sm:$0xff]  }
  0x1f   :  { %1740 = vmatpush1.bf16.msra.mxu0 %v3704_v16  ;;  %1477 = vmatprep.subr.bf16.mxu1 %v3599_v0 }
  0x20   :  { %1741 = vmatprep.subr.bf16.mxu0 %v3599_v0 }
  0x22   :  { %1478 = vmatpush1.bf16.msra.mxu1 %v3311_v17  ;;  %v3386_v17 = vld [vmem:[%s4864_s0 + $0x180] ss:$24 sps:$4 sm:$0xff]  }
  0x23   :  { %1742 = vmatpush1.bf16.msra.mxu0 %v3715_v18  ;;  %1479 = vmatprep.subr.bf16.mxu1 %v3599_v0 }
  0x24   :  { %1743 = vmatprep.subr.bf16.mxu0 %v3599_v0 }
  0x26   :  { %1480 = vmatpush1.bf16.msra.mxu1 %v3313_v20  ;;  %v3390_v20 = vld [vmem:[%s4864_s0 + $0x1bc] ss:$24 sps:$4 sm:$0xff]  }
  0x27   :  { %1744 = vmatpush1.bf16.msra.mxu0 %v3732_v22  ;;  %1481 = vmatprep.subr.bf16.mxu1 %v3599_v0 }
  0x28   :  { %1745 = vmatprep.subr.bf16.mxu0 %v3599_v0 }
  0x2a   :  { %1482 = vmatpush1.bf16.msra.mxu1 %v3315_v23  ;;  %v3395_v23 = vld [vmem:[%s4864_s0 + $0x1e4] ss:$24 sps:$4 sm:$0xff]  }
  0x2b   :  { %1746 = vmatpush1.bf16.msra.mxu0 %v3743_v24  ;;  %1483 = vmatprep.subr.bf16.mxu1 %v3599_v0 }
  0x2c   :  { %1747 = vmatprep.subr.bf16.mxu0 %v3599_v0 }
  0x2e   :  { %1484 = vmatpush1.bf16.msra.mxu1 %v3317_v25  ;;  %v3400_v25 = vld [vmem:[%s4864_s0 + $0x1e8] ss:$24 sps:$4 sm:$0xff]  }
  0x2f   :  { %1748 = vmatpush1.bf16.msra.mxu0 %v3754_v26  ;;  %1485 = vmatprep.subr.bf16.mxu1 %v3599_v0 }
  0x30   :  { %1749 = vmatprep.subr.bf16.mxu0 %v3599_v0 }
  0x32   :  { %1486 = vmatpush1.bf16.msra.mxu1 %v3319_v27  ;;  %v3404_v27 = vld [vmem:[%s4864_s0 + $0x21c] ss:$24 sps:$4 sm:$0xff]  }
  0x33   :  { %1750 = vmatpush1.bf16.msra.mxu0 %v3765_v28  ;;  %1487 = vmatprep.subr.bf16.mxu1 %v3599_v0 }
  0x34   :  { %1751 = vmatprep.subr.bf16.mxu0 %v3599_v0 }
  0x36   :  { %1488 = vmatpush1.bf16.msra.mxu1 %v3321_v29  ;;  %v3407_v29 = vld [vmem:[%s4864_s0 + $0x218] ss:$24 sps:$4 sm:$0xff]  }
  0x37   :  { %1752 = vmatpush1.bf16.msra.mxu0 %v3776_v30  ;;  %1489 = vmatprep.subr.bf16.mxu1 %v3599_v0 }
  0x38   :  { %1753 = vmatprep.subr.bf16.mxu0 %v3599_v0 }
  0x3a   :  { %1490 = vmatpush1.bf16.msra.mxu1 %v3323_v31  ;;  %v3411_v31 = vld [vmem:[%s4864_s0 + $0x24c] ss:$24 sps:$4 sm:$0xff]  }
  0x3b   :  { %1754 = vmatpush1.bf16.msra.mxu0 %v3787_v32  ;;  %1491 = vmatprep.subr.bf16.mxu1 %v3599_v0 }
  0x3c   :  { %1755 = vmatprep.subr.bf16.mxu0 %v3599_v0 }
  0x3e   :  { %1492 = vmatpush1.bf16.msra.mxu1 %v3325_v33  ;;  %v3414_v33 = vld [vmem:[%s4864_s0 + $0x248] ss:$24 sps:$4 sm:$0xff]  }
  0x3f   :  { %1756 = vmatpush1.bf16.msra.mxu0 %v3798_v34  ;;  %3089 = vmatprep.subr.bf16.mxu1 %v3599_v0 }
  0x40   :  { %1989 = vmatprep.subr.bf16.mxu0 %v3599_v0 }
  0x41   :  { %1494 = vmatmul.mubr.bf16.vlgmr.msra.gmra.mrb[0].mxu1 %v3327_v35  ;;  %v3418_v35 = vld [vmem:[%s4864_s0 + $0x27c] ss:$24 sps:$4 sm:$0xff]  }
  0x42   :  { %1758 = vmatmul.mubr.bf16.vlgmr.msra.gmra.mrb[0].mxu0 %v3330_v36  ;;  %1501 = vmatprep.mubr.bf16.mxu1 %v3334_v38  ;;  %v3420_v36 = vld [vmem:[%s4864_s0 + $0x270] ss:$24 sps:$4 sm:$0xff]   ;;  %v3422_v38 = vld [vmem:[%s4864_s0 + $0x2a4] ss:$24 sps:$4 sm:$0xff]  }
  0x43   :  { %1990 = vmatpush1.bf16.msra.mxu0 %v3333_v37  ;;  %1765 = vmatprep.mubr.bf16.mxu0 %v3336_v39  ;;  %v3421_v37 = vld [vmem:[%s4864_s0 + $0x278] ss:$24 sps:$4 sm:$0xff]   ;;  %v3424_v39 = vld [vmem:[%s4864_s0 + $0x2ac] ss:$24 sps:$4 sm:$0xff]  }
  0x44   :  { %3105 = vmatpush1.bf16.msra.mxu1 %v3628_v2  ;;  %1991 = vmatprep.subr.bf16.mxu0 %v3599_v0  ;;  %v3408_v2 = vld [vmem:[%s4863_s1 + $0x148] sm:$0xff]  }
  0x45   :  { %3090 = vmatprep.subr.bf16.mxu1 %v3599_v0 }
  0x47   :  { %1992 = vmatpush1.bf16.msra.mxu0 %v3340_v40  ;;  %v3427_v40 = vld [vmem:[%s4864_s0 + $0x2a0] ss:$24 sps:$4 sm:$0xff]  }
  0x48   :  { %1993 = vmatprep.subr.bf16.mxu0 %v3599_v0  ;;  %3106 = vmatpush1.bf16.msra.mxu1 %v3638_v4  ;;  %v3368_v4 = vld [vmem:[%s4864_s0 + $0x124] ss:$24 sps:$4 sm:$0xff]  }
  0x49   :  { %1502 = vmatmul.mubr.bf16.gmra.mrb[4].mxu1 %v3338_v41  ;;  %3091 = vmatprep.subr.bf16.mxu1 %v3599_v0  ;;  %v3428_v41 = vld [vmem:[%s4864_s0 + $0x2a8] ss:$24 sps:$4 sm:$0xff]  }
  0x4a   :  { %1766 = vmatmul.mubr.bf16.gmra.mrb[4].mxu0 %v3339_v42  ;;  %1509 = vmatprep.mubr.bf16.mxu1 %v3341_v43  ;;  %v3429_v42 = vld [vmem:[%s4864_s0 + $0x2d4] ss:$24 sps:$4 sm:$0xff]  }
  0x4b   :  { %1773 = vmatprep.mubr.bf16.mxu0 %v3343_v44  ;;  %1994 = vmatpush1.bf16.msra.mxu0 %v3347_v45  ;;  %v3433_v43 = vld [vmem:[%s4864_s0 + $0x14] ss:$24 sps:$4 sm:$0xff]   ;;  %v3434_v44 = vld [vmem:[%s4864_s0 + $0x2d0] ss:$24 sps:$4 sm:$0xff]  }
  0x4c   :  { %1995 = vmatprep.subr.bf16.mxu0 %v3599_v0  ;;  %3107 = vmatpush1.bf16.msra.mxu1 %v3649_v6  ;;  %v3415_v6 = vld [vmem:[%s4863_s1 + $0x150] sm:$0xff]  }
  0x4d   :  { %3092 = vmatprep.subr.bf16.mxu1 %v3599_v0  ;;  %v3431_v45 = vld [vmem:[%s4864_s0 + $0x10] ss:$24 sps:$4 sm:$0xff]  }
  0x4f   :  { %1996 = vmatpush1.bf16.msra.mxu0 %v3358_v46  ;;  %v3435_v46 = vld [vmem:[%s4864_s0 + $0x304] ss:$24 sps:$4 sm:$0xff]  }
  0x50   :  { %1997 = vmatprep.subr.bf16.mxu0 %v3599_v0  ;;  %3108 = vmatpush1.bf16.msra.mxu1 %v3660_v8  ;;  %v3372_v8 = vld [vmem:[%s4864_s0 + $0x120] ss:$24 sps:$4 sm:$0xff]  }
  0x51   :  { %1510 = vmatmul.mubr.bf16.gmra.mrb[8].mxu1 %v3345_v47  ;;  %3093 = vmatprep.subr.bf16.mxu1 %v3599_v0  ;;  %v3437_v47 = vld [vmem:[%s4864_s0 + $0x44] ss:$24 sps:$4 sm:$0xff]  }
  0x52   :  { %1774 = vmatmul.mubr.bf16.gmra.mrb[8].mxu0 %v3346_v48  ;;  %1517 = vmatprep.mubr.bf16.mxu1 %v3348_v49  ;;  %v3439_v48 = vld [vmem:[%s4864_s0 + $0x300] ss:$24 sps:$4 sm:$0xff]  }
  0x53   :  { %1781 = vmatprep.mubr.bf16.mxu0 %v3350_v50  ;;  %1998 = vmatpush1.bf16.msra.mxu0 %v3367_v51  ;;  %v3440_v49 = vld [vmem:[%s4864_s0 + $0x40] ss:$24 sps:$4 sm:$0xff]   ;;  %v3441_v50 = vld [vmem:[%s4864_s0 + $0x334] ss:$24 sps:$4 sm:$0xff]  }
  0x54   :  { %1999 = vmatprep.subr.bf16.mxu0 %v3599_v0  ;;  %3109 = vmatpush1.bf16.msra.mxu1 %v3671_v10  ;;  %v3375_v10 = vld [vmem:[%s4864_s0 + $0x154] ss:$24 sps:$4 sm:$0xff]  }
  0x55   :  { %3094 = vmatprep.subr.bf16.mxu1 %v3599_v0  ;;  %v3443_v51 = vld [vmem:[%s4864_s0 + $0x74] ss:$24 sps:$4 sm:$0xff]  }
  0x57   :  { %2000 = vmatpush1.bf16.msra.mxu0 %v3374_v52  ;;  %v3445_v52 = vld [vmem:[%s4864_s0 + $0x330] ss:$24 sps:$4 sm:$0xff]  }
  0x58   :  { %2001 = vmatprep.subr.bf16.mxu0 %v3599_v0  ;;  %3110 = vmatpush1.bf16.msra.mxu1 %v3682_v12  ;;  %v3377_v12 = vld [vmem:[%s4864_s0 + $0x15c] ss:$24 sps:$4 sm:$0xff]  }
  0x59   :  { %1518 = vmatmul.mubr.bf16.gmra.mrb[12].mxu1 %v3352_v53  ;;  %3095 = vmatprep.subr.bf16.mxu1 %v3599_v0  ;;  %v3446_v53 = vld [vmem:[%s4864_s0 + $0x70] ss:$24 sps:$4 sm:$0xff]  }
  0x5a   :  { %1782 = vmatmul.mubr.bf16.gmra.mrb[12].mxu0 %v3353_v54  ;;  %1525 = vmatprep.mubr.bf16.mxu1 %v3354_v55  ;;  %v3447_v54 = vld [vmem:[%s4864_s0 + $0x364] ss:$24 sps:$4 sm:$0xff]  }
  0x5b   :  { %1789 = vmatprep.mubr.bf16.mxu0 %v3356_v56  ;;  %2002 = vmatpush1.bf16.msra.mxu0 %v3381_v57  ;;  %v3449_v55 = vld [vmem:[%s4864_s0 + $0xa4] ss:$24 sps:$4 sm:$0xff]   ;;  %v3451_v56 = vld [vmem:[%s4864_s0 + $0x360] ss:$24 sps:$4 sm:$0xff]  }
  0x5c   :  { %2003 = vmatprep.subr.bf16.mxu0 %v3599_v0  ;;  %3111 = vmatpush1.bf16.msra.mxu1 %v3693_v14  ;;  %v3380_v14 = vld [vmem:[%s4864_s0 + $0x158] ss:$24 sps:$4 sm:$0xff]  }
  0x5d   :  { %3096 = vmatprep.subr.bf16.mxu1 %v3599_v0  ;;  %v3452_v57 = vld [vmem:[%s4864_s0 + $0xa0] ss:$24 sps:$4 sm:$0xff]  }
  0x5f   :  { %2004 = vmatpush1.bf16.msra.mxu0 %v3392_v58  ;;  %v3453_v58 = vld [vmem:[%s4864_s0 + $0x394] ss:$24 sps:$4 sm:$0xff]  }
  0x60   :  { %2005 = vmatprep.subr.bf16.mxu0 %v3599_v0  ;;  %3112 = vmatpush1.bf16.msra.mxu1 %v3704_v16  ;;  %v3384_v16 = vld [vmem:[%s4864_s0 + $0x18c] ss:$24 sps:$4 sm:$0xff]  }
  0x61   :  { %1526 = vmatmul.mubr.bf16.gmra.mrb[16].mxu1 %v3359_v59  ;;  %3097 = vmatprep.subr.bf16.mxu1 %v3599_v0  ;;  %v3455_v59 = vld [vmem:[%s4864_s0 + $0xd4] ss:$24 sps:$4 sm:$0xff]  }
  0x62   :  { %1790 = vmatmul.mubr.bf16.gmra.mrb[16].mxu0 %v3360_v60  ;;  %1533 = vmatprep.mubr.bf16.mxu1 %v3361_v61  ;;  %v3457_v60 = vld [vmem:[%s4864_s0 + $0x390] ss:$24 sps:$4 sm:$0xff]  }
  0x63   :  { %1797 = vmatprep.mubr.bf16.mxu0 %v3363_v62  ;;  %2006 = vmatpush1.bf16.msra.mxu0 %v3401_v63  ;;  %v3458_v61 = vld [vmem:[%s4864_s0 + $0xd0] ss:$24 sps:$4 sm:$0xff]   ;;  %v3459_v62 = vld [vmem:[%s4864_s0 + $0x3c4] ss:$24 sps:$4 sm:$0xff]  }
  0x64   :  { %2007 = vmatprep.subr.bf16.mxu0 %v3599_v0  ;;  %3113 = vmatpush1.bf16.msra.mxu1 %v3715_v18  ;;  %v3387_v18 = vld [vmem:[%s4864_s0 + $0x188] ss:$24 sps:$4 sm:$0xff]   ;;  %v3461_v63 = vld [vmem:[%s4864_s0 + $0x104] ss:$24 sps:$4 sm:$0xff]  }
  0x65   :  { %3098 = vmatprep.subr.bf16.mxu1 %v3599_v0 }
  0x67   :  { %2008 = vmatpush1.bf16.msra.mxu0 %v3408_v2  ;;  %v3464_v2 = vld [vmem:[%s4864_s0 + $0x100] ss:$24 sps:$4 sm:$0xff]  }
  0x68   :  { %2009 = vmatprep.subr.bf16.mxu0 %v3599_v0  ;;  %3114 = vmatpush1.bf16.msra.mxu1 %v3732_v22  ;;  %v3394_v22 = vld [vmem:[%s4864_s0 + $0x1b8] ss:$24 sps:$4 sm:$0xff]  }
  0x69   :  { %1534 = vmatmul.mubr.bf16.gmra.mrb[20].mxu1 %v3365_v1  ;;  %3099 = vmatprep.subr.bf16.mxu1 %v3599_v0  ;;  %v3463_v1 = vld [vmem:[%s4864_s0 + $0x3c0] ss:$24 sps:$4 sm:$0xff]  }
  0x6a   :  { %1798 = vmatmul.mubr.bf16.gmra.mrb[20].mxu0 %v3366_v3  ;;  %1541 = vmatprep.mubr.bf16.mxu1 %v3368_v4  ;;  %v3465_v3 = vld [vmem:[%s4864_s0 + $0x3f4] ss:$24 sps:$4 sm:$0xff]  }
  0x6b   :  { %1805 = vmatprep.mubr.bf16.mxu0 %v3370_v5  ;;  %2010 = vmatpush1.bf16.msra.mxu0 %v3415_v6  ;;  %v3467_v4 = vld [vmem:[%s4864_s0 + $0x134] ss:$24 sps:$4 sm:$0xff]   ;;  %v3469_v5 = vld [vmem:[%s4864_s0 + $0x3f0] ss:$24 sps:$4 sm:$0xff]  }
  0x6c   :  { %2011 = vmatprep.subr.bf16.mxu0 %v3599_v0  ;;  %3115 = vmatpush1.bf16.msra.mxu1 %v3743_v24  ;;  %v3399_v24 = vld [vmem:[%s4864_s0 + $0x1e0] ss:$24 sps:$4 sm:$0xff]   ;;  %v3470_v6 = vld [vmem:[%s4864_s0 + $0x130] ss:$24 sps:$4 sm:$0xff]  }
  0x6d   :  { %3100 = vmatprep.subr.bf16.mxu1 %v3599_v0 }
  0x6f   :  { %2012 = vmatpush1.bf16.msra.mxu0 %v1459_v11  ;;  %v3477_v11 = vld [vmem:[%s4864_s0 + $0x454] ss:$24 sps:$4 sm:$0xff]  }
  0x70   :  { %3116 = vmatpush1.bf16.msra.mxu1 %v3754_v26  ;;  %v3402_v26 = vld [vmem:[%s4864_s0 + $0x214] ss:$24 sps:$4 sm:$0xff]  }
  0x71   :  { %1542 = vmatmul.mubr.bf16.gmra.mrb[24].mxu1 %v3372_v8  ;;  %3101 = vmatprep.subr.bf16.mxu1 %v3599_v0  ;;  %v3473_v8 = vld [vmem:[%s4864_s0 + $0x164] ss:$24 sps:$4 sm:$0xff]  }
  0x72   :  { %1806 = vmatmul.mubr.bf16.gmra.mrb[24].mxu0 %v3373_v9  ;;  %1549 = vmatprep.mubr.bf16.mxu1 %v3375_v10  ;;  %v3475_v9 = vld [vmem:[%s4864_s0 + $0x420] ss:$24 sps:$4 sm:$0xff]  }
  0x73   :  { %1813 = vmatprep.mubr.bf16.mxu0 %v3377_v12  ;;  %v3476_v10 = vld [vmem:[%s4864_s0 + $0x160] ss:$24 sps:$4 sm:$0xff]   ;;  %v3479_v12 = vld [vmem:[%s4864_s0 + $0x194] ss:$24 sps:$4 sm:$0xff]  }
  0x74   :  { %3117 = vmatpush1.bf16.msra.mxu1 %v3765_v28  ;;  %v3406_v28 = vld [vmem:[%s4864_s0 + $0x210] ss:$24 sps:$4 sm:$0xff]  }
  0x75   :  { %3102 = vmatprep.subr.bf16.mxu1 %v3599_v0 }
  0x78   :  { %3118 = vmatpush1.bf16.msra.mxu1 %v3776_v30  ;;  %v3409_v30 = vld [vmem:[%s4864_s0 + $0x244] ss:$24 sps:$4 sm:$0xff]  }
  0x79   :  { %1550 = vmatmul.mubr.bf16.gmra.mrb[28].mxu1 %v3379_v13  ;;  %3103 = vmatprep.subr.bf16.mxu1 %v3599_v0  ;;  %v3481_v13 = vld [vmem:[%s4864_s0 + $0x450] ss:$24 sps:$4 sm:$0xff]  }
  0x7a   :  { %1814 = vmatmul.mubr.bf16.gmra.mrb[28].mxu0 %v3380_v14  ;;  %1557 = vmatprep.mubr.bf16.mxu1 %v3382_v15  ;;  %v3482_v14 = vld [vmem:[%s4864_s0 + $0x190] ss:$24 sps:$4 sm:$0xff]   ;;  %v3483_v15 = vld [vmem:[%s4864_s0 + $0x484] ss:$24 sps:$4 sm:$0xff]  }
  0x7b   :  { %1821 = vmatprep.mubr.bf16.mxu0 %v3384_v16  ;;  %v3485_v16 = vld [vmem:[%s4864_s0 + $0x1c4] ss:$24 sps:$4 sm:$0xff]  }
  0x7c   :  { %3119 = vmatpush1.bf16.msra.mxu1 %v3787_v32  ;;  %v3413_v32 = vld [vmem:[%s4864_s0 + $0x240] ss:$24 sps:$4 sm:$0xff]  }
  0x7d   :  { %3104 = vmatprep.subr.bf16.mxu1 %v3599_v0  ;;  %v3397_v0 = vld [vmem:[%s4864_s0 + $0x1ec] ss:$24 sps:$4 sm:$0xff]  }
  0x80   :  { %3120 = vmatpush1.bf16.msra.mxu1 %v3798_v34  ;;  %v3416_v34 = vld [vmem:[%s4864_s0 + $0x274] ss:$24 sps:$4 sm:$0xff]  }
  0x81   :  { %1558 = vmatmul.mubr.bf16.gmra.mrb[32].mxu1 %v3386_v17  ;;  %v3487_v17 = vld [vmem:[%s4864_s0 + $0x480] ss:$24 sps:$4 sm:$0xff]  }
  0x82   :  { %1822 = vmatmul.mubr.bf16.gmra.mrb[32].mxu0 %v3387_v18  ;;  %1565 = vmatprep.mubr.bf16.mxu1 %v3388_v19  ;;  %v3488_v18 = vld [vmem:[%s4864_s0 + $0x1c0] ss:$24 sps:$4 sm:$0xff]   ;;  %v3489_v19 = vld [vmem:[%s4864_s0 + $0x4b4] ss:$24 sps:$4 sm:$0xff]  }
  0x83   :  { %1829 = vmatprep.mubr.bf16.mxu0 %v3390_v20  ;;  %v3491_v20 = vld [vmem:[%s4864_s0 + $0x1f4] ss:$24 sps:$4 sm:$0xff]  }
  0x89   :  { %1566 = vmatmul.mubr.bf16.gmra.mrb[36].mxu1 %v3393_v21  ;;  %v3493_v21 = vld [vmem:[%s4864_s0 + $0x4b0] ss:$24 sps:$4 sm:$0xff]  }
  0x8a   :  { %1830 = vmatmul.mubr.bf16.gmra.mrb[36].mxu0 %v3394_v22  ;;  %1573 = vmatprep.mubr.bf16.mxu1 %v3395_v23  ;;  %v3494_v22 = vld [vmem:[%s4864_s0 + $0x1f0] ss:$24 sps:$4 sm:$0xff]   ;;  %v3495_v23 = vld [vmem:[%s4864_s0 + $0x4e4] ss:$24 sps:$4 sm:$0xff]  }
  0x8b   :  { %1837 = vmatprep.mubr.bf16.mxu0 %v3397_v0  ;;  %v3497_v0 = vld [vmem:[%s4864_s0 + $0x224] ss:$24 sps:$4 sm:$0xff]  }
  0x91   :  { %1574 = vmatmul.mubr.bf16.gmra.mrb[40].mxu1 %v3399_v24  ;;  %v3499_v24 = vld [vmem:[%s4864_s0 + $0x4e0] ss:$24 sps:$4 sm:$0xff]  }
  0x92   :  { %1838 = vmatmul.mubr.bf16.gmra.mrb[40].mxu0 %v3400_v25  ;;  %1581 = vmatprep.mubr.bf16.mxu1 %v3402_v26  ;;  %v3500_v25 = vld [vmem:[%s4864_s0 + $0x220] ss:$24 sps:$4 sm:$0xff]   ;;  %v3501_v26 = vld [vmem:[%s4864_s0 + $0x514] ss:$24 sps:$4 sm:$0xff]  }
  0x93   :  { %1845 = vmatprep.mubr.bf16.mxu0 %v3404_v27  ;;  %v3503_v27 = vld [vmem:[%s4864_s0 + $0x254] ss:$24 sps:$4 sm:$0xff]  }
  0x99   :  { %1582 = vmatmul.mubr.bf16.gmra.mrb[44].mxu1 %v3406_v28  ;;  %v183_v28 = vld [vmem:[%s4864_s0 + $0x540] sm:$0x11] }
  0x9a   :  { %1846 = vmatmul.mubr.bf16.gmra.mrb[44].mxu0 %v3407_v29  ;;  %1589 = vmatprep.mubr.bf16.mxu1 %v3409_v30  ;;  %v3505_v30 = vld [vmem:[%s4864_s0 + $0x510] ss:$24 sps:$4 sm:$0xff]  }
  0x9b   :  { %1853 = vmatprep.mubr.bf16.mxu0 %v3411_v31 }
  0xa1   :  { %1590 = vmatmul.mubr.bf16.gmra.mrb[48].mxu1 %v3413_v32  ;;  %v3506_v32 = vld [vmem:[%s4864_s0 + $0x250] ss:$24 sps:$4 sm:$0xff]  }
  0xa2   :  { %1854 = vmatmul.mubr.bf16.gmra.mrb[48].mxu0 %v3414_v33  ;;  %1597 = vmatprep.mubr.bf16.mxu1 %v3416_v34  ;;  %v2895_v34 = vcombine.high %v183_v28, %v183_v28 }
  0xa3   :  { %1861 = vmatprep.mubr.bf16.mxu0 %v3418_v35 }
  0xa9   :  { %1598 = vmatmul.mubr.bf16.gmra.mrb[52].mxu1 %v3420_v36  ;;  %v3508_v36 = vld [vmem:[%s4864_s0 + $0x284] ss:$24 sps:$4 sm:$0xff]  }
  0xaa   :  { %1862 = vmatmul.mubr.bf16.gmra.mrb[52].mxu0 %v3421_v37  ;;  %1605 = vmatprep.mubr.bf16.mxu1 %v3422_v38  ;;  %v2894_v38 = vcombine.low %v183_v28, %v183_v28  ;;  %v3550_v28 = vld [vmem:[%s4864_s0 + $0x3d4] ss:$24 sps:$4 sm:$0xff]  }
  0xab   :  { %1869 = vmatprep.mubr.bf16.mxu0 %v3424_v39 }
  0xb1   :  { %1606 = vmatmul.mubr.bf16.gmra.mrb[56].mxu1 %v3427_v40  ;;  %v3511_v40 = vld [vmem:[%s4864_s0 + $0x280] ss:$24 sps:$4 sm:$0xff]  }
  0xb2   :  { %1870 = vmatmul.mubr.bf16.gmra.mrb[56].mxu0 %v3428_v41  ;;  %1613 = vmatprep.mubr.bf16.mxu1 %v3429_v42  ;;  %v3514_v42 = vld [vmem:[%s4864_s0 + $0x2dc] ss:$24 sps:$4 sm:$0xff]  }
  0xb3   :  { %2944 = vmatprep.mubr.msk.bf16.mxu0 %vm1369_vm1, %v3433_v43 }
  0xb9   :  { %1614 = vmatmul.mubr.bf16.gmra.mrb[60].mxu1 %v3434_v44  ;;  %v3515_v44 = vld [vmem:[%s4864_s0 + $0x2b4] ss:$24 sps:$4 sm:$0xff]  }
  0xba   :  { %2022 = vmatmul.mubr.bf16.vlgmr.msra.gmra.mrb[0].mxu0 %v3431_v45  ;;  %1621 = vmatprep.mubr.bf16.mxu1 %v3435_v46  ;;  %v3512_v46 = vld [vmem:[%s4864_s0 + $0x2d8] ss:$24 sps:$4 sm:$0xff]  }
  0xbb   :  { %2945 = vmatprep.mubr.msk.bf16.mxu0 %vm1369_vm1, %v3437_v47 }
  0xc1   :  { %1622 = vmatmul.mubr.bf16.gmra.mrb[64].mxu1 %v3439_v48  ;;  %v3517_v48 = vld [vmem:[%s4864_s0 + $0x2b0] ss:$24 sps:$4 sm:$0xff]  }
  0xc2   :  { %2030 = vmatmul.mubr.bf16.gmra.mrb[4].mxu0 %v3440_v49  ;;  %1629 = vmatprep.mubr.bf16.mxu1 %v3441_v50  ;;  %v3518_v50 = vld [vmem:[%s4864_s0 + $0x30c] ss:$24 sps:$4 sm:$0xff]  }
  0xc3   :  { %2946 = vmatprep.mubr.msk.bf16.mxu0 %vm1369_vm1, %v3443_v51 }
  0xc9   :  { %1630 = vmatmul.mubr.bf16.gmra.mrb[68].mxu1 %v3445_v52  ;;  %v3520_v52 = vld [vmem:[%s4864_s0 + $0x2e4] ss:$24 sps:$4 sm:$0xff]  }
  0xca   :  { %2038 = vmatmul.mubr.bf16.gmra.mrb[8].mxu0 %v3446_v53  ;;  %1637 = vmatprep.mubr.bf16.mxu1 %v3447_v54  ;;  %v3522_v54 = vld [vmem:[%s4864_s0 + $0x308] ss:$24 sps:$4 sm:$0xff]  }
  0xcb   :  { %2947 = vmatprep.mubr.msk.bf16.mxu0 %vm1369_vm1, %v3449_v55 }
  0xd1   :  { %1638 = vmatmul.mubr.bf16.gmra.mrb[72].mxu1 %v3451_v56  ;;  %v3523_v56 = vld [vmem:[%s4864_s0 + $0x2e0] ss:$24 sps:$4 sm:$0xff]  }
  0xd2   :  { %2046 = vmatmul.mubr.bf16.gmra.mrb[12].mxu0 %v3452_v57  ;;  %1645 = vmatprep.mubr.bf16.mxu1 %v3453_v58  ;;  %v3524_v58 = vld [vmem:[%s4864_s0 + $0x33c] ss:$24 sps:$4 sm:$0xff]  }
  0xd3   :  { %2948 = vmatprep.mubr.msk.bf16.mxu0 %vm1369_vm1, %v3455_v59 }
  0xd9   :  { %1646 = vmatmul.mubr.bf16.gmra.mrb[76].mxu1 %v3457_v60  ;;  %v3526_v60 = vld [vmem:[%s4864_s0 + $0x314] ss:$24 sps:$4 sm:$0xff]  }
  0xda   :  { %2054 = vmatmul.mubr.bf16.gmra.mrb[16].mxu0 %v3458_v61  ;;  %1653 = vmatprep.mubr.bf16.mxu1 %v3459_v62  ;;  %v3528_v62 = vld [vmem:[%s4864_s0 + $0x338] ss:$24 sps:$4 sm:$0xff]  }
  0xdb   :  { %2949 = vmatprep.mubr.msk.bf16.mxu0 %vm1369_vm1, %v3461_v63 }
  0xe1   :  { %1654 = vmatmul.mubr.bf16.gmra.mrb[80].mxu1 %v3463_v1  ;;  %v3529_v1 = vld [vmem:[%s4864_s0 + $0x310] ss:$24 sps:$4 sm:$0xff]  }
  0xe2   :  { %2062 = vmatmul.mubr.bf16.gmra.mrb[20].mxu0 %v3464_v2  ;;  %1661 = vmatprep.mubr.bf16.mxu1 %v3465_v3  ;;  %v3530_v3 = vld [vmem:[%s4864_s0 + $0x36c] ss:$24 sps:$4 sm:$0xff]  }
  0xe3   :  { %2950 = vmatprep.mubr.msk.bf16.mxu0 %vm1369_vm1, %v3467_v4 }
  0xe9   :  { %1662 = vmatmul.mubr.bf16.gmra.mrb[84].mxu1 %v3469_v5  ;;  %v3532_v5 = vld [vmem:[%s4864_s0 + $0x344] ss:$24 sps:$4 sm:$0xff]  }
  0xea   :  { %2070 = vmatmul.mubr.bf16.gmra.mrb[24].mxu0 %v3470_v6  ;;  %1669 = vmatprep.mubr.bf16.mxu1 %v3471_v7  ;;  %v3534_v7 = vld [vmem:[%s4864_s0 + $0x368] ss:$24 sps:$4 sm:$0xff]  }
  0xeb   :  { %2951 = vmatprep.mubr.msk.bf16.mxu0 %vm1369_vm1, %v3473_v8 }
  0xf1   :  { %1670 = vmatmul.mubr.bf16.gmra.mrb[88].mxu1 %v3475_v9  ;;  %v3535_v9 = vld [vmem:[%s4864_s0 + $0x340] ss:$24 sps:$4 sm:$0xff]  }
  0xf2   :  { %2078 = vmatmul.mubr.bf16.gmra.mrb[28].mxu0 %v3476_v10  ;;  %1677 = vmatprep.mubr.bf16.mxu1 %v3477_v11  ;;  %v3536_v11 = vld [vmem:[%s4864_s0 + $0x39c] ss:$24 sps:$4 sm:$0xff]  }
  0xf3   :  { %2952 = vmatprep.mubr.msk.bf16.mxu0 %vm1369_vm1, %v3479_v12 }
  0xf9   :  { %1678 = vmatmul.mubr.bf16.gmra.mrb[92].mxu1 %v3481_v13  ;;  %v3538_v13 = vld [vmem:[%s4864_s0 + $0x374] ss:$24 sps:$4 sm:$0xff]  }
  0xfa   :  { %2086 = vmatmul.mubr.bf16.gmra.mrb[32].mxu0 %v3482_v14  ;;  %1685 = vmatprep.mubr.bf16.mxu1 %v3483_v15  ;;  %v3540_v15 = vld [vmem:[%s4864_s0 + $0x398] ss:$24 sps:$4 sm:$0xff]  }
  0xfb   :  { %2953 = vmatprep.mubr.msk.bf16.mxu0 %vm1369_vm1, %v3485_v16 }
 0x101   :  { %1686 = vmatmul.mubr.bf16.gmra.mrb[96].mxu1 %v3487_v17  ;;  %v3541_v17 = vld [vmem:[%s4864_s0 + $0x370] ss:$24 sps:$4 sm:$0xff]  }
 0x102   :  { %2094 = vmatmul.mubr.bf16.gmra.mrb[36].mxu0 %v3488_v18  ;;  %1693 = vmatprep.mubr.bf16.mxu1 %v3489_v19  ;;  %v3542_v19 = vld [vmem:[%s4864_s0 + $0x3cc] ss:$24 sps:$4 sm:$0xff]  }
 0x103   :  { %2954 = vmatprep.mubr.msk.bf16.mxu0 %vm1369_vm1, %v3491_v20 }
 0x109   :  { %1694 = vmatmul.mubr.bf16.gmra.mrb[100].mxu1 %v3493_v21  ;;  %v3544_v21 = vld [vmem:[%s4864_s0 + $0x3a4] ss:$24 sps:$4 sm:$0xff]  }
 0x10a   :  { %2102 = vmatmul.mubr.bf16.gmra.mrb[40].mxu0 %v3494_v22  ;;  %1701 = vmatprep.mubr.bf16.mxu1 %v3495_v23  ;;  %v3546_v23 = vld [vmem:[%s4864_s0 + $0x3c8] ss:$24 sps:$4 sm:$0xff]  }
 0x10b   :  { %2955 = vmatprep.mubr.msk.bf16.mxu0 %vm1369_vm1, %v3497_v0 }
 0x111   :  { %1702 = vmatmul.mubr.bf16.gmra.mrb[104].mxu1 %v3499_v24  ;;  %v3547_v24 = vld [vmem:[%s4864_s0 + $0x3a0] ss:$24 sps:$4 sm:$0xff]  }
 0x112   :  { %2110 = vmatmul.mubr.bf16.gmra.mrb[44].mxu0 %v3500_v25  ;;  %1709 = vmatprep.mubr.bf16.mxu1 %v3501_v26  ;;  %v3548_v26 = vld [vmem:[%s4864_s0 + $0x3fc] ss:$24 sps:$4 sm:$0xff]  }
 0x113   :  { %2956 = vmatprep.mubr.msk.bf16.mxu0 %vm1369_vm1, %v3503_v27 }
 0x114   :  { %v4222_v29 = vpop.f32.mrb[0].mxu1 }
 0x115   :  { %v1497_v31 = vpop.f32.mrb[1].mxu1 }
 0x116   :  { %v4230_v33 = vpop.f32.mrb[2].mxu1  ;;  %v3552_v31 = vld [vmem:[%s4864_s0 + $0x3f8] ss:$24 sps:$4 sm:$0xff]  }
 0x117   :  { %v1500_v35 = vpop.f32.mrb[3].mxu1 }
 0x119   :  { %1710 = vmatmul.mubr.bf16.gmra.mrb[108].mxu1 %v3505_v30 }
 0x11a   :  { %2118 = vmatmul.mubr.bf16.gmra.mrb[48].mxu0 %v3506_v32  ;;  %1717 = vmatprep.mubr.bf16.mxu1 %v2895_v34  ;;  %v3553_v34 = vld [vmem:[%s4864_s0 + $0x3d0] ss:$24 sps:$4 sm:$0xff]  }
 0x11b   :  { %2957 = vmatprep.mubr.msk.bf16.mxu0 %vm1369_vm1, %v3508_v36  ;;  %v3554_v36 = vld [vmem:[%s4864_s0 + $0x42c] ss:$24 sps:$4 sm:$0xff]  }
 0x11c   :  { %v4236_v37 = vpop.f32.mrb[4].mxu1 }
 0x11d   :  { %v1505_v39 = vpop.f32.mrb[5].mxu1 }
 0x11e   :  { %v4241_v41 = vpop.f32.mrb[6].mxu1  ;;  %v3556_v39 = vld [vmem:[%s4864_s0 + $0x404] ss:$24 sps:$4 sm:$0xff]  }
 0x11f   :  { %v1508_v43 = vpop.f32.mrb[7].mxu1 }
 0x121   :  { %1718 = vmatmul.mubr.bf16.gmra.mrb[112].mxu1 %v2894_v38 }
 0x122   :  { %2126 = vmatmul.mubr.bf16.gmra.mrb[52].mxu0 %v3511_v40  ;;  %1877 = vmatprep.mubr.bf16.mxu1 %v3514_v42  ;;  %v3558_v42 = vld [vmem:[%s4864_s0 + $0x428] ss:$24 sps:$4 sm:$0xff]  }
 0x123   :  { %2958 = vmatprep.mubr.msk.bf16.mxu0 %vm1369_vm1, %v3515_v44  ;;  %v3559_v44 = vld [vmem:[%s4864_s0 + $0x400] ss:$24 sps:$4 sm:$0xff]  }
 0x124   :  { %v4250_v45 = vpop.f32.mrb[8].mxu1 }
 0x125   :  { %v1513_v47 = vpop.f32.mrb[9].mxu1 }
 0x126   :  { %v4258_v49 = vpop.f32.mrb[10].mxu1  ;;  %v3560_v47 = vld [vmem:[%s4864_s0 + $0x45c] ss:$24 sps:$4 sm:$0xff]  }
 0x127   :  { %v1516_v51 = vpop.f32.mrb[11].mxu1 }
 0x129   :  { %1878 = vmatmul.mubr.bf16.vlgmr.msra.gmra.mrb[60].mxu1 %v3512_v46 }
 0x12a   :  { %2134 = vmatmul.mubr.bf16.gmra.mrb[56].mxu0 %v3517_v48  ;;  %1885 = vmatprep.mubr.bf16.mxu1 %v3518_v50  ;;  %v3562_v50 = vld [vmem:[%s4864_s0 + $0x434] ss:$24 sps:$4 sm:$0xff]  }
 0x12b   :  { %2959 = vmatprep.mubr.msk.bf16.mxu0 %vm1369_vm1, %v3520_v52  ;;  %v3564_v52 = vld [vmem:[%s4864_s0 + $0x458] ss:$24 sps:$4 sm:$0xff]  }
 0x12c   :  { %v4267_v53 = vpop.f32.mrb[12].mxu1 }
 0x12d   :  { %v1521_v55 = vpop.f32.mrb[13].mxu1 }
 0x12e   :  { %v4275_v57 = vpop.f32.mrb[14].mxu1  ;;  %v3565_v55 = vld [vmem:[%s4864_s0 + $0x430] ss:$24 sps:$4 sm:$0xff]  }
 0x12f   :  { %v1524_v59 = vpop.f32.mrb[15].mxu1 }
 0x131   :  { %1886 = vmatmul.mubr.bf16.gmra.mrb[64].mxu1 %v3522_v54 }
 0x132   :  { %2142 = vmatmul.mubr.bf16.gmra.mrb[60].mxu0 %v3523_v56  ;;  %1893 = vmatprep.mubr.bf16.mxu1 %v3524_v58  ;;  %v3566_v58 = vld [vmem:[%s4864_s0 + $0x48c] ss:$24 sps:$4 sm:$0xff]  }
 0x133   :  { %2960 = vmatprep.mubr.msk.bf16.mxu0 %vm1369_vm1, %v3526_v60  ;;  %v3568_v60 = vld [vmem:[%s4864_s0 + $0x464] ss:$24 sps:$4 sm:$0xff]  }
 0x134   :  { %v4284_v61 = vpop.f32.mrb[16].mxu1 }
 0x135   :  { %v1529_v63 = vpop.f32.mrb[17].mxu1 }
 0x136   :  { %v4292_v2 = vpop.f32.mrb[18].mxu1  ;;  %v3570_v63 = vld [vmem:[%s4864_s0 + $0x488] ss:$24 sps:$4 sm:$0xff]  }
 0x137   :  { %v1532_v4 = vpop.f32.mrb[19].mxu1 }
 0x139   :  { %1894 = vmatmul.mubr.bf16.gmra.mrb[68].mxu1 %v3528_v62 }
 0x13a   :  { %2150 = vmatmul.mubr.bf16.gmra.mrb[64].mxu0 %v3529_v1  ;;  %1901 = vmatprep.mubr.bf16.mxu1 %v3530_v3  ;;  %v3571_v3 = vld [vmem:[%s4864_s0 + $0x460] ss:$24 sps:$4 sm:$0xff]  }
 0x13b   :  { %2961 = vmatprep.mubr.msk.bf16.mxu0 %vm1369_vm1, %v3532_v5  ;;  %v3572_v5 = vld [vmem:[%s4864_s0 + $0x4bc] ss:$24 sps:$4 sm:$0xff]  }
 0x13c   :  { %v4301_v6 = vpop.f32.mrb[20].mxu1 }
 0x13d   :  { %v1537_v8 = vpop.f32.mrb[21].mxu1 }
 0x13e   :  { %v4309_v10 = vpop.f32.mrb[22].mxu1  ;;  %v3574_v8 = vld [vmem:[%s4864_s0 + $0x494] ss:$24 sps:$4 sm:$0xff]  }
 0x13f   :  { %v1540_v12 = vpop.f32.mrb[23].mxu1 }
 0x141   :  { %1902 = vmatmul.mubr.bf16.gmra.mrb[72].mxu1 %v3534_v7 }
 0x142   :  { %2158 = vmatmul.mubr.bf16.gmra.mrb[68].mxu0 %v3535_v9  ;;  %1909 = vmatprep.mubr.bf16.mxu1 %v3536_v11  ;;  %v3576_v11 = vld [vmem:[%s4864_s0 + $0x4b8] ss:$24 sps:$4 sm:$0xff]  }
 0x143   :  { %2962 = vmatprep.mubr.msk.bf16.mxu0 %vm1369_vm1, %v3538_v13  ;;  %v3577_v13 = vld [vmem:[%s4864_s0 + $0x490] ss:$24 sps:$4 sm:$0xff]  }
 0x144   :  { %v4318_v14 = vpop.f32.mrb[24].mxu1 }
 0x145   :  { %v1545_v16 = vpop.f32.mrb[25].mxu1 }
 0x146   :  { %v4326_v18 = vpop.f32.mrb[26].mxu1  ;;  %v3578_v16 = vld [vmem:[%s4864_s0 + $0x4ec] ss:$24 sps:$4 sm:$0xff]  }
 0x147   :  { %v1548_v20 = vpop.f32.mrb[27].mxu1 }
 0x149   :  { %1910 = vmatmul.mubr.bf16.gmra.mrb[76].mxu1 %v3540_v15 }
 0x14a   :  { %2166 = vmatmul.mubr.bf16.gmra.mrb[72].mxu0 %v3541_v17  ;;  %1917 = vmatprep.mubr.bf16.mxu1 %v3542_v19  ;;  %v3580_v19 = vld [vmem:[%s4864_s0 + $0x4c4] ss:$24 sps:$4 sm:$0xff]  }
 0x14b   :  { %2963 = vmatprep.mubr.msk.bf16.mxu0 %vm1369_vm1, %v3544_v21  ;;  %v3582_v21 = vld [vmem:[%s4864_s0 + $0x4e8] ss:$24 sps:$4 sm:$0xff]  }
 0x14c   :  { %v4335_v22 = vpop.f32.mrb[28].mxu1 }
 0x14d   :  { %v1553_v0 = vpop.f32.mrb[29].mxu1 }
 0x14e   :  { %v4343_v25 = vpop.f32.mrb[30].mxu1  ;;  %v3583_v0 = vld [vmem:[%s4864_s0 + $0x4c0] ss:$24 sps:$4 sm:$0xff]  }
 0x14f   :  { %v1556_v27 = vpop.f32.mrb[31].mxu1 }
 0x151   :  { %1918 = vmatmul.mubr.bf16.gmra.mrb[80].mxu1 %v3546_v23 }
 0x152   :  { %2174 = vmatmul.mubr.bf16.gmra.mrb[76].mxu0 %v3547_v24  ;;  %1925 = vmatprep.mubr.bf16.mxu1 %v3548_v26  ;;  %v3584_v26 = vld [vmem:[%s4864_s0 + $0x51c] ss:$24 sps:$4 sm:$0xff]  }
 0x153   :  { %2964 = vmatprep.mubr.msk.bf16.mxu0 %vm1369_vm1, %v3550_v28  ;;  %v3586_v28 = vld [vmem:[%s4864_s0 + $0x4f4] ss:$24 sps:$4 sm:$0xff]  }
 0x154   :  { %v4352_v30 = vpop.f32.mrb[32].mxu1 }
 0x155   :  { %v1561_v32 = vpop.f32.mrb[33].mxu1 }
 0x156   :  { %v4360_v35 = vpop.f32.mrb[34].mxu1 }
 0x157   :  { %v1564_v38 = vpop.f32.mrb[35].mxu1 }
 0x158   :  { %v3589_v38 = vld [vmem:[%s4864_s0 + $0x4f0] ss:$24 sps:$4 sm:$0xff]  }
 0x159   :  { %1926 = vmatmul.mubr.bf16.gmra.mrb[84].mxu1 %v3552_v31  ;;  %v184_v31 = vld [vmem:[%s4864_s0 + $0x548] sm:$0x11] }
 0x15a   :  { %2182 = vmatmul.mubr.bf16.gmra.mrb[80].mxu0 %v3553_v34  ;;  %1933 = vmatprep.mubr.bf16.mxu1 %v3554_v36  ;;  %v3588_v34 = vld [vmem:[%s4864_s0 + $0x518] ss:$24 sps:$4 sm:$0xff]  }
 0x15b   :  { %2965 = vmatprep.mubr.msk.bf16.mxu0 %vm1369_vm1, %v3556_v39 }
 0x15c   :  { %v4369_v40 = vpop.f32.mrb[36].mxu1 }
 0x15d   :  { %v1569_v43 = vpop.f32.mrb[37].mxu1 }
 0x15e   :  { %v4377_v46 = vpop.f32.mrb[38].mxu1 }
 0x15f   :  { %v1572_v48 = vpop.f32.mrb[39].mxu1 }
 0x161   :  { %1934 = vmatmul.mubr.bf16.gmra.mrb[88].mxu1 %v3558_v42  ;;  %v2897_v42 = vcombine.high %v184_v31, %v184_v31 }
 0x162   :  { %2190 = vmatmul.mubr.bf16.gmra.mrb[84].mxu0 %v3559_v44  ;;  %1941 = vmatprep.mubr.bf16.mxu1 %v3560_v47  ;;  %v3591_v44 = vld [vmem:[%s4864_s0 + $0x524] ss:$24 sps:$4 sm:$0xff]   ;;  %v185_v47 = vld [vmem:[%s4864_s0 + $0x550] sm:$0x11] }
 0x163   :  { %2966 = vmatprep.mubr.msk.bf16.mxu0 %vm1369_vm1, %v3562_v50  ;;  %v4477_v50 = vld [vmem:[%s4865_s2] ss:$0 sm:$0xff] }
 0x164   :  { %v4386_v51 = vpop.f32.mrb[40].mxu1 }
 0x165   :  { %v1577_v54 = vpop.f32.mrb[41].mxu1 }
 0x166   :  { %v4394_v56 = vpop.f32.mrb[42].mxu1 }
 0x167   :  { %v1580_v59 = vpop.f32.mrb[43].mxu1 }
 0x168   :  { %v4486_v59 = vld [vmem:[%s4865_s2 + $0x1] ss:$0 sm:$0xff] }
 0x169   :  { %1942 = vmatmul.mubr.bf16.gmra.mrb[92].mxu1 %v3564_v52  ;;  %v2896_v52 = vcombine.low %v184_v31, %v184_v31 }
 0x16a   :  { %2198 = vmatmul.mubr.bf16.gmra.mrb[88].mxu0 %v3565_v55  ;;  %1949 = vmatprep.mubr.bf16.mxu1 %v3566_v58  ;;  %v3594_v58 = vld [vmem:[%s4864_s0 + $0x520] ss:$24 sps:$4 sm:$0xff]  }
 0x16b   :  { %2967 = vmatprep.mubr.msk.bf16.mxu0 %vm1369_vm1, %v3568_v60 }
 0x16c   :  { %v4403_v62 = vpop.f32.mrb[44].mxu1 }
 0x16d   :  { %v1585_v1 = vpop.f32.mrb[45].mxu1 }
 0x16e   :  { %v4411_v4 = vpop.f32.mrb[46].mxu1 }
 0x16f   :  { %v1588_v7 = vpop.f32.mrb[47].mxu1 }
 0x171   :  { %1950 = vmatmul.mubr.bf16.gmra.mrb[96].mxu1 %v3570_v63  ;;  %v2899_v63 = vcombine.high %v185_v47, %v185_v47 }
 0x172   :  { %2206 = vmatmul.mubr.bf16.gmra.mrb[92].mxu0 %v3571_v3  ;;  %1957 = vmatprep.mubr.bf16.mxu1 %v3572_v5 }
 0x173   :  { %2968 = vmatprep.mubr.msk.bf16.mxu0 %vm1369_vm1, %v3574_v8 }
 0x174   :  { %v4420_v9 = vpop.f32.mrb[48].mxu1 }
 0x175   :  { %v1593_v12 = vpop.f32.mrb[49].mxu1 }
 0x176   :  { %v4428_v15 = vpop.f32.mrb[50].mxu1 }
 0x177   :  { %v1596_v17 = vpop.f32.mrb[51].mxu1 }
 0x179   :  { %1958 = vmatmul.mubr.bf16.gmra.mrb[100].mxu1 %v3576_v11 }
 0x17a   :  { %2214 = vmatmul.mubr.bf16.gmra.mrb[96].mxu0 %v3577_v13  ;;  %1965 = vmatprep.mubr.bf16.mxu1 %v3578_v16 }
 0x17b   :  { %2969 = vmatprep.mubr.msk.bf16.mxu0 %vm1369_vm1, %v3580_v19 }
 0x17c   :  { %v4437_v20 = vpop.f32.mrb[52].mxu1 }
 0x17d   :  { %v1601_v23 = vpop.f32.mrb[53].mxu1 }
 0x17e   :  { %v4445_v24 = vpop.f32.mrb[54].mxu1 }
 0x17f   :  { %v1604_v27 = vpop.f32.mrb[55].mxu1 }
 0x181   :  { %1966 = vmatmul.mubr.bf16.gmra.mrb[104].mxu1 %v3582_v21 }
 0x182   :  { %2222 = vmatmul.mubr.bf16.gmra.mrb[100].mxu0 %v3583_v0  ;;  %1973 = vmatprep.mubr.bf16.mxu1 %v3584_v26 }
 0x183   :  { %2970 = vmatprep.mubr.msk.bf16.mxu0 %vm1369_vm1, %v3586_v28 }
 0x184   :  { %v4457_v32 = vpop.f32.mrb[56].mxu1 }
 0x185   :  { %v1609_v36 = vpop.f32.mrb[57].mxu1 }
 0x186   :  { %v4465_v39 = vpop.f32.mrb[58].mxu1 }
 0x187   :  { %v1612_v43 = vpop.f32.mrb[59].mxu1 }
 0x189   :  { %1974 = vmatmul.mubr.bf16.gmra.mrb[108].mxu1 %v3588_v34 }
 0x18a   :  { %2230 = vmatmul.mubr.bf16.gmra.mrb[104].mxu0 %v3589_v38  ;;  %1981 = vmatprep.mubr.bf16.mxu1 %v2897_v42 }
 0x18b   :  { %2971 = vmatprep.mubr.msk.bf16.mxu0 %vm1369_vm1, %v3591_v44 }
 0x18d   :  { %v2023_v48 = vpop.f32.mrb[0].mxu0 }
 0x18e   :  { %v3121_v54 = vadd.f32 %v2023_v48, %v4222_v29  ;;  %v2025_v55 = vpop.f32.mrb[1].mxu0 }
 0x18f   :  { %v2026_v60 = vpop.f32.mrb[2].mxu0 }
 0x190   :  { %v2258_v1 = vmul.f32 %v3121_v54, %v4477_v50  ;;  %v3122_v3 = vadd.f32 %v2026_v60, %v4230_v33  ;;  %v2028_v5 = vpop.f32.mrb[3].mxu0  ;;  %v2898_v33 = vcombine.low %v185_v47, %v185_v47 }
 0x191   :  { %1982 = vmatmul.mubr.bf16.gmra.mrb[112].mxu1 %v2896_v52 }
 0x192   :  { %v2320_v29 = vadd.f32 %v4486_v59, %v2258_v1  ;;  %v2259_v7 = vmul.f32 %v3122_v3, %v4477_v50  ;;  %2238 = vmatmul.mubr.bf16.gmra.mrb[108].mxu0 %v3594_v58 }
 0x193   :  { %2972 = vmatprep.mubr.msk.bf16.mxu0 %vm1369_vm1, %v2899_v63 }
 0x194   :  { %v2377_v8 = vmax.f32 %v2320_v29, 0.0  ;;  %v2321_v11 = vadd.f32 %v4486_v59, %v2259_v7 }
 0x195   :  { %v2031_v12 = vpop.f32.mrb[4].mxu0 }
 0x196   :  { %v3032_v13 = vpack.c.bf16 %v2377_v8, %v2377_v8  ;;  %v2378_v16 = vmax.f32 %v2321_v11, 0.0  ;;  %v3123_v17 = vadd.f32 %v2031_v12, %v4236_v37  ;;  %v2033_v19 = vpop.f32.mrb[5].mxu0 }
 0x197   :  { %v2034_v21 = vpop.f32.mrb[6].mxu0 }
 0x198   :  { %2664 = vst.msk [vmem:[%s4866_s3] sm:$0xf] %vm2663_vm2, %v3032_v13  ;;  %v3033_v23 = vpack.c.bf16 %v2378_v16, %v2378_v16  ;;  %v2260_v0 = vmul.f32 %v3123_v17, %v4477_v50  ;;  %v3124_v26 = vadd.f32 %v2034_v21, %v4241_v41  ;;  %v2036_v27 = vpop.f32.mrb[7].mxu0 }
 0x19a   :  { %2665 = vst.msk [vmem:[%s4866_s3 + $0x4] sm:$0xf] %vm2663_vm2, %v3033_v23  ;;  %v2322_v37 = vadd.f32 %v4486_v59, %v2260_v0  ;;  %v2261_v28 = vmul.f32 %v3124_v26, %v4477_v50  ;;  %2246 = vmatmul.mubr.bf16.gmra.mrb[112].mxu0 %v2898_v33 }
 0x19c   :  { %v2379_v31 = vmax.f32 %v2322_v37, 0.0  ;;  %v2323_v34 = vadd.f32 %v4486_v59, %v2261_v28 }
 0x19d   :  { %v2039_v36 = vpop.f32.mrb[8].mxu0 }
 0x19e   :  { %v3034_v38 = vpack.c.bf16 %v2379_v31, %v2379_v31  ;;  %v2380_v42 = vmax.f32 %v2323_v34, 0.0  ;;  %v3125_v43 = vadd.f32 %v2039_v36, %v4250_v45  ;;  %v2041_v41 = vpop.f32.mrb[9].mxu0 }
 0x19f   :  { %v2042_v44 = vpop.f32.mrb[10].mxu0 }
 0x1a0   :  { %2666 = vst.msk [vmem:[%s4866_s3 + $0x8] sm:$0xf] %vm2663_vm2, %v3034_v38  ;;  %v3035_v47 = vpack.c.bf16 %v2380_v42, %v2380_v42  ;;  %v2262_v48 = vmul.f32 %v3125_v43, %v4477_v50  ;;  %v3126_v52 = vadd.f32 %v2042_v44, %v4258_v49  ;;  %v2044_v54 = vpop.f32.mrb[11].mxu0 }
 0x1a2   :  { %2667 = vst.msk [vmem:[%s4866_s3 + $0xc] sm:$0xf] %vm2663_vm2, %v3035_v47  ;;  %v2324_v45 = vadd.f32 %v4486_v59, %v2262_v48  ;;  %v2263_v55 = vmul.f32 %v3126_v52, %v4477_v50 }
 0x1a4   :  { %v2381_v58 = vmax.f32 %v2324_v45, 0.0  ;;  %v2325_v60 = vadd.f32 %v4486_v59, %v2263_v55 }
 0x1a5   :  { %v2047_v63 = vpop.f32.mrb[12].mxu0 }
 0x1a6   :  { %v3036_v1 = vpack.c.bf16 %v2381_v58, %v2381_v58  ;;  %v2382_v3 = vmax.f32 %v2325_v60, 0.0  ;;  %v3127_v5 = vadd.f32 %v2047_v63, %v4267_v53  ;;  %v2049_v29 = vpop.f32.mrb[13].mxu0 }
 0x1a7   :  { %v2050_v49 = vpop.f32.mrb[14].mxu0 }
 0x1a8   :  { %2668 = vst.msk [vmem:[%s4866_s3 + $0x10] sm:$0xf] %vm2663_vm2, %v3036_v1  ;;  %v3037_v7 = vpack.c.bf16 %v2382_v3, %v2382_v3  ;;  %v2264_v8 = vmul.f32 %v3127_v5, %v4477_v50  ;;  %v3128_v11 = vadd.f32 %v2050_v49, %v4275_v57  ;;  %v2052_v12 = vpop.f32.mrb[15].mxu0 }
 0x1aa   :  { %2669 = vst.msk [vmem:[%s4866_s3 + $0x14] sm:$0xf] %vm2663_vm2, %v3037_v7  ;;  %v2326_v53 = vadd.f32 %v4486_v59, %v2264_v8  ;;  %v2265_v13 = vmul.f32 %v3128_v11, %v4477_v50 }
 0x1ac   :  { %v2383_v16 = vmax.f32 %v2326_v53, 0.0  ;;  %v2327_v17 = vadd.f32 %v4486_v59, %v2265_v13 }
 0x1ad   :  { %v2055_v19 = vpop.f32.mrb[16].mxu0 }
 0x1ae   :  { %v3038_v33 = vpack.c.bf16 %v2383_v16, %v2383_v16  ;;  %v2384_v21 = vmax.f32 %v2327_v17, 0.0  ;;  %v3129_v23 = vadd.f32 %v2055_v19, %v4284_v61  ;;  %v2057_v0 = vpop.f32.mrb[17].mxu0 }
 0x1af   :  { %v2058_v57 = vpop.f32.mrb[18].mxu0 }
 0x1b0   :  { %2670 = vst.msk [vmem:[%s4866_s3 + $0x18] sm:$0xf] %vm2663_vm2, %v3038_v33  ;;  %v3039_v26 = vpack.c.bf16 %v2384_v21, %v2384_v21  ;;  %v2266_v27 = vmul.f32 %v3129_v23, %v4477_v50  ;;  %v3130_v37 = vadd.f32 %v2058_v57, %v4292_v2  ;;  %v2060_v28 = vpop.f32.mrb[19].mxu0 }
 0x1b2   :  { %2671 = vst.msk [vmem:[%s4866_s3 + $0x1c] sm:$0xf] %vm2663_vm2, %v3039_v26  ;;  %v2328_v61 = vadd.f32 %v4486_v59, %v2266_v27  ;;  %v2267_v31 = vmul.f32 %v3130_v37, %v4477_v50 }
 0x1b4   :  { %v2385_v34 = vmax.f32 %v2328_v61, 0.0  ;;  %v2329_v36 = vadd.f32 %v4486_v59, %v2267_v31 }
 0x1b5   :  { %v2063_v38 = vpop.f32.mrb[20].mxu0 }
 0x1b6   :  { %v3040_v42 = vpack.c.bf16 %v2385_v34, %v2385_v34  ;;  %v2386_v43 = vmax.f32 %v2329_v36, 0.0  ;;  %v3131_v41 = vadd.f32 %v2063_v38, %v4301_v6  ;;  %v2065_v44 = vpop.f32.mrb[21].mxu0 }
 0x1b7   :  { %v2066_v2 = vpop.f32.mrb[22].mxu0 }
 0x1b8   :  { %2672 = vst.msk [vmem:[%s4866_s3 + $0x20] sm:$0xf] %vm2663_vm2, %v3040_v42  ;;  %v3041_v47 = vpack.c.bf16 %v2386_v43, %v2386_v43  ;;  %v2268_v48 = vmul.f32 %v3131_v41, %v4477_v50  ;;  %v3132_v52 = vadd.f32 %v2066_v2, %v4309_v10  ;;  %v2068_v54 = vpop.f32.mrb[23].mxu0 }
 0x1ba   :  { %2673 = vst.msk [vmem:[%s4866_s3 + $0x24] sm:$0xf] %vm2663_vm2, %v3041_v47  ;;  %v2330_v6 = vadd.f32 %v4486_v59, %v2268_v48  ;;  %v2269_v45 = vmul.f32 %v3132_v52, %v4477_v50 }
 0x1bc   :  { %v2387_v55 = vmax.f32 %v2330_v6, 0.0  ;;  %v2331_v58 = vadd.f32 %v4486_v59, %v2269_v45 }
 0x1bd   :  { %v2071_v60 = vpop.f32.mrb[24].mxu0 }
 0x1be   :  { %v3042_v63 = vpack.c.bf16 %v2387_v55, %v2387_v55  ;;  %v2388_v1 = vmax.f32 %v2331_v58, 0.0  ;;  %v3133_v3 = vadd.f32 %v2071_v60, %v4318_v14  ;;  %v2073_v5 = vpop.f32.mrb[25].mxu0 }
 0x1bf   :  { %v2074_v10 = vpop.f32.mrb[26].mxu0 }
 0x1c0   :  { %2674 = vst.msk [vmem:[%s4866_s3 + $0x28] sm:$0xf] %vm2663_vm2, %v3042_v63  ;;  %v3043_v29 = vpack.c.bf16 %v2388_v1, %v2388_v1  ;;  %v2270_v49 = vmul.f32 %v3133_v3, %v4477_v50  ;;  %v3134_v7 = vadd.f32 %v2074_v10, %v4326_v18  ;;  %v2076_v8 = vpop.f32.mrb[27].mxu0 }
 0x1c2   :  { %2675 = vst.msk [vmem:[%s4866_s3 + $0x2c] sm:$0xf] %vm2663_vm2, %v3043_v29  ;;  %v2332_v14 = vadd.f32 %v4486_v59, %v2270_v49  ;;  %v2271_v11 = vmul.f32 %v3134_v7, %v4477_v50 }
 0x1c4   :  { %v2389_v12 = vmax.f32 %v2332_v14, 0.0  ;;  %v2333_v53 = vadd.f32 %v4486_v59, %v2271_v11 }
 0x1c5   :  { %v2079_v13 = vpop.f32.mrb[28].mxu0 }
 0x1c6   :  { %v3044_v16 = vpack.c.bf16 %v2389_v12, %v2389_v12  ;;  %v2390_v17 = vmax.f32 %v2333_v53, 0.0  ;;  %v3135_v19 = vadd.f32 %v2079_v13, %v4335_v22  ;;  %v2081_v33 = vpop.f32.mrb[29].mxu0 }
 0x1c7   :  { %v2082_v18 = vpop.f32.mrb[30].mxu0 }
 0x1c8   :  { %2676 = vst.msk [vmem:[%s4866_s3 + $0x30] sm:$0xf] %vm2663_vm2, %v3044_v16  ;;  %v3045_v21 = vpack.c.bf16 %v2390_v17, %v2390_v17  ;;  %v2272_v23 = vmul.f32 %v3135_v19, %v4477_v50  ;;  %v3136_v0 = vadd.f32 %v2082_v18, %v4343_v25  ;;  %v2084_v57 = vpop.f32.mrb[31].mxu0 }
 0x1ca   :  { %2677 = vst.msk [vmem:[%s4866_s3 + $0x34] sm:$0xf] %vm2663_vm2, %v3045_v21  ;;  %v2334_v22 = vadd.f32 %v4486_v59, %v2272_v23  ;;  %v2273_v26 = vmul.f32 %v3136_v0, %v4477_v50 }
 0x1cc   :  { %v2391_v27 = vmax.f32 %v2334_v22, 0.0  ;;  %v2335_v37 = vadd.f32 %v4486_v59, %v2273_v26 }
 0x1cd   :  { %v2087_v28 = vpop.f32.mrb[32].mxu0 }
 0x1ce   :  { %v3046_v61 = vpack.c.bf16 %v2391_v27, %v2391_v27  ;;  %v2392_v31 = vmax.f32 %v2335_v37, 0.0  ;;  %v3137_v34 = vadd.f32 %v2087_v28, %v4352_v30  ;;  %v2089_v36 = vpop.f32.mrb[33].mxu0 }
 0x1cf   :  { %v2090_v25 = vpop.f32.mrb[34].mxu0 }
 0x1d0   :  { %2678 = vst.msk [vmem:[%s4866_s3 + $0x38] sm:$0xf] %vm2663_vm2, %v3046_v61  ;;  %v3047_v38 = vpack.c.bf16 %v2392_v31, %v2392_v31  ;;  %v2274_v42 = vmul.f32 %v3137_v34, %v4477_v50  ;;  %v3138_v43 = vadd.f32 %v2090_v25, %v4360_v35  ;;  %v2092_v41 = vpop.f32.mrb[35].mxu0 }
 0x1d2   :  { %2679 = vst.msk [vmem:[%s4866_s3 + $0x3c] sm:$0xf] %vm2663_vm2, %v3047_v38  ;;  %v2336_v30 = vadd.f32 %v4486_v59, %v2274_v42  ;;  %v2275_v44 = vmul.f32 %v3138_v43, %v4477_v50 }
 0x1d4   :  { %v2393_v2 = vmax.f32 %v2336_v30, 0.0  ;;  %v2337_v47 = vadd.f32 %v4486_v59, %v2275_v44 }
 0x1d5   :  { %v2095_v48 = vpop.f32.mrb[36].mxu0 }
 0x1d6   :  { %v3048_v52 = vpack.c.bf16 %v2393_v2, %v2393_v2  ;;  %v2394_v54 = vmax.f32 %v2337_v47, 0.0  ;;  %v3139_v6 = vadd.f32 %v2095_v48, %v4369_v40  ;;  %v2097_v45 = vpop.f32.mrb[37].mxu0 }
 0x1d7   :  { %v2098_v35 = vpop.f32.mrb[38].mxu0 }
 0x1d8   :  { %2680 = vst.msk [vmem:[%s4866_s3 + $0x40] sm:$0xf] %vm2663_vm2, %v3048_v52  ;;  %v3049_v55 = vpack.c.bf16 %v2394_v54, %v2394_v54  ;;  %v2276_v58 = vmul.f32 %v3139_v6, %v4477_v50  ;;  %v3140_v60 = vadd.f32 %v2098_v35, %v4377_v46  ;;  %v2100_v63 = vpop.f32.mrb[39].mxu0 }
 0x1da   :  { %2681 = vst.msk [vmem:[%s4866_s3 + $0x44] sm:$0xf] %vm2663_vm2, %v3049_v55  ;;  %v2338_v40 = vadd.f32 %v4486_v59, %v2276_v58  ;;  %v2277_v1 = vmul.f32 %v3140_v60, %v4477_v50 }
 0x1dc   :  { %v2395_v3 = vmax.f32 %v2338_v40, 0.0  ;;  %v2339_v5 = vadd.f32 %v4486_v59, %v2277_v1 }
 0x1dd   :  { %v2103_v10 = vpop.f32.mrb[40].mxu0 }
 0x1de   :  { %v3050_v29 = vpack.c.bf16 %v2395_v3, %v2395_v3  ;;  %v2396_v49 = vmax.f32 %v2339_v5, 0.0  ;;  %v3141_v7 = vadd.f32 %v2103_v10, %v4386_v51  ;;  %v2105_v8 = vpop.f32.mrb[41].mxu0 }
 0x1df   :  { %v2106_v46 = vpop.f32.mrb[42].mxu0 }
 0x1e0   :  { %2682 = vst.msk [vmem:[%s4866_s3 + $0x48] sm:$0xf] %vm2663_vm2, %v3050_v29  ;;  %v3051_v14 = vpack.c.bf16 %v2396_v49, %v2396_v49  ;;  %v2278_v11 = vmul.f32 %v3141_v7, %v4477_v50  ;;  %v3142_v12 = vadd.f32 %v2106_v46, %v4394_v56  ;;  %v2108_v53 = vpop.f32.mrb[43].mxu0 }
 0x1e2   :  { %2683 = vst.msk [vmem:[%s4866_s3 + $0x4c] sm:$0xf] %vm2663_vm2, %v3051_v14  ;;  %v2340_v51 = vadd.f32 %v4486_v59, %v2278_v11  ;;  %v2279_v13 = vmul.f32 %v3142_v12, %v4477_v50 }
 0x1e4   :  { %v2397_v16 = vmax.f32 %v2340_v51, 0.0  ;;  %v2341_v17 = vadd.f32 %v4486_v59, %v2279_v13 }
 0x1e5   :  { %v2111_v19 = vpop.f32.mrb[44].mxu0 }
 0x1e6   :  { %v3052_v33 = vpack.c.bf16 %v2397_v16, %v2397_v16  ;;  %v2398_v18 = vmax.f32 %v2341_v17, 0.0  ;;  %v3143_v21 = vadd.f32 %v2111_v19, %v4403_v62  ;;  %v2113_v23 = vpop.f32.mrb[45].mxu0 }
 0x1e7   :  { %v2114_v56 = vpop.f32.mrb[46].mxu0 }
 0x1e8   :  { %2684 = vst.msk [vmem:[%s4866_s3 + $0x50] sm:$0xf] %vm2663_vm2, %v3052_v33  ;;  %v3053_v0 = vpack.c.bf16 %v2398_v18, %v2398_v18  ;;  %v2280_v57 = vmul.f32 %v3143_v21, %v4477_v50  ;;  %v3144_v22 = vadd.f32 %v2114_v56, %v4411_v4  ;;  %v2116_v26 = vpop.f32.mrb[47].mxu0 }
 0x1ea   :  { %2685 = vst.msk [vmem:[%s4866_s3 + $0x54] sm:$0xf] %vm2663_vm2, %v3053_v0  ;;  %v2342_v62 = vadd.f32 %v4486_v59, %v2280_v57  ;;  %v2281_v27 = vmul.f32 %v3144_v22, %v4477_v50 }
 0x1ec   :  { %v2399_v37 = vmax.f32 %v2342_v62, 0.0  ;;  %v2343_v28 = vadd.f32 %v4486_v59, %v2281_v27 }
 0x1ed   :  { %v2119_v61 = vpop.f32.mrb[48].mxu0 }
 0x1ee   :  { %v3054_v31 = vpack.c.bf16 %v2399_v37, %v2399_v37  ;;  %v2400_v34 = vmax.f32 %v2343_v28, 0.0  ;;  %v3145_v36 = vadd.f32 %v2119_v61, %v4420_v9  ;;  %v2121_v25 = vpop.f32.mrb[49].mxu0 }
 0x1ef   :  { %v2122_v4 = vpop.f32.mrb[50].mxu0 }
 0x1f0   :  { %2686 = vst.msk [vmem:[%s4866_s3 + $0x58] sm:$0xf] %vm2663_vm2, %v3054_v31  ;;  %v3055_v38 = vpack.c.bf16 %v2400_v34, %v2400_v34  ;;  %v2282_v42 = vmul.f32 %v3145_v36, %v4477_v50  ;;  %v3146_v43 = vadd.f32 %v2122_v4, %v4428_v15  ;;  %v2124_v41 = vpop.f32.mrb[51].mxu0 }
 0x1f2   :  { %2687 = vst.msk [vmem:[%s4866_s3 + $0x5c] sm:$0xf] %vm2663_vm2, %v3055_v38  ;;  %v2344_v9 = vadd.f32 %v4486_v59, %v2282_v42  ;;  %v2283_v30 = vmul.f32 %v3146_v43, %v4477_v50 }
 0x1f4   :  { %v2401_v44 = vmax.f32 %v2344_v9, 0.0  ;;  %v2345_v2 = vadd.f32 %v4486_v59, %v2283_v30 }
 0x1f5   :  { %v2127_v47 = vpop.f32.mrb[52].mxu0 }
 0x1f6   :  { %v3056_v48 = vpack.c.bf16 %v2401_v44, %v2401_v44  ;;  %v2402_v52 = vmax.f32 %v2345_v2, 0.0  ;;  %v3147_v54 = vadd.f32 %v2127_v47, %v4437_v20  ;;  %v2129_v6 = vpop.f32.mrb[53].mxu0 }
 0x1f7   :  { %v2130_v15 = vpop.f32.mrb[54].mxu0 }
 0x1f8   :  { %2688 = vst.msk [vmem:[%s4866_s3 + $0x60] sm:$0xf] %vm2663_vm2, %v3056_v48  ;;  %v3057_v45 = vpack.c.bf16 %v2402_v52, %v2402_v52  ;;  %v2284_v35 = vmul.f32 %v3147_v54, %v4477_v50  ;;  %v3148_v55 = vadd.f32 %v2130_v15, %v4445_v24  ;;  %v2132_v58 = vpop.f32.mrb[55].mxu0 }
 0x1fa   :  { %2689 = vst.msk [vmem:[%s4866_s3 + $0x64] sm:$0xf] %vm2663_vm2, %v3057_v45  ;;  %v2346_v20 = vadd.f32 %v4486_v59, %v2284_v35  ;;  %v2285_v60 = vmul.f32 %v3148_v55, %v4477_v50 }
 0x1fc   :  { %v2403_v63 = vmax.f32 %v2346_v20, 0.0  ;;  %v2347_v40 = vadd.f32 %v4486_v59, %v2285_v60  ;;  %v1879_v1 = vpop.f32.mrb[60].mxu1 }
 0x1fd   :  { %v2135_v3 = vpop.f32.mrb[56].mxu0  ;;  %v1881_v5 = vpop.f32.mrb[61].mxu1 }
 0x1fe   :  { %v3058_v10 = vpack.c.bf16 %v2403_v63, %v2403_v63  ;;  %v2404_v29 = vmax.f32 %v2347_v40, 0.0  ;;  %v3149_v24 = vadd.f32 %v2135_v3, %v4457_v32  ;;  %v2137_v49 = vpop.f32.mrb[57].mxu0  ;;  %v1882_v7 = vpop.f32.mrb[62].mxu1 }
 0x1ff   :  { %v2138_v8 = vpop.f32.mrb[58].mxu0  ;;  %v1884_v46 = vpop.f32.mrb[63].mxu1 }
 0x200   :  { %2690 = vst.msk [vmem:[%s4866_s3 + $0x68] sm:$0xf] %vm2663_vm2, %v3058_v10  ;;  %v3059_v14 = vpack.c.bf16 %v2404_v29, %v2404_v29  ;;  %v2286_v11 = vmul.f32 %v3149_v24, %v4477_v50  ;;  %v3150_v12 = vadd.f32 %v2138_v8, %v4465_v39  ;;  %v2140_v53 = vpop.f32.mrb[59].mxu0 }
 0x202   :  { %2691 = vst.msk [vmem:[%s4866_s3 + $0x6c] sm:$0xf] %vm2663_vm2, %v3059_v14  ;;  %v2348_v32 = vadd.f32 %v4486_v59, %v2286_v11  ;;  %v2287_v51 = vmul.f32 %v3150_v12, %v4477_v50 }
 0x204   :  { %v2405_v13 = vmax.f32 %v2348_v32, 0.0  ;;  %v2349_v16 = vadd.f32 %v4486_v59, %v2287_v51  ;;  %v1887_v17 = vpop.f32.mrb[64].mxu1 }
 0x205   :  { %v2143_v19 = vpop.f32.mrb[60].mxu0  ;;  %v1889_v33 = vpop.f32.mrb[65].mxu1 }
 0x206   :  { %v3060_v18 = vpack.c.bf16 %v2405_v13, %v2405_v13  ;;  %v2406_v21 = vmax.f32 %v2349_v16, 0.0  ;;  %v3151_v23 = vadd.f32 %v2143_v19, %v1879_v1  ;;  %v2145_v39 = vpop.f32.mrb[61].mxu0  ;;  %v1890_v56 = vpop.f32.mrb[66].mxu1 }
 0x207   :  { %v2146_v0 = vpop.f32.mrb[62].mxu0  ;;  %v1892_v57 = vpop.f32.mrb[67].mxu1 }
 0x208   :  { %2692 = vst.msk [vmem:[%s4866_s3 + $0x70] sm:$0xf] %vm2663_vm2, %v3060_v18  ;;  %v3061_v22 = vpack.c.bf16 %v2406_v21, %v2406_v21  ;;  %v2288_v26 = vmul.f32 %v3151_v23, %v4477_v50  ;;  %v3152_v62 = vadd.f32 %v2146_v0, %v1882_v7  ;;  %v2148_v27 = vpop.f32.mrb[63].mxu0 }
 0x20a   :  { %2693 = vst.msk [vmem:[%s4866_s3 + $0x74] sm:$0xf] %vm2663_vm2, %v3061_v22  ;;  %v2350_v37 = vadd.f32 %v4486_v59, %v2288_v26  ;;  %v2289_v28 = vmul.f32 %v3152_v62, %v4477_v50 }
 0x20c   :  { %v2407_v61 = vmax.f32 %v2350_v37, 0.0  ;;  %v2351_v31 = vadd.f32 %v4486_v59, %v2289_v28  ;;  %v1895_v34 = vpop.f32.mrb[68].mxu1 }
 0x20d   :  { %v2151_v36 = vpop.f32.mrb[64].mxu0  ;;  %v1897_v25 = vpop.f32.mrb[69].mxu1 }
 0x20e   :  { %v3062_v4 = vpack.c.bf16 %v2407_v61, %v2407_v61  ;;  %v2408_v38 = vmax.f32 %v2351_v31, 0.0  ;;  %v3153_v42 = vadd.f32 %v2151_v36, %v1887_v17  ;;  %v2153_v43 = vpop.f32.mrb[65].mxu0  ;;  %v1898_v41 = vpop.f32.mrb[70].mxu1 }
 0x20f   :  { %v2154_v9 = vpop.f32.mrb[66].mxu0  ;;  %v1900_v30 = vpop.f32.mrb[71].mxu1 }
 0x210   :  { %2694 = vst.msk [vmem:[%s4866_s3 + $0x78] sm:$0xf] %vm2663_vm2, %v3062_v4  ;;  %v3063_v44 = vpack.c.bf16 %v2408_v38, %v2408_v38  ;;  %v2290_v2 = vmul.f32 %v3153_v42, %v4477_v50  ;;  %v3154_v47 = vadd.f32 %v2154_v9, %v1890_v56  ;;  %v2156_v48 = vpop.f32.mrb[67].mxu0 }
 0x212   :  { %2695 = vst.msk [vmem:[%s4866_s3 + $0x7c] sm:$0xf] %vm2663_vm2, %v3063_v44  ;;  %v2352_v52 = vadd.f32 %v4486_v59, %v2290_v2  ;;  %v2291_v54 = vmul.f32 %v3154_v47, %v4477_v50 }
 0x214   :  { %v2409_v6 = vmax.f32 %v2352_v52, 0.0  ;;  %v2353_v15 = vadd.f32 %v4486_v59, %v2291_v54  ;;  %v1903_v45 = vpop.f32.mrb[72].mxu1 }
 0x215   :  { %v2159_v35 = vpop.f32.mrb[68].mxu0  ;;  %v1905_v55 = vpop.f32.mrb[73].mxu1 }
 0x216   :  { %v3064_v58 = vpack.c.bf16 %v2409_v6, %v2409_v6  ;;  %v2410_v20 = vmax.f32 %v2353_v15, 0.0  ;;  %v3155_v60 = vadd.f32 %v2159_v35, %v1895_v34  ;;  %v2161_v63 = vpop.f32.mrb[69].mxu0  ;;  %v1906_v40 = vpop.f32.mrb[74].mxu1 }
 0x217   :  { %v2162_v1 = vpop.f32.mrb[70].mxu0  ;;  %v1908_v3 = vpop.f32.mrb[75].mxu1 }
 0x218   :  { %2696 = vst.msk [vmem:[%s4866_s3 + $0x80] sm:$0xf] %vm2663_vm2, %v3064_v58  ;;  %v3065_v5 = vpack.c.bf16 %v2410_v20, %v2410_v20  ;;  %v2292_v10 = vmul.f32 %v3155_v60, %v4477_v50  ;;  %v3156_v29 = vadd.f32 %v2162_v1, %v1898_v41  ;;  %v2164_v24 = vpop.f32.mrb[71].mxu0 }
 0x21a   :  { %2697 = vst.msk [vmem:[%s4866_s3 + $0x84] sm:$0xf] %vm2663_vm2, %v3065_v5  ;;  %v2354_v49 = vadd.f32 %v4486_v59, %v2292_v10  ;;  %v2293_v7 = vmul.f32 %v3156_v29, %v4477_v50 }
 0x21c   :  { %v2411_v8 = vmax.f32 %v2354_v49, 0.0  ;;  %v2355_v46 = vadd.f32 %v4486_v59, %v2293_v7  ;;  %v1911_v14 = vpop.f32.mrb[76].mxu1 }
 0x21d   :  { %v2167_v11 = vpop.f32.mrb[72].mxu0  ;;  %v1913_v12 = vpop.f32.mrb[77].mxu1 }
 0x21e   :  { %v3066_v53 = vpack.c.bf16 %v2411_v8, %v2411_v8  ;;  %v2412_v32 = vmax.f32 %v2355_v46, 0.0  ;;  %v3157_v51 = vadd.f32 %v2167_v11, %v1903_v45  ;;  %v2169_v13 = vpop.f32.mrb[73].mxu0  ;;  %v1914_v16 = vpop.f32.mrb[78].mxu1 }
 0x21f   :  { %v2170_v17 = vpop.f32.mrb[74].mxu0  ;;  %v1916_v19 = vpop.f32.mrb[79].mxu1 }
 0x220   :  { %2698 = vst.msk [vmem:[%s4866_s3 + $0x88] sm:$0xf] %vm2663_vm2, %v3066_v53  ;;  %v3067_v33 = vpack.c.bf16 %v2412_v32, %v2412_v32  ;;  %v2294_v18 = vmul.f32 %v3157_v51, %v4477_v50  ;;  %v3158_v21 = vadd.f32 %v2170_v17, %v1906_v40  ;;  %v2172_v23 = vpop.f32.mrb[75].mxu0 }
 0x222   :  { %2699 = vst.msk [vmem:[%s4866_s3 + $0x8c] sm:$0xf] %vm2663_vm2, %v3067_v33  ;;  %v2356_v39 = vadd.f32 %v4486_v59, %v2294_v18  ;;  %v2295_v56 = vmul.f32 %v3158_v21, %v4477_v50 }
 0x224   :  { %v2413_v0 = vmax.f32 %v2356_v39, 0.0  ;;  %v2357_v57 = vadd.f32 %v4486_v59, %v2295_v56  ;;  %v1919_v22 = vpop.f32.mrb[80].mxu1 }
 0x225   :  { %v2175_v26 = vpop.f32.mrb[76].mxu0  ;;  %v1921_v62 = vpop.f32.mrb[81].mxu1 }
 0x226   :  { %v3068_v27 = vpack.c.bf16 %v2413_v0, %v2413_v0  ;;  %v2414_v37 = vmax.f32 %v2357_v57, 0.0  ;;  %v3159_v28 = vadd.f32 %v2175_v26, %v1911_v14  ;;  %v2177_v61 = vpop.f32.mrb[77].mxu0  ;;  %v1922_v31 = vpop.f32.mrb[82].mxu1 }
 0x227   :  { %v2178_v34 = vpop.f32.mrb[78].mxu0  ;;  %v1924_v36 = vpop.f32.mrb[83].mxu1 }
 0x228   :  { %2700 = vst.msk [vmem:[%s4866_s3 + $0x90] sm:$0xf] %vm2663_vm2, %v3068_v27  ;;  %v3069_v25 = vpack.c.bf16 %v2414_v37, %v2414_v37  ;;  %v2296_v4 = vmul.f32 %v3159_v28, %v4477_v50  ;;  %v3160_v38 = vadd.f32 %v2178_v34, %v1914_v16  ;;  %v2180_v42 = vpop.f32.mrb[79].mxu0 }
 0x22a   :  { %2701 = vst.msk [vmem:[%s4866_s3 + $0x94] sm:$0xf] %vm2663_vm2, %v3069_v25  ;;  %v2358_v43 = vadd.f32 %v4486_v59, %v2296_v4  ;;  %v2297_v41 = vmul.f32 %v3160_v38, %v4477_v50 }
 0x22c   :  { %v2415_v9 = vmax.f32 %v2358_v43, 0.0  ;;  %v2359_v30 = vadd.f32 %v4486_v59, %v2297_v41  ;;  %v1927_v44 = vpop.f32.mrb[84].mxu1 }
 0x22d   :  { %v2183_v2 = vpop.f32.mrb[80].mxu0  ;;  %v1929_v47 = vpop.f32.mrb[85].mxu1 }
 0x22e   :  { %v3070_v48 = vpack.c.bf16 %v2415_v9, %v2415_v9  ;;  %v2416_v52 = vmax.f32 %v2359_v30, 0.0  ;;  %v3161_v54 = vadd.f32 %v2183_v2, %v1919_v22  ;;  %v2185_v6 = vpop.f32.mrb[81].mxu0  ;;  %v1930_v15 = vpop.f32.mrb[86].mxu1 }
 0x22f   :  { %v2186_v45 = vpop.f32.mrb[82].mxu0  ;;  %v1932_v35 = vpop.f32.mrb[87].mxu1 }
 0x230   :  { %2702 = vst.msk [vmem:[%s4866_s3 + $0x98] sm:$0xf] %vm2663_vm2, %v3070_v48  ;;  %v3071_v55 = vpack.c.bf16 %v2416_v52, %v2416_v52  ;;  %v2298_v58 = vmul.f32 %v3161_v54, %v4477_v50  ;;  %v3162_v20 = vadd.f32 %v2186_v45, %v1922_v31  ;;  %v2188_v60 = vpop.f32.mrb[83].mxu0 }
 0x232   :  { %2703 = vst.msk [vmem:[%s4866_s3 + $0x9c] sm:$0xf] %vm2663_vm2, %v3071_v55  ;;  %v2360_v63 = vadd.f32 %v4486_v59, %v2298_v58  ;;  %v2299_v40 = vmul.f32 %v3162_v20, %v4477_v50 }
 0x234   :  { %v2417_v1 = vmax.f32 %v2360_v63, 0.0  ;;  %v2361_v3 = vadd.f32 %v4486_v59, %v2299_v40  ;;  %v1935_v5 = vpop.f32.mrb[88].mxu1 }
 0x235   :  { %v2191_v10 = vpop.f32.mrb[84].mxu0  ;;  %v1937_v29 = vpop.f32.mrb[89].mxu1 }
 0x236   :  { %v3072_v24 = vpack.c.bf16 %v2417_v1, %v2417_v1  ;;  %v2418_v49 = vmax.f32 %v2361_v3, 0.0  ;;  %v3163_v7 = vadd.f32 %v2191_v10, %v1927_v44  ;;  %v2193_v8 = vpop.f32.mrb[85].mxu0  ;;  %v1938_v46 = vpop.f32.mrb[90].mxu1 }
 0x237   :  { %v2194_v14 = vpop.f32.mrb[86].mxu0  ;;  %v1940_v11 = vpop.f32.mrb[91].mxu1 }
 0x238   :  { %2704 = vst.msk [vmem:[%s4866_s3 + $0xa0] sm:$0xf] %vm2663_vm2, %v3072_v24  ;;  %v3073_v12 = vpack.c.bf16 %v2418_v49, %v2418_v49  ;;  %v2300_v53 = vmul.f32 %v3163_v7, %v4477_v50  ;;  %v3164_v32 = vadd.f32 %v2194_v14, %v1930_v15  ;;  %v2196_v51 = vpop.f32.mrb[87].mxu0 }
 0x23a   :  { %2705 = vst.msk [vmem:[%s4866_s3 + $0xa4] sm:$0xf] %vm2663_vm2, %v3073_v12  ;;  %v2362_v13 = vadd.f32 %v4486_v59, %v2300_v53  ;;  %v2301_v16 = vmul.f32 %v3164_v32, %v4477_v50 }
 0x23c   :  { %v2419_v17 = vmax.f32 %v2362_v13, 0.0  ;;  %v2363_v19 = vadd.f32 %v4486_v59, %v2301_v16  ;;  %v1943_v33 = vpop.f32.mrb[92].mxu1 }
 0x23d   :  { %v2199_v18 = vpop.f32.mrb[88].mxu0  ;;  %v1945_v21 = vpop.f32.mrb[93].mxu1 }
 0x23e   :  { %v3074_v23 = vpack.c.bf16 %v2419_v17, %v2419_v17  ;;  %v2420_v39 = vmax.f32 %v2363_v19, 0.0  ;;  %v3165_v56 = vadd.f32 %v2199_v18, %v1935_v5  ;;  %v2201_v0 = vpop.f32.mrb[89].mxu0  ;;  %v1946_v57 = vpop.f32.mrb[94].mxu1 }
 0x23f   :  { %v2202_v22 = vpop.f32.mrb[90].mxu0  ;;  %v1948_v26 = vpop.f32.mrb[95].mxu1 }
 0x240   :  { %2706 = vst.msk [vmem:[%s4866_s3 + $0xa8] sm:$0xf] %vm2663_vm2, %v3074_v23  ;;  %v3075_v62 = vpack.c.bf16 %v2420_v39, %v2420_v39  ;;  %v2302_v27 = vmul.f32 %v3165_v56, %v4477_v50  ;;  %v3166_v37 = vadd.f32 %v2202_v22, %v1938_v46  ;;  %v2204_v28 = vpop.f32.mrb[91].mxu0 }
 0x242   :  { %2707 = vst.msk [vmem:[%s4866_s3 + $0xac] sm:$0xf] %vm2663_vm2, %v3075_v62  ;;  %v2364_v61 = vadd.f32 %v4486_v59, %v2302_v27  ;;  %v2303_v31 = vmul.f32 %v3166_v37, %v4477_v50 }
 0x244   :  { %v2421_v34 = vmax.f32 %v2364_v61, 0.0  ;;  %v2365_v36 = vadd.f32 %v4486_v59, %v2303_v31  ;;  %v1951_v25 = vpop.f32.mrb[96].mxu1 }
 0x245   :  { %v2207_v4 = vpop.f32.mrb[92].mxu0  ;;  %v1953_v38 = vpop.f32.mrb[97].mxu1 }
 0x246   :  { %v3076_v42 = vpack.c.bf16 %v2421_v34, %v2421_v34  ;;  %v2422_v43 = vmax.f32 %v2365_v36, 0.0  ;;  %v3167_v41 = vadd.f32 %v2207_v4, %v1943_v33  ;;  %v2209_v9 = vpop.f32.mrb[93].mxu0  ;;  %v1954_v30 = vpop.f32.mrb[98].mxu1 }
 0x247   :  { %v2210_v44 = vpop.f32.mrb[94].mxu0  ;;  %v1956_v2 = vpop.f32.mrb[99].mxu1 }
 0x248   :  { %2708 = vst.msk [vmem:[%s4866_s3 + $0xb0] sm:$0xf] %vm2663_vm2, %v3076_v42  ;;  %v3077_v47 = vpack.c.bf16 %v2422_v43, %v2422_v43  ;;  %v2304_v48 = vmul.f32 %v3167_v41, %v4477_v50  ;;  %v3168_v52 = vadd.f32 %v2210_v44, %v1946_v57  ;;  %v2212_v54 = vpop.f32.mrb[95].mxu0 }
 0x24a   :  { %2709 = vst.msk [vmem:[%s4866_s3 + $0xb4] sm:$0xf] %vm2663_vm2, %v3077_v47  ;;  %v2366_v6 = vadd.f32 %v4486_v59, %v2304_v48  ;;  %v2305_v15 = vmul.f32 %v3168_v52, %v4477_v50 }
 0x24c   :  { %v2423_v45 = vmax.f32 %v2366_v6, 0.0  ;;  %v2367_v35 = vadd.f32 %v4486_v59, %v2305_v15  ;;  %v1959_v55 = vpop.f32.mrb[100].mxu1 }
 0x24d   :  { %v2215_v58 = vpop.f32.mrb[96].mxu0  ;;  %v1961_v20 = vpop.f32.mrb[101].mxu1 }
 0x24e   :  { %v3078_v60 = vpack.c.bf16 %v2423_v45, %v2423_v45  ;;  %v2424_v63 = vmax.f32 %v2367_v35, 0.0  ;;  %v3169_v40 = vadd.f32 %v2215_v58, %v1951_v25  ;;  %v2217_v1 = vpop.f32.mrb[97].mxu0  ;;  %v1962_v3 = vpop.f32.mrb[102].mxu1 }
 0x24f   :  { %v2218_v5 = vpop.f32.mrb[98].mxu0  ;;  %v1964_v10 = vpop.f32.mrb[103].mxu1 }
 0x250   :  { %2710 = vst.msk [vmem:[%s4866_s3 + $0xb8] sm:$0xf] %vm2663_vm2, %v3078_v60  ;;  %v3079_v29 = vpack.c.bf16 %v2424_v63, %v2424_v63  ;;  %v2306_v24 = vmul.f32 %v3169_v40, %v4477_v50  ;;  %v3170_v49 = vadd.f32 %v2218_v5, %v1954_v30  ;;  %v2220_v7 = vpop.f32.mrb[99].mxu0 }
 0x252   :  { %2711 = vst.msk [vmem:[%s4866_s3 + $0xbc] sm:$0xf] %vm2663_vm2, %v3079_v29  ;;  %v2368_v8 = vadd.f32 %v4486_v59, %v2306_v24  ;;  %v2307_v46 = vmul.f32 %v3170_v49, %v4477_v50 }
 0x254   :  { %v2425_v14 = vmax.f32 %v2368_v8, 0.0  ;;  %v2369_v11 = vadd.f32 %v4486_v59, %v2307_v46  ;;  %v1967_v12 = vpop.f32.mrb[104].mxu1 }
 0x255   :  { %v2223_v53 = vpop.f32.mrb[100].mxu0  ;;  %v1969_v32 = vpop.f32.mrb[105].mxu1 }
 0x256   :  { %v3080_v51 = vpack.c.bf16 %v2425_v14, %v2425_v14  ;;  %v2426_v13 = vmax.f32 %v2369_v11, 0.0  ;;  %v3171_v16 = vadd.f32 %v2223_v53, %v1959_v55  ;;  %v2225_v17 = vpop.f32.mrb[101].mxu0  ;;  %v1970_v19 = vpop.f32.mrb[106].mxu1  ;;  %v3597_v11 = vld [vmem:[%s4865_s2] ss:$0 sm:$0xff] }
 0x257   :  { %v2226_v33 = vpop.f32.mrb[102].mxu0  ;;  %v1972_v18 = vpop.f32.mrb[107].mxu1 }
 0x258   :  { %2712 = vst.msk [vmem:[%s4866_s3 + $0xc0] sm:$0xf] %vm2663_vm2, %v3080_v51  ;;  %v3081_v21 = vpack.c.bf16 %v2426_v13, %v2426_v13  ;;  %v2308_v23 = vmul.f32 %v3171_v16, %v4477_v50  ;;  %v3172_v39 = vadd.f32 %v2226_v33, %v1962_v3  ;;  %v2228_v56 = vpop.f32.mrb[103].mxu0 }
 0x25a   :  { %2713 = vst.msk [vmem:[%s4866_s3 + $0xc4] sm:$0xf] %vm2663_vm2, %v3081_v21  ;;  %v2370_v0 = vadd.f32 %v4486_v59, %v2308_v23  ;;  %v2309_v57 = vmul.f32 %v3172_v39, %v4477_v50 }
 0x25c   :  { %v2427_v22 = vmax.f32 %v2370_v0, 0.0  ;;  %v2371_v26 = vadd.f32 %v4486_v59, %v2309_v57  ;;  %v1975_v62 = vpop.f32.mrb[108].mxu1 }
 0x25d   :  { %v2231_v27 = vpop.f32.mrb[104].mxu0  ;;  %v1977_v37 = vpop.f32.mrb[109].mxu1 }
 0x25e   :  { %v3082_v28 = vpack.c.bf16 %v2427_v22, %v2427_v22  ;;  %v2428_v61 = vmax.f32 %v2371_v26, 0.0  ;;  %v3173_v31 = vadd.f32 %v2231_v27, %v1967_v12  ;;  %v2233_v34 = vpop.f32.mrb[105].mxu0  ;;  %v1978_v36 = vpop.f32.mrb[110].mxu1 }
 0x25f   :  { %v2234_v25 = vpop.f32.mrb[106].mxu0  ;;  %v1980_v4 = vpop.f32.mrb[111].mxu1 }
 0x260   :  { %2714 = vst.msk [vmem:[%s4866_s3 + $0xc8] sm:$0xf] %vm2663_vm2, %v3082_v28  ;;  %v3083_v38 = vpack.c.bf16 %v2428_v61, %v2428_v61  ;;  %v2310_v42 = vmul.f32 %v3173_v31, %v4477_v50  ;;  %v3174_v43 = vadd.f32 %v2234_v25, %v1970_v19  ;;  %v2236_v41 = vpop.f32.mrb[107].mxu0 }
 0x262   :  { %2715 = vst.msk [vmem:[%s4866_s3 + $0xcc] sm:$0xf] %vm2663_vm2, %v3083_v38  ;;  %v2372_v9 = vadd.f32 %v4486_v59, %v2310_v42  ;;  %v2311_v30 = vmul.f32 %v3174_v43, %v4477_v50 }
 0x264   :  { %v2429_v44 = vmax.f32 %v2372_v9, 0.0  ;;  %v2373_v2 = vadd.f32 %v4486_v59, %v2311_v30  ;;  %v1983_v47 = vpop.f32.mrb[112].mxu1 }
 0x265   :  { %v2239_v48 = vpop.f32.mrb[108].mxu0  ;;  %v1985_v52 = vpop.f32.mrb[113].mxu1 }
 0x266   :  { %v3084_v54 = vpack.c.bf16 %v2429_v44, %v2429_v44  ;;  %v2430_v6 = vmax.f32 %v2373_v2, 0.0  ;;  %v3175_v15 = vadd.f32 %v2239_v48, %v1975_v62  ;;  %v2241_v45 = vpop.f32.mrb[109].mxu0  ;;  %v1986_v35 = vpop.f32.mrb[114].mxu1 }
 0x267   :  { %v2242_v55 = vpop.f32.mrb[110].mxu0  ;;  %v1987_v58 = vpop.f32.mrb[115].mxu1 }
 0x268   :  { %2716 = vst.msk [vmem:[%s4866_s3 + $0xd0] sm:$0xf] %vm2663_vm2, %v3084_v54  ;;  %v3085_v20 = vpack.c.bf16 %v2430_v6, %v2430_v6  ;;  %v2312_v60 = vmul.f32 %v3175_v15, %v4477_v50  ;;  %v3176_v63 = vadd.f32 %v2242_v55, %v1978_v36  ;;  %v2244_v40 = vpop.f32.mrb[111].mxu0 }
 0x26a   :  { %2717 = vst.msk [vmem:[%s4866_s3 + $0xd4] sm:$0xf] %vm2663_vm2, %v3085_v20  ;;  %v2374_v1 = vadd.f32 %v4486_v59, %v2312_v60  ;;  %v2313_v3 = vmul.f32 %v3176_v63, %v4477_v50 }
 0x26c   :  { %v2431_v5 = vmax.f32 %v2374_v1, 0.0  ;;  %v2375_v10 = vadd.f32 %v4486_v59, %v2313_v3  ;;  %v3598_v59 = vld [vmem:[%s4865_s2 + $0x1] ss:$0 sm:$0xff] }
 0x26d   :  { %v2247_v29 = vpop.f32.mrb[112].mxu0 }
 0x26e   :  { %v3086_v24 = vpack.c.bf16 %v2431_v5, %v2431_v5  ;;  %v2432_v49 = vmax.f32 %v2375_v10, 0.0  ;;  %v3177_v7 = vadd.f32 %v2247_v29, %v1983_v47  ;;  %v2249_v8 = vpop.f32.mrb[113].mxu0 }
 0x26f   :  { %v2250_v46 = vpop.f32.mrb[114].mxu0 }
 0x270   :  { %2718 = vst.msk [vmem:[%s4866_s3 + $0xd8] sm:$0xf] %vm2663_vm2, %v3086_v24  ;;  %v3087_v14 = vpack.c.bf16 %v2432_v49, %v2432_v49  ;;  %v2314_v50 = vmul.f32 %v3597_v11, %v3177_v7  ;;  %v2251_v12 = vpop.f32.mrb[115].mxu0 }
 0x272   :  { %2719 = vst.msk [vmem:[%s4866_s3 + $0xdc] sm:$0xf] %vm2663_vm2, %v3087_v14  ;;  %v2376_v53 = vadd.f32 %v3598_v59, %v2314_v50 }
 0x274   :  { %v2433_v32 = vmax.f32 %v2376_v53, 0.0 }
 0x276   :  { %v3088_v51 = vpack.c.bf16 %v2433_v32, %v2433_v32 }
 0x278   :  { %2721 = vst.msk [vmem:[%s4866_s3 + $0xe0] sm:$0x1] %vm2720_vm3, %v3088_v51 }

// kernel: autoencoder_forward.24
= control target key start
LH: loop header
LB: loop body
LE: loop exit
PB: predicated region body
PF: predicated region fallthrough
CT: control target
= control target key end

     0   :  { %s1810_s12 = smov 0   ;;  %s2183_s0 = inlined_call_operand.vmem [shape: bf16[2048,72], index: 0, kind: input, shape index: {}]   ;;  %s2184_s1 = inlined_call_operand.vmem [shape: bf16[72,4], index: 1, kind: input, shape index: {}]   ;;  %s2185_s2 = inlined_call_operand.vmem [shape: f32[2,4], index: 2, kind: input, shape index: {}]   ;;  %s2186_s3 = inlined_call_operand.vmem [shape: bf16[2048,4], index: 3, kind: output, shape index: {}]  }
   0x1 LB: > { %s1404_s13 = sadd.s32 4294967295, %s1788_s12   ;;  %p1408_p0 = scmp.ge.s32.totalorder %s1788_s12, 1  ;;  %s1788_s12 = sphi %s1810_s12, %s13_s12  }
   0x2   : > { %p138_p1 = scmp.lt.s32.totalorder %s1788_s12, 5 }
   0x4   : > { %p139_p2 = pnand %p1408_p0, %p138_p1 }
   0x5   : > { %v1745_v0 = vld [vmem:[%s2184_s1] sm:$0xff] (!%p139_p2)   ;;  %v1746_v1 = vld [vmem:[%s2184_s1 + $0x8] sm:$0xff] (!%p139_p2)   ;;  %s1409_s18 = sshll.u32 (!%p139_p2), %s1404_s13, 6  ;;  %v1747_v2 = vld [vmem:[%s2184_s1 + $0x10] sm:$0xff] (!%p139_p2)   ;;  %vm435_vm0 = vcmask (!%p139_p2), 588800   ;;  %vm532_vm1 = vcmask (!%p139_p2), 1043456  }
   0x6   : > { %142 = sbr.rel (%p139_p2) target bundleno = 313 (0x139), region = 32  ;;  %1651 = vmatprep.subr.bf16.mxu0 (!%p139_p2), %v1745_v0  ;;  %1725 = vmatprep.subr.bf16.mxu1 (!%p139_p2), %v1745_v0  ;;  %p163_p3 = scmp.lt.s32.totalorder (!%p139_p2), %s1409_s18, 255  ;;  %v1748_v3 = vld [vmem:[%s2184_s1 + $0x18] sm:$0xff] (!%p139_p2)   ;;  %v1749_v6 = vld [vmem:[%s2184_s1 + $0x20] ss:$0 sps:$4 sm:$0xff] (!%p139_p2)   ;;  %vm1283_vm2 = vcmask (!%p139_p2), 27648  }
   0x7   : > { %1652 = vmatpush3.bf16.msra.mxu0 (!%p139_p2), %v1745_v0  ;;  %1730 = vmatpush3.bf16.msra.mxu1 (!%p139_p2), %v1745_v0  ;;  %v534_v7 = vsel (!%p139_p2), %vm532_vm1, %v1749_v6, 0  ;;  %v1910_v38 = vld [vmem:[%s2185_s2] ss:$0 sm:$0xff] (!%p139_p2)  ;;  %v1915_v40 = vld [vmem:[%s2185_s2 + $0x1] ss:$0 sm:$0xff] (!%p139_p2) }
   0x8   : > { %1653 = vmatprep.subr.bf16.mxu0 (!%p139_p2), %v1746_v1  ;;  %1726 = vmatprep.subr.bf16.mxu1 (!%p139_p2), %v1746_v1 }
   0xb   : > { %1654 = vmatpush3.bf16.msra.mxu0 (!%p139_p2), %v1746_v1  ;;  %1731 = vmatpush3.bf16.msra.mxu1 (!%p139_p2), %v1746_v1 }
   0xc   : > { %1655 = vmatprep.subr.bf16.mxu0 (!%p139_p2), %v1747_v2  ;;  %1727 = vmatprep.subr.bf16.mxu1 (!%p139_p2), %v1747_v2 }
   0xd   : > { %s2188_s18 = smov (!%p163_p3, %s1409_s18), 255 }
   0xe   : > { %s1410_s21 = sshll.u32 %s2188_s18, 2 }
   0xf   : > { %s1838_s26 = scalar_lea.vmem %s2183_s0, %s1410_s21  ;;  %1656 = vmatpush3.bf16.msra.mxu0 %v1747_v2  ;;  %1732 = vmatpush3.bf16.msra.mxu1 %v1747_v2  ;;  %s1936_s8 = scalar_lea.vmem %s2186_s3, %s1410_s21 }
  0x10   : > { %v1750_v4 = vld [vmem:[%s1838_s26] sm:$0xff]   ;;  %1657 = vmatprep.subr.bf16.mxu0 %v1748_v3  ;;  %1728 = vmatprep.subr.bf16.mxu1 %v1748_v3  ;;  %v1752_v8 = vld [vmem:[%s1838_s26 + $0x8] sm:$0xff]   ;;  %v1754_v10 = vld [vmem:[%s1838_s26 + $0x10] sm:$0xff]  }
  0x11   : > { %v1751_v5 = vld [vmem:[%s1838_s26 + $0x80] sm:$0xff]   ;;  %1661 = vmatprep.mubr.msk.bf16.mxu0 %vm435_vm0, %v1750_v4  ;;  %v1753_v9 = vld [vmem:[%s1838_s26 + $0x88] sm:$0xff]   ;;  %v1755_v11 = vld [vmem:[%s1838_s26 + $0x90] sm:$0xff]  }
  0x12   : > { %1693 = vmatprep.mubr.msk.bf16.mxu1 %vm435_vm0, %v1751_v5  ;;  %v1756_v12 = vld [vmem:[%s1838_s26 + $0x18] sm:$0xff]   ;;  %v1758_v14 = vld [vmem:[%s1838_s26 + $0x20] sm:$0xff]   ;;  %v1760_v16 = vld [vmem:[%s1838_s26 + $0x28] sm:$0xff]  }
  0x13   : > { %1658 = vmatpush3.bf16.msra.mxu0 %v1748_v3  ;;  %1733 = vmatpush3.bf16.msra.mxu1 %v1748_v3  ;;  %v1757_v13 = vld [vmem:[%s1838_s26 + $0x98] sm:$0xff]   ;;  %v1759_v15 = vld [vmem:[%s1838_s26 + $0xa0] sm:$0xff]   ;;  %v1761_v17 = vld [vmem:[%s1838_s26 + $0xa8] sm:$0xff]  }
  0x14   : > { %1735 = vmatprep.subr.msk.bf16.mxu0 %vm532_vm1, %v1749_v6  ;;  %1736 = vmatprep.subr.msk.bf16.mxu1 %vm532_vm1, %v1749_v6  ;;  %v1762_v18 = vld [vmem:[%s1838_s26 + $0x30] sm:$0xff]   ;;  %v1764_v20 = vld [vmem:[%s1838_s26 + $0x38] sm:$0xff]   ;;  %v1766_v22 = vld [vmem:[%s1838_s26 + $0x40] sm:$0xff]  }
  0x15   : > { %v1763_v19 = vld [vmem:[%s1838_s26 + $0xb0] sm:$0xff]   ;;  %v1765_v21 = vld [vmem:[%s1838_s26 + $0xb8] sm:$0xff]   ;;  %v1767_v23 = vld [vmem:[%s1838_s26 + $0xc0] sm:$0xff]  }
  0x16   : > { %v1768_v24 = vld [vmem:[%s1838_s26 + $0x48] sm:$0xff]   ;;  %v1770_v26 = vld [vmem:[%s1838_s26 + $0x50] sm:$0xff]   ;;  %v1772_v28 = vld [vmem:[%s1838_s26 + $0x58] sm:$0xff]  }
  0x17   : > { %1660 = vmatpush3.bf16.msra.mxu0 %v534_v7  ;;  %1734 = vmatpush3.bf16.msra.mxu1 %v534_v7  ;;  %v1769_v25 = vld [vmem:[%s1838_s26 + $0xc8] sm:$0xff]   ;;  %v1771_v27 = vld [vmem:[%s1838_s26 + $0xd0] sm:$0xff]   ;;  %v1773_v29 = vld [vmem:[%s1838_s26 + $0xd8] sm:$0xff]  }
  0x18   : > { %v1774_v30 = vld [vmem:[%s1838_s26 + $0x60] sm:$0xff]   ;;  %v1776_v32 = vld [vmem:[%s1838_s26 + $0x68] sm:$0xff]   ;;  %v1778_v34 = vld [vmem:[%s1838_s26 + $0x70] sm:$0xff]  }
  0x19   : > { %v1775_v31 = vld [vmem:[%s1838_s26 + $0xe0] sm:$0xff]   ;;  %v1777_v33 = vld [vmem:[%s1838_s26 + $0xe8] sm:$0xff]   ;;  %v1779_v35 = vld [vmem:[%s1838_s26 + $0xf0] sm:$0xff]  }
  0x1a   : > { %1662 = vmatmul.mubr.msk.bf16.vlgmr.msra.gmra.mrb[0].mxu0 %vm435_vm0, %v1752_v8  ;;  %1694 = vmatmul.mubr.msk.bf16.vlgmr.msra.gmra.mrb[0].mxu1 %vm435_vm0, %v1753_v9  ;;  %v1780_v36 = vld [vmem:[%s1838_s26 + $0x78] sm:$0xff]  }
  0x1b   : > { %1665 = vmatprep.mubr.msk.bf16.mxu0 %vm435_vm0, %v1754_v10  ;;  %1697 = vmatprep.mubr.msk.bf16.mxu1 %vm435_vm0, %v1755_v11  ;;  %v1781_v37 = vld [vmem:[%s1838_s26 + $0xf8] sm:$0xff]  }
  0x22   : > { %1666 = vmatmul.mubr.msk.bf16.gmra.mrb[4].mxu0 %vm435_vm0, %v1756_v12  ;;  %1698 = vmatmul.mubr.msk.bf16.gmra.mrb[4].mxu1 %vm435_vm0, %v1757_v13 }
  0x23   : > { %1669 = vmatprep.mubr.msk.bf16.mxu0 %vm435_vm0, %v1758_v14  ;;  %1701 = vmatprep.mubr.msk.bf16.mxu1 %vm435_vm0, %v1759_v15 }
  0x2a   : > { %1670 = vmatmul.mubr.msk.bf16.gmra.mrb[8].mxu0 %vm435_vm0, %v1760_v16  ;;  %1702 = vmatmul.mubr.msk.bf16.gmra.mrb[8].mxu1 %vm435_vm0, %v1761_v17 }
  0x2b   : > { %1673 = vmatprep.mubr.msk.bf16.mxu0 %vm435_vm0, %v1762_v18  ;;  %1705 = vmatprep.mubr.msk.bf16.mxu1 %vm435_vm0, %v1763_v19 }
  0x32   : > { %1674 = vmatmul.mubr.msk.bf16.gmra.mrb[12].mxu0 %vm435_vm0, %v1764_v20  ;;  %1706 = vmatmul.mubr.msk.bf16.gmra.mrb[12].mxu1 %vm435_vm0, %v1765_v21 }
  0x33   : > { %1677 = vmatprep.mubr.msk.bf16.mxu0 %vm435_vm0, %v1766_v22  ;;  %1709 = vmatprep.mubr.msk.bf16.mxu1 %vm435_vm0, %v1767_v23 }
  0x3a   : > { %1678 = vmatmul.mubr.msk.bf16.gmra.mrb[16].mxu0 %vm435_vm0, %v1768_v24  ;;  %1710 = vmatmul.mubr.msk.bf16.gmra.mrb[16].mxu1 %vm435_vm0, %v1769_v25 }
  0x3b   : > { %1681 = vmatprep.mubr.msk.bf16.mxu0 %vm435_vm0, %v1770_v26  ;;  %1713 = vmatprep.mubr.msk.bf16.mxu1 %vm435_vm0, %v1771_v27 }
  0x42   : > { %1682 = vmatmul.mubr.msk.bf16.gmra.mrb[20].mxu0 %vm435_vm0, %v1772_v28  ;;  %1714 = vmatmul.mubr.msk.bf16.gmra.mrb[20].mxu1 %vm435_vm0, %v1773_v29 }
  0x43   : > { %1685 = vmatprep.mubr.msk.bf16.mxu0 %vm435_vm0, %v1774_v30  ;;  %1717 = vmatprep.mubr.msk.bf16.mxu1 %vm435_vm0, %v1775_v31 }
  0x4a   : > { %1686 = vmatmul.mubr.msk.bf16.gmra.mrb[24].mxu0 %vm435_vm0, %v1776_v32  ;;  %1718 = vmatmul.mubr.msk.bf16.gmra.mrb[24].mxu1 %vm435_vm0, %v1777_v33 }
  0x4b   : > { %1689 = vmatprep.mubr.msk.bf16.mxu0 %vm435_vm0, %v1778_v34  ;;  %1721 = vmatprep.mubr.msk.bf16.mxu1 %vm435_vm0, %v1779_v35 }
  0x52   : > { %1690 = vmatmul.mubr.msk.bf16.gmra.mrb[28].mxu0 %vm435_vm0, %v1780_v36  ;;  %1722 = vmatmul.mubr.msk.bf16.gmra.mrb[28].mxu1 %vm435_vm0, %v1781_v37 }
  0xed   : > { %v1663_v39 = vpop.f32.mrb[0].mxu0  ;;  %v1695_v41 = vpop.f32.mrb[0].mxu1 }
  0xee   : > { %v832_v42 = vmul.f32 %v1663_v39, %v1910_v38  ;;  %v864_v43 = vmul.f32 %v1695_v41, %v1910_v38  ;;  %v570_v44 = vpop.f32.mrb[1].mxu0  ;;  %v698_v45 = vpop.f32.mrb[1].mxu1 }
  0xef   : > { %v830_v46 = vmul.f32 %v1910_v38, %v570_v44  ;;  %v862_v47 = vmul.f32 %v1910_v38, %v698_v45  ;;  %v1664_v48 = vpop.f32.mrb[2].mxu0  ;;  %v1696_v49 = vpop.f32.mrb[2].mxu1 }
  0xf0   : > { %v901_v50 = vadd.f32 %v1915_v40, %v832_v42  ;;  %v933_v51 = vadd.f32 %v1915_v40, %v864_v43  ;;  %v833_v52 = vmul.f32 %v1664_v48, %v1910_v38  ;;  %v865_v53 = vmul.f32 %v1696_v49, %v1910_v38  ;;  %v573_v54 = vpop.f32.mrb[3].mxu0  ;;  %v701_v55 = vpop.f32.mrb[3].mxu1 }
  0xf1   : > { %v899_v56 = vadd.f32 %v1915_v40, %v830_v46  ;;  %v931_v57 = vadd.f32 %v1915_v40, %v862_v47  ;;  %v831_v58 = vmul.f32 %v1910_v38, %v573_v54  ;;  %v863_v59 = vmul.f32 %v1910_v38, %v701_v55 }
  0xf2   : > { %v965_v60 = vmax.f32 %v901_v50, 0.0  ;;  %v997_v61 = vmax.f32 %v933_v51, 0.0  ;;  %v902_v62 = vadd.f32 %v1915_v40, %v833_v52  ;;  %v934_v63 = vadd.f32 %v1915_v40, %v865_v53 }
  0xf3   : > { %v963_v0 = vmax.f32 %v899_v56, 0.0  ;;  %v995_v1 = vmax.f32 %v931_v57, 0.0  ;;  %v900_v2 = vadd.f32 %v1915_v40, %v831_v58  ;;  %v932_v3 = vadd.f32 %v1915_v40, %v863_v59 }
  0xf4   : > { %v1552_v4 = vpack.c.bf16 %v965_v60, %v965_v60  ;;  %v1584_v5 = vpack.c.bf16 %v997_v61, %v997_v61  ;;  %v966_v6 = vmax.f32 %v902_v62, 0.0  ;;  %v998_v7 = vmax.f32 %v934_v63, 0.0 }
  0xf5   : > { %v1550_v8 = vpack.c.bf16 %v963_v0, %v963_v0  ;;  %v1582_v9 = vpack.c.bf16 %v995_v1, %v995_v1  ;;  %v964_v10 = vmax.f32 %v900_v2, 0.0  ;;  %v996_v11 = vmax.f32 %v932_v3, 0.0  ;;  %v1667_v12 = vpop.f32.mrb[4].mxu0  ;;  %v1699_v13 = vpop.f32.mrb[4].mxu1 }
  0xf6   : > { %1286 = vst.msk [vmem:[%s1936_s8 + $0x8] sm:$0xf] %vm1283_vm2, %v1552_v4  ;;  %1318 = vst.msk [vmem:[%s1936_s8 + $0x88] sm:$0xf] %vm1283_vm2, %v1584_v5  ;;  %v1553_v14 = vpack.c.bf16 %v966_v6, %v966_v6  ;;  %v1585_v15 = vpack.c.bf16 %v998_v7, %v998_v7  ;;  %v836_v16 = vmul.f32 %v1667_v12, %v1910_v38  ;;  %v586_v18 = vpop.f32.mrb[5].mxu0  ;;  %v714_v19 = vpop.f32.mrb[5].mxu1 }
  0xf7   : > { %v868_v17 = vmul.f32 %v1699_v13, %v1910_v38  ;;  %1284 = vst.msk [vmem:[%s1936_s8] sm:$0xf] %vm1283_vm2, %v1550_v8  ;;  %1316 = vst.msk [vmem:[%s1936_s8 + $0x80] sm:$0xf] %vm1283_vm2, %v1582_v9  ;;  %v1551_v20 = vpack.c.bf16 %v964_v10, %v964_v10  ;;  %v1583_v21 = vpack.c.bf16 %v996_v11, %v996_v11  ;;  %v1668_v24 = vpop.f32.mrb[6].mxu0  ;;  %v1700_v25 = vpop.f32.mrb[6].mxu1 }
  0xf8   : > { %v834_v22 = vmul.f32 %v1910_v38, %v586_v18  ;;  %v866_v23 = vmul.f32 %v1910_v38, %v714_v19  ;;  %1287 = vst.msk [vmem:[%s1936_s8 + $0xc] sm:$0xf] %vm1283_vm2, %v1553_v14  ;;  %1319 = vst.msk [vmem:[%s1936_s8 + $0x8c] sm:$0xf] %vm1283_vm2, %v1585_v15  ;;  %v905_v26 = vadd.f32 %v1915_v40, %v836_v16  ;;  %v589_v30 = vpop.f32.mrb[7].mxu0  ;;  %v717_v31 = vpop.f32.mrb[7].mxu1 }
  0xf9   : > { %v937_v27 = vadd.f32 %v1915_v40, %v868_v17  ;;  %v837_v28 = vmul.f32 %v1668_v24, %v1910_v38  ;;  %v869_v29 = vmul.f32 %v1700_v25, %v1910_v38  ;;  %1285 = vst.msk [vmem:[%s1936_s8 + $0x4] sm:$0xf] %vm1283_vm2, %v1551_v20  ;;  %1317 = vst.msk [vmem:[%s1936_s8 + $0x84] sm:$0xf] %vm1283_vm2, %v1583_v21 }
  0xfa   : > { %v903_v32 = vadd.f32 %v1915_v40, %v834_v22  ;;  %v935_v33 = vadd.f32 %v1915_v40, %v866_v23  ;;  %v835_v34 = vmul.f32 %v1910_v38, %v589_v30  ;;  %v867_v35 = vmul.f32 %v1910_v38, %v717_v31 }
  0xfb   : > { %v969_v36 = vmax.f32 %v905_v26, 0.0  ;;  %v1001_v37 = vmax.f32 %v937_v27, 0.0  ;;  %v906_v39 = vadd.f32 %v1915_v40, %v837_v28  ;;  %v938_v41 = vadd.f32 %v1915_v40, %v869_v29 }
  0xfc   : > { %v967_v42 = vmax.f32 %v903_v32, 0.0  ;;  %v999_v43 = vmax.f32 %v935_v33, 0.0  ;;  %v904_v44 = vadd.f32 %v1915_v40, %v835_v34  ;;  %v936_v45 = vadd.f32 %v1915_v40, %v867_v35 }
  0xfd   : > { %v1556_v46 = vpack.c.bf16 %v969_v36, %v969_v36  ;;  %v1588_v47 = vpack.c.bf16 %v1001_v37, %v1001_v37  ;;  %v970_v48 = vmax.f32 %v906_v39, 0.0  ;;  %v1002_v49 = vmax.f32 %v938_v41, 0.0  ;;  %v1671_v54 = vpop.f32.mrb[8].mxu0  ;;  %v1703_v55 = vpop.f32.mrb[8].mxu1 }
  0xfe   : > { %v1554_v50 = vpack.c.bf16 %v967_v42, %v967_v42  ;;  %v1586_v51 = vpack.c.bf16 %v999_v43, %v999_v43  ;;  %v968_v52 = vmax.f32 %v904_v44, 0.0  ;;  %v1000_v53 = vmax.f32 %v936_v45, 0.0  ;;  %v602_v60 = vpop.f32.mrb[9].mxu0  ;;  %v730_v61 = vpop.f32.mrb[9].mxu1 }
  0xff   : > { %1290 = vst.msk [vmem:[%s1936_s8 + $0x18] sm:$0xf] %vm1283_vm2, %v1556_v46  ;;  %1322 = vst.msk [vmem:[%s1936_s8 + $0x98] sm:$0xf] %vm1283_vm2, %v1588_v47  ;;  %v1557_v56 = vpack.c.bf16 %v970_v48, %v970_v48  ;;  %v1589_v57 = vpack.c.bf16 %v1002_v49, %v1002_v49  ;;  %v840_v58 = vmul.f32 %v1671_v54, %v1910_v38  ;;  %v1672_v2 = vpop.f32.mrb[10].mxu0  ;;  %v1704_v3 = vpop.f32.mrb[10].mxu1 }
 0x100   : > { %v872_v59 = vmul.f32 %v1703_v55, %v1910_v38  ;;  %1288 = vst.msk [vmem:[%s1936_s8 + $0x10] sm:$0xf] %vm1283_vm2, %v1554_v50  ;;  %1320 = vst.msk [vmem:[%s1936_s8 + $0x90] sm:$0xf] %vm1283_vm2, %v1586_v51  ;;  %v1555_v62 = vpack.c.bf16 %v968_v52, %v968_v52  ;;  %v1587_v63 = vpack.c.bf16 %v1000_v53, %v1000_v53  ;;  %v605_v8 = vpop.f32.mrb[11].mxu0  ;;  %v733_v9 = vpop.f32.mrb[11].mxu1 }
 0x101   : > { %v838_v0 = vmul.f32 %v1910_v38, %v602_v60  ;;  %v870_v1 = vmul.f32 %v1910_v38, %v730_v61  ;;  %1291 = vst.msk [vmem:[%s1936_s8 + $0x1c] sm:$0xf] %vm1283_vm2, %v1557_v56  ;;  %1323 = vst.msk [vmem:[%s1936_s8 + $0x9c] sm:$0xf] %vm1283_vm2, %v1589_v57  ;;  %v909_v4 = vadd.f32 %v1915_v40, %v840_v58 }
 0x102   : > { %v941_v5 = vadd.f32 %v1915_v40, %v872_v59  ;;  %v841_v6 = vmul.f32 %v1672_v2, %v1910_v38  ;;  %v873_v7 = vmul.f32 %v1704_v3, %v1910_v38  ;;  %1289 = vst.msk [vmem:[%s1936_s8 + $0x14] sm:$0xf] %vm1283_vm2, %v1555_v62  ;;  %1321 = vst.msk [vmem:[%s1936_s8 + $0x94] sm:$0xf] %vm1283_vm2, %v1587_v63 }
 0x103   : > { %v907_v10 = vadd.f32 %v1915_v40, %v838_v0  ;;  %v939_v11 = vadd.f32 %v1915_v40, %v870_v1  ;;  %v839_v12 = vmul.f32 %v1910_v38, %v605_v8  ;;  %v871_v13 = vmul.f32 %v1910_v38, %v733_v9 }
 0x104   : > { %v973_v14 = vmax.f32 %v909_v4, 0.0  ;;  %v1005_v15 = vmax.f32 %v941_v5, 0.0  ;;  %v910_v16 = vadd.f32 %v1915_v40, %v841_v6  ;;  %v942_v17 = vadd.f32 %v1915_v40, %v873_v7 }
 0x105   : > { %v971_v18 = vmax.f32 %v907_v10, 0.0  ;;  %v1003_v19 = vmax.f32 %v939_v11, 0.0  ;;  %v908_v20 = vadd.f32 %v1915_v40, %v839_v12  ;;  %v940_v21 = vadd.f32 %v1915_v40, %v871_v13  ;;  %v1675_v30 = vpop.f32.mrb[12].mxu0  ;;  %v1707_v31 = vpop.f32.mrb[12].mxu1 }
 0x106   : > { %v1560_v22 = vpack.c.bf16 %v973_v14, %v973_v14  ;;  %v1592_v23 = vpack.c.bf16 %v1005_v15, %v1005_v15  ;;  %v974_v24 = vmax.f32 %v910_v16, 0.0  ;;  %v1006_v25 = vmax.f32 %v942_v17, 0.0  ;;  %v618_v36 = vpop.f32.mrb[13].mxu0  ;;  %v746_v37 = vpop.f32.mrb[13].mxu1 }
 0x107   : > { %v1558_v26 = vpack.c.bf16 %v971_v18, %v971_v18  ;;  %v1590_v27 = vpack.c.bf16 %v1003_v19, %v1003_v19  ;;  %v972_v28 = vmax.f32 %v908_v20, 0.0  ;;  %v1004_v29 = vmax.f32 %v940_v21, 0.0  ;;  %v1676_v44 = vpop.f32.mrb[14].mxu0  ;;  %v1708_v45 = vpop.f32.mrb[14].mxu1 }
 0x108   : > { %1294 = vst.msk [vmem:[%s1936_s8 + $0x28] sm:$0xf] %vm1283_vm2, %v1560_v22  ;;  %1326 = vst.msk [vmem:[%s1936_s8 + $0xa8] sm:$0xf] %vm1283_vm2, %v1592_v23  ;;  %v1561_v32 = vpack.c.bf16 %v974_v24, %v974_v24  ;;  %v1593_v33 = vpack.c.bf16 %v1006_v25, %v1006_v25  ;;  %v844_v34 = vmul.f32 %v1675_v30, %v1910_v38  ;;  %v621_v50 = vpop.f32.mrb[15].mxu0  ;;  %v749_v51 = vpop.f32.mrb[15].mxu1 }
 0x109   : > { %v876_v35 = vmul.f32 %v1707_v31, %v1910_v38  ;;  %1292 = vst.msk [vmem:[%s1936_s8 + $0x20] sm:$0xf] %vm1283_vm2, %v1558_v26  ;;  %1324 = vst.msk [vmem:[%s1936_s8 + $0xa0] sm:$0xf] %vm1283_vm2, %v1590_v27  ;;  %v1559_v39 = vpack.c.bf16 %v972_v28, %v972_v28  ;;  %v1591_v41 = vpack.c.bf16 %v1004_v29, %v1004_v29 }
 0x10a   : > { %v842_v42 = vmul.f32 %v1910_v38, %v618_v36  ;;  %v874_v43 = vmul.f32 %v1910_v38, %v746_v37  ;;  %1295 = vst.msk [vmem:[%s1936_s8 + $0x2c] sm:$0xf] %vm1283_vm2, %v1561_v32  ;;  %1327 = vst.msk [vmem:[%s1936_s8 + $0xac] sm:$0xf] %vm1283_vm2, %v1593_v33  ;;  %v913_v46 = vadd.f32 %v1915_v40, %v844_v34 }
 0x10b   : > { %v945_v47 = vadd.f32 %v1915_v40, %v876_v35  ;;  %v845_v48 = vmul.f32 %v1676_v44, %v1910_v38  ;;  %v877_v49 = vmul.f32 %v1708_v45, %v1910_v38  ;;  %1293 = vst.msk [vmem:[%s1936_s8 + $0x24] sm:$0xf] %vm1283_vm2, %v1559_v39  ;;  %1325 = vst.msk [vmem:[%s1936_s8 + $0xa4] sm:$0xf] %vm1283_vm2, %v1591_v41 }
 0x10c   : > { %v911_v52 = vadd.f32 %v1915_v40, %v842_v42  ;;  %v943_v53 = vadd.f32 %v1915_v40, %v874_v43  ;;  %v843_v54 = vmul.f32 %v1910_v38, %v621_v50  ;;  %v875_v55 = vmul.f32 %v1910_v38, %v749_v51 }
 0x10d   : > { %v977_v56 = vmax.f32 %v913_v46, 0.0  ;;  %v1009_v57 = vmax.f32 %v945_v47, 0.0  ;;  %v914_v58 = vadd.f32 %v1915_v40, %v845_v48  ;;  %v946_v59 = vadd.f32 %v1915_v40, %v877_v49  ;;  %v1679_v8 = vpop.f32.mrb[16].mxu0  ;;  %v1711_v9 = vpop.f32.mrb[16].mxu1 }
 0x10e   : > { %v975_v60 = vmax.f32 %v911_v52, 0.0  ;;  %v1007_v61 = vmax.f32 %v943_v53, 0.0  ;;  %v912_v62 = vadd.f32 %v1915_v40, %v843_v54  ;;  %v944_v63 = vadd.f32 %v1915_v40, %v875_v55  ;;  %v634_v14 = vpop.f32.mrb[17].mxu0  ;;  %v762_v15 = vpop.f32.mrb[17].mxu1 }
 0x10f   : > { %v1564_v0 = vpack.c.bf16 %v977_v56, %v977_v56  ;;  %v1596_v1 = vpack.c.bf16 %v1009_v57, %v1009_v57  ;;  %v978_v2 = vmax.f32 %v914_v58, 0.0  ;;  %v1010_v3 = vmax.f32 %v946_v59, 0.0  ;;  %v1680_v20 = vpop.f32.mrb[18].mxu0  ;;  %v1712_v21 = vpop.f32.mrb[18].mxu1 }
 0x110   : > { %v1562_v4 = vpack.c.bf16 %v975_v60, %v975_v60  ;;  %v1594_v5 = vpack.c.bf16 %v1007_v61, %v1007_v61  ;;  %v976_v6 = vmax.f32 %v912_v62, 0.0  ;;  %v1008_v7 = vmax.f32 %v944_v63, 0.0  ;;  %v637_v26 = vpop.f32.mrb[19].mxu0  ;;  %v765_v27 = vpop.f32.mrb[19].mxu1 }
 0x111   : > { %1298 = vst.msk [vmem:[%s1936_s8 + $0x38] sm:$0xf] %vm1283_vm2, %v1564_v0  ;;  %1330 = vst.msk [vmem:[%s1936_s8 + $0xb8] sm:$0xf] %vm1283_vm2, %v1596_v1  ;;  %v1565_v10 = vpack.c.bf16 %v978_v2, %v978_v2  ;;  %v1597_v11 = vpack.c.bf16 %v1010_v3, %v1010_v3  ;;  %v848_v12 = vmul.f32 %v1679_v8, %v1910_v38 }
 0x112   : > { %v880_v13 = vmul.f32 %v1711_v9, %v1910_v38  ;;  %1296 = vst.msk [vmem:[%s1936_s8 + $0x30] sm:$0xf] %vm1283_vm2, %v1562_v4  ;;  %1328 = vst.msk [vmem:[%s1936_s8 + $0xb0] sm:$0xf] %vm1283_vm2, %v1594_v5  ;;  %v1563_v16 = vpack.c.bf16 %v976_v6, %v976_v6  ;;  %v1595_v17 = vpack.c.bf16 %v1008_v7, %v1008_v7 }
 0x113   : > { %v846_v18 = vmul.f32 %v1910_v38, %v634_v14  ;;  %v878_v19 = vmul.f32 %v1910_v38, %v762_v15  ;;  %1299 = vst.msk [vmem:[%s1936_s8 + $0x3c] sm:$0xf] %vm1283_vm2, %v1565_v10  ;;  %1331 = vst.msk [vmem:[%s1936_s8 + $0xbc] sm:$0xf] %vm1283_vm2, %v1597_v11  ;;  %v917_v22 = vadd.f32 %v1915_v40, %v848_v12 }
 0x114   : > { %v949_v23 = vadd.f32 %v1915_v40, %v880_v13  ;;  %v849_v24 = vmul.f32 %v1680_v20, %v1910_v38  ;;  %v881_v25 = vmul.f32 %v1712_v21, %v1910_v38  ;;  %1297 = vst.msk [vmem:[%s1936_s8 + $0x34] sm:$0xf] %vm1283_vm2, %v1563_v16  ;;  %1329 = vst.msk [vmem:[%s1936_s8 + $0xb4] sm:$0xf] %vm1283_vm2, %v1595_v17 }
 0x115   : > { %v915_v28 = vadd.f32 %v1915_v40, %v846_v18  ;;  %v947_v29 = vadd.f32 %v1915_v40, %v878_v19  ;;  %v847_v30 = vmul.f32 %v1910_v38, %v637_v26  ;;  %v879_v31 = vmul.f32 %v1910_v38, %v765_v27  ;;  %v1683_v50 = vpop.f32.mrb[20].mxu0  ;;  %v1715_v51 = vpop.f32.mrb[20].mxu1 }
 0x116   : > { %v981_v32 = vmax.f32 %v917_v22, 0.0  ;;  %v1013_v33 = vmax.f32 %v949_v23, 0.0  ;;  %v918_v34 = vadd.f32 %v1915_v40, %v849_v24  ;;  %v950_v35 = vadd.f32 %v1915_v40, %v881_v25  ;;  %v650_v56 = vpop.f32.mrb[21].mxu0  ;;  %v778_v57 = vpop.f32.mrb[21].mxu1 }
 0x117   : > { %v979_v36 = vmax.f32 %v915_v28, 0.0  ;;  %v1011_v37 = vmax.f32 %v947_v29, 0.0  ;;  %v916_v39 = vadd.f32 %v1915_v40, %v847_v30  ;;  %v948_v41 = vadd.f32 %v1915_v40, %v879_v31  ;;  %v1684_v62 = vpop.f32.mrb[22].mxu0  ;;  %v1716_v63 = vpop.f32.mrb[22].mxu1 }
 0x118   : > { %v1568_v42 = vpack.c.bf16 %v981_v32, %v981_v32  ;;  %v1600_v43 = vpack.c.bf16 %v1013_v33, %v1013_v33  ;;  %v982_v44 = vmax.f32 %v918_v34, 0.0  ;;  %v1014_v45 = vmax.f32 %v950_v35, 0.0  ;;  %v653_v4 = vpop.f32.mrb[23].mxu0  ;;  %v781_v5 = vpop.f32.mrb[23].mxu1 }
 0x119   : > { %v1566_v46 = vpack.c.bf16 %v979_v36, %v979_v36  ;;  %v1598_v47 = vpack.c.bf16 %v1011_v37, %v1011_v37  ;;  %v980_v48 = vmax.f32 %v916_v39, 0.0  ;;  %v1012_v49 = vmax.f32 %v948_v41, 0.0 }
 0x11a   : > { %1302 = vst.msk [vmem:[%s1936_s8 + $0x48] sm:$0xf] %vm1283_vm2, %v1568_v42  ;;  %1334 = vst.msk [vmem:[%s1936_s8 + $0xc8] sm:$0xf] %vm1283_vm2, %v1600_v43  ;;  %v1569_v52 = vpack.c.bf16 %v982_v44, %v982_v44  ;;  %v1601_v53 = vpack.c.bf16 %v1014_v45, %v1014_v45  ;;  %v852_v54 = vmul.f32 %v1683_v50, %v1910_v38 }
 0x11b   : > { %v884_v55 = vmul.f32 %v1715_v51, %v1910_v38  ;;  %1300 = vst.msk [vmem:[%s1936_s8 + $0x40] sm:$0xf] %vm1283_vm2, %v1566_v46  ;;  %1332 = vst.msk [vmem:[%s1936_s8 + $0xc0] sm:$0xf] %vm1283_vm2, %v1598_v47  ;;  %v1567_v58 = vpack.c.bf16 %v980_v48, %v980_v48  ;;  %v1599_v59 = vpack.c.bf16 %v1012_v49, %v1012_v49 }
 0x11c   : > { %v850_v60 = vmul.f32 %v1910_v38, %v650_v56  ;;  %v882_v61 = vmul.f32 %v1910_v38, %v778_v57  ;;  %1303 = vst.msk [vmem:[%s1936_s8 + $0x4c] sm:$0xf] %vm1283_vm2, %v1569_v52  ;;  %1335 = vst.msk [vmem:[%s1936_s8 + $0xcc] sm:$0xf] %vm1283_vm2, %v1601_v53  ;;  %v921_v0 = vadd.f32 %v1915_v40, %v852_v54 }
 0x11d   : > { %v953_v1 = vadd.f32 %v1915_v40, %v884_v55  ;;  %v853_v2 = vmul.f32 %v1684_v62, %v1910_v38  ;;  %v885_v3 = vmul.f32 %v1716_v63, %v1910_v38  ;;  %1301 = vst.msk [vmem:[%s1936_s8 + $0x44] sm:$0xf] %vm1283_vm2, %v1567_v58  ;;  %1333 = vst.msk [vmem:[%s1936_s8 + $0xc4] sm:$0xf] %vm1283_vm2, %v1599_v59  ;;  %v1687_v26 = vpop.f32.mrb[24].mxu0  ;;  %v1719_v27 = vpop.f32.mrb[24].mxu1 }
 0x11e   : > { %v919_v6 = vadd.f32 %v1915_v40, %v850_v60  ;;  %v951_v7 = vadd.f32 %v1915_v40, %v882_v61  ;;  %v851_v8 = vmul.f32 %v1910_v38, %v653_v4  ;;  %v883_v9 = vmul.f32 %v1910_v38, %v781_v5  ;;  %v666_v32 = vpop.f32.mrb[25].mxu0  ;;  %v794_v33 = vpop.f32.mrb[25].mxu1 }
 0x11f   : > { %v985_v10 = vmax.f32 %v921_v0, 0.0  ;;  %v1017_v11 = vmax.f32 %v953_v1, 0.0  ;;  %v922_v12 = vadd.f32 %v1915_v40, %v853_v2  ;;  %v954_v13 = vadd.f32 %v1915_v40, %v885_v3  ;;  %v1688_v39 = vpop.f32.mrb[26].mxu0  ;;  %v1720_v41 = vpop.f32.mrb[26].mxu1 }
 0x120   : > { %v983_v14 = vmax.f32 %v919_v6, 0.0  ;;  %v1015_v15 = vmax.f32 %v951_v7, 0.0  ;;  %v920_v16 = vadd.f32 %v1915_v40, %v851_v8  ;;  %v952_v17 = vadd.f32 %v1915_v40, %v883_v9  ;;  %v669_v46 = vpop.f32.mrb[27].mxu0  ;;  %v797_v47 = vpop.f32.mrb[27].mxu1 }
 0x121   : > { %v1572_v18 = vpack.c.bf16 %v985_v10, %v985_v10  ;;  %v1604_v19 = vpack.c.bf16 %v1017_v11, %v1017_v11  ;;  %v986_v20 = vmax.f32 %v922_v12, 0.0  ;;  %v1018_v21 = vmax.f32 %v954_v13, 0.0 }
 0x122   : > { %v1570_v22 = vpack.c.bf16 %v983_v14, %v983_v14  ;;  %v1602_v23 = vpack.c.bf16 %v1015_v15, %v1015_v15  ;;  %v984_v24 = vmax.f32 %v920_v16, 0.0  ;;  %v1016_v25 = vmax.f32 %v952_v17, 0.0 }
 0x123   : > { %1306 = vst.msk [vmem:[%s1936_s8 + $0x58] sm:$0xf] %vm1283_vm2, %v1572_v18  ;;  %1338 = vst.msk [vmem:[%s1936_s8 + $0xd8] sm:$0xf] %vm1283_vm2, %v1604_v19  ;;  %v1573_v28 = vpack.c.bf16 %v986_v20, %v986_v20  ;;  %v1605_v29 = vpack.c.bf16 %v1018_v21, %v1018_v21  ;;  %v856_v30 = vmul.f32 %v1687_v26, %v1910_v38 }
 0x124   : > { %v888_v31 = vmul.f32 %v1719_v27, %v1910_v38  ;;  %1304 = vst.msk [vmem:[%s1936_s8 + $0x50] sm:$0xf] %vm1283_vm2, %v1570_v22  ;;  %1336 = vst.msk [vmem:[%s1936_s8 + $0xd0] sm:$0xf] %vm1283_vm2, %v1602_v23  ;;  %v1571_v34 = vpack.c.bf16 %v984_v24, %v984_v24  ;;  %v1603_v35 = vpack.c.bf16 %v1016_v25, %v1016_v25 }
 0x125   : > { %v854_v36 = vmul.f32 %v1910_v38, %v666_v32  ;;  %v886_v37 = vmul.f32 %v1910_v38, %v794_v33  ;;  %1307 = vst.msk [vmem:[%s1936_s8 + $0x5c] sm:$0xf] %vm1283_vm2, %v1573_v28  ;;  %1339 = vst.msk [vmem:[%s1936_s8 + $0xdc] sm:$0xf] %vm1283_vm2, %v1605_v29  ;;  %v925_v42 = vadd.f32 %v1915_v40, %v856_v30  ;;  %v1691_v4 = vpop.f32.mrb[28].mxu0  ;;  %v1723_v5 = vpop.f32.mrb[28].mxu1 }
 0x126   : > { %v957_v43 = vadd.f32 %v1915_v40, %v888_v31  ;;  %v857_v44 = vmul.f32 %v1688_v39, %v1910_v38  ;;  %v889_v45 = vmul.f32 %v1720_v41, %v1910_v38  ;;  %1305 = vst.msk [vmem:[%s1936_s8 + $0x54] sm:$0xf] %vm1283_vm2, %v1571_v34  ;;  %1337 = vst.msk [vmem:[%s1936_s8 + $0xd4] sm:$0xf] %vm1283_vm2, %v1603_v35  ;;  %v682_v10 = vpop.f32.mrb[29].mxu0  ;;  %v810_v11 = vpop.f32.mrb[29].mxu1 }
 0x127   : > { %v923_v48 = vadd.f32 %v1915_v40, %v854_v36  ;;  %v955_v49 = vadd.f32 %v1915_v40, %v886_v37  ;;  %v855_v50 = vmul.f32 %v1910_v38, %v669_v46  ;;  %v887_v51 = vmul.f32 %v1910_v38, %v797_v47  ;;  %v1692_v16 = vpop.f32.mrb[30].mxu0  ;;  %v1724_v17 = vpop.f32.mrb[30].mxu1 }
 0x128   : > { %v989_v52 = vmax.f32 %v925_v42, 0.0  ;;  %v1021_v53 = vmax.f32 %v957_v43, 0.0  ;;  %v926_v54 = vadd.f32 %v1915_v40, %v857_v44  ;;  %v958_v55 = vadd.f32 %v1915_v40, %v889_v45  ;;  %v685_v22 = vpop.f32.mrb[31].mxu0  ;;  %v813_v23 = vpop.f32.mrb[31].mxu1 }
 0x129   : > { %v987_v56 = vmax.f32 %v923_v48, 0.0  ;;  %v1019_v57 = vmax.f32 %v955_v49, 0.0  ;;  %v924_v58 = vadd.f32 %v1915_v40, %v855_v50  ;;  %v956_v59 = vadd.f32 %v1915_v40, %v887_v51 }
 0x12a   : > { %v1576_v60 = vpack.c.bf16 %v989_v52, %v989_v52  ;;  %v1608_v61 = vpack.c.bf16 %v1021_v53, %v1021_v53  ;;  %v990_v62 = vmax.f32 %v926_v54, 0.0  ;;  %v1022_v63 = vmax.f32 %v958_v55, 0.0 }
 0x12b   : > { %v1574_v0 = vpack.c.bf16 %v987_v56, %v987_v56  ;;  %v1606_v1 = vpack.c.bf16 %v1019_v57, %v1019_v57  ;;  %v988_v2 = vmax.f32 %v924_v58, 0.0  ;;  %v1020_v3 = vmax.f32 %v956_v59, 0.0 }
 0x12c   : > { %1310 = vst.msk [vmem:[%s1936_s8 + $0x68] sm:$0xf] %vm1283_vm2, %v1576_v60  ;;  %1342 = vst.msk [vmem:[%s1936_s8 + $0xe8] sm:$0xf] %vm1283_vm2, %v1608_v61  ;;  %v1577_v6 = vpack.c.bf16 %v990_v62, %v990_v62  ;;  %v1609_v7 = vpack.c.bf16 %v1022_v63, %v1022_v63  ;;  %v860_v8 = vmul.f32 %v1691_v4, %v1910_v38 }
 0x12d   : > { %v892_v9 = vmul.f32 %v1723_v5, %v1910_v38  ;;  %1308 = vst.msk [vmem:[%s1936_s8 + $0x60] sm:$0xf] %vm1283_vm2, %v1574_v0  ;;  %1340 = vst.msk [vmem:[%s1936_s8 + $0xe0] sm:$0xf] %vm1283_vm2, %v1606_v1  ;;  %v1575_v12 = vpack.c.bf16 %v988_v2, %v988_v2  ;;  %v1607_v13 = vpack.c.bf16 %v1020_v3, %v1020_v3 }
 0x12e   : > { %v858_v14 = vmul.f32 %v1910_v38, %v682_v10  ;;  %v890_v15 = vmul.f32 %v1910_v38, %v810_v11  ;;  %1311 = vst.msk [vmem:[%s1936_s8 + $0x6c] sm:$0xf] %vm1283_vm2, %v1577_v6  ;;  %1343 = vst.msk [vmem:[%s1936_s8 + $0xec] sm:$0xf] %vm1283_vm2, %v1609_v7  ;;  %v929_v18 = vadd.f32 %v1915_v40, %v860_v8 }
 0x12f   : > { %v961_v19 = vadd.f32 %v1915_v40, %v892_v9  ;;  %v861_v20 = vmul.f32 %v1692_v16, %v1910_v38  ;;  %v893_v21 = vmul.f32 %v1724_v17, %v1910_v38  ;;  %1309 = vst.msk [vmem:[%s1936_s8 + $0x64] sm:$0xf] %vm1283_vm2, %v1575_v12  ;;  %1341 = vst.msk [vmem:[%s1936_s8 + $0xe4] sm:$0xf] %vm1283_vm2, %v1607_v13 }
 0x130   : > { %v927_v24 = vadd.f32 %v1915_v40, %v858_v14  ;;  %v959_v25 = vadd.f32 %v1915_v40, %v890_v15  ;;  %v859_v26 = vmul.f32 %v1910_v38, %v685_v22  ;;  %v891_v27 = vmul.f32 %v1910_v38, %v813_v23 }
 0x131   : > { %v993_v28 = vmax.f32 %v929_v18, 0.0  ;;  %v1025_v29 = vmax.f32 %v961_v19, 0.0  ;;  %v930_v30 = vadd.f32 %v1915_v40, %v861_v20  ;;  %v962_v31 = vadd.f32 %v1915_v40, %v893_v21 }
 0x132   : > { %v991_v32 = vmax.f32 %v927_v24, 0.0  ;;  %v1023_v33 = vmax.f32 %v959_v25, 0.0  ;;  %v928_v34 = vadd.f32 %v1915_v40, %v859_v26  ;;  %v960_v35 = vadd.f32 %v1915_v40, %v891_v27 }
 0x133   : > { %v1580_v36 = vpack.c.bf16 %v993_v28, %v993_v28  ;;  %v1612_v37 = vpack.c.bf16 %v1025_v29, %v1025_v29  ;;  %v994_v38 = vmax.f32 %v930_v30, 0.0  ;;  %v1026_v39 = vmax.f32 %v962_v31, 0.0 }
 0x134   : > { %v1578_v41 = vpack.c.bf16 %v991_v32, %v991_v32  ;;  %v1610_v42 = vpack.c.bf16 %v1023_v33, %v1023_v33  ;;  %v992_v43 = vmax.f32 %v928_v34, 0.0  ;;  %v1024_v44 = vmax.f32 %v960_v35, 0.0 }
 0x135   : > { %1314 = vst.msk [vmem:[%s1936_s8 + $0x78] sm:$0xf] %vm1283_vm2, %v1580_v36  ;;  %1346 = vst.msk [vmem:[%s1936_s8 + $0xf8] sm:$0xf] %vm1283_vm2, %v1612_v37  ;;  %v1581_v45 = vpack.c.bf16 %v994_v38, %v994_v38  ;;  %v1613_v46 = vpack.c.bf16 %v1026_v39, %v1026_v39 }
 0x136   : > { %1312 = vst.msk [vmem:[%s1936_s8 + $0x70] sm:$0xf] %vm1283_vm2, %v1578_v41  ;;  %1344 = vst.msk [vmem:[%s1936_s8 + $0xf0] sm:$0xf] %vm1283_vm2, %v1610_v42  ;;  %v1579_v40 = vpack.c.bf16 %v992_v43, %v992_v43  ;;  %v1611_v47 = vpack.c.bf16 %v1024_v44, %v1024_v44 }
 0x137   : > { %1315 = vst.msk [vmem:[%s1936_s8 + $0x7c] sm:$0xf] %vm1283_vm2, %v1581_v45  ;;  %1347 = vst.msk [vmem:[%s1936_s8 + $0xfc] sm:$0xf] %vm1283_vm2, %v1613_v46 }
 0x138   : > { %1313 = vst.msk [vmem:[%s1936_s8 + $0x74] sm:$0xf] %vm1283_vm2, %v1579_v40  ;;  %1345 = vst.msk [vmem:[%s1936_s8 + $0xf4] sm:$0xf] %vm1283_vm2, %v1611_v47 }
 0x139 PF: > { %s13_s12 = sadd.s32 1, %s1788_s12  }
 0x13a   : > { %p10_p4 = scmp.ge.s32.totalorder %s13_s12, 6  }
 0x13c   :  { %12 = sbr.rel (!%p10_p4) target bundleno = 1 (0x1), region = 62 }

// kernel: autoencoder_forward.25
= control target key start
LH: loop header
LB: loop body
LE: loop exit
PB: predicated region body
PF: predicated region fallthrough
CT: control target
= control target key end

     0   :  { %s1731_s12 = smov 0   ;;  %s2224_s0 = inlined_call_operand.vmem [shape: bf16[2048,64], index: 0, kind: input, shape index: {}]   ;;  %s2225_s1 = inlined_call_operand.vmem [shape: bf16[64,3], index: 1, kind: input, shape index: {}]   ;;  %s2226_s2 = inlined_call_operand.vmem [shape: f32[2,3], index: 2, kind: input, shape index: {}]   ;;  %s2227_s3 = inlined_call_operand.vmem [shape: f32[2048,3], index: 3, kind: output, shape index: {}]  }
   0x1 LB: > { %s1332_s13 = sadd.s32 4294967295, %s1709_s12   ;;  %p1336_p0 = scmp.ge.s32.totalorder %s1709_s12, 1  ;;  %s1709_s12 = sphi %s1731_s12, %s13_s12  }
   0x2   : > { %p138_p1 = scmp.lt.s32.totalorder %s1709_s12, 5 }
   0x4   : > { %p139_p2 = pnand %p1336_p0, %p138_p1 }
   0x5   : > { %v1537_v0 = vld [vmem:[%s2225_s1] sm:$0xff] (!%p139_p2)   ;;  %s1337_s16 = sshll.u32 (!%p139_p2), %s1332_s13, 6  ;;  %v1538_v1 = vld [vmem:[%s2225_s1 + $0x8] sm:$0xff] (!%p139_p2)   ;;  %v1539_v2 = vld [vmem:[%s2225_s1 + $0x10] sm:$0xff] (!%p139_p2)   ;;  %vm431_vm0 = vcmask (!%p139_p2), 523264   ;;  %vm1211_vm1 = vcmask (!%p139_p2), 23552  }
   0x6   : > { %142 = sbr.rel (%p139_p2) target bundleno = 345 (0x159), region = 32  ;;  %p163_p3 = scmp.lt.s32.totalorder (!%p139_p2), %s1337_s16, 255  ;;  %1449 = vmatprep.subr.bf16.mxu0 (!%p139_p2), %v1537_v0  ;;  %1521 = vmatprep.subr.bf16.mxu1 (!%p139_p2), %v1537_v0  ;;  %v1540_v3 = vld [vmem:[%s2225_s1 + $0x18] sm:$0xff] (!%p139_p2)   ;;  %v1826_v36 = vld [vmem:[%s2226_s2] ss:$0 sm:$0xff] (!%p139_p2) }
   0x7   : > { %1450 = vmatpush3.bf16.msra.mxu0 (!%p139_p2), %v1537_v0  ;;  %1525 = vmatpush3.bf16.msra.mxu1 (!%p139_p2), %v1537_v0  ;;  %v1831_v38 = vld [vmem:[%s2226_s2 + $0x1] ss:$0 sm:$0xff] (!%p139_p2) }
   0x8   : > { %1451 = vmatprep.subr.bf16.mxu0 (!%p139_p2), %v1538_v1  ;;  %1522 = vmatprep.subr.bf16.mxu1 (!%p139_p2), %v1538_v1 }
   0xb   : > { %1452 = vmatpush3.bf16.msra.mxu0 (!%p139_p2), %v1538_v1  ;;  %1526 = vmatpush3.bf16.msra.mxu1 (!%p139_p2), %v1538_v1 }
   0xc   : > { %1453 = vmatprep.subr.bf16.mxu0 (!%p139_p2), %v1539_v2  ;;  %1523 = vmatprep.subr.bf16.mxu1 (!%p139_p2), %v1539_v2 }
   0xd   : > { %s2229_s16 = smov (!%p163_p3, %s1337_s16), 255 }
   0xe   : > { %s1338_s21 = sshll.u32 %s2229_s16, 2  ;;  %s1340_s4 = sshll.u32 %s2229_s16, 3 }
   0xf   : > { %s1757_s26 = scalar_lea.vmem %s2224_s0, %s1338_s21  ;;  %1454 = vmatpush3.bf16.msra.mxu0 %v1539_v2  ;;  %1527 = vmatpush3.bf16.msra.mxu1 %v1539_v2  ;;  %s1872_s7 = scalar_lea.vmem %s2227_s3, %s1340_s4 }
  0x10   : > { %v1541_v4 = vld [vmem:[%s1757_s26] sm:$0xff]   ;;  %1455 = vmatprep.subr.bf16.mxu0 %v1540_v3  ;;  %1524 = vmatprep.subr.bf16.mxu1 %v1540_v3  ;;  %v1543_v6 = vld [vmem:[%s1757_s26 + $0x8] sm:$0xff]   ;;  %v1545_v8 = vld [vmem:[%s1757_s26 + $0x10] sm:$0xff]  }
  0x11   : > { %v1542_v5 = vld [vmem:[%s1757_s26 + $0x80] sm:$0xff]   ;;  %1457 = vmatprep.mubr.msk.bf16.mxu0 %vm431_vm0, %v1541_v4  ;;  %v1544_v7 = vld [vmem:[%s1757_s26 + $0x88] sm:$0xff]   ;;  %v1546_v9 = vld [vmem:[%s1757_s26 + $0x90] sm:$0xff]  }
  0x12   : > { %1489 = vmatprep.mubr.msk.bf16.mxu1 %vm431_vm0, %v1542_v5  ;;  %v1547_v10 = vld [vmem:[%s1757_s26 + $0x18] sm:$0xff]   ;;  %v1549_v12 = vld [vmem:[%s1757_s26 + $0x20] sm:$0xff]   ;;  %v1551_v14 = vld [vmem:[%s1757_s26 + $0x28] sm:$0xff]  }
  0x13   : > { %1456 = vmatpush3.bf16.msra.mxu0 %v1540_v3  ;;  %1528 = vmatpush3.bf16.msra.mxu1 %v1540_v3  ;;  %v1548_v11 = vld [vmem:[%s1757_s26 + $0x98] sm:$0xff]   ;;  %v1550_v13 = vld [vmem:[%s1757_s26 + $0xa0] sm:$0xff]   ;;  %v1552_v15 = vld [vmem:[%s1757_s26 + $0xa8] sm:$0xff]  }
  0x14   : > { %v1553_v16 = vld [vmem:[%s1757_s26 + $0x30] sm:$0xff]   ;;  %v1555_v18 = vld [vmem:[%s1757_s26 + $0x38] sm:$0xff]   ;;  %v1557_v20 = vld [vmem:[%s1757_s26 + $0x40] sm:$0xff]  }
  0x15   : > { %v1554_v17 = vld [vmem:[%s1757_s26 + $0xb0] sm:$0xff]   ;;  %v1556_v19 = vld [vmem:[%s1757_s26 + $0xb8] sm:$0xff]   ;;  %v1558_v21 = vld [vmem:[%s1757_s26 + $0xc0] sm:$0xff]  }
  0x16   : > { %1458 = vmatmul.mubr.msk.bf16.vlgmr.msra.gmra.mrb[0].mxu0 %vm431_vm0, %v1543_v6  ;;  %1490 = vmatmul.mubr.msk.bf16.vlgmr.msra.gmra.mrb[0].mxu1 %vm431_vm0, %v1544_v7  ;;  %v1559_v22 = vld [vmem:[%s1757_s26 + $0x48] sm:$0xff]   ;;  %v1561_v24 = vld [vmem:[%s1757_s26 + $0x50] sm:$0xff]   ;;  %v1563_v26 = vld [vmem:[%s1757_s26 + $0x58] sm:$0xff]  }
  0x17   : > { %1461 = vmatprep.mubr.msk.bf16.mxu0 %vm431_vm0, %v1545_v8  ;;  %1493 = vmatprep.mubr.msk.bf16.mxu1 %vm431_vm0, %v1546_v9  ;;  %v1560_v23 = vld [vmem:[%s1757_s26 + $0xc8] sm:$0xff]   ;;  %v1562_v25 = vld [vmem:[%s1757_s26 + $0xd0] sm:$0xff]   ;;  %v1564_v27 = vld [vmem:[%s1757_s26 + $0xd8] sm:$0xff]  }
  0x18   : > { %v1565_v28 = vld [vmem:[%s1757_s26 + $0x60] sm:$0xff]   ;;  %v1567_v30 = vld [vmem:[%s1757_s26 + $0x68] sm:$0xff]   ;;  %v1569_v32 = vld [vmem:[%s1757_s26 + $0x70] sm:$0xff]  }
  0x19   : > { %v1566_v29 = vld [vmem:[%s1757_s26 + $0xe0] sm:$0xff]   ;;  %v1568_v31 = vld [vmem:[%s1757_s26 + $0xe8] sm:$0xff]   ;;  %v1570_v33 = vld [vmem:[%s1757_s26 + $0xf0] sm:$0xff]  }
  0x1a   : > { %v1571_v34 = vld [vmem:[%s1757_s26 + $0x78] sm:$0xff]  }
  0x1b   : > { %v1572_v35 = vld [vmem:[%s1757_s26 + $0xf8] sm:$0xff]  }
  0x1e   : > { %1462 = vmatmul.mubr.msk.bf16.gmra.mrb[4].mxu0 %vm431_vm0, %v1547_v10  ;;  %1494 = vmatmul.mubr.msk.bf16.gmra.mrb[4].mxu1 %vm431_vm0, %v1548_v11 }
  0x1f   : > { %1465 = vmatprep.mubr.msk.bf16.mxu0 %vm431_vm0, %v1549_v12  ;;  %1497 = vmatprep.mubr.msk.bf16.mxu1 %vm431_vm0, %v1550_v13 }
  0x26   : > { %1466 = vmatmul.mubr.msk.bf16.gmra.mrb[8].mxu0 %vm431_vm0, %v1551_v14  ;;  %1498 = vmatmul.mubr.msk.bf16.gmra.mrb[8].mxu1 %vm431_vm0, %v1552_v15 }
  0x27   : > { %1469 = vmatprep.mubr.msk.bf16.mxu0 %vm431_vm0, %v1553_v16  ;;  %1501 = vmatprep.mubr.msk.bf16.mxu1 %vm431_vm0, %v1554_v17 }
  0x2e   : > { %1470 = vmatmul.mubr.msk.bf16.gmra.mrb[12].mxu0 %vm431_vm0, %v1555_v18  ;;  %1502 = vmatmul.mubr.msk.bf16.gmra.mrb[12].mxu1 %vm431_vm0, %v1556_v19 }
  0x2f   : > { %1473 = vmatprep.mubr.msk.bf16.mxu0 %vm431_vm0, %v1557_v20  ;;  %1505 = vmatprep.mubr.msk.bf16.mxu1 %vm431_vm0, %v1558_v21 }
  0x36   : > { %1474 = vmatmul.mubr.msk.bf16.gmra.mrb[16].mxu0 %vm431_vm0, %v1559_v22  ;;  %1506 = vmatmul.mubr.msk.bf16.gmra.mrb[16].mxu1 %vm431_vm0, %v1560_v23 }
  0x37   : > { %1477 = vmatprep.mubr.msk.bf16.mxu0 %vm431_vm0, %v1561_v24  ;;  %1509 = vmatprep.mubr.msk.bf16.mxu1 %vm431_vm0, %v1562_v25 }
  0x3e   : > { %1478 = vmatmul.mubr.msk.bf16.gmra.mrb[20].mxu0 %vm431_vm0, %v1563_v26  ;;  %1510 = vmatmul.mubr.msk.bf16.gmra.mrb[20].mxu1 %vm431_vm0, %v1564_v27 }
  0x3f   : > { %1481 = vmatprep.mubr.msk.bf16.mxu0 %vm431_vm0, %v1565_v28  ;;  %1513 = vmatprep.mubr.msk.bf16.mxu1 %vm431_vm0, %v1566_v29 }
  0x46   : > { %1482 = vmatmul.mubr.msk.bf16.gmra.mrb[24].mxu0 %vm431_vm0, %v1567_v30  ;;  %1514 = vmatmul.mubr.msk.bf16.gmra.mrb[24].mxu1 %vm431_vm0, %v1568_v31 }
  0x47   : > { %1485 = vmatprep.mubr.msk.bf16.mxu0 %vm431_vm0, %v1569_v32  ;;  %1517 = vmatprep.mubr.msk.bf16.mxu1 %vm431_vm0, %v1570_v33 }
  0x4e   : > { %1486 = vmatmul.mubr.msk.bf16.gmra.mrb[28].mxu0 %vm431_vm0, %v1571_v34  ;;  %1518 = vmatmul.mubr.msk.bf16.gmra.mrb[28].mxu1 %vm431_vm0, %v1572_v35 }
  0xe9   : > { %v1459_v37 = vpop.f32.mrb[0].mxu0  ;;  %v1491_v39 = vpop.f32.mrb[0].mxu1 }
  0xea   : > { %v824_v40 = vmul.f32 %v1459_v37, %v1826_v36  ;;  %v856_v41 = vmul.f32 %v1491_v39, %v1826_v36  ;;  %v562_v42 = vpop.f32.mrb[1].mxu0  ;;  %v690_v43 = vpop.f32.mrb[1].mxu1 }
  0xeb   : > { %v822_v44 = vmul.f32 %v1826_v36, %v562_v42  ;;  %v854_v45 = vmul.f32 %v1826_v36, %v690_v43  ;;  %v1460_v46 = vpop.f32.mrb[2].mxu0  ;;  %v1492_v47 = vpop.f32.mrb[2].mxu1 }
  0xec   : > { %v893_v48 = vadd.f32 %v1831_v38, %v824_v40  ;;  %v925_v49 = vadd.f32 %v1831_v38, %v856_v41  ;;  %v825_v50 = vmul.f32 %v1460_v46, %v1826_v36  ;;  %v857_v51 = vmul.f32 %v1492_v47, %v1826_v36  ;;  %v565_v52 = vpop.f32.mrb[3].mxu0  ;;  %v693_v53 = vpop.f32.mrb[3].mxu1 }
  0xed   : > { %v891_v54 = vadd.f32 %v1831_v38, %v822_v44  ;;  %v923_v55 = vadd.f32 %v1831_v38, %v854_v45  ;;  %v823_v56 = vmul.f32 %v1826_v36, %v565_v52  ;;  %v855_v57 = vmul.f32 %v1826_v36, %v693_v53 }
  0xee   : > { %v957_v58 = vmul.f32 0.5, %v893_v48  ;;  %v989_v59 = vmul.f32 0.5, %v925_v49  ;;  %v894_v60 = vadd.f32 %v1831_v38, %v825_v50  ;;  %v926_v61 = vadd.f32 %v1831_v38, %v857_v51 }
  0xef   : > { %v955_v62 = vmul.f32 0.5, %v891_v54  ;;  %v987_v63 = vmul.f32 0.5, %v923_v55  ;;  %v892_v0 = vadd.f32 %v1831_v38, %v823_v56  ;;  %v924_v1 = vadd.f32 %v1831_v38, %v855_v57 }
  0xf0   : > { %1573 = vtanh.f32 %v957_v58  ;;  %v958_v2 = vmul.f32 0.5, %v894_v60  ;;  %v990_v3 = vmul.f32 0.5, %v926_v61 }
  0xf1   : > { %1575 = vtanh.f32 %v989_v59  ;;  %v1463_v4 = vpop.f32.mrb[4].mxu0  ;;  %v1495_v5 = vpop.f32.mrb[4].mxu1  ;;  %v956_v6 = vmul.f32 0.5, %v892_v0  ;;  %v988_v11 = vmul.f32 0.5, %v924_v1 }
  0xf2   : > { %1577 = vtanh.f32 %v955_v62  ;;  %v828_v7 = vmul.f32 %v1463_v4, %v1826_v36  ;;  %v860_v8 = vmul.f32 %v1495_v5, %v1826_v36  ;;  %v578_v9 = vpop.f32.mrb[5].mxu0  ;;  %v706_v10 = vpop.f32.mrb[5].mxu1 }
  0xf3   : > { %1579 = vtanh.f32 %v987_v63  ;;  %v826_v12 = vmul.f32 %v1826_v36, %v578_v9  ;;  %v858_v13 = vmul.f32 %v1826_v36, %v706_v10  ;;  %v1464_v14 = vpop.f32.mrb[6].mxu0  ;;  %v1496_v15 = vpop.f32.mrb[6].mxu1 }
  0xf4   : > { %1581 = vtanh.f32 %v958_v2  ;;  %v897_v16 = vadd.f32 %v1831_v38, %v828_v7  ;;  %v929_v17 = vadd.f32 %v1831_v38, %v860_v8  ;;  %v829_v18 = vmul.f32 %v1464_v14, %v1826_v36  ;;  %v581_v19 = vpop.f32.mrb[7].mxu0  ;;  %v709_v20 = vpop.f32.mrb[7].mxu1 }
  0xf5   : > { %1583 = vtanh.f32 %v990_v3  ;;  %v895_v21 = vadd.f32 %v1831_v38, %v826_v12  ;;  %v927_v22 = vadd.f32 %v1831_v38, %v858_v13  ;;  %v861_v23 = vmul.f32 %v1496_v15, %v1826_v36 }
  0xf6   : > { %1585 = vtanh.f32 %v956_v6  ;;  %v961_v24 = vmul.f32 0.5, %v897_v16  ;;  %v993_v25 = vmul.f32 0.5, %v929_v17  ;;  %v898_v26 = vadd.f32 %v1831_v38, %v829_v18 }
  0xf7   : > { %1587 = vtanh.f32 %v988_v11  ;;  %v959_v27 = vmul.f32 0.5, %v895_v21  ;;  %v991_v28 = vmul.f32 0.5, %v927_v22  ;;  %v930_v29 = vadd.f32 %v1831_v38, %v861_v23 }
  0xf8   : > { %1589 = vtanh.f32 %v961_v24  ;;  %v962_v30 = vmul.f32 0.5, %v898_v26  ;;  %v827_v31 = vmul.f32 %v1826_v36, %v581_v19  ;;  %v859_v32 = vmul.f32 %v1826_v36, %v709_v20 }
  0xf9   : > { %1591 = vtanh.f32 %v993_v25  ;;  %v994_v33 = vmul.f32 0.5, %v930_v29  ;;  %v1467_v34 = vpop.f32.mrb[8].mxu0  ;;  %v1499_v35 = vpop.f32.mrb[8].mxu1 }
  0xfa   : > { %v1574_v37 = vpop.eup %1573  ;;  %1593 = vtanh.f32 %v959_v27  ;;  %v896_v39 = vadd.f32 %v1831_v38, %v827_v31  ;;  %v928_v40 = vadd.f32 %v1831_v38, %v859_v32  ;;  %v832_v41 = vmul.f32 %v1467_v34, %v1826_v36  ;;  %v594_v42 = vpop.f32.mrb[9].mxu0 }
  0xfb   : > { %v722_v43 = vpop.f32.mrb[9].mxu1  ;;  %v1576_v44 = vpop.eup %1575  ;;  %v1085_v45 = vadd.f32 1.0, %v1574_v37  ;;  %1595 = vtanh.f32 %v991_v28  ;;  %v864_v46 = vmul.f32 %v1499_v35, %v1826_v36  ;;  %v830_v47 = vmul.f32 %v1826_v36, %v594_v42 }
  0xfc   : > { %v1468_v48 = vpop.f32.mrb[10].mxu0  ;;  %v1500_v49 = vpop.f32.mrb[10].mxu1  ;;  %v1117_v51 = vadd.f32 1.0, %v1576_v44  ;;  %1597 = vtanh.f32 %v962_v30  ;;  %v960_v52 = vmul.f32 0.5, %v896_v39  ;;  %v992_v53 = vmul.f32 0.5, %v928_v40 }
  0xfd   : > { %v1578_v50 = vpop.eup %1577  ;;  %v1874_v54 = vpop.f32.mrb[11].mxu0  ;;  %v1149_v57 = vmul.f32 0.5, %v1085_v45  ;;  %1599 = vtanh.f32 %v994_v33  ;;  %v901_v59 = vadd.f32 %v1831_v38, %v832_v41  ;;  %v933_v63 = vadd.f32 %v1831_v38, %v864_v46 }
  0xfe   : > { %v1876_v55 = vpop.f32.mrb[11].mxu1  ;;  %v1580_v56 = vpop.eup %1579  ;;  %v1083_v58 = vadd.f32 1.0, %v1578_v50  ;;  %v1181_v61 = vmul.f32 0.5, %v1117_v51  ;;  %1601 = vtanh.f32 %v960_v52  ;;  %v899_v8 = vadd.f32 %v1831_v38, %v830_v47 }
  0xff   : > { %v1582_v60 = vpop.eup %1581  ;;  %v1115_v62 = vadd.f32 1.0, %v1580_v56  ;;  %1214 = vst.msk [vmem:[%s1872_s7 + $0x10] sm:$0xff] %vm1211_vm1, %v1149_v57  ;;  %1603 = vtanh.f32 %v992_v53  ;;  %v965_v3 = vmul.f32 0.5, %v901_v59  ;;  %v997_v7 = vmul.f32 0.5, %v933_v63 }
 0x100   : > { %v1584_v0 = vpop.eup %1583  ;;  %v1147_v1 = vmul.f32 0.5, %v1083_v58  ;;  %v1086_v2 = vadd.f32 1.0, %v1582_v60  ;;  %1246 = vst.msk [vmem:[%s1872_s7 + $0x110] sm:$0xff] %vm1211_vm1, %v1181_v61  ;;  %v862_v12 = vmul.f32 %v1826_v36, %v722_v43  ;;  %v963_v18 = vmul.f32 0.5, %v899_v8 }
 0x101   : > { %v1586_v4 = vpop.eup %1585  ;;  %v1179_v5 = vmul.f32 0.5, %v1115_v62  ;;  %v1118_v6 = vadd.f32 1.0, %v1584_v0  ;;  %1605 = vtanh.f32 %v965_v3  ;;  %v1888_v13 = vpop.f32.mrb[12].mxu0  ;;  %v833_v25 = vmul.f32 %v1468_v48, %v1826_v36 }
 0x102   : > { %v1588_v9 = vpop.eup %1587  ;;  %1212 = vst.msk [vmem:[%s1872_s7] sm:$0xff] %vm1211_vm1, %v1147_v1  ;;  %v1150_v10 = vmul.f32 0.5, %v1086_v2  ;;  %v1084_v11 = vadd.f32 1.0, %v1586_v4  ;;  %v1890_v14 = vpop.f32.mrb[12].mxu1  ;;  %1607 = vtanh.f32 %v997_v7  ;;  %v931_v24 = vadd.f32 %v1831_v38, %v862_v12 }
 0x103   : > { %v1590_v15 = vpop.eup %1589  ;;  %1244 = vst.msk [vmem:[%s1872_s7 + $0x100] sm:$0xff] %vm1211_vm1, %v1179_v5  ;;  %v1182_v16 = vmul.f32 0.5, %v1118_v6  ;;  %v1116_v17 = vadd.f32 1.0, %v1588_v9  ;;  %v1894_v19 = vpop.f32.mrb[13].mxu0  ;;  %1609 = vtanh.f32 %v963_v18  ;;  %v865_v31 = vmul.f32 %v1500_v49, %v1826_v36 }
 0x104   : > { %v1896_v20 = vpop.f32.mrb[13].mxu1  ;;  %v1592_v21 = vpop.eup %1591  ;;  %1215 = vst.msk [vmem:[%s1872_s7 + $0x18] sm:$0xff] %vm1211_vm1, %v1150_v10  ;;  %v1148_v22 = vmul.f32 0.5, %v1084_v11  ;;  %v1089_v23 = vadd.f32 1.0, %v1590_v15  ;;  %v995_v39 = vmul.f32 0.5, %v931_v24  ;;  %v902_v40 = vadd.f32 %v1831_v38, %v833_v25 }
 0x105   : > { %v1902_v26 = vpop.f32.mrb[14].mxu0  ;;  %v1904_v27 = vpop.f32.mrb[14].mxu1  ;;  %1247 = vst.msk [vmem:[%s1872_s7 + $0x118] sm:$0xff] %vm1211_vm1, %v1182_v16  ;;  %v1180_v29 = vmul.f32 0.5, %v1116_v17  ;;  %v1121_v30 = vadd.f32 1.0, %v1592_v21  ;;  %v934_v44 = vadd.f32 %v1831_v38, %v865_v31  ;;  %v831_v45 = vmul.f32 %v1826_v36, %v1874_v54 }
 0x106   : > { %v1594_v28 = vpop.eup %1593  ;;  %v1909_v32 = vpop.f32.mrb[15].mxu0  ;;  %1213 = vst.msk [vmem:[%s1872_s7 + $0x8] sm:$0xff] %vm1211_vm1, %v1148_v22  ;;  %v1153_v35 = vmul.f32 0.5, %v1089_v23  ;;  %1611 = vtanh.f32 %v995_v39  ;;  %v966_v49 = vmul.f32 0.5, %v902_v40  ;;  %v863_v59 = vmul.f32 %v1826_v36, %v1876_v55 }
 0x107   : > { %v1911_v33 = vpop.f32.mrb[15].mxu1  ;;  %v1596_v34 = vpop.eup %1595  ;;  %v1087_v37 = vadd.f32 1.0, %v1594_v28  ;;  %1245 = vst.msk [vmem:[%s1872_s7 + $0x108] sm:$0xff] %vm1211_vm1, %v1180_v29  ;;  %v1185_v42 = vmul.f32 0.5, %v1121_v30  ;;  %v998_v53 = vmul.f32 0.5, %v934_v44  ;;  %v900_v56 = vadd.f32 %v1831_v38, %v831_v45 }
 0x108   : > { %v1598_v41 = vpop.eup %1597  ;;  %v1119_v43 = vadd.f32 1.0, %v1596_v34  ;;  %1218 = vst.msk [vmem:[%s1872_s7 + $0x30] sm:$0xff] %vm1211_vm1, %v1153_v35  ;;  %1613 = vtanh.f32 %v966_v49  ;;  %v932_v4 = vadd.f32 %v1831_v38, %v863_v59  ;;  %v836_v5 = vmul.f32 %v1888_v13, %v1826_v36 }
 0x109   : > { %v1600_v46 = vpop.eup %1599  ;;  %v1151_v47 = vmul.f32 0.5, %v1087_v37  ;;  %v1090_v48 = vadd.f32 1.0, %v1598_v41  ;;  %1250 = vst.msk [vmem:[%s1872_s7 + $0x130] sm:$0xff] %vm1211_vm1, %v1185_v42  ;;  %v1930_v60 = vpop.f32.mrb[16].mxu0  ;;  %1615 = vtanh.f32 %v998_v53  ;;  %v964_v0 = vmul.f32 0.5, %v900_v56 }
 0x10a   : > { %v1602_v50 = vpop.eup %1601  ;;  %v1183_v51 = vmul.f32 0.5, %v1119_v43  ;;  %v1122_v52 = vadd.f32 1.0, %v1600_v46  ;;  %v1932_v61 = vpop.f32.mrb[16].mxu1  ;;  %v868_v6 = vmul.f32 %v1890_v14, %v1826_v36  ;;  %v834_v12 = vmul.f32 %v1826_v36, %v1894_v19 }
 0x10b   : > { %v1604_v57 = vpop.eup %1603  ;;  %1216 = vst.msk [vmem:[%s1872_s7 + $0x20] sm:$0xff] %vm1211_vm1, %v1151_v47  ;;  %v1154_v54 = vmul.f32 0.5, %v1090_v48  ;;  %v1088_v58 = vadd.f32 1.0, %v1602_v50  ;;  %v1936_v1 = vpop.f32.mrb[17].mxu0  ;;  %1617 = vtanh.f32 %v964_v0  ;;  %v996_v16 = vmul.f32 0.5, %v932_v4 }
 0x10c   : > { %1248 = vst.msk [vmem:[%s1872_s7 + $0x120] sm:$0xff] %vm1211_vm1, %v1183_v51  ;;  %v1186_v62 = vmul.f32 0.5, %v1122_v52  ;;  %v1120_v63 = vadd.f32 1.0, %v1604_v57  ;;  %v1938_v2 = vpop.f32.mrb[17].mxu1  ;;  %v1606_v3 = vpop.eup %1605  ;;  %v905_v17 = vadd.f32 %v1831_v38, %v836_v5  ;;  %v937_v18 = vadd.f32 %v1831_v38, %v868_v6 }
 0x10d   : > { %1219 = vst.msk [vmem:[%s1872_s7 + $0x38] sm:$0xff] %vm1211_vm1, %v1154_v54  ;;  %v1152_v55 = vmul.f32 0.5, %v1088_v58  ;;  %v1947_v7 = vpop.f32.mrb[18].mxu0  ;;  %v1949_v8 = vpop.f32.mrb[18].mxu1  ;;  %v1093_v11 = vadd.f32 1.0, %v1606_v3  ;;  %v903_v19 = vadd.f32 %v1831_v38, %v834_v12  ;;  %v866_v23 = vmul.f32 %v1826_v36, %v1896_v20 }
 0x10e   : > { %v1608_v9 = vpop.eup %1607  ;;  %1251 = vst.msk [vmem:[%s1872_s7 + $0x138] sm:$0xff] %vm1211_vm1, %v1186_v62  ;;  %v1184_v10 = vmul.f32 0.5, %v1120_v63  ;;  %v1955_v15 = vpop.f32.mrb[19].mxu0  ;;  %v837_v24 = vmul.f32 %v1902_v26, %v1826_v36  ;;  %1619 = vtanh.f32 %v996_v16  ;;  %v969_v29 = vmul.f32 0.5, %v905_v17 }
 0x10f   : > { %v1957_v13 = vpop.f32.mrb[19].mxu1  ;;  %1217 = vst.msk [vmem:[%s1872_s7 + $0x28] sm:$0xff] %vm1211_vm1, %v1152_v55  ;;  %v1125_v14 = vadd.f32 1.0, %v1608_v9  ;;  %v1610_v21 = vpop.eup %1609  ;;  %v1157_v22 = vmul.f32 0.5, %v1093_v11  ;;  %v1001_v30 = vmul.f32 0.5, %v937_v18  ;;  %v967_v31 = vmul.f32 0.5, %v903_v19 }
 0x110   : > { %1249 = vst.msk [vmem:[%s1872_s7 + $0x128] sm:$0xff] %vm1211_vm1, %v1184_v10  ;;  %v1091_v28 = vadd.f32 1.0, %v1610_v21  ;;  %v935_v34 = vadd.f32 %v1831_v38, %v866_v23  ;;  %v906_v35 = vadd.f32 %v1831_v38, %v837_v24  ;;  %v1612_v37 = vpop.eup %1611  ;;  %1621 = vtanh.f32 %v969_v29 }
 0x111   : > { %v1189_v25 = vmul.f32 0.5, %v1125_v14  ;;  %1222 = vst.msk [vmem:[%s1872_s7 + $0x50] sm:$0xff] %vm1211_vm1, %v1157_v22  ;;  %v869_v26 = vmul.f32 %v1904_v27, %v1826_v36  ;;  %v835_v39 = vmul.f32 %v1826_v36, %v1909_v32  ;;  %v1980_v40 = vpop.f32.mrb[20].mxu0  ;;  %v1982_v41 = vpop.f32.mrb[20].mxu1  ;;  %v1123_v42 = vadd.f32 1.0, %v1612_v37 }
 0x112   : > { %v1155_v20 = vmul.f32 0.5, %v1091_v28  ;;  %1623 = vtanh.f32 %v1001_v30  ;;  %v999_v43 = vmul.f32 0.5, %v935_v34  ;;  %v970_v44 = vmul.f32 0.5, %v906_v35  ;;  %v1984_v45 = vpop.f32.mrb[21].mxu0  ;;  %v1986_v46 = vpop.f32.mrb[21].mxu1 }
 0x113   : > { %1254 = vst.msk [vmem:[%s1872_s7 + $0x150] sm:$0xff] %vm1211_vm1, %v1189_v25  ;;  %v1614_v47 = vpop.eup %1613  ;;  %1625 = vtanh.f32 %v967_v31  ;;  %v938_v27 = vadd.f32 %v1831_v38, %v869_v26  ;;  %v904_v32 = vadd.f32 %v1831_v38, %v835_v39  ;;  %v867_v48 = vmul.f32 %v1826_v36, %v1911_v33  ;;  %v1994_v49 = vpop.f32.mrb[22].mxu0 }
 0x114   : > { %1220 = vst.msk [vmem:[%s1872_s7 + $0x40] sm:$0xff] %vm1211_vm1, %v1155_v20  ;;  %v1996_v50 = vpop.f32.mrb[22].mxu1  ;;  %v1616_v51 = vpop.eup %1615  ;;  %v1187_v52 = vmul.f32 0.5, %v1123_v42  ;;  %v1094_v53 = vadd.f32 1.0, %v1614_v47  ;;  %1627 = vtanh.f32 %v999_v43  ;;  %v840_v56 = vmul.f32 %v1930_v60, %v1826_v36 }
 0x115   : > { %v2000_v57 = vpop.f32.mrb[23].mxu0  ;;  %v2002_v54 = vpop.f32.mrb[23].mxu1  ;;  %v1126_v58 = vadd.f32 1.0, %v1616_v51  ;;  %1629 = vtanh.f32 %v970_v44  ;;  %v1002_v59 = vmul.f32 0.5, %v938_v27  ;;  %v968_v33 = vmul.f32 0.5, %v904_v32 }
 0x116   : > { %v1618_v62 = vpop.eup %1617  ;;  %1252 = vst.msk [vmem:[%s1872_s7 + $0x140] sm:$0xff] %vm1211_vm1, %v1187_v52  ;;  %v1158_v63 = vmul.f32 0.5, %v1094_v53  ;;  %v936_v0 = vadd.f32 %v1831_v38, %v867_v48  ;;  %v909_v3 = vadd.f32 %v1831_v38, %v840_v56  ;;  %v872_v60 = vmul.f32 %v1932_v61, %v1826_v36 }
 0x117   : > { %v1190_v55 = vmul.f32 0.5, %v1126_v58  ;;  %v1092_v4 = vadd.f32 1.0, %v1618_v62  ;;  %1631 = vtanh.f32 %v1002_v59  ;;  %v838_v5 = vmul.f32 %v1826_v36, %v1936_v1 }
 0x118   : > { %1223 = vst.msk [vmem:[%s1872_s7 + $0x58] sm:$0xff] %vm1211_vm1, %v1158_v63  ;;  %1633 = vtanh.f32 %v968_v33  ;;  %v1000_v6 = vmul.f32 0.5, %v936_v0  ;;  %v973_v9 = vmul.f32 0.5, %v909_v3  ;;  %v941_v10 = vadd.f32 %v1831_v38, %v872_v60  ;;  %v1620_v11 = vpop.eup %1619 }
 0x119   : > { %1255 = vst.msk [vmem:[%s1872_s7 + $0x158] sm:$0xff] %vm1211_vm1, %v1190_v55  ;;  %v1156_v12 = vmul.f32 0.5, %v1092_v4  ;;  %v907_v61 = vadd.f32 %v1831_v38, %v838_v5  ;;  %v870_v14 = vmul.f32 %v1826_v36, %v1938_v2  ;;  %v841_v1 = vmul.f32 %v1947_v7, %v1826_v36  ;;  %v2022_v16 = vpop.f32.mrb[24].mxu0  ;;  %v2024_v17 = vpop.f32.mrb[24].mxu1 }
 0x11a   : > { %v1124_v18 = vadd.f32 1.0, %v1620_v11  ;;  %1635 = vtanh.f32 %v1000_v6  ;;  %v1005_v21 = vmul.f32 0.5, %v941_v10  ;;  %v873_v22 = vmul.f32 %v1949_v8, %v1826_v36  ;;  %v2028_v19 = vpop.f32.mrb[25].mxu0  ;;  %v2030_v23 = vpop.f32.mrb[25].mxu1 }
 0x11b   : > { %v1622_v24 = vpop.eup %1621  ;;  %1221 = vst.msk [vmem:[%s1872_s7 + $0x48] sm:$0xff] %vm1211_vm1, %v1156_v12  ;;  %1637 = vtanh.f32 %v973_v9  ;;  %v971_v2 = vmul.f32 0.5, %v907_v61  ;;  %v939_v7 = vadd.f32 %v1831_v38, %v870_v14  ;;  %v910_v25 = vadd.f32 %v1831_v38, %v841_v1  ;;  %v2036_v28 = vpop.f32.mrb[26].mxu0 }
 0x11c   : > { %v2038_v29 = vpop.f32.mrb[26].mxu1  ;;  %v1624_v30 = vpop.eup %1623  ;;  %v1188_v8 = vmul.f32 0.5, %v1124_v18  ;;  %v1097_v31 = vadd.f32 1.0, %v1622_v24  ;;  %1639 = vtanh.f32 %v1005_v21  ;;  %v942_v34 = vadd.f32 %v1831_v38, %v873_v22 }
 0x11d   : > { %v2041_v35 = vpop.f32.mrb[27].mxu0  ;;  %v2043_v37 = vpop.f32.mrb[27].mxu1  ;;  %v1129_v26 = vadd.f32 1.0, %v1624_v30  ;;  %1641 = vtanh.f32 %v971_v2  ;;  %v1003_v39 = vmul.f32 0.5, %v939_v7  ;;  %v974_v42 = vmul.f32 0.5, %v910_v25 }
 0x11e   : > { %v1626_v20 = vpop.eup %1625  ;;  %1253 = vst.msk [vmem:[%s1872_s7 + $0x148] sm:$0xff] %vm1211_vm1, %v1188_v8  ;;  %v1161_v44 = vmul.f32 0.5, %v1097_v31  ;;  %v1006_v27 = vmul.f32 0.5, %v942_v34  ;;  %v839_v32 = vmul.f32 %v1826_v36, %v1955_v15  ;;  %v871_v53 = vmul.f32 %v1826_v36, %v1957_v13 }
 0x11f   : > { %v1628_v43 = vpop.eup %1627  ;;  %v1095_v47 = vadd.f32 1.0, %v1626_v20  ;;  %v1193_v51 = vmul.f32 0.5, %v1129_v26  ;;  %1643 = vtanh.f32 %v1003_v39  ;;  %v844_v63 = vmul.f32 %v1980_v40, %v1826_v36 }
 0x120   : > { %v1630_v48 = vpop.eup %1629  ;;  %v1127_v52 = vadd.f32 1.0, %v1628_v43  ;;  %1226 = vst.msk [vmem:[%s1872_s7 + $0x70] sm:$0xff] %vm1211_vm1, %v1161_v44  ;;  %1645 = vtanh.f32 %v974_v42  ;;  %v908_v59 = vadd.f32 %v1831_v38, %v839_v32  ;;  %v940_v62 = vadd.f32 %v1831_v38, %v871_v53 }
 0x121   : > { %v1159_v56 = vmul.f32 0.5, %v1095_v47  ;;  %v1098_v58 = vadd.f32 1.0, %v1630_v48  ;;  %v1632_v33 = vpop.eup %1631  ;;  %1258 = vst.msk [vmem:[%s1872_s7 + $0x170] sm:$0xff] %vm1211_vm1, %v1193_v51  ;;  %1647 = vtanh.f32 %v1006_v27  ;;  %v2059_v0 = vpop.f32.mrb[28].mxu0  ;;  %v876_v5 = vmul.f32 %v1982_v41, %v1826_v36 }
 0x122   : > { %v1191_v15 = vmul.f32 0.5, %v1127_v52  ;;  %v2061_v13 = vpop.f32.mrb[28].mxu1  ;;  %v1634_v3 = vpop.eup %1633  ;;  %v1130_v55 = vadd.f32 1.0, %v1632_v33  ;;  %v972_v4 = vmul.f32 0.5, %v908_v59  ;;  %v1004_v10 = vmul.f32 0.5, %v940_v62 }
 0x123   : > { %1224 = vst.msk [vmem:[%s1872_s7 + $0x60] sm:$0xff] %vm1211_vm1, %v1159_v56  ;;  %v1162_v60 = vmul.f32 0.5, %v1098_v58  ;;  %v2067_v6 = vpop.f32.mrb[29].mxu0  ;;  %v2069_v9 = vpop.f32.mrb[29].mxu1  ;;  %v1096_v40 = vadd.f32 1.0, %v1634_v3  ;;  %v913_v11 = vadd.f32 %v1831_v38, %v844_v63  ;;  %v842_v12 = vmul.f32 %v1826_v36, %v1984_v45 }
 0x124   : > { %1256 = vst.msk [vmem:[%s1872_s7 + $0x160] sm:$0xff] %vm1211_vm1, %v1191_v15  ;;  %v2076_v61 = vpop.f32.mrb[30].mxu0  ;;  %v2078_v14 = vpop.f32.mrb[30].mxu1  ;;  %v1194_v41 = vmul.f32 0.5, %v1130_v55  ;;  %1649 = vtanh.f32 %v972_v4  ;;  %v945_v18 = vadd.f32 %v1831_v38, %v876_v5  ;;  %v874_v21 = vmul.f32 %v1826_v36, %v1986_v46 }
 0x125   : > { %v1636_v1 = vpop.eup %1635  ;;  %1227 = vst.msk [vmem:[%s1872_s7 + $0x78] sm:$0xff] %vm1211_vm1, %v1162_v60  ;;  %v2085_v22 = vpop.f32.mrb[31].mxu0  ;;  %v1160_v2 = vmul.f32 0.5, %v1096_v40  ;;  %1651 = vtanh.f32 %v1004_v10  ;;  %v977_v25 = vmul.f32 0.5, %v913_v11  ;;  %v911_v34 = vadd.f32 %v1831_v38, %v842_v12 }
 0x126   : > { %v2087_v24 = vpop.f32.mrb[31].mxu1  ;;  %v1638_v45 = vpop.eup %1637  ;;  %v1128_v7 = vadd.f32 1.0, %v1636_v1  ;;  %1259 = vst.msk [vmem:[%s1872_s7 + $0x178] sm:$0xff] %vm1211_vm1, %v1194_v41  ;;  %v1009_v31 = vmul.f32 0.5, %v945_v18  ;;  %v943_v20 = vadd.f32 %v1831_v38, %v874_v21  ;;  %v845_v42 = vmul.f32 %v1994_v49, %v1826_v36 }
 0x127   : > { %v1640_v30 = vpop.eup %1639  ;;  %v1101_v8 = vadd.f32 1.0, %v1638_v45  ;;  %1225 = vst.msk [vmem:[%s1872_s7 + $0x68] sm:$0xff] %vm1211_vm1, %v1160_v2  ;;  %1653 = vtanh.f32 %v977_v25  ;;  %v975_v47 = vmul.f32 0.5, %v911_v34  ;;  %v877_v52 = vmul.f32 %v1996_v50, %v1826_v36 }
 0x128   : > { %v1642_v46 = vpop.eup %1641  ;;  %v1192_v26 = vmul.f32 0.5, %v1128_v7  ;;  %v1133_v39 = vadd.f32 1.0, %v1640_v30  ;;  %1655 = vtanh.f32 %v1009_v31  ;;  %v1007_v48 = vmul.f32 0.5, %v943_v20 }
 0x129   : > { %v1165_v43 = vmul.f32 0.5, %v1101_v8  ;;  %v1099_v44 = vadd.f32 1.0, %v1642_v46  ;;  %v1644_v27 = vpop.eup %1643  ;;  %v914_v51 = vadd.f32 %v1831_v38, %v845_v42  ;;  %1657 = vtanh.f32 %v975_v47 }
 0x12a   : > { %1257 = vst.msk [vmem:[%s1872_s7 + $0x168] sm:$0xff] %vm1211_vm1, %v1192_v26  ;;  %v1197_v32 = vmul.f32 0.5, %v1133_v39  ;;  %v1646_v53 = vpop.eup %1645  ;;  %v1131_v56 = vadd.f32 1.0, %v1644_v27  ;;  %v843_v58 = vmul.f32 %v1826_v36, %v2000_v57  ;;  %1659 = vtanh.f32 %v1007_v48 }
 0x12b   : > { %1230 = vst.msk [vmem:[%s1872_s7 + $0x90] sm:$0xff] %vm1211_vm1, %v1165_v43  ;;  %v1163_v49 = vmul.f32 0.5, %v1099_v44  ;;  %v1648_v59 = vpop.eup %1647  ;;  %v1102_v33 = vadd.f32 1.0, %v1646_v53  ;;  %v978_v15 = vmul.f32 0.5, %v914_v51  ;;  %v946_v62 = vadd.f32 %v1831_v38, %v877_v52 }
 0x12c   : > { %1262 = vst.msk [vmem:[%s1872_s7 + $0x190] sm:$0xff] %vm1211_vm1, %v1197_v32  ;;  %v1195_v50 = vmul.f32 0.5, %v1131_v56  ;;  %v1134_v63 = vadd.f32 1.0, %v1648_v59  ;;  %v912_v3 = vadd.f32 %v1831_v38, %v843_v58  ;;  %v875_v60 = vmul.f32 %v1826_v36, %v2002_v54 }
 0x12d   : > { %1228 = vst.msk [vmem:[%s1872_s7 + $0x80] sm:$0xff] %vm1211_vm1, %v1163_v49  ;;  %v1166_v57 = vmul.f32 0.5, %v1102_v33  ;;  %1661 = vtanh.f32 %v978_v15  ;;  %v1010_v55 = vmul.f32 0.5, %v946_v62  ;;  %v848_v4 = vmul.f32 %v2022_v16, %v1826_v36 }
 0x12e   : > { %v1650_v5 = vpop.eup %1649  ;;  %1260 = vst.msk [vmem:[%s1872_s7 + $0x180] sm:$0xff] %vm1211_vm1, %v1195_v50  ;;  %v1198_v40 = vmul.f32 0.5, %v1134_v63  ;;  %v976_v10 = vmul.f32 0.5, %v912_v3  ;;  %v944_v11 = vadd.f32 %v1831_v38, %v875_v60  ;;  %v880_v12 = vmul.f32 %v2024_v17, %v1826_v36 }
 0x12f   : > { %v1652_v1 = vpop.eup %1651  ;;  %1231 = vst.msk [vmem:[%s1872_s7 + $0x98] sm:$0xff] %vm1211_vm1, %v1166_v57  ;;  %v1100_v54 = vadd.f32 1.0, %v1650_v5  ;;  %1663 = vtanh.f32 %v1010_v55  ;;  %v917_v41 = vadd.f32 %v1831_v38, %v848_v4  ;;  %v846_v16 = vmul.f32 %v1826_v36, %v2028_v19 }
 0x130   : > { %1263 = vst.msk [vmem:[%s1872_s7 + $0x198] sm:$0xff] %vm1211_vm1, %v1198_v40  ;;  %v1132_v18 = vadd.f32 1.0, %v1652_v1  ;;  %1665 = vtanh.f32 %v976_v10  ;;  %v1008_v21 = vmul.f32 0.5, %v944_v11  ;;  %v949_v45 = vadd.f32 %v1831_v38, %v880_v12 }
 0x131   : > { %v1654_v2 = vpop.eup %1653  ;;  %v1164_v17 = vmul.f32 0.5, %v1100_v54  ;;  %v981_v7 = vmul.f32 0.5, %v917_v41  ;;  %v915_v25 = vadd.f32 %v1831_v38, %v846_v16  ;;  %v878_v30 = vmul.f32 %v1826_v36, %v2030_v23 }
 0x132   : > { %v1656_v8 = vpop.eup %1655  ;;  %v1196_v31 = vmul.f32 0.5, %v1132_v18  ;;  %v1105_v19 = vadd.f32 1.0, %v1654_v2  ;;  %1667 = vtanh.f32 %v1008_v21  ;;  %v1013_v34 = vmul.f32 0.5, %v949_v45 }
 0x133   : > { %1229 = vst.msk [vmem:[%s1872_s7 + $0x88] sm:$0xff] %vm1211_vm1, %v1164_v17  ;;  %v1137_v20 = vadd.f32 1.0, %v1656_v8  ;;  %1669 = vtanh.f32 %v981_v7  ;;  %v979_v46 = vmul.f32 0.5, %v915_v25  ;;  %v947_v26 = vadd.f32 %v1831_v38, %v878_v30  ;;  %v1658_v39 = vpop.eup %1657 }
 0x134   : > { %1261 = vst.msk [vmem:[%s1872_s7 + $0x188] sm:$0xff] %vm1211_vm1, %v1196_v31  ;;  %v1169_v42 = vmul.f32 0.5, %v1105_v19  ;;  %1671 = vtanh.f32 %v1013_v34  ;;  %v849_v23 = vmul.f32 %v2036_v28, %v1826_v36  ;;  %v881_v43 = vmul.f32 %v2038_v29, %v1826_v36  ;;  %v1660_v44 = vpop.eup %1659 }
 0x135   : > { %v1201_v47 = vmul.f32 0.5, %v1137_v20  ;;  %v1103_v27 = vadd.f32 1.0, %v1658_v39  ;;  %1673 = vtanh.f32 %v979_v46  ;;  %v1011_v32 = vmul.f32 0.5, %v947_v26  ;;  %v1701_v26 = vld [vmem:[%s2226_s2 + $0x1] ss:$0 sm:$0xff] }
 0x136   : > { %1234 = vst.msk [vmem:[%s1872_s7 + $0xb0] sm:$0xff] %vm1211_vm1, %v1169_v42  ;;  %v1135_v48 = vadd.f32 1.0, %v1660_v44  ;;  %v918_v51 = vadd.f32 %v1831_v38, %v849_v23  ;;  %v950_v52 = vadd.f32 %v1831_v38, %v881_v43  ;;  %v847_v53 = vmul.f32 %v1826_v36, %v2041_v35 }
 0x137   : > { %v1662_v28 = vpop.eup %1661  ;;  %1266 = vst.msk [vmem:[%s1872_s7 + $0x1b0] sm:$0xff] %vm1211_vm1, %v1201_v47  ;;  %v1167_v29 = vmul.f32 0.5, %v1103_v27  ;;  %1675 = vtanh.f32 %v1011_v32  ;;  %v879_v49 = vmul.f32 %v1826_v36, %v2043_v37  ;;  %v852_v56 = vmul.f32 %v2059_v0, %v1826_v36 }
 0x138   : > { %v1199_v58 = vmul.f32 0.5, %v1135_v48  ;;  %v1106_v59 = vadd.f32 1.0, %v1662_v28  ;;  %v982_v33 = vmul.f32 0.5, %v918_v51  ;;  %v1014_v15 = vmul.f32 0.5, %v950_v52 }
 0x139   : > { %v1664_v62 = vpop.eup %1663  ;;  %1232 = vst.msk [vmem:[%s1872_s7 + $0xa0] sm:$0xff] %vm1211_vm1, %v1167_v29  ;;  %v916_v35 = vadd.f32 %v1831_v38, %v847_v53  ;;  %v948_v50 = vadd.f32 %v1831_v38, %v879_v49  ;;  %v921_v63 = vadd.f32 %v1831_v38, %v852_v56  ;;  %v884_v37 = vmul.f32 %v2061_v13, %v1826_v36 }
 0x13a   : > { %v1666_v3 = vpop.eup %1665  ;;  %1264 = vst.msk [vmem:[%s1872_s7 + $0x1a0] sm:$0xff] %vm1211_vm1, %v1199_v58  ;;  %v1170_v0 = vmul.f32 0.5, %v1106_v59  ;;  %v1138_v60 = vadd.f32 1.0, %v1664_v62  ;;  %1677 = vtanh.f32 %v982_v33  ;;  %v850_v57 = vmul.f32 %v1826_v36, %v2067_v6 }
 0x13b   : > { %v1104_v55 = vadd.f32 1.0, %v1666_v3  ;;  %1679 = vtanh.f32 %v1014_v15  ;;  %v980_v4 = vmul.f32 0.5, %v916_v35  ;;  %v1012_v5 = vmul.f32 0.5, %v948_v50 }
 0x13c   : > { %v1668_v40 = vpop.eup %1667  ;;  %1235 = vst.msk [vmem:[%s1872_s7 + $0xb8] sm:$0xff] %vm1211_vm1, %v1170_v0  ;;  %v1202_v10 = vmul.f32 0.5, %v1138_v60  ;;  %v985_v13 = vmul.f32 0.5, %v921_v63  ;;  %v953_v11 = vadd.f32 %v1831_v38, %v884_v37  ;;  %v919_v12 = vadd.f32 %v1831_v38, %v850_v57 }
 0x13d   : > { %v1670_v1 = vpop.eup %1669  ;;  %v1168_v54 = vmul.f32 0.5, %v1104_v55  ;;  %v1136_v41 = vadd.f32 1.0, %v1668_v40  ;;  %1681 = vtanh.f32 %v980_v4  ;;  %v882_v6 = vmul.f32 %v1826_v36, %v2069_v9 }
 0x13e   : > { %v1672_v16 = vpop.eup %1671  ;;  %1267 = vst.msk [vmem:[%s1872_s7 + $0x1b8] sm:$0xff] %vm1211_vm1, %v1202_v10  ;;  %v1109_v18 = vadd.f32 1.0, %v1670_v1  ;;  %1683 = vtanh.f32 %v1012_v5  ;;  %v1017_v21 = vmul.f32 0.5, %v953_v11  ;;  %v983_v45 = vmul.f32 0.5, %v919_v12 }
 0x13f   : > { %v1674_v2 = vpop.eup %1673  ;;  %1233 = vst.msk [vmem:[%s1872_s7 + $0xa8] sm:$0xff] %vm1211_vm1, %v1168_v54  ;;  %v1200_v17 = vmul.f32 0.5, %v1136_v41  ;;  %v1141_v7 = vadd.f32 1.0, %v1672_v16  ;;  %1685 = vtanh.f32 %v985_v13  ;;  %v951_v25 = vadd.f32 %v1831_v38, %v882_v6 }
 0x140   : > { %v1173_v30 = vmul.f32 0.5, %v1109_v18  ;;  %v1107_v8 = vadd.f32 1.0, %v1674_v2  ;;  %1687 = vtanh.f32 %v1017_v21  ;;  %v853_v9 = vmul.f32 %v2076_v61, %v1826_v36  ;;  %v1702_v61 = vld [vmem:[%s2226_s2] ss:$0 sm:$0xff] }
 0x141   : > { %v1676_v31 = vpop.eup %1675  ;;  %1265 = vst.msk [vmem:[%s1872_s7 + $0x1a8] sm:$0xff] %vm1211_vm1, %v1200_v17  ;;  %v1205_v19 = vmul.f32 0.5, %v1141_v7  ;;  %1689 = vtanh.f32 %v983_v45  ;;  %v1015_v34 = vmul.f32 0.5, %v951_v25  ;;  %v885_v20 = vmul.f32 %v2078_v14, %v1826_v36 }
 0x142   : > { %1238 = vst.msk [vmem:[%s1872_s7 + $0xd0] sm:$0xff] %vm1211_vm1, %v1173_v30  ;;  %v1171_v38 = vmul.f32 0.5, %v1107_v8  ;;  %v1139_v46 = vadd.f32 1.0, %v1676_v31  ;;  %v922_v39 = vadd.f32 %v1701_v26, %v853_v9  ;;  %v851_v42 = vmul.f32 %v1702_v61, %v2085_v22 }
 0x143   : > { %1270 = vst.msk [vmem:[%s1872_s7 + $0x1d0] sm:$0xff] %vm1211_vm1, %v1205_v19  ;;  %1691 = vtanh.f32 %v1015_v34  ;;  %v954_v36 = vadd.f32 %v1701_v26, %v885_v20  ;;  %v883_v14 = vmul.f32 %v1702_v61, %v2087_v24 }
 0x144   : > { %v1678_v23 = vpop.eup %1677  ;;  %1236 = vst.msk [vmem:[%s1872_s7 + $0xc0] sm:$0xff] %vm1211_vm1, %v1171_v38  ;;  %v1203_v43 = vmul.f32 0.5, %v1139_v46  ;;  %v986_v44 = vmul.f32 0.5, %v922_v39  ;;  %v920_v47 = vadd.f32 %v1701_v26, %v851_v42 }
 0x145   : > { %v1680_v27 = vpop.eup %1679  ;;  %v1110_v32 = vadd.f32 1.0, %v1678_v23  ;;  %v1018_v48 = vmul.f32 0.5, %v954_v36  ;;  %v952_v51 = vadd.f32 %v1701_v26, %v883_v14 }
 0x146   : > { %1268 = vst.msk [vmem:[%s1872_s7 + $0x1c0] sm:$0xff] %vm1211_vm1, %v1203_v43  ;;  %v1142_v22 = vadd.f32 1.0, %v1680_v27  ;;  %1693 = vtanh.f32 %v986_v44  ;;  %v984_v52 = vmul.f32 0.5, %v920_v47 }
 0x147   : > { %v1682_v53 = vpop.eup %1681  ;;  %v1174_v28 = vmul.f32 0.5, %v1110_v32  ;;  %1695 = vtanh.f32 %v1018_v48  ;;  %v1016_v24 = vmul.f32 0.5, %v952_v51 }
 0x148   : > { %v1684_v29 = vpop.eup %1683  ;;  %v1206_v49 = vmul.f32 0.5, %v1142_v22  ;;  %v1108_v56 = vadd.f32 1.0, %v1682_v53  ;;  %1697 = vtanh.f32 %v984_v52 }
 0x149   : > { %v1686_v58 = vpop.eup %1685  ;;  %1239 = vst.msk [vmem:[%s1872_s7 + $0xd8] sm:$0xff] %vm1211_vm1, %v1174_v28  ;;  %v1140_v59 = vadd.f32 1.0, %v1684_v29  ;;  %1699 = vtanh.f32 %v1016_v24 }
 0x14a   : > { %v1688_v33 = vpop.eup %1687  ;;  %1271 = vst.msk [vmem:[%s1872_s7 + $0x1d8] sm:$0xff] %vm1211_vm1, %v1206_v49  ;;  %v1172_v15 = vmul.f32 0.5, %v1108_v56  ;;  %v1113_v62 = vadd.f32 1.0, %v1686_v58 }
 0x14b   : > { %v1690_v35 = vpop.eup %1689  ;;  %v1204_v50 = vmul.f32 0.5, %v1140_v59  ;;  %v1145_v63 = vadd.f32 1.0, %v1688_v33 }
 0x14c   : > { %1237 = vst.msk [vmem:[%s1872_s7 + $0xc8] sm:$0xff] %vm1211_vm1, %v1172_v15  ;;  %v1177_v37 = vmul.f32 0.5, %v1113_v62  ;;  %v1111_v3 = vadd.f32 1.0, %v1690_v35 }
 0x14d   : > { %v1692_v0 = vpop.eup %1691  ;;  %1269 = vst.msk [vmem:[%s1872_s7 + $0x1c8] sm:$0xff] %vm1211_vm1, %v1204_v50  ;;  %v1209_v60 = vmul.f32 0.5, %v1145_v63 }
 0x14e   : > { %1242 = vst.msk [vmem:[%s1872_s7 + $0xf0] sm:$0xff] %vm1211_vm1, %v1177_v37  ;;  %v1175_v57 = vmul.f32 0.5, %v1111_v3  ;;  %v1143_v55 = vadd.f32 1.0, %v1692_v0 }
 0x14f   : > { %1274 = vst.msk [vmem:[%s1872_s7 + $0x1f0] sm:$0xff] %vm1211_vm1, %v1209_v60 }
 0x150   : > { %v1694_v4 = vpop.eup %1693  ;;  %1240 = vst.msk [vmem:[%s1872_s7 + $0xe0] sm:$0xff] %vm1211_vm1, %v1175_v57  ;;  %v1207_v5 = vmul.f32 0.5, %v1143_v55 }
 0x151   : > { %v1696_v40 = vpop.eup %1695  ;;  %v1114_v10 = vadd.f32 1.0, %v1694_v4 }
 0x152   : > { %v1698_v13 = vpop.eup %1697  ;;  %1272 = vst.msk [vmem:[%s1872_s7 + $0x1e0] sm:$0xff] %vm1211_vm1, %v1207_v5  ;;  %v1146_v11 = vadd.f32 1.0, %v1696_v40 }
 0x153   : > { %v1700_v12 = vpop.eup %1699  ;;  %v1178_v1 = vmul.f32 0.5, %v1114_v10  ;;  %v1112_v54 = vadd.f32 1.0, %v1698_v13 }
 0x154   : > { %v1210_v41 = vmul.f32 0.5, %v1146_v11  ;;  %v1144_v6 = vadd.f32 1.0, %v1700_v12 }
 0x155   : > { %1243 = vst.msk [vmem:[%s1872_s7 + $0xf8] sm:$0xff] %vm1211_vm1, %v1178_v1  ;;  %v1176_v16 = vmul.f32 0.5, %v1112_v54 }
 0x156   : > { %1275 = vst.msk [vmem:[%s1872_s7 + $0x1f8] sm:$0xff] %vm1211_vm1, %v1210_v41  ;;  %v1208_v18 = vmul.f32 0.5, %v1144_v6 }
 0x157   : > { %1241 = vst.msk [vmem:[%s1872_s7 + $0xe8] sm:$0xff] %vm1211_vm1, %v1176_v16 }
 0x158   : > { %1273 = vst.msk [vmem:[%s1872_s7 + $0x1e8] sm:$0xff] %vm1211_vm1, %v1208_v18 }
 0x159 PF: > { %s13_s12 = sadd.s32 1, %s1709_s12  }
 0x15a   : > { %p10_p4 = scmp.ge.s32.totalorder %s13_s12, 6  }
 0x15c   :  { %12 = sbr.rel (!%p10_p4) target bundleno = 1 (0x1), region = 62 }

</bundles_post_ra>
